<compile_context>
chip_gen: v7x
topology: tpu7x:2x2x1
jax: 0.10.0
libtpu: 0.0.40
codegen_flags: <defaults>
</compile_context>

<pallas_src>
import math
import functools

import jax
import jax.numpy as jnp
from jax.experimental import pallas as pl
from jax.experimental.pallas import tpu as pltpu

EPS = 1e-5          # PyTorch LayerNorm default
NEG_INF = -1e30


# ------------------------------ in-kernel helpers ----------------------------

def _layernorm(y, g, b):
    mu = jnp.mean(y, axis=-1, keepdims=True)
    c = y - mu
    var = jnp.mean(c * c, axis=-1, keepdims=True)
    return c * jax.lax.rsqrt(var + EPS) * g + b


def _attention(xq, xkv, wqkv, bqkv, wo, bo, *, nhead, causal):
    """Multi-head attention for one batch element.
    xq: (Sq, D) queries, xkv: (Sk, D) key/value source.
    wqkv: (3, D, D) stacked Q/K/V weights, bqkv: (3, 1, D); wo/bo: out proj.
    """
    Sq, D = xq.shape
    Sk = xkv.shape[0]
    Hd = D // nhead
    scale = 1.0 / math.sqrt(Hd)

    q = jnp.dot(xq, wqkv[0], preferred_element_type=jnp.float32) + bqkv[0]
    k = jnp.dot(xkv, wqkv[1], preferred_element_type=jnp.float32) + bqkv[1]
    v = jnp.dot(xkv, wqkv[2], preferred_element_type=jnp.float32) + bqkv[2]

    lane = jax.lax.broadcasted_iota(jnp.int32, (1, D), 1)
    if causal:
        # Module's mask exactly as written: 0 where j >= i, -inf where j < i.
        row = jax.lax.broadcasted_iota(jnp.int32, (Sq, Sk), 0)
        col = jax.lax.broadcasted_iota(jnp.int32, (Sq, Sk), 1)
        bias = jnp.where(col >= row, 0.0, NEG_INF).astype(jnp.float32)

    dn_nt = (((1,), (1,)), ((), ()))      # contract last dims: q . k^T, no k.T copy
    ctx = jnp.zeros((Sq, D), jnp.float32)
    for h in range(nhead):
        mh = jnp.where((lane >= h * Hd) & (lane < (h + 1) * Hd), 1.0, 0.0)
        s = jax.lax.dot_general(q * mh, k, dn_nt,
                                preferred_element_type=jnp.float32) * scale
        if causal:
            s = s + bias
        s = s - jnp.max(s, axis=-1, keepdims=True)
        p = jnp.exp(s)
        p = p * pl.reciprocal(jnp.sum(p, axis=-1, keepdims=True), approx=True)
        ctx = ctx + jnp.dot(p, v * mh, preferred_element_type=jnp.float32)

    return jnp.dot(ctx, wo, preferred_element_type=jnp.float32) + bo


def _ffn(x, w1, b1, w2t, b2):
    """linear(D->F) -> relu -> linear(F->D).  w2t is stored PyTorch-style
    (D, F) so both FFN weights stay lane-dense; second matmul is NT form."""
    h = jnp.maximum(jnp.dot(x, w1, preferred_element_type=jnp.float32) + b1, 0.0)
    return jax.lax.dot_general(h, w2t, (((1,), (1,)), ((), ())),
                               preferred_element_type=jnp.float32) + b2


# ------------------------------ fused model kernel ---------------------------

def _model_kernel(src_ref,
                  emb_w_ref, emb_b_ref, pe_ref,
                  enc_wqkv_ref, enc_bqkv_ref, enc_wo_ref, enc_bo_ref,
                  enc_ln1g_ref, enc_ln1b_ref,
                  enc_w1_ref, enc_b1_ref, enc_w2_ref, enc_b2_ref,
                  enc_ln2g_ref, enc_ln2b_ref,
                  enc_norm_g_ref, enc_norm_b_ref,
                  dec_swqkv_ref, dec_sbqkv_ref, dec_swo_ref, dec_sbo_ref,
                  dec_ln1g_ref, dec_ln1b_ref,
                  dec_cwqkv_ref, dec_cbqkv_ref, dec_cwo_ref, dec_cbo_ref,
                  dec_ln2g_ref, dec_ln2b_ref,
                  dec_w1_ref, dec_b1_ref, dec_w2_ref, dec_b2_ref,
                  dec_ln3g_ref, dec_ln3b_ref,
                  dec_norm_g_ref, dec_norm_b_ref,
                  fc_w_ref, fc_b_ref,
                  o_ref, *, nhead, n_enc, n_dec):
    # ---- embedding + positional encoding for this batch element ----
    x0 = (jnp.dot(src_ref[0], emb_w_ref[...], preferred_element_type=jnp.float32)
          + emb_b_ref[...] + pe_ref[...])                       # (S, D)

    # ---- encoder stack (post-norm layers + stack-final LayerNorm) ----
    x = x0
    for li in range(n_enc):
        a = _attention(x, x, enc_wqkv_ref[li], enc_bqkv_ref[li],
                       enc_wo_ref[li], enc_bo_ref[li], nhead=nhead, causal=True)
        x = _layernorm(x + a, enc_ln1g_ref[li], enc_ln1b_ref[li])
        f = _ffn(x, enc_w1_ref[li], enc_b1_ref[li], enc_w2_ref[li], enc_b2_ref[li])
        x = _layernorm(x + f, enc_ln2g_ref[li], enc_ln2b_ref[li])
    mem = _layernorm(x, enc_norm_g_ref[...], enc_norm_b_ref[...])

    # ---- decoder stack (tgt == positionally-encoded src, as in the module) ----
    y = x0
    for li in range(n_dec):
        a = _attention(y, y, dec_swqkv_ref[li], dec_sbqkv_ref[li],
                       dec_swo_ref[li], dec_sbo_ref[li], nhead=nhead, causal=True)
        y = _layernorm(y + a, dec_ln1g_ref[li], dec_ln1b_ref[li])
        a = _attention(y, mem, dec_cwqkv_ref[li], dec_cbqkv_ref[li],
                       dec_cwo_ref[li], dec_cbo_ref[li], nhead=nhead, causal=False)
        y = _layernorm(y + a, dec_ln2g_ref[li], dec_ln2b_ref[li])
        f = _ffn(y, dec_w1_ref[li], dec_b1_ref[li], dec_w2_ref[li], dec_b2_ref[li])
        y = _layernorm(y + f, dec_ln3g_ref[li], dec_ln3b_ref[li])

    # ---- output[-1] -> decoder-final LayerNorm (row-wise) -> fc ----
    S = y.shape[0]
    last = y[S - 1:S, :]                                        # (1, D) static slice
    last = _layernorm(last, dec_norm_g_ref[...], dec_norm_b_ref[...])
    o_ref[0] = (jnp.dot(last, fc_w_ref[...], preferred_element_type=jnp.float32)
                + fc_b_ref[...])                                # (1, O)


# ------------------------------ model forward --------------------------------

def transformer_model_forward(params, src, *, nhead):
    """src: (batch, seq, input_dim) -> (batch, output_dim)."""
    B, S, In = src.shape
    D = params['emb_w'].shape[1]
    O = params['fc_w'].shape[1]
    pe_s = params['pe'][:S]                                     # (S, D)

    enc = params['enc']
    dec = params['dec']
    n_enc = enc['wqkv'].shape[0]
    n_dec = dec['s_wqkv'].shape[0]

    weight_args = [
        params['emb_w'], params['emb_b'], pe_s,
        enc['wqkv'], enc['bqkv'], enc['wo'], enc['bo'],
        enc['ln1_g'], enc['ln1_b'],
        enc['w1'], enc['b1'], enc['w2'], enc['b2'],
        enc['ln2_g'], enc['ln2_b'],
        params['enc_norm_g'], params['enc_norm_b'],
        dec['s_wqkv'], dec['s_bqkv'], dec['s_wo'], dec['s_bo'],
        dec['ln1_g'], dec['ln1_b'],
        dec['c_wqkv'], dec['c_bqkv'], dec['c_wo'], dec['c_bo'],
        dec['ln2_g'], dec['ln2_b'],
        dec['w1'], dec['b1'], dec['w2'], dec['b2'],
        dec['ln3_g'], dec['ln3_b'],
        params['dec_norm_g'], params['dec_norm_b'],
        params['fc_w'], params['fc_b'],
    ]

    def _rep(a):
        nd = a.ndim
        return pl.BlockSpec(a.shape, lambda b, _nd=nd: (0,) * _nd)  # VMEM-resident

    in_specs = ([pl.BlockSpec((1, S, In), lambda b: (b, 0, 0))]     # per-batch src
                + [_rep(a) for a in weight_args])

    kern = functools.partial(_model_kernel, nhead=nhead, n_enc=n_enc, n_dec=n_dec)

    out = pl.pallas_call(
        kern,
        out_shape=jax.ShapeDtypeStruct((B, 1, O), jnp.float32),
        grid=(B,),
        in_specs=in_specs,
        out_specs=pl.BlockSpec((1, 1, O), lambda b: (b, 0, 0)),
        compiler_params=pltpu.CompilerParams(
            dimension_semantics=("parallel",),
            vmem_limit_bytes=32 * 1024 * 1024),     # safe on v5e/v6e/v7x
    )(src, *weight_args)
    return out.reshape(B, O)


# ------------------------------- parameters ----------------------------------

def make_positional_encoding(d_model, max_len):
    position = jnp.arange(max_len, dtype=jnp.float32)[:, None]
    div_term = jnp.exp(jnp.arange(0, d_model, 2, dtype=jnp.float32)
                       * (-math.log(10000.0) / d_model))
    pe = jnp.zeros((max_len, d_model), jnp.float32)
    pe = pe.at[:, 0::2].set(jnp.sin(position * div_term))
    pe = pe.at[:, 1::2].set(jnp.cos(position * div_term))
    return pe                                                   # (max_len, d_model)


def init_params(key, input_dim, d_model, nhead, n_enc, n_dec, output_dim,
                dim_ff, max_len):
    keys = iter(jax.random.split(key, 64))

    def w(shape, scale=0.02):
        return (scale * jax.random.normal(next(keys), shape)).astype(jnp.float32)

    def zeros(shape):
        return jnp.zeros(shape, jnp.float32)

    def ones(shape):
        return jnp.ones(shape, jnp.float32)

    # Per-layer parameters are stacked along a leading "layer" axis so the
    # whole stack is a single pallas_call argument.
    enc = dict(
        wqkv=w((n_enc, 3, d_model, d_model)),
        bqkv=zeros((n_enc, 3, 1, d_model)),
        wo=w((n_enc, d_model, d_model)), bo=zeros((n_enc, 1, d_model)),
        ln1_g=ones((n_enc, 1, d_model)), ln1_b=zeros((n_enc, 1, d_model)),
        w1=w((n_enc, d_model, dim_ff)), b1=zeros((n_enc, 1, dim_ff)),
        w2=w((n_enc, d_model, dim_ff)),            # PyTorch (out, in) layout, lane-dense
        b2=zeros((n_enc, 1, d_model)),
        ln2_g=ones((n_enc, 1, d_model)), ln2_b=zeros((n_enc, 1, d_model)),
    )
    dec = dict(
        s_wqkv=w((n_dec, 3, d_model, d_model)),
        s_bqkv=zeros((n_dec, 3, 1, d_model)),
        s_wo=w((n_dec, d_model, d_model)), s_bo=zeros((n_dec, 1, d_model)),
        ln1_g=ones((n_dec, 1, d_model)), ln1_b=zeros((n_dec, 1, d_model)),
        c_wqkv=w((n_dec, 3, d_model, d_model)),
        c_bqkv=zeros((n_dec, 3, 1, d_model)),
        c_wo=w((n_dec, d_model, d_model)), c_bo=zeros((n_dec, 1, d_model)),
        ln2_g=ones((n_dec, 1, d_model)), ln2_b=zeros((n_dec, 1, d_model)),
        w1=w((n_dec, d_model, dim_ff)), b1=zeros((n_dec, 1, dim_ff)),
        w2=w((n_dec, d_model, dim_ff)),            # PyTorch (out, in) layout, lane-dense
        b2=zeros((n_dec, 1, d_model)),
        ln3_g=ones((n_dec, 1, d_model)), ln3_b=zeros((n_dec, 1, d_model)),
    )

    return dict(
        emb_w=w((input_dim, d_model)), emb_b=zeros((1, d_model)),
        pe=make_positional_encoding(d_model, max_len),
        enc=enc, dec=dec,
        enc_norm_g=ones((1, d_model)), enc_norm_b=zeros((1, d_model)),
        dec_norm_g=ones((1, d_model)), dec_norm_b=zeros((1, d_model)),
        fc_w=w((d_model, output_dim)), fc_b=zeros((1, output_dim)),
    )


# ---------------------------------- main --------------------------------------

if __name__ == "__main__":
    # small hyperparameters consistent with the module
    input_dim = 16
    d_model = 32
    nhead = 4
    num_encoder_layers = 2
    num_decoder_layers = 2
    output_dim = 8
    dim_feedforward = 2048     # nn.Transformer default
    max_len = 1000
    B, S = 2, 8                # batch=2, seq=8

    root = jax.random.PRNGKey(0)
    pkey, dkey = jax.random.split(root)
    params = init_params(pkey, input_dim, d_model, nhead,
                         num_encoder_layers, num_decoder_layers,
                         output_dim, dim_feedforward, max_len)
    src = jax.random.normal(dkey, (B, S, input_dim), dtype=jnp.float32)

    fwd = jax.jit(functools.partial(transformer_model_forward, nhead=nhead))
    y = fwd(params, src)
    jax.block_until_ready(y)
    assert y.shape == (B, output_dim) and y.dtype == jnp.float32
    print("KERNEL_OK")
</pallas_src>

<mosaic_0001>
module attributes {stable_mosaic.version = 11 : i64} {
  func.func @_model_kernel(%arg0: i32, %arg1: memref<1x8x16xf32, #tpu.memory_space<vmem>>, %arg2: memref<16x32xf32, #tpu.memory_space<vmem>>, %arg3: memref<1x32xf32, #tpu.memory_space<vmem>>, %arg4: memref<8x32xf32, #tpu.memory_space<vmem>>, %arg5: memref<2x3x32x32xf32, #tpu.memory_space<vmem>>, %arg6: memref<2x3x1x32xf32, #tpu.memory_space<vmem>>, %arg7: memref<2x32x32xf32, #tpu.memory_space<vmem>>, %arg8: memref<2x1x32xf32, #tpu.memory_space<vmem>>, %arg9: memref<2x1x32xf32, #tpu.memory_space<vmem>>, %arg10: memref<2x1x32xf32, #tpu.memory_space<vmem>>, %arg11: memref<2x32x2048xf32, #tpu.memory_space<vmem>>, %arg12: memref<2x1x2048xf32, #tpu.memory_space<vmem>>, %arg13: memref<2x32x2048xf32, #tpu.memory_space<vmem>>, %arg14: memref<2x1x32xf32, #tpu.memory_space<vmem>>, %arg15: memref<2x1x32xf32, #tpu.memory_space<vmem>>, %arg16: memref<2x1x32xf32, #tpu.memory_space<vmem>>, %arg17: memref<1x32xf32, #tpu.memory_space<vmem>>, %arg18: memref<1x32xf32, #tpu.memory_space<vmem>>, %arg19: memref<2x3x32x32xf32, #tpu.memory_space<vmem>>, %arg20: memref<2x3x1x32xf32, #tpu.memory_space<vmem>>, %arg21: memref<2x32x32xf32, #tpu.memory_space<vmem>>, %arg22: memref<2x1x32xf32, #tpu.memory_space<vmem>>, %arg23: memref<2x1x32xf32, #tpu.memory_space<vmem>>, %arg24: memref<2x1x32xf32, #tpu.memory_space<vmem>>, %arg25: memref<2x3x32x32xf32, #tpu.memory_space<vmem>>, %arg26: memref<2x3x1x32xf32, #tpu.memory_space<vmem>>, %arg27: memref<2x32x32xf32, #tpu.memory_space<vmem>>, %arg28: memref<2x1x32xf32, #tpu.memory_space<vmem>>, %arg29: memref<2x1x32xf32, #tpu.memory_space<vmem>>, %arg30: memref<2x1x32xf32, #tpu.memory_space<vmem>>, %arg31: memref<2x32x2048xf32, #tpu.memory_space<vmem>>, %arg32: memref<2x1x2048xf32, #tpu.memory_space<vmem>>, %arg33: memref<2x32x2048xf32, #tpu.memory_space<vmem>>, %arg34: memref<2x1x32xf32, #tpu.memory_space<vmem>>, %arg35: memref<2x1x32xf32, #tpu.memory_space<vmem>>, %arg36: memref<2x1x32xf32, #tpu.memory_space<vmem>>, %arg37: memref<1x32xf32, #tpu.memory_space<vmem>>, %arg38: memref<1x32xf32, #tpu.memory_space<vmem>>, %arg39: memref<32x8xf32, #tpu.memory_space<vmem>>, %arg40: memref<1x8xf32, #tpu.memory_space<vmem>>, %arg41: memref<1x1x8xf32, #tpu.memory_space<vmem>>) attributes {dimension_semantics = [#tpu.dimension_semantics<parallel>], iteration_bounds = array<i64: 2>, scalar_prefetch = 0 : i64, scratch_operands = 0 : i64, tpu.core_type = #tpu.core_type<tc>, window_params = [{transform_indices = @transform_0, window_bounds = array<i64: 1, 8, 16>}, {pipeline_mode = #tpu.pipeline_mode<synchronous>, transform_indices = @transform_1, window_bounds = array<i64: 16, 32>}, {pipeline_mode = #tpu.pipeline_mode<synchronous>, transform_indices = @transform_2, window_bounds = array<i64: 1, 32>}, {pipeline_mode = #tpu.pipeline_mode<synchronous>, transform_indices = @transform_3, window_bounds = array<i64: 8, 32>}, {pipeline_mode = #tpu.pipeline_mode<synchronous>, transform_indices = @transform_4, window_bounds = array<i64: 2, 3, 32, 32>}, {pipeline_mode = #tpu.pipeline_mode<synchronous>, transform_indices = @transform_5, window_bounds = array<i64: 2, 3, 1, 32>}, {pipeline_mode = #tpu.pipeline_mode<synchronous>, transform_indices = @transform_6, window_bounds = array<i64: 2, 32, 32>}, {pipeline_mode = #tpu.pipeline_mode<synchronous>, transform_indices = @transform_7, window_bounds = array<i64: 2, 1, 32>}, {pipeline_mode = #tpu.pipeline_mode<synchronous>, transform_indices = @transform_8, window_bounds = array<i64: 2, 1, 32>}, {pipeline_mode = #tpu.pipeline_mode<synchronous>, transform_indices = @transform_9, window_bounds = array<i64: 2, 1, 32>}, {pipeline_mode = #tpu.pipeline_mode<synchronous>, transform_indices = @transform_10, window_bounds = array<i64: 2, 32, 2048>}, {pipeline_mode = #tpu.pipeline_mode<synchronous>, transform_indices = @transform_11, window_bounds = array<i64: 2, 1, 2048>}, {pipeline_mode = #tpu.pipeline_mode<synchronous>, transform_indices = @transform_12, window_bounds = array<i64: 2, 32, 2048>}, {pipeline_mode = #tpu.pipeline_mode<synchronous>, transform_indices = @transform_13, window_bounds = array<i64: 2, 1, 32>}, {pipeline_mode = #tpu.pipeline_mode<synchronous>, transform_indices = @transform_14, window_bounds = array<i64: 2, 1, 32>}, {pipeline_mode = #tpu.pipeline_mode<synchronous>, transform_indices = @transform_15, window_bounds = array<i64: 2, 1, 32>}, {pipeline_mode = #tpu.pipeline_mode<synchronous>, transform_indices = @transform_16, window_bounds = array<i64: 1, 32>}, {pipeline_mode = #tpu.pipeline_mode<synchronous>, transform_indices = @transform_17, window_bounds = array<i64: 1, 32>}, {pipeline_mode = #tpu.pipeline_mode<synchronous>, transform_indices = @transform_18, window_bounds = array<i64: 2, 3, 32, 32>}, {pipeline_mode = #tpu.pipeline_mode<synchronous>, transform_indices = @transform_19, window_bounds = array<i64: 2, 3, 1, 32>}, {pipeline_mode = #tpu.pipeline_mode<synchronous>, transform_indices = @transform_20, window_bounds = array<i64: 2, 32, 32>}, {pipeline_mode = #tpu.pipeline_mode<synchronous>, transform_indices = @transform_21, window_bounds = array<i64: 2, 1, 32>}, {pipeline_mode = #tpu.pipeline_mode<synchronous>, transform_indices = @transform_22, window_bounds = array<i64: 2, 1, 32>}, {pipeline_mode = #tpu.pipeline_mode<synchronous>, transform_indices = @transform_23, window_bounds = array<i64: 2, 1, 32>}, {pipeline_mode = #tpu.pipeline_mode<synchronous>, transform_indices = @transform_24, window_bounds = array<i64: 2, 3, 32, 32>}, {pipeline_mode = #tpu.pipeline_mode<synchronous>, transform_indices = @transform_25, window_bounds = array<i64: 2, 3, 1, 32>}, {pipeline_mode = #tpu.pipeline_mode<synchronous>, transform_indices = @transform_26, window_bounds = array<i64: 2, 32, 32>}, {pipeline_mode = #tpu.pipeline_mode<synchronous>, transform_indices = @transform_27, window_bounds = array<i64: 2, 1, 32>}, {pipeline_mode = #tpu.pipeline_mode<synchronous>, transform_indices = @transform_28, window_bounds = array<i64: 2, 1, 32>}, {pipeline_mode = #tpu.pipeline_mode<synchronous>, transform_indices = @transform_29, window_bounds = array<i64: 2, 1, 32>}, {pipeline_mode = #tpu.pipeline_mode<synchronous>, transform_indices = @transform_30, window_bounds = array<i64: 2, 32, 2048>}, {pipeline_mode = #tpu.pipeline_mode<synchronous>, transform_indices = @transform_31, window_bounds = array<i64: 2, 1, 2048>}, {pipeline_mode = #tpu.pipeline_mode<synchronous>, transform_indices = @transform_32, window_bounds = array<i64: 2, 32, 2048>}, {pipeline_mode = #tpu.pipeline_mode<synchronous>, transform_indices = @transform_33, window_bounds = array<i64: 2, 1, 32>}, {pipeline_mode = #tpu.pipeline_mode<synchronous>, transform_indices = @transform_34, window_bounds = array<i64: 2, 1, 32>}, {pipeline_mode = #tpu.pipeline_mode<synchronous>, transform_indices = @transform_35, window_bounds = array<i64: 2, 1, 32>}, {pipeline_mode = #tpu.pipeline_mode<synchronous>, transform_indices = @transform_36, window_bounds = array<i64: 1, 32>}, {pipeline_mode = #tpu.pipeline_mode<synchronous>, transform_indices = @transform_37, window_bounds = array<i64: 1, 32>}, {pipeline_mode = #tpu.pipeline_mode<synchronous>, transform_indices = @transform_38, window_bounds = array<i64: 32, 8>}, {pipeline_mode = #tpu.pipeline_mode<synchronous>, transform_indices = @transform_39, window_bounds = array<i64: 1, 8>}, {transform_indices = @transform_40, window_bounds = array<i64: 1, 1, 8>}]} {
    %c0 = arith.constant 0 : index
    %c0_0 = arith.constant 0 : index
    %c0_1 = arith.constant 0 : index
    %0 = vector.load %arg1[%c0, %c0_0, %c0_1] : memref<1x8x16xf32, #tpu.memory_space<vmem>>, vector<1x8x16xf32>
    %1 = vector.shape_cast %0 : vector<1x8x16xf32> to vector<8x16xf32>
    %c0_2 = arith.constant 0 : index
    %c0_3 = arith.constant 0 : index
    %2 = vector.load %arg2[%c0_2, %c0_3] : memref<16x32xf32, #tpu.memory_space<vmem>>, vector<16x32xf32>
    %cst = arith.constant dense<0.000000e+00> : vector<8x32xf32>
    %3 = tpu.matmul %1, %2, %cst {dimension_numbers = #tpu.dot_dimension_numbers<[1], [0], [0], [1], [0, 0, 1, 1], [], []>} : vector<8x16xf32>, vector<16x32xf32>, vector<8x32xf32> -> vector<8x32xf32>
    %c0_4 = arith.constant 0 : index
    %c0_5 = arith.constant 0 : index
    %4 = vector.load %arg3[%c0_4, %c0_5] : memref<1x32xf32, #tpu.memory_space<vmem>>, vector<1x32xf32>
    %5 = vector.broadcast %4 : vector<1x32xf32> to vector<8x32xf32>
    %6 = arith.addf %3, %5 : vector<8x32xf32>
    %c0_6 = arith.constant 0 : index
    %c0_7 = arith.constant 0 : index
    %7 = vector.load %arg4[%c0_6, %c0_7] : memref<8x32xf32, #tpu.memory_space<vmem>>, vector<8x32xf32>
    %8 = arith.addf %6, %7 : vector<8x32xf32>
    %c0_8 = arith.constant 0 : index
    %c0_9 = arith.constant 0 : index
    %c0_10 = arith.constant 0 : index
    %c0_11 = arith.constant 0 : index
    %9 = vector.load %arg5[%c0_8, %c0_9, %c0_10, %c0_11] : memref<2x3x32x32xf32, #tpu.memory_space<vmem>>, vector<1x3x32x32xf32>
    %10 = vector.shape_cast %9 : vector<1x3x32x32xf32> to vector<3x32x32xf32>
    %c0_12 = arith.constant 0 : index
    %c0_13 = arith.constant 0 : index
    %c0_14 = arith.constant 0 : index
    %c0_15 = arith.constant 0 : index
    %11 = vector.load %arg6[%c0_12, %c0_13, %c0_14, %c0_15] : memref<2x3x1x32xf32, #tpu.memory_space<vmem>>, vector<1x3x1x32xf32>
    %12 = vector.shape_cast %11 : vector<1x3x1x32xf32> to vector<3x1x32xf32>
    %c0_16 = arith.constant 0 : index
    %c0_17 = arith.constant 0 : index
    %c0_18 = arith.constant 0 : index
    %13 = vector.load %arg7[%c0_16, %c0_17, %c0_18] : memref<2x32x32xf32, #tpu.memory_space<vmem>>, vector<1x32x32xf32>
    %14 = vector.shape_cast %13 : vector<1x32x32xf32> to vector<32x32xf32>
    %c0_19 = arith.constant 0 : index
    %c0_20 = arith.constant 0 : index
    %c0_21 = arith.constant 0 : index
    %15 = vector.load %arg8[%c0_19, %c0_20, %c0_21] : memref<2x1x32xf32, #tpu.memory_space<vmem>>, vector<1x1x32xf32>
    %16 = vector.shape_cast %15 : vector<1x1x32xf32> to vector<1x32xf32>
    %17 = vector.extract_strided_slice %10 {offsets = [0, 0, 0], sizes = [1, 32, 32], strides = [1, 1, 1]} : vector<3x32x32xf32> to vector<1x32x32xf32>
    %18 = vector.shape_cast %17 : vector<1x32x32xf32> to vector<32x32xf32>
    %cst_22 = arith.constant dense<0.000000e+00> : vector<8x32xf32>
    %19 = tpu.matmul %8, %18, %cst_22 {dimension_numbers = #tpu.dot_dimension_numbers<[1], [0], [0], [1], [0, 0, 1, 1], [], []>} : vector<8x32xf32>, vector<32x32xf32>, vector<8x32xf32> -> vector<8x32xf32>
    %20 = vector.extract_strided_slice %12 {offsets = [0, 0, 0], sizes = [1, 1, 32], strides = [1, 1, 1]} : vector<3x1x32xf32> to vector<1x1x32xf32>
    %21 = vector.shape_cast %20 : vector<1x1x32xf32> to vector<1x32xf32>
    %22 = vector.broadcast %21 : vector<1x32xf32> to vector<8x32xf32>
    %23 = arith.addf %19, %22 : vector<8x32xf32>
    %24 = vector.extract_strided_slice %10 {offsets = [1, 0, 0], sizes = [1, 32, 32], strides = [1, 1, 1]} : vector<3x32x32xf32> to vector<1x32x32xf32>
    %25 = vector.shape_cast %24 : vector<1x32x32xf32> to vector<32x32xf32>
    %cst_23 = arith.constant dense<0.000000e+00> : vector<8x32xf32>
    %26 = tpu.matmul %8, %25, %cst_23 {dimension_numbers = #tpu.dot_dimension_numbers<[1], [0], [0], [1], [0, 0, 1, 1], [], []>} : vector<8x32xf32>, vector<32x32xf32>, vector<8x32xf32> -> vector<8x32xf32>
    %27 = vector.extract_strided_slice %12 {offsets = [1, 0, 0], sizes = [1, 1, 32], strides = [1, 1, 1]} : vector<3x1x32xf32> to vector<1x1x32xf32>
    %28 = vector.shape_cast %27 : vector<1x1x32xf32> to vector<1x32xf32>
    %29 = vector.broadcast %28 : vector<1x32xf32> to vector<8x32xf32>
    %30 = arith.addf %26, %29 : vector<8x32xf32>
    %31 = vector.extract_strided_slice %10 {offsets = [2, 0, 0], sizes = [1, 32, 32], strides = [1, 1, 1]} : vector<3x32x32xf32> to vector<1x32x32xf32>
    %32 = vector.shape_cast %31 : vector<1x32x32xf32> to vector<32x32xf32>
    %cst_24 = arith.constant dense<0.000000e+00> : vector<8x32xf32>
    %33 = tpu.matmul %8, %32, %cst_24 {dimension_numbers = #tpu.dot_dimension_numbers<[1], [0], [0], [1], [0, 0, 1, 1], [], []>} : vector<8x32xf32>, vector<32x32xf32>, vector<8x32xf32> -> vector<8x32xf32>
    %34 = vector.extract_strided_slice %12 {offsets = [2, 0, 0], sizes = [1, 1, 32], strides = [1, 1, 1]} : vector<3x1x32xf32> to vector<1x1x32xf32>
    %35 = vector.shape_cast %34 : vector<1x1x32xf32> to vector<1x32xf32>
    %36 = vector.broadcast %35 : vector<1x32xf32> to vector<8x32xf32>
    %37 = arith.addf %33, %36 : vector<8x32xf32>
    %38 = tpu.iota {dimensions = array<i32: 1>} : vector<1x32xi32>
    %39 = tpu.iota {dimensions = array<i32: 0>} : vector<8x8xi32>
    %40 = tpu.iota {dimensions = array<i32: 1>} : vector<8x8xi32>
    %41 = arith.cmpi sge, %40, %39 : vector<8x8xi32>
    %cst_25 = arith.constant 0.000000e+00 : f32
    %cst_26 = arith.constant -1.000000e+30 : f32
    %42 = vector.broadcast %cst_25 : f32 to vector<8x8xf32>
    %43 = vector.broadcast %cst_26 : f32 to vector<8x8xf32>
    %44 = arith.select %41, %42, %43 : vector<8x8xi1>, vector<8x8xf32>
    %cst_27 = arith.constant 0.000000e+00 : f32
    %45 = vector.broadcast %cst_27 : f32 to vector<8x32xf32>
    %c0_i32 = arith.constant 0 : i32
    %46 = vector.broadcast %c0_i32 : i32 to vector<1x32xi32>
    %47 = arith.cmpi sge, %38, %46 : vector<1x32xi32>
    %c8_i32 = arith.constant 8 : i32
    %48 = vector.broadcast %c8_i32 : i32 to vector<1x32xi32>
    %49 = arith.cmpi slt, %38, %48 : vector<1x32xi32>
    %50 = arith.andi %47, %49 : vector<1x32xi1>
    %cst_28 = arith.constant 1.000000e+00 : f32
    %cst_29 = arith.constant 0.000000e+00 : f32
    %51 = vector.broadcast %cst_28 : f32 to vector<1x32xf32>
    %52 = vector.broadcast %cst_29 : f32 to vector<1x32xf32>
    %53 = arith.select %50, %51, %52 : vector<1x32xi1>, vector<1x32xf32>
    %54 = vector.broadcast %53 : vector<1x32xf32> to vector<8x32xf32>
    %55 = arith.mulf %23, %54 : vector<8x32xf32>
    %cst_30 = arith.constant dense<0.000000e+00> : vector<8x8xf32>
    %56 = tpu.matmul %55, %30, %cst_30 {dimension_numbers = #tpu.dot_dimension_numbers<[1], [1], [0], [0], [0, 0, 1, 0], [], []>} : vector<8x32xf32>, vector<8x32xf32>, vector<8x8xf32> -> vector<8x8xf32>
    %cst_31 = arith.constant 0.353553385 : f32
    %57 = vector.broadcast %cst_31 : f32 to vector<8x8xf32>
    %58 = arith.mulf %56, %57 : vector<8x8xf32>
    %59 = arith.addf %58, %44 : vector<8x8xf32>
    %cst_32 = arith.constant dense<0xFF800000> : vector<8xf32>
    %60 = vector.multi_reduction <maximumf>, %59, %cst_32 [1] : vector<8x8xf32> to vector<8xf32>
    %61 = vector.shape_cast %60 : vector<8xf32> to vector<8x1xf32>
    %62 = vector.broadcast %61 : vector<8x1xf32> to vector<8x8xf32>
    %63 = arith.subf %59, %62 : vector<8x8xf32>
    %64 = math.exp %63 : vector<8x8xf32>
    %cst_33 = arith.constant dense<0.000000e+00> : vector<8xf32>
    %65 = vector.multi_reduction <add>, %64, %cst_33 [1] : vector<8x8xf32> to vector<8xf32>
    %66 = vector.shape_cast %65 : vector<8xf32> to vector<8x1xf32>
    %67 = tpu.reciprocal %66 {approx = true} : vector<8x1xf32> -> vector<8x1xf32>
    %68 = vector.broadcast %67 : vector<8x1xf32> to vector<8x8xf32>
    %69 = arith.mulf %64, %68 : vector<8x8xf32>
    %70 = vector.broadcast %53 : vector<1x32xf32> to vector<8x32xf32>
    %71 = arith.mulf %37, %70 : vector<8x32xf32>
    %cst_34 = arith.constant dense<0.000000e+00> : vector<8x32xf32>
    %72 = tpu.matmul %69, %71, %cst_34 {dimension_numbers = #tpu.dot_dimension_numbers<[1], [0], [0], [1], [0, 0, 1, 1], [], []>} : vector<8x8xf32>, vector<8x32xf32>, vector<8x32xf32> -> vector<8x32xf32>
    %73 = arith.addf %45, %72 : vector<8x32xf32>
    %c8_i32_35 = arith.constant 8 : i32
    %74 = vector.broadcast %c8_i32_35 : i32 to vector<1x32xi32>
    %75 = arith.cmpi sge, %38, %74 : vector<1x32xi32>
    %c16_i32 = arith.constant 16 : i32
    %76 = vector.broadcast %c16_i32 : i32 to vector<1x32xi32>
    %77 = arith.cmpi slt, %38, %76 : vector<1x32xi32>
    %78 = arith.andi %75, %77 : vector<1x32xi1>
    %cst_36 = arith.constant 1.000000e+00 : f32
    %cst_37 = arith.constant 0.000000e+00 : f32
    %79 = vector.broadcast %cst_36 : f32 to vector<1x32xf32>
    %80 = vector.broadcast %cst_37 : f32 to vector<1x32xf32>
    %81 = arith.select %78, %79, %80 : vector<1x32xi1>, vector<1x32xf32>
    %82 = vector.broadcast %81 : vector<1x32xf32> to vector<8x32xf32>
    %83 = arith.mulf %23, %82 : vector<8x32xf32>
    %cst_38 = arith.constant dense<0.000000e+00> : vector<8x8xf32>
    %84 = tpu.matmul %83, %30, %cst_38 {dimension_numbers = #tpu.dot_dimension_numbers<[1], [1], [0], [0], [0, 0, 1, 0], [], []>} : vector<8x32xf32>, vector<8x32xf32>, vector<8x8xf32> -> vector<8x8xf32>
    %cst_39 = arith.constant 0.353553385 : f32
    %85 = vector.broadcast %cst_39 : f32 to vector<8x8xf32>
    %86 = arith.mulf %84, %85 : vector<8x8xf32>
    %87 = arith.addf %86, %44 : vector<8x8xf32>
    %cst_40 = arith.constant dense<0xFF800000> : vector<8xf32>
    %88 = vector.multi_reduction <maximumf>, %87, %cst_40 [1] : vector<8x8xf32> to vector<8xf32>
    %89 = vector.shape_cast %88 : vector<8xf32> to vector<8x1xf32>
    %90 = vector.broadcast %89 : vector<8x1xf32> to vector<8x8xf32>
    %91 = arith.subf %87, %90 : vector<8x8xf32>
    %92 = math.exp %91 : vector<8x8xf32>
    %cst_41 = arith.constant dense<0.000000e+00> : vector<8xf32>
    %93 = vector.multi_reduction <add>, %92, %cst_41 [1] : vector<8x8xf32> to vector<8xf32>
    %94 = vector.shape_cast %93 : vector<8xf32> to vector<8x1xf32>
    %95 = tpu.reciprocal %94 {approx = true} : vector<8x1xf32> -> vector<8x1xf32>
    %96 = vector.broadcast %95 : vector<8x1xf32> to vector<8x8xf32>
    %97 = arith.mulf %92, %96 : vector<8x8xf32>
    %98 = vector.broadcast %81 : vector<1x32xf32> to vector<8x32xf32>
    %99 = arith.mulf %37, %98 : vector<8x32xf32>
    %cst_42 = arith.constant dense<0.000000e+00> : vector<8x32xf32>
    %100 = tpu.matmul %97, %99, %cst_42 {dimension_numbers = #tpu.dot_dimension_numbers<[1], [0], [0], [1], [0, 0, 1, 1], [], []>} : vector<8x8xf32>, vector<8x32xf32>, vector<8x32xf32> -> vector<8x32xf32>
    %101 = arith.addf %73, %100 : vector<8x32xf32>
    %c16_i32_43 = arith.constant 16 : i32
    %102 = vector.broadcast %c16_i32_43 : i32 to vector<1x32xi32>
    %103 = arith.cmpi sge, %38, %102 : vector<1x32xi32>
    %c24_i32 = arith.constant 24 : i32
    %104 = vector.broadcast %c24_i32 : i32 to vector<1x32xi32>
    %105 = arith.cmpi slt, %38, %104 : vector<1x32xi32>
    %106 = arith.andi %103, %105 : vector<1x32xi1>
    %cst_44 = arith.constant 1.000000e+00 : f32
    %cst_45 = arith.constant 0.000000e+00 : f32
    %107 = vector.broadcast %cst_44 : f32 to vector<1x32xf32>
    %108 = vector.broadcast %cst_45 : f32 to vector<1x32xf32>
    %109 = arith.select %106, %107, %108 : vector<1x32xi1>, vector<1x32xf32>
    %110 = vector.broadcast %109 : vector<1x32xf32> to vector<8x32xf32>
    %111 = arith.mulf %23, %110 : vector<8x32xf32>
    %cst_46 = arith.constant dense<0.000000e+00> : vector<8x8xf32>
    %112 = tpu.matmul %111, %30, %cst_46 {dimension_numbers = #tpu.dot_dimension_numbers<[1], [1], [0], [0], [0, 0, 1, 0], [], []>} : vector<8x32xf32>, vector<8x32xf32>, vector<8x8xf32> -> vector<8x8xf32>
    %cst_47 = arith.constant 0.353553385 : f32
    %113 = vector.broadcast %cst_47 : f32 to vector<8x8xf32>
    %114 = arith.mulf %112, %113 : vector<8x8xf32>
    %115 = arith.addf %114, %44 : vector<8x8xf32>
    %cst_48 = arith.constant dense<0xFF800000> : vector<8xf32>
    %116 = vector.multi_reduction <maximumf>, %115, %cst_48 [1] : vector<8x8xf32> to vector<8xf32>
    %117 = vector.shape_cast %116 : vector<8xf32> to vector<8x1xf32>
    %118 = vector.broadcast %117 : vector<8x1xf32> to vector<8x8xf32>
    %119 = arith.subf %115, %118 : vector<8x8xf32>
    %120 = math.exp %119 : vector<8x8xf32>
    %cst_49 = arith.constant dense<0.000000e+00> : vector<8xf32>
    %121 = vector.multi_reduction <add>, %120, %cst_49 [1] : vector<8x8xf32> to vector<8xf32>
    %122 = vector.shape_cast %121 : vector<8xf32> to vector<8x1xf32>
    %123 = tpu.reciprocal %122 {approx = true} : vector<8x1xf32> -> vector<8x1xf32>
    %124 = vector.broadcast %123 : vector<8x1xf32> to vector<8x8xf32>
    %125 = arith.mulf %120, %124 : vector<8x8xf32>
    %126 = vector.broadcast %109 : vector<1x32xf32> to vector<8x32xf32>
    %127 = arith.mulf %37, %126 : vector<8x32xf32>
    %cst_50 = arith.constant dense<0.000000e+00> : vector<8x32xf32>
    %128 = tpu.matmul %125, %127, %cst_50 {dimension_numbers = #tpu.dot_dimension_numbers<[1], [0], [0], [1], [0, 0, 1, 1], [], []>} : vector<8x8xf32>, vector<8x32xf32>, vector<8x32xf32> -> vector<8x32xf32>
    %129 = arith.addf %101, %128 : vector<8x32xf32>
    %c24_i32_51 = arith.constant 24 : i32
    %130 = vector.broadcast %c24_i32_51 : i32 to vector<1x32xi32>
    %131 = arith.cmpi sge, %38, %130 : vector<1x32xi32>
    %c32_i32 = arith.constant 32 : i32
    %132 = vector.broadcast %c32_i32 : i32 to vector<1x32xi32>
    %133 = arith.cmpi slt, %38, %132 : vector<1x32xi32>
    %134 = arith.andi %131, %133 : vector<1x32xi1>
    %cst_52 = arith.constant 1.000000e+00 : f32
    %cst_53 = arith.constant 0.000000e+00 : f32
    %135 = vector.broadcast %cst_52 : f32 to vector<1x32xf32>
    %136 = vector.broadcast %cst_53 : f32 to vector<1x32xf32>
    %137 = arith.select %134, %135, %136 : vector<1x32xi1>, vector<1x32xf32>
    %138 = vector.broadcast %137 : vector<1x32xf32> to vector<8x32xf32>
    %139 = arith.mulf %23, %138 : vector<8x32xf32>
    %cst_54 = arith.constant dense<0.000000e+00> : vector<8x8xf32>
    %140 = tpu.matmul %139, %30, %cst_54 {dimension_numbers = #tpu.dot_dimension_numbers<[1], [1], [0], [0], [0, 0, 1, 0], [], []>} : vector<8x32xf32>, vector<8x32xf32>, vector<8x8xf32> -> vector<8x8xf32>
    %cst_55 = arith.constant 0.353553385 : f32
    %141 = vector.broadcast %cst_55 : f32 to vector<8x8xf32>
    %142 = arith.mulf %140, %141 : vector<8x8xf32>
    %143 = arith.addf %142, %44 : vector<8x8xf32>
    %cst_56 = arith.constant dense<0xFF800000> : vector<8xf32>
    %144 = vector.multi_reduction <maximumf>, %143, %cst_56 [1] : vector<8x8xf32> to vector<8xf32>
    %145 = vector.shape_cast %144 : vector<8xf32> to vector<8x1xf32>
    %146 = vector.broadcast %145 : vector<8x1xf32> to vector<8x8xf32>
    %147 = arith.subf %143, %146 : vector<8x8xf32>
    %148 = math.exp %147 : vector<8x8xf32>
    %cst_57 = arith.constant dense<0.000000e+00> : vector<8xf32>
    %149 = vector.multi_reduction <add>, %148, %cst_57 [1] : vector<8x8xf32> to vector<8xf32>
    %150 = vector.shape_cast %149 : vector<8xf32> to vector<8x1xf32>
    %151 = tpu.reciprocal %150 {approx = true} : vector<8x1xf32> -> vector<8x1xf32>
    %152 = vector.broadcast %151 : vector<8x1xf32> to vector<8x8xf32>
    %153 = arith.mulf %148, %152 : vector<8x8xf32>
    %154 = vector.broadcast %137 : vector<1x32xf32> to vector<8x32xf32>
    %155 = arith.mulf %37, %154 : vector<8x32xf32>
    %cst_58 = arith.constant dense<0.000000e+00> : vector<8x32xf32>
    %156 = tpu.matmul %153, %155, %cst_58 {dimension_numbers = #tpu.dot_dimension_numbers<[1], [0], [0], [1], [0, 0, 1, 1], [], []>} : vector<8x8xf32>, vector<8x32xf32>, vector<8x32xf32> -> vector<8x32xf32>
    %157 = arith.addf %129, %156 : vector<8x32xf32>
    %cst_59 = arith.constant dense<0.000000e+00> : vector<8x32xf32>
    %158 = tpu.matmul %157, %14, %cst_59 {dimension_numbers = #tpu.dot_dimension_numbers<[1], [0], [0], [1], [0, 0, 1, 1], [], []>} : vector<8x32xf32>, vector<32x32xf32>, vector<8x32xf32> -> vector<8x32xf32>
    %159 = vector.broadcast %16 : vector<1x32xf32> to vector<8x32xf32>
    %160 = arith.addf %158, %159 : vector<8x32xf32>
    %161 = arith.addf %8, %160 : vector<8x32xf32>
    %c0_60 = arith.constant 0 : index
    %c0_61 = arith.constant 0 : index
    %c0_62 = arith.constant 0 : index
    %162 = vector.load %arg9[%c0_60, %c0_61, %c0_62] : memref<2x1x32xf32, #tpu.memory_space<vmem>>, vector<1x1x32xf32>
    %163 = vector.shape_cast %162 : vector<1x1x32xf32> to vector<1x32xf32>
    %c0_63 = arith.constant 0 : index
    %c0_64 = arith.constant 0 : index
    %c0_65 = arith.constant 0 : index
    %164 = vector.load %arg10[%c0_63, %c0_64, %c0_65] : memref<2x1x32xf32, #tpu.memory_space<vmem>>, vector<1x1x32xf32>
    %165 = vector.shape_cast %164 : vector<1x1x32xf32> to vector<1x32xf32>
    %cst_66 = arith.constant dense<0.000000e+00> : vector<8xf32>
    %166 = vector.multi_reduction <add>, %161, %cst_66 [1] : vector<8x32xf32> to vector<8xf32>
    %167 = vector.shape_cast %166 : vector<8xf32> to vector<8x1xf32>
    %cst_67 = arith.constant 3.200000e+01 : f32
    %168 = vector.broadcast %cst_67 : f32 to vector<8x1xf32>
    %169 = arith.divf %167, %168 : vector<8x1xf32>
    %170 = vector.broadcast %169 : vector<8x1xf32> to vector<8x32xf32>
    %171 = arith.subf %161, %170 : vector<8x32xf32>
    %172 = arith.mulf %171, %171 : vector<8x32xf32>
    %cst_68 = arith.constant dense<0.000000e+00> : vector<8xf32>
    %173 = vector.multi_reduction <add>, %172, %cst_68 [1] : vector<8x32xf32> to vector<8xf32>
    %174 = vector.shape_cast %173 : vector<8xf32> to vector<8x1xf32>
    %cst_69 = arith.constant 3.200000e+01 : f32
    %175 = vector.broadcast %cst_69 : f32 to vector<8x1xf32>
    %176 = arith.divf %174, %175 : vector<8x1xf32>
    %cst_70 = arith.constant 9.99999974E-6 : f32
    %177 = vector.broadcast %cst_70 : f32 to vector<8x1xf32>
    %178 = arith.addf %176, %177 : vector<8x1xf32>
    %179 = math.rsqrt %178 : vector<8x1xf32>
    %180 = vector.broadcast %179 : vector<8x1xf32> to vector<8x32xf32>
    %181 = arith.mulf %171, %180 : vector<8x32xf32>
    %182 = vector.broadcast %163 : vector<1x32xf32> to vector<8x32xf32>
    %183 = arith.mulf %181, %182 : vector<8x32xf32>
    %184 = vector.broadcast %165 : vector<1x32xf32> to vector<8x32xf32>
    %185 = arith.addf %183, %184 : vector<8x32xf32>
    %c0_71 = arith.constant 0 : index
    %c0_72 = arith.constant 0 : index
    %c0_73 = arith.constant 0 : index
    %186 = vector.load %arg11[%c0_71, %c0_72, %c0_73] : memref<2x32x2048xf32, #tpu.memory_space<vmem>>, vector<1x32x2048xf32>
    %187 = vector.shape_cast %186 : vector<1x32x2048xf32> to vector<32x2048xf32>
    %c0_74 = arith.constant 0 : index
    %c0_75 = arith.constant 0 : index
    %c0_76 = arith.constant 0 : index
    %188 = vector.load %arg12[%c0_74, %c0_75, %c0_76] : memref<2x1x2048xf32, #tpu.memory_space<vmem>>, vector<1x1x2048xf32>
    %189 = vector.shape_cast %188 : vector<1x1x2048xf32> to vector<1x2048xf32>
    %c0_77 = arith.constant 0 : index
    %c0_78 = arith.constant 0 : index
    %c0_79 = arith.constant 0 : index
    %190 = vector.load %arg13[%c0_77, %c0_78, %c0_79] : memref<2x32x2048xf32, #tpu.memory_space<vmem>>, vector<1x32x2048xf32>
    %191 = vector.shape_cast %190 : vector<1x32x2048xf32> to vector<32x2048xf32>
    %c0_80 = arith.constant 0 : index
    %c0_81 = arith.constant 0 : index
    %c0_82 = arith.constant 0 : index
    %192 = vector.load %arg14[%c0_80, %c0_81, %c0_82] : memref<2x1x32xf32, #tpu.memory_space<vmem>>, vector<1x1x32xf32>
    %193 = vector.shape_cast %192 : vector<1x1x32xf32> to vector<1x32xf32>
    %cst_83 = arith.constant dense<0.000000e+00> : vector<8x2048xf32>
    %194 = tpu.matmul %185, %187, %cst_83 {dimension_numbers = #tpu.dot_dimension_numbers<[1], [0], [0], [1], [0, 0, 1, 1], [], []>} : vector<8x32xf32>, vector<32x2048xf32>, vector<8x2048xf32> -> vector<8x2048xf32>
    %195 = vector.broadcast %189 : vector<1x2048xf32> to vector<8x2048xf32>
    %196 = arith.addf %194, %195 : vector<8x2048xf32>
    %cst_84 = arith.constant 0.000000e+00 : f32
    %197 = vector.broadcast %cst_84 : f32 to vector<8x2048xf32>
    %198 = arith.maximumf %196, %197 : vector<8x2048xf32>
    %cst_85 = arith.constant dense<0.000000e+00> : vector<8x32xf32>
    %199 = tpu.matmul %198, %191, %cst_85 {dimension_numbers = #tpu.dot_dimension_numbers<[1], [1], [0], [0], [0, 0, 1, 0], [], []>} : vector<8x2048xf32>, vector<32x2048xf32>, vector<8x32xf32> -> vector<8x32xf32>
    %200 = vector.broadcast %193 : vector<1x32xf32> to vector<8x32xf32>
    %201 = arith.addf %199, %200 : vector<8x32xf32>
    %202 = arith.addf %185, %201 : vector<8x32xf32>
    %c0_86 = arith.constant 0 : index
    %c0_87 = arith.constant 0 : index
    %c0_88 = arith.constant 0 : index
    %203 = vector.load %arg15[%c0_86, %c0_87, %c0_88] : memref<2x1x32xf32, #tpu.memory_space<vmem>>, vector<1x1x32xf32>
    %204 = vector.shape_cast %203 : vector<1x1x32xf32> to vector<1x32xf32>
    %c0_89 = arith.constant 0 : index
    %c0_90 = arith.constant 0 : index
    %c0_91 = arith.constant 0 : index
    %205 = vector.load %arg16[%c0_89, %c0_90, %c0_91] : memref<2x1x32xf32, #tpu.memory_space<vmem>>, vector<1x1x32xf32>
    %206 = vector.shape_cast %205 : vector<1x1x32xf32> to vector<1x32xf32>
    %cst_92 = arith.constant dense<0.000000e+00> : vector<8xf32>
    %207 = vector.multi_reduction <add>, %202, %cst_92 [1] : vector<8x32xf32> to vector<8xf32>
    %208 = vector.shape_cast %207 : vector<8xf32> to vector<8x1xf32>
    %cst_93 = arith.constant 3.200000e+01 : f32
    %209 = vector.broadcast %cst_93 : f32 to vector<8x1xf32>
    %210 = arith.divf %208, %209 : vector<8x1xf32>
    %211 = vector.broadcast %210 : vector<8x1xf32> to vector<8x32xf32>
    %212 = arith.subf %202, %211 : vector<8x32xf32>
    %213 = arith.mulf %212, %212 : vector<8x32xf32>
    %cst_94 = arith.constant dense<0.000000e+00> : vector<8xf32>
    %214 = vector.multi_reduction <add>, %213, %cst_94 [1] : vector<8x32xf32> to vector<8xf32>
    %215 = vector.shape_cast %214 : vector<8xf32> to vector<8x1xf32>
    %cst_95 = arith.constant 3.200000e+01 : f32
    %216 = vector.broadcast %cst_95 : f32 to vector<8x1xf32>
    %217 = arith.divf %215, %216 : vector<8x1xf32>
    %cst_96 = arith.constant 9.99999974E-6 : f32
    %218 = vector.broadcast %cst_96 : f32 to vector<8x1xf32>
    %219 = arith.addf %217, %218 : vector<8x1xf32>
    %220 = math.rsqrt %219 : vector<8x1xf32>
    %221 = vector.broadcast %220 : vector<8x1xf32> to vector<8x32xf32>
    %222 = arith.mulf %212, %221 : vector<8x32xf32>
    %223 = vector.broadcast %204 : vector<1x32xf32> to vector<8x32xf32>
    %224 = arith.mulf %222, %223 : vector<8x32xf32>
    %225 = vector.broadcast %206 : vector<1x32xf32> to vector<8x32xf32>
    %226 = arith.addf %224, %225 : vector<8x32xf32>
    %c1 = arith.constant 1 : index
    %c0_97 = arith.constant 0 : index
    %c0_98 = arith.constant 0 : index
    %c0_99 = arith.constant 0 : index
    %227 = vector.load %arg5[%c1, %c0_97, %c0_98, %c0_99] : memref<2x3x32x32xf32, #tpu.memory_space<vmem>>, vector<1x3x32x32xf32>
    %228 = vector.shape_cast %227 : vector<1x3x32x32xf32> to vector<3x32x32xf32>
    %c1_100 = arith.constant 1 : index
    %c0_101 = arith.constant 0 : index
    %c0_102 = arith.constant 0 : index
    %c0_103 = arith.constant 0 : index
    %229 = vector.load %arg6[%c1_100, %c0_101, %c0_102, %c0_103] : memref<2x3x1x32xf32, #tpu.memory_space<vmem>>, vector<1x3x1x32xf32>
    %230 = vector.shape_cast %229 : vector<1x3x1x32xf32> to vector<3x1x32xf32>
    %c1_104 = arith.constant 1 : index
    %c0_105 = arith.constant 0 : index
    %c0_106 = arith.constant 0 : index
    %231 = vector.load %arg7[%c1_104, %c0_105, %c0_106] : memref<2x32x32xf32, #tpu.memory_space<vmem>>, vector<1x32x32xf32>
    %232 = vector.shape_cast %231 : vector<1x32x32xf32> to vector<32x32xf32>
    %c1_107 = arith.constant 1 : index
    %c0_108 = arith.constant 0 : index
    %c0_109 = arith.constant 0 : index
    %233 = vector.load %arg8[%c1_107, %c0_108, %c0_109] : memref<2x1x32xf32, #tpu.memory_space<vmem>>, vector<1x1x32xf32>
    %234 = vector.shape_cast %233 : vector<1x1x32xf32> to vector<1x32xf32>
    %235 = vector.extract_strided_slice %228 {offsets = [0, 0, 0], sizes = [1, 32, 32], strides = [1, 1, 1]} : vector<3x32x32xf32> to vector<1x32x32xf32>
    %236 = vector.shape_cast %235 : vector<1x32x32xf32> to vector<32x32xf32>
    %cst_110 = arith.constant dense<0.000000e+00> : vector<8x32xf32>
    %237 = tpu.matmul %226, %236, %cst_110 {dimension_numbers = #tpu.dot_dimension_numbers<[1], [0], [0], [1], [0, 0, 1, 1], [], []>} : vector<8x32xf32>, vector<32x32xf32>, vector<8x32xf32> -> vector<8x32xf32>
    %238 = vector.extract_strided_slice %230 {offsets = [0, 0, 0], sizes = [1, 1, 32], strides = [1, 1, 1]} : vector<3x1x32xf32> to vector<1x1x32xf32>
    %239 = vector.shape_cast %238 : vector<1x1x32xf32> to vector<1x32xf32>
    %240 = vector.broadcast %239 : vector<1x32xf32> to vector<8x32xf32>
    %241 = arith.addf %237, %240 : vector<8x32xf32>
    %242 = vector.extract_strided_slice %228 {offsets = [1, 0, 0], sizes = [1, 32, 32], strides = [1, 1, 1]} : vector<3x32x32xf32> to vector<1x32x32xf32>
    %243 = vector.shape_cast %242 : vector<1x32x32xf32> to vector<32x32xf32>
    %cst_111 = arith.constant dense<0.000000e+00> : vector<8x32xf32>
    %244 = tpu.matmul %226, %243, %cst_111 {dimension_numbers = #tpu.dot_dimension_numbers<[1], [0], [0], [1], [0, 0, 1, 1], [], []>} : vector<8x32xf32>, vector<32x32xf32>, vector<8x32xf32> -> vector<8x32xf32>
    %245 = vector.extract_strided_slice %230 {offsets = [1, 0, 0], sizes = [1, 1, 32], strides = [1, 1, 1]} : vector<3x1x32xf32> to vector<1x1x32xf32>
    %246 = vector.shape_cast %245 : vector<1x1x32xf32> to vector<1x32xf32>
    %247 = vector.broadcast %246 : vector<1x32xf32> to vector<8x32xf32>
    %248 = arith.addf %244, %247 : vector<8x32xf32>
    %249 = vector.extract_strided_slice %228 {offsets = [2, 0, 0], sizes = [1, 32, 32], strides = [1, 1, 1]} : vector<3x32x32xf32> to vector<1x32x32xf32>
    %250 = vector.shape_cast %249 : vector<1x32x32xf32> to vector<32x32xf32>
    %cst_112 = arith.constant dense<0.000000e+00> : vector<8x32xf32>
    %251 = tpu.matmul %226, %250, %cst_112 {dimension_numbers = #tpu.dot_dimension_numbers<[1], [0], [0], [1], [0, 0, 1, 1], [], []>} : vector<8x32xf32>, vector<32x32xf32>, vector<8x32xf32> -> vector<8x32xf32>
    %252 = vector.extract_strided_slice %230 {offsets = [2, 0, 0], sizes = [1, 1, 32], strides = [1, 1, 1]} : vector<3x1x32xf32> to vector<1x1x32xf32>
    %253 = vector.shape_cast %252 : vector<1x1x32xf32> to vector<1x32xf32>
    %254 = vector.broadcast %253 : vector<1x32xf32> to vector<8x32xf32>
    %255 = arith.addf %251, %254 : vector<8x32xf32>
    %256 = tpu.iota {dimensions = array<i32: 1>} : vector<1x32xi32>
    %257 = tpu.iota {dimensions = array<i32: 0>} : vector<8x8xi32>
    %258 = tpu.iota {dimensions = array<i32: 1>} : vector<8x8xi32>
    %259 = arith.cmpi sge, %258, %257 : vector<8x8xi32>
    %cst_113 = arith.constant 0.000000e+00 : f32
    %cst_114 = arith.constant -1.000000e+30 : f32
    %260 = vector.broadcast %cst_113 : f32 to vector<8x8xf32>
    %261 = vector.broadcast %cst_114 : f32 to vector<8x8xf32>
    %262 = arith.select %259, %260, %261 : vector<8x8xi1>, vector<8x8xf32>
    %cst_115 = arith.constant 0.000000e+00 : f32
    %263 = vector.broadcast %cst_115 : f32 to vector<8x32xf32>
    %c0_i32_116 = arith.constant 0 : i32
    %264 = vector.broadcast %c0_i32_116 : i32 to vector<1x32xi32>
    %265 = arith.cmpi sge, %256, %264 : vector<1x32xi32>
    %c8_i32_117 = arith.constant 8 : i32
    %266 = vector.broadcast %c8_i32_117 : i32 to vector<1x32xi32>
    %267 = arith.cmpi slt, %256, %266 : vector<1x32xi32>
    %268 = arith.andi %265, %267 : vector<1x32xi1>
    %cst_118 = arith.constant 1.000000e+00 : f32
    %cst_119 = arith.constant 0.000000e+00 : f32
    %269 = vector.broadcast %cst_118 : f32 to vector<1x32xf32>
    %270 = vector.broadcast %cst_119 : f32 to vector<1x32xf32>
    %271 = arith.select %268, %269, %270 : vector<1x32xi1>, vector<1x32xf32>
    %272 = vector.broadcast %271 : vector<1x32xf32> to vector<8x32xf32>
    %273 = arith.mulf %241, %272 : vector<8x32xf32>
    %cst_120 = arith.constant dense<0.000000e+00> : vector<8x8xf32>
    %274 = tpu.matmul %273, %248, %cst_120 {dimension_numbers = #tpu.dot_dimension_numbers<[1], [1], [0], [0], [0, 0, 1, 0], [], []>} : vector<8x32xf32>, vector<8x32xf32>, vector<8x8xf32> -> vector<8x8xf32>
    %cst_121 = arith.constant 0.353553385 : f32
    %275 = vector.broadcast %cst_121 : f32 to vector<8x8xf32>
    %276 = arith.mulf %274, %275 : vector<8x8xf32>
    %277 = arith.addf %276, %262 : vector<8x8xf32>
    %cst_122 = arith.constant dense<0xFF800000> : vector<8xf32>
    %278 = vector.multi_reduction <maximumf>, %277, %cst_122 [1] : vector<8x8xf32> to vector<8xf32>
    %279 = vector.shape_cast %278 : vector<8xf32> to vector<8x1xf32>
    %280 = vector.broadcast %279 : vector<8x1xf32> to vector<8x8xf32>
    %281 = arith.subf %277, %280 : vector<8x8xf32>
    %282 = math.exp %281 : vector<8x8xf32>
    %cst_123 = arith.constant dense<0.000000e+00> : vector<8xf32>
    %283 = vector.multi_reduction <add>, %282, %cst_123 [1] : vector<8x8xf32> to vector<8xf32>
    %284 = vector.shape_cast %283 : vector<8xf32> to vector<8x1xf32>
    %285 = tpu.reciprocal %284 {approx = true} : vector<8x1xf32> -> vector<8x1xf32>
    %286 = vector.broadcast %285 : vector<8x1xf32> to vector<8x8xf32>
    %287 = arith.mulf %282, %286 : vector<8x8xf32>
    %288 = vector.broadcast %271 : vector<1x32xf32> to vector<8x32xf32>
    %289 = arith.mulf %255, %288 : vector<8x32xf32>
    %cst_124 = arith.constant dense<0.000000e+00> : vector<8x32xf32>
    %290 = tpu.matmul %287, %289, %cst_124 {dimension_numbers = #tpu.dot_dimension_numbers<[1], [0], [0], [1], [0, 0, 1, 1], [], []>} : vector<8x8xf32>, vector<8x32xf32>, vector<8x32xf32> -> vector<8x32xf32>
    %291 = arith.addf %263, %290 : vector<8x32xf32>
    %c8_i32_125 = arith.constant 8 : i32
    %292 = vector.broadcast %c8_i32_125 : i32 to vector<1x32xi32>
    %293 = arith.cmpi sge, %256, %292 : vector<1x32xi32>
    %c16_i32_126 = arith.constant 16 : i32
    %294 = vector.broadcast %c16_i32_126 : i32 to vector<1x32xi32>
    %295 = arith.cmpi slt, %256, %294 : vector<1x32xi32>
    %296 = arith.andi %293, %295 : vector<1x32xi1>
    %cst_127 = arith.constant 1.000000e+00 : f32
    %cst_128 = arith.constant 0.000000e+00 : f32
    %297 = vector.broadcast %cst_127 : f32 to vector<1x32xf32>
    %298 = vector.broadcast %cst_128 : f32 to vector<1x32xf32>
    %299 = arith.select %296, %297, %298 : vector<1x32xi1>, vector<1x32xf32>
    %300 = vector.broadcast %299 : vector<1x32xf32> to vector<8x32xf32>
    %301 = arith.mulf %241, %300 : vector<8x32xf32>
    %cst_129 = arith.constant dense<0.000000e+00> : vector<8x8xf32>
    %302 = tpu.matmul %301, %248, %cst_129 {dimension_numbers = #tpu.dot_dimension_numbers<[1], [1], [0], [0], [0, 0, 1, 0], [], []>} : vector<8x32xf32>, vector<8x32xf32>, vector<8x8xf32> -> vector<8x8xf32>
    %cst_130 = arith.constant 0.353553385 : f32
    %303 = vector.broadcast %cst_130 : f32 to vector<8x8xf32>
    %304 = arith.mulf %302, %303 : vector<8x8xf32>
    %305 = arith.addf %304, %262 : vector<8x8xf32>
    %cst_131 = arith.constant dense<0xFF800000> : vector<8xf32>
    %306 = vector.multi_reduction <maximumf>, %305, %cst_131 [1] : vector<8x8xf32> to vector<8xf32>
    %307 = vector.shape_cast %306 : vector<8xf32> to vector<8x1xf32>
    %308 = vector.broadcast %307 : vector<8x1xf32> to vector<8x8xf32>
    %309 = arith.subf %305, %308 : vector<8x8xf32>
    %310 = math.exp %309 : vector<8x8xf32>
    %cst_132 = arith.constant dense<0.000000e+00> : vector<8xf32>
    %311 = vector.multi_reduction <add>, %310, %cst_132 [1] : vector<8x8xf32> to vector<8xf32>
    %312 = vector.shape_cast %311 : vector<8xf32> to vector<8x1xf32>
    %313 = tpu.reciprocal %312 {approx = true} : vector<8x1xf32> -> vector<8x1xf32>
    %314 = vector.broadcast %313 : vector<8x1xf32> to vector<8x8xf32>
    %315 = arith.mulf %310, %314 : vector<8x8xf32>
    %316 = vector.broadcast %299 : vector<1x32xf32> to vector<8x32xf32>
    %317 = arith.mulf %255, %316 : vector<8x32xf32>
    %cst_133 = arith.constant dense<0.000000e+00> : vector<8x32xf32>
    %318 = tpu.matmul %315, %317, %cst_133 {dimension_numbers = #tpu.dot_dimension_numbers<[1], [0], [0], [1], [0, 0, 1, 1], [], []>} : vector<8x8xf32>, vector<8x32xf32>, vector<8x32xf32> -> vector<8x32xf32>
    %319 = arith.addf %291, %318 : vector<8x32xf32>
    %c16_i32_134 = arith.constant 16 : i32
    %320 = vector.broadcast %c16_i32_134 : i32 to vector<1x32xi32>
    %321 = arith.cmpi sge, %256, %320 : vector<1x32xi32>
    %c24_i32_135 = arith.constant 24 : i32
    %322 = vector.broadcast %c24_i32_135 : i32 to vector<1x32xi32>
    %323 = arith.cmpi slt, %256, %322 : vector<1x32xi32>
    %324 = arith.andi %321, %323 : vector<1x32xi1>
    %cst_136 = arith.constant 1.000000e+00 : f32
    %cst_137 = arith.constant 0.000000e+00 : f32
    %325 = vector.broadcast %cst_136 : f32 to vector<1x32xf32>
    %326 = vector.broadcast %cst_137 : f32 to vector<1x32xf32>
    %327 = arith.select %324, %325, %326 : vector<1x32xi1>, vector<1x32xf32>
    %328 = vector.broadcast %327 : vector<1x32xf32> to vector<8x32xf32>
    %329 = arith.mulf %241, %328 : vector<8x32xf32>
    %cst_138 = arith.constant dense<0.000000e+00> : vector<8x8xf32>
    %330 = tpu.matmul %329, %248, %cst_138 {dimension_numbers = #tpu.dot_dimension_numbers<[1], [1], [0], [0], [0, 0, 1, 0], [], []>} : vector<8x32xf32>, vector<8x32xf32>, vector<8x8xf32> -> vector<8x8xf32>
    %cst_139 = arith.constant 0.353553385 : f32
    %331 = vector.broadcast %cst_139 : f32 to vector<8x8xf32>
    %332 = arith.mulf %330, %331 : vector<8x8xf32>
    %333 = arith.addf %332, %262 : vector<8x8xf32>
    %cst_140 = arith.constant dense<0xFF800000> : vector<8xf32>
    %334 = vector.multi_reduction <maximumf>, %333, %cst_140 [1] : vector<8x8xf32> to vector<8xf32>
    %335 = vector.shape_cast %334 : vector<8xf32> to vector<8x1xf32>
    %336 = vector.broadcast %335 : vector<8x1xf32> to vector<8x8xf32>
    %337 = arith.subf %333, %336 : vector<8x8xf32>
    %338 = math.exp %337 : vector<8x8xf32>
    %cst_141 = arith.constant dense<0.000000e+00> : vector<8xf32>
    %339 = vector.multi_reduction <add>, %338, %cst_141 [1] : vector<8x8xf32> to vector<8xf32>
    %340 = vector.shape_cast %339 : vector<8xf32> to vector<8x1xf32>
    %341 = tpu.reciprocal %340 {approx = true} : vector<8x1xf32> -> vector<8x1xf32>
    %342 = vector.broadcast %341 : vector<8x1xf32> to vector<8x8xf32>
    %343 = arith.mulf %338, %342 : vector<8x8xf32>
    %344 = vector.broadcast %327 : vector<1x32xf32> to vector<8x32xf32>
    %345 = arith.mulf %255, %344 : vector<8x32xf32>
    %cst_142 = arith.constant dense<0.000000e+00> : vector<8x32xf32>
    %346 = tpu.matmul %343, %345, %cst_142 {dimension_numbers = #tpu.dot_dimension_numbers<[1], [0], [0], [1], [0, 0, 1, 1], [], []>} : vector<8x8xf32>, vector<8x32xf32>, vector<8x32xf32> -> vector<8x32xf32>
    %347 = arith.addf %319, %346 : vector<8x32xf32>
    %c24_i32_143 = arith.constant 24 : i32
    %348 = vector.broadcast %c24_i32_143 : i32 to vector<1x32xi32>
    %349 = arith.cmpi sge, %256, %348 : vector<1x32xi32>
    %c32_i32_144 = arith.constant 32 : i32
    %350 = vector.broadcast %c32_i32_144 : i32 to vector<1x32xi32>
    %351 = arith.cmpi slt, %256, %350 : vector<1x32xi32>
    %352 = arith.andi %349, %351 : vector<1x32xi1>
    %cst_145 = arith.constant 1.000000e+00 : f32
    %cst_146 = arith.constant 0.000000e+00 : f32
    %353 = vector.broadcast %cst_145 : f32 to vector<1x32xf32>
    %354 = vector.broadcast %cst_146 : f32 to vector<1x32xf32>
    %355 = arith.select %352, %353, %354 : vector<1x32xi1>, vector<1x32xf32>
    %356 = vector.broadcast %355 : vector<1x32xf32> to vector<8x32xf32>
    %357 = arith.mulf %241, %356 : vector<8x32xf32>
    %cst_147 = arith.constant dense<0.000000e+00> : vector<8x8xf32>
    %358 = tpu.matmul %357, %248, %cst_147 {dimension_numbers = #tpu.dot_dimension_numbers<[1], [1], [0], [0], [0, 0, 1, 0], [], []>} : vector<8x32xf32>, vector<8x32xf32>, vector<8x8xf32> -> vector<8x8xf32>
    %cst_148 = arith.constant 0.353553385 : f32
    %359 = vector.broadcast %cst_148 : f32 to vector<8x8xf32>
    %360 = arith.mulf %358, %359 : vector<8x8xf32>
    %361 = arith.addf %360, %262 : vector<8x8xf32>
    %cst_149 = arith.constant dense<0xFF800000> : vector<8xf32>
    %362 = vector.multi_reduction <maximumf>, %361, %cst_149 [1] : vector<8x8xf32> to vector<8xf32>
    %363 = vector.shape_cast %362 : vector<8xf32> to vector<8x1xf32>
    %364 = vector.broadcast %363 : vector<8x1xf32> to vector<8x8xf32>
    %365 = arith.subf %361, %364 : vector<8x8xf32>
    %366 = math.exp %365 : vector<8x8xf32>
    %cst_150 = arith.constant dense<0.000000e+00> : vector<8xf32>
    %367 = vector.multi_reduction <add>, %366, %cst_150 [1] : vector<8x8xf32> to vector<8xf32>
    %368 = vector.shape_cast %367 : vector<8xf32> to vector<8x1xf32>
    %369 = tpu.reciprocal %368 {approx = true} : vector<8x1xf32> -> vector<8x1xf32>
    %370 = vector.broadcast %369 : vector<8x1xf32> to vector<8x8xf32>
    %371 = arith.mulf %366, %370 : vector<8x8xf32>
    %372 = vector.broadcast %355 : vector<1x32xf32> to vector<8x32xf32>
    %373 = arith.mulf %255, %372 : vector<8x32xf32>
    %cst_151 = arith.constant dense<0.000000e+00> : vector<8x32xf32>
    %374 = tpu.matmul %371, %373, %cst_151 {dimension_numbers = #tpu.dot_dimension_numbers<[1], [0], [0], [1], [0, 0, 1, 1], [], []>} : vector<8x8xf32>, vector<8x32xf32>, vector<8x32xf32> -> vector<8x32xf32>
    %375 = arith.addf %347, %374 : vector<8x32xf32>
    %cst_152 = arith.constant dense<0.000000e+00> : vector<8x32xf32>
    %376 = tpu.matmul %375, %232, %cst_152 {dimension_numbers = #tpu.dot_dimension_numbers<[1], [0], [0], [1], [0, 0, 1, 1], [], []>} : vector<8x32xf32>, vector<32x32xf32>, vector<8x32xf32> -> vector<8x32xf32>
    %377 = vector.broadcast %234 : vector<1x32xf32> to vector<8x32xf32>
    %378 = arith.addf %376, %377 : vector<8x32xf32>
    %379 = arith.addf %226, %378 : vector<8x32xf32>
    %c1_153 = arith.constant 1 : index
    %c0_154 = arith.constant 0 : index
    %c0_155 = arith.constant 0 : index
    %380 = vector.load %arg9[%c1_153, %c0_154, %c0_155] : memref<2x1x32xf32, #tpu.memory_space<vmem>>, vector<1x1x32xf32>
    %381 = vector.shape_cast %380 : vector<1x1x32xf32> to vector<1x32xf32>
    %c1_156 = arith.constant 1 : index
    %c0_157 = arith.constant 0 : index
    %c0_158 = arith.constant 0 : index
    %382 = vector.load %arg10[%c1_156, %c0_157, %c0_158] : memref<2x1x32xf32, #tpu.memory_space<vmem>>, vector<1x1x32xf32>
    %383 = vector.shape_cast %382 : vector<1x1x32xf32> to vector<1x32xf32>
    %cst_159 = arith.constant dense<0.000000e+00> : vector<8xf32>
    %384 = vector.multi_reduction <add>, %379, %cst_159 [1] : vector<8x32xf32> to vector<8xf32>
    %385 = vector.shape_cast %384 : vector<8xf32> to vector<8x1xf32>
    %cst_160 = arith.constant 3.200000e+01 : f32
    %386 = vector.broadcast %cst_160 : f32 to vector<8x1xf32>
    %387 = arith.divf %385, %386 : vector<8x1xf32>
    %388 = vector.broadcast %387 : vector<8x1xf32> to vector<8x32xf32>
    %389 = arith.subf %379, %388 : vector<8x32xf32>
    %390 = arith.mulf %389, %389 : vector<8x32xf32>
    %cst_161 = arith.constant dense<0.000000e+00> : vector<8xf32>
    %391 = vector.multi_reduction <add>, %390, %cst_161 [1] : vector<8x32xf32> to vector<8xf32>
    %392 = vector.shape_cast %391 : vector<8xf32> to vector<8x1xf32>
    %cst_162 = arith.constant 3.200000e+01 : f32
    %393 = vector.broadcast %cst_162 : f32 to vector<8x1xf32>
    %394 = arith.divf %392, %393 : vector<8x1xf32>
    %cst_163 = arith.constant 9.99999974E-6 : f32
    %395 = vector.broadcast %cst_163 : f32 to vector<8x1xf32>
    %396 = arith.addf %394, %395 : vector<8x1xf32>
    %397 = math.rsqrt %396 : vector<8x1xf32>
    %398 = vector.broadcast %397 : vector<8x1xf32> to vector<8x32xf32>
    %399 = arith.mulf %389, %398 : vector<8x32xf32>
    %400 = vector.broadcast %381 : vector<1x32xf32> to vector<8x32xf32>
    %401 = arith.mulf %399, %400 : vector<8x32xf32>
    %402 = vector.broadcast %383 : vector<1x32xf32> to vector<8x32xf32>
    %403 = arith.addf %401, %402 : vector<8x32xf32>
    %c1_164 = arith.constant 1 : index
    %c0_165 = arith.constant 0 : index
    %c0_166 = arith.constant 0 : index
    %404 = vector.load %arg11[%c1_164, %c0_165, %c0_166] : memref<2x32x2048xf32, #tpu.memory_space<vmem>>, vector<1x32x2048xf32>
    %405 = vector.shape_cast %404 : vector<1x32x2048xf32> to vector<32x2048xf32>
    %c1_167 = arith.constant 1 : index
    %c0_168 = arith.constant 0 : index
    %c0_169 = arith.constant 0 : index
    %406 = vector.load %arg12[%c1_167, %c0_168, %c0_169] : memref<2x1x2048xf32, #tpu.memory_space<vmem>>, vector<1x1x2048xf32>
    %407 = vector.shape_cast %406 : vector<1x1x2048xf32> to vector<1x2048xf32>
    %c1_170 = arith.constant 1 : index
    %c0_171 = arith.constant 0 : index
    %c0_172 = arith.constant 0 : index
    %408 = vector.load %arg13[%c1_170, %c0_171, %c0_172] : memref<2x32x2048xf32, #tpu.memory_space<vmem>>, vector<1x32x2048xf32>
    %409 = vector.shape_cast %408 : vector<1x32x2048xf32> to vector<32x2048xf32>
    %c1_173 = arith.constant 1 : index
    %c0_174 = arith.constant 0 : index
    %c0_175 = arith.constant 0 : index
    %410 = vector.load %arg14[%c1_173, %c0_174, %c0_175] : memref<2x1x32xf32, #tpu.memory_space<vmem>>, vector<1x1x32xf32>
    %411 = vector.shape_cast %410 : vector<1x1x32xf32> to vector<1x32xf32>
    %cst_176 = arith.constant dense<0.000000e+00> : vector<8x2048xf32>
    %412 = tpu.matmul %403, %405, %cst_176 {dimension_numbers = #tpu.dot_dimension_numbers<[1], [0], [0], [1], [0, 0, 1, 1], [], []>} : vector<8x32xf32>, vector<32x2048xf32>, vector<8x2048xf32> -> vector<8x2048xf32>
    %413 = vector.broadcast %407 : vector<1x2048xf32> to vector<8x2048xf32>
    %414 = arith.addf %412, %413 : vector<8x2048xf32>
    %cst_177 = arith.constant 0.000000e+00 : f32
    %415 = vector.broadcast %cst_177 : f32 to vector<8x2048xf32>
    %416 = arith.maximumf %414, %415 : vector<8x2048xf32>
    %cst_178 = arith.constant dense<0.000000e+00> : vector<8x32xf32>
    %417 = tpu.matmul %416, %409, %cst_178 {dimension_numbers = #tpu.dot_dimension_numbers<[1], [1], [0], [0], [0, 0, 1, 0], [], []>} : vector<8x2048xf32>, vector<32x2048xf32>, vector<8x32xf32> -> vector<8x32xf32>
    %418 = vector.broadcast %411 : vector<1x32xf32> to vector<8x32xf32>
    %419 = arith.addf %417, %418 : vector<8x32xf32>
    %420 = arith.addf %403, %419 : vector<8x32xf32>
    %c1_179 = arith.constant 1 : index
    %c0_180 = arith.constant 0 : index
    %c0_181 = arith.constant 0 : index
    %421 = vector.load %arg15[%c1_179, %c0_180, %c0_181] : memref<2x1x32xf32, #tpu.memory_space<vmem>>, vector<1x1x32xf32>
    %422 = vector.shape_cast %421 : vector<1x1x32xf32> to vector<1x32xf32>
    %c1_182 = arith.constant 1 : index
    %c0_183 = arith.constant 0 : index
    %c0_184 = arith.constant 0 : index
    %423 = vector.load %arg16[%c1_182, %c0_183, %c0_184] : memref<2x1x32xf32, #tpu.memory_space<vmem>>, vector<1x1x32xf32>
    %424 = vector.shape_cast %423 : vector<1x1x32xf32> to vector<1x32xf32>
    %cst_185 = arith.constant dense<0.000000e+00> : vector<8xf32>
    %425 = vector.multi_reduction <add>, %420, %cst_185 [1] : vector<8x32xf32> to vector<8xf32>
    %426 = vector.shape_cast %425 : vector<8xf32> to vector<8x1xf32>
    %cst_186 = arith.constant 3.200000e+01 : f32
    %427 = vector.broadcast %cst_186 : f32 to vector<8x1xf32>
    %428 = arith.divf %426, %427 : vector<8x1xf32>
    %429 = vector.broadcast %428 : vector<8x1xf32> to vector<8x32xf32>
    %430 = arith.subf %420, %429 : vector<8x32xf32>
    %431 = arith.mulf %430, %430 : vector<8x32xf32>
    %cst_187 = arith.constant dense<0.000000e+00> : vector<8xf32>
    %432 = vector.multi_reduction <add>, %431, %cst_187 [1] : vector<8x32xf32> to vector<8xf32>
    %433 = vector.shape_cast %432 : vector<8xf32> to vector<8x1xf32>
    %cst_188 = arith.constant 3.200000e+01 : f32
    %434 = vector.broadcast %cst_188 : f32 to vector<8x1xf32>
    %435 = arith.divf %433, %434 : vector<8x1xf32>
    %cst_189 = arith.constant 9.99999974E-6 : f32
    %436 = vector.broadcast %cst_189 : f32 to vector<8x1xf32>
    %437 = arith.addf %435, %436 : vector<8x1xf32>
    %438 = math.rsqrt %437 : vector<8x1xf32>
    %439 = vector.broadcast %438 : vector<8x1xf32> to vector<8x32xf32>
    %440 = arith.mulf %430, %439 : vector<8x32xf32>
    %441 = vector.broadcast %422 : vector<1x32xf32> to vector<8x32xf32>
    %442 = arith.mulf %440, %441 : vector<8x32xf32>
    %443 = vector.broadcast %424 : vector<1x32xf32> to vector<8x32xf32>
    %444 = arith.addf %442, %443 : vector<8x32xf32>
    %c0_190 = arith.constant 0 : index
    %c0_191 = arith.constant 0 : index
    %445 = vector.load %arg17[%c0_190, %c0_191] : memref<1x32xf32, #tpu.memory_space<vmem>>, vector<1x32xf32>
    %c0_192 = arith.constant 0 : index
    %c0_193 = arith.constant 0 : index
    %446 = vector.load %arg18[%c0_192, %c0_193] : memref<1x32xf32, #tpu.memory_space<vmem>>, vector<1x32xf32>
    %cst_194 = arith.constant dense<0.000000e+00> : vector<8xf32>
    %447 = vector.multi_reduction <add>, %444, %cst_194 [1] : vector<8x32xf32> to vector<8xf32>
    %448 = vector.shape_cast %447 : vector<8xf32> to vector<8x1xf32>
    %cst_195 = arith.constant 3.200000e+01 : f32
    %449 = vector.broadcast %cst_195 : f32 to vector<8x1xf32>
    %450 = arith.divf %448, %449 : vector<8x1xf32>
    %451 = vector.broadcast %450 : vector<8x1xf32> to vector<8x32xf32>
    %452 = arith.subf %444, %451 : vector<8x32xf32>
    %453 = arith.mulf %452, %452 : vector<8x32xf32>
    %cst_196 = arith.constant dense<0.000000e+00> : vector<8xf32>
    %454 = vector.multi_reduction <add>, %453, %cst_196 [1] : vector<8x32xf32> to vector<8xf32>
    %455 = vector.shape_cast %454 : vector<8xf32> to vector<8x1xf32>
    %cst_197 = arith.constant 3.200000e+01 : f32
    %456 = vector.broadcast %cst_197 : f32 to vector<8x1xf32>
    %457 = arith.divf %455, %456 : vector<8x1xf32>
    %cst_198 = arith.constant 9.99999974E-6 : f32
    %458 = vector.broadcast %cst_198 : f32 to vector<8x1xf32>
    %459 = arith.addf %457, %458 : vector<8x1xf32>
    %460 = math.rsqrt %459 : vector<8x1xf32>
    %461 = vector.broadcast %460 : vector<8x1xf32> to vector<8x32xf32>
    %462 = arith.mulf %452, %461 : vector<8x32xf32>
    %463 = vector.broadcast %445 : vector<1x32xf32> to vector<8x32xf32>
    %464 = arith.mulf %462, %463 : vector<8x32xf32>
    %465 = vector.broadcast %446 : vector<1x32xf32> to vector<8x32xf32>
    %466 = arith.addf %464, %465 : vector<8x32xf32>
    %c0_199 = arith.constant 0 : index
    %c0_200 = arith.constant 0 : index
    %c0_201 = arith.constant 0 : index
    %c0_202 = arith.constant 0 : index
    %467 = vector.load %arg19[%c0_199, %c0_200, %c0_201, %c0_202] : memref<2x3x32x32xf32, #tpu.memory_space<vmem>>, vector<1x3x32x32xf32>
    %468 = vector.shape_cast %467 : vector<1x3x32x32xf32> to vector<3x32x32xf32>
    %c0_203 = arith.constant 0 : index
    %c0_204 = arith.constant 0 : index
    %c0_205 = arith.constant 0 : index
    %c0_206 = arith.constant 0 : index
    %469 = vector.load %arg20[%c0_203, %c0_204, %c0_205, %c0_206] : memref<2x3x1x32xf32, #tpu.memory_space<vmem>>, vector<1x3x1x32xf32>
    %470 = vector.shape_cast %469 : vector<1x3x1x32xf32> to vector<3x1x32xf32>
    %c0_207 = arith.constant 0 : index
    %c0_208 = arith.constant 0 : index
    %c0_209 = arith.constant 0 : index
    %471 = vector.load %arg21[%c0_207, %c0_208, %c0_209] : memref<2x32x32xf32, #tpu.memory_space<vmem>>, vector<1x32x32xf32>
    %472 = vector.shape_cast %471 : vector<1x32x32xf32> to vector<32x32xf32>
    %c0_210 = arith.constant 0 : index
    %c0_211 = arith.constant 0 : index
    %c0_212 = arith.constant 0 : index
    %473 = vector.load %arg22[%c0_210, %c0_211, %c0_212] : memref<2x1x32xf32, #tpu.memory_space<vmem>>, vector<1x1x32xf32>
    %474 = vector.shape_cast %473 : vector<1x1x32xf32> to vector<1x32xf32>
    %475 = vector.extract_strided_slice %468 {offsets = [0, 0, 0], sizes = [1, 32, 32], strides = [1, 1, 1]} : vector<3x32x32xf32> to vector<1x32x32xf32>
    %476 = vector.shape_cast %475 : vector<1x32x32xf32> to vector<32x32xf32>
    %cst_213 = arith.constant dense<0.000000e+00> : vector<8x32xf32>
    %477 = tpu.matmul %8, %476, %cst_213 {dimension_numbers = #tpu.dot_dimension_numbers<[1], [0], [0], [1], [0, 0, 1, 1], [], []>} : vector<8x32xf32>, vector<32x32xf32>, vector<8x32xf32> -> vector<8x32xf32>
    %478 = vector.extract_strided_slice %470 {offsets = [0, 0, 0], sizes = [1, 1, 32], strides = [1, 1, 1]} : vector<3x1x32xf32> to vector<1x1x32xf32>
    %479 = vector.shape_cast %478 : vector<1x1x32xf32> to vector<1x32xf32>
    %480 = vector.broadcast %479 : vector<1x32xf32> to vector<8x32xf32>
    %481 = arith.addf %477, %480 : vector<8x32xf32>
    %482 = vector.extract_strided_slice %468 {offsets = [1, 0, 0], sizes = [1, 32, 32], strides = [1, 1, 1]} : vector<3x32x32xf32> to vector<1x32x32xf32>
    %483 = vector.shape_cast %482 : vector<1x32x32xf32> to vector<32x32xf32>
    %cst_214 = arith.constant dense<0.000000e+00> : vector<8x32xf32>
    %484 = tpu.matmul %8, %483, %cst_214 {dimension_numbers = #tpu.dot_dimension_numbers<[1], [0], [0], [1], [0, 0, 1, 1], [], []>} : vector<8x32xf32>, vector<32x32xf32>, vector<8x32xf32> -> vector<8x32xf32>
    %485 = vector.extract_strided_slice %470 {offsets = [1, 0, 0], sizes = [1, 1, 32], strides = [1, 1, 1]} : vector<3x1x32xf32> to vector<1x1x32xf32>
    %486 = vector.shape_cast %485 : vector<1x1x32xf32> to vector<1x32xf32>
    %487 = vector.broadcast %486 : vector<1x32xf32> to vector<8x32xf32>
    %488 = arith.addf %484, %487 : vector<8x32xf32>
    %489 = vector.extract_strided_slice %468 {offsets = [2, 0, 0], sizes = [1, 32, 32], strides = [1, 1, 1]} : vector<3x32x32xf32> to vector<1x32x32xf32>
    %490 = vector.shape_cast %489 : vector<1x32x32xf32> to vector<32x32xf32>
    %cst_215 = arith.constant dense<0.000000e+00> : vector<8x32xf32>
    %491 = tpu.matmul %8, %490, %cst_215 {dimension_numbers = #tpu.dot_dimension_numbers<[1], [0], [0], [1], [0, 0, 1, 1], [], []>} : vector<8x32xf32>, vector<32x32xf32>, vector<8x32xf32> -> vector<8x32xf32>
    %492 = vector.extract_strided_slice %470 {offsets = [2, 0, 0], sizes = [1, 1, 32], strides = [1, 1, 1]} : vector<3x1x32xf32> to vector<1x1x32xf32>
    %493 = vector.shape_cast %492 : vector<1x1x32xf32> to vector<1x32xf32>
    %494 = vector.broadcast %493 : vector<1x32xf32> to vector<8x32xf32>
    %495 = arith.addf %491, %494 : vector<8x32xf32>
    %496 = tpu.iota {dimensions = array<i32: 1>} : vector<1x32xi32>
    %497 = tpu.iota {dimensions = array<i32: 0>} : vector<8x8xi32>
    %498 = tpu.iota {dimensions = array<i32: 1>} : vector<8x8xi32>
    %499 = arith.cmpi sge, %498, %497 : vector<8x8xi32>
    %cst_216 = arith.constant 0.000000e+00 : f32
    %cst_217 = arith.constant -1.000000e+30 : f32
    %500 = vector.broadcast %cst_216 : f32 to vector<8x8xf32>
    %501 = vector.broadcast %cst_217 : f32 to vector<8x8xf32>
    %502 = arith.select %499, %500, %501 : vector<8x8xi1>, vector<8x8xf32>
    %cst_218 = arith.constant 0.000000e+00 : f32
    %503 = vector.broadcast %cst_218 : f32 to vector<8x32xf32>
    %c0_i32_219 = arith.constant 0 : i32
    %504 = vector.broadcast %c0_i32_219 : i32 to vector<1x32xi32>
    %505 = arith.cmpi sge, %496, %504 : vector<1x32xi32>
    %c8_i32_220 = arith.constant 8 : i32
    %506 = vector.broadcast %c8_i32_220 : i32 to vector<1x32xi32>
    %507 = arith.cmpi slt, %496, %506 : vector<1x32xi32>
    %508 = arith.andi %505, %507 : vector<1x32xi1>
    %cst_221 = arith.constant 1.000000e+00 : f32
    %cst_222 = arith.constant 0.000000e+00 : f32
    %509 = vector.broadcast %cst_221 : f32 to vector<1x32xf32>
    %510 = vector.broadcast %cst_222 : f32 to vector<1x32xf32>
    %511 = arith.select %508, %509, %510 : vector<1x32xi1>, vector<1x32xf32>
    %512 = vector.broadcast %511 : vector<1x32xf32> to vector<8x32xf32>
    %513 = arith.mulf %481, %512 : vector<8x32xf32>
    %cst_223 = arith.constant dense<0.000000e+00> : vector<8x8xf32>
    %514 = tpu.matmul %513, %488, %cst_223 {dimension_numbers = #tpu.dot_dimension_numbers<[1], [1], [0], [0], [0, 0, 1, 0], [], []>} : vector<8x32xf32>, vector<8x32xf32>, vector<8x8xf32> -> vector<8x8xf32>
    %cst_224 = arith.constant 0.353553385 : f32
    %515 = vector.broadcast %cst_224 : f32 to vector<8x8xf32>
    %516 = arith.mulf %514, %515 : vector<8x8xf32>
    %517 = arith.addf %516, %502 : vector<8x8xf32>
    %cst_225 = arith.constant dense<0xFF800000> : vector<8xf32>
    %518 = vector.multi_reduction <maximumf>, %517, %cst_225 [1] : vector<8x8xf32> to vector<8xf32>
    %519 = vector.shape_cast %518 : vector<8xf32> to vector<8x1xf32>
    %520 = vector.broadcast %519 : vector<8x1xf32> to vector<8x8xf32>
    %521 = arith.subf %517, %520 : vector<8x8xf32>
    %522 = math.exp %521 : vector<8x8xf32>
    %cst_226 = arith.constant dense<0.000000e+00> : vector<8xf32>
    %523 = vector.multi_reduction <add>, %522, %cst_226 [1] : vector<8x8xf32> to vector<8xf32>
    %524 = vector.shape_cast %523 : vector<8xf32> to vector<8x1xf32>
    %525 = tpu.reciprocal %524 {approx = true} : vector<8x1xf32> -> vector<8x1xf32>
    %526 = vector.broadcast %525 : vector<8x1xf32> to vector<8x8xf32>
    %527 = arith.mulf %522, %526 : vector<8x8xf32>
    %528 = vector.broadcast %511 : vector<1x32xf32> to vector<8x32xf32>
    %529 = arith.mulf %495, %528 : vector<8x32xf32>
    %cst_227 = arith.constant dense<0.000000e+00> : vector<8x32xf32>
    %530 = tpu.matmul %527, %529, %cst_227 {dimension_numbers = #tpu.dot_dimension_numbers<[1], [0], [0], [1], [0, 0, 1, 1], [], []>} : vector<8x8xf32>, vector<8x32xf32>, vector<8x32xf32> -> vector<8x32xf32>
    %531 = arith.addf %503, %530 : vector<8x32xf32>
    %c8_i32_228 = arith.constant 8 : i32
    %532 = vector.broadcast %c8_i32_228 : i32 to vector<1x32xi32>
    %533 = arith.cmpi sge, %496, %532 : vector<1x32xi32>
    %c16_i32_229 = arith.constant 16 : i32
    %534 = vector.broadcast %c16_i32_229 : i32 to vector<1x32xi32>
    %535 = arith.cmpi slt, %496, %534 : vector<1x32xi32>
    %536 = arith.andi %533, %535 : vector<1x32xi1>
    %cst_230 = arith.constant 1.000000e+00 : f32
    %cst_231 = arith.constant 0.000000e+00 : f32
    %537 = vector.broadcast %cst_230 : f32 to vector<1x32xf32>
    %538 = vector.broadcast %cst_231 : f32 to vector<1x32xf32>
    %539 = arith.select %536, %537, %538 : vector<1x32xi1>, vector<1x32xf32>
    %540 = vector.broadcast %539 : vector<1x32xf32> to vector<8x32xf32>
    %541 = arith.mulf %481, %540 : vector<8x32xf32>
    %cst_232 = arith.constant dense<0.000000e+00> : vector<8x8xf32>
    %542 = tpu.matmul %541, %488, %cst_232 {dimension_numbers = #tpu.dot_dimension_numbers<[1], [1], [0], [0], [0, 0, 1, 0], [], []>} : vector<8x32xf32>, vector<8x32xf32>, vector<8x8xf32> -> vector<8x8xf32>
    %cst_233 = arith.constant 0.353553385 : f32
    %543 = vector.broadcast %cst_233 : f32 to vector<8x8xf32>
    %544 = arith.mulf %542, %543 : vector<8x8xf32>
    %545 = arith.addf %544, %502 : vector<8x8xf32>
    %cst_234 = arith.constant dense<0xFF800000> : vector<8xf32>
    %546 = vector.multi_reduction <maximumf>, %545, %cst_234 [1] : vector<8x8xf32> to vector<8xf32>
    %547 = vector.shape_cast %546 : vector<8xf32> to vector<8x1xf32>
    %548 = vector.broadcast %547 : vector<8x1xf32> to vector<8x8xf32>
    %549 = arith.subf %545, %548 : vector<8x8xf32>
    %550 = math.exp %549 : vector<8x8xf32>
    %cst_235 = arith.constant dense<0.000000e+00> : vector<8xf32>
    %551 = vector.multi_reduction <add>, %550, %cst_235 [1] : vector<8x8xf32> to vector<8xf32>
    %552 = vector.shape_cast %551 : vector<8xf32> to vector<8x1xf32>
    %553 = tpu.reciprocal %552 {approx = true} : vector<8x1xf32> -> vector<8x1xf32>
    %554 = vector.broadcast %553 : vector<8x1xf32> to vector<8x8xf32>
    %555 = arith.mulf %550, %554 : vector<8x8xf32>
    %556 = vector.broadcast %539 : vector<1x32xf32> to vector<8x32xf32>
    %557 = arith.mulf %495, %556 : vector<8x32xf32>
    %cst_236 = arith.constant dense<0.000000e+00> : vector<8x32xf32>
    %558 = tpu.matmul %555, %557, %cst_236 {dimension_numbers = #tpu.dot_dimension_numbers<[1], [0], [0], [1], [0, 0, 1, 1], [], []>} : vector<8x8xf32>, vector<8x32xf32>, vector<8x32xf32> -> vector<8x32xf32>
    %559 = arith.addf %531, %558 : vector<8x32xf32>
    %c16_i32_237 = arith.constant 16 : i32
    %560 = vector.broadcast %c16_i32_237 : i32 to vector<1x32xi32>
    %561 = arith.cmpi sge, %496, %560 : vector<1x32xi32>
    %c24_i32_238 = arith.constant 24 : i32
    %562 = vector.broadcast %c24_i32_238 : i32 to vector<1x32xi32>
    %563 = arith.cmpi slt, %496, %562 : vector<1x32xi32>
    %564 = arith.andi %561, %563 : vector<1x32xi1>
    %cst_239 = arith.constant 1.000000e+00 : f32
    %cst_240 = arith.constant 0.000000e+00 : f32
    %565 = vector.broadcast %cst_239 : f32 to vector<1x32xf32>
    %566 = vector.broadcast %cst_240 : f32 to vector<1x32xf32>
    %567 = arith.select %564, %565, %566 : vector<1x32xi1>, vector<1x32xf32>
    %568 = vector.broadcast %567 : vector<1x32xf32> to vector<8x32xf32>
    %569 = arith.mulf %481, %568 : vector<8x32xf32>
    %cst_241 = arith.constant dense<0.000000e+00> : vector<8x8xf32>
    %570 = tpu.matmul %569, %488, %cst_241 {dimension_numbers = #tpu.dot_dimension_numbers<[1], [1], [0], [0], [0, 0, 1, 0], [], []>} : vector<8x32xf32>, vector<8x32xf32>, vector<8x8xf32> -> vector<8x8xf32>
    %cst_242 = arith.constant 0.353553385 : f32
    %571 = vector.broadcast %cst_242 : f32 to vector<8x8xf32>
    %572 = arith.mulf %570, %571 : vector<8x8xf32>
    %573 = arith.addf %572, %502 : vector<8x8xf32>
    %cst_243 = arith.constant dense<0xFF800000> : vector<8xf32>
    %574 = vector.multi_reduction <maximumf>, %573, %cst_243 [1] : vector<8x8xf32> to vector<8xf32>
    %575 = vector.shape_cast %574 : vector<8xf32> to vector<8x1xf32>
    %576 = vector.broadcast %575 : vector<8x1xf32> to vector<8x8xf32>
    %577 = arith.subf %573, %576 : vector<8x8xf32>
    %578 = math.exp %577 : vector<8x8xf32>
    %cst_244 = arith.constant dense<0.000000e+00> : vector<8xf32>
    %579 = vector.multi_reduction <add>, %578, %cst_244 [1] : vector<8x8xf32> to vector<8xf32>
    %580 = vector.shape_cast %579 : vector<8xf32> to vector<8x1xf32>
    %581 = tpu.reciprocal %580 {approx = true} : vector<8x1xf32> -> vector<8x1xf32>
    %582 = vector.broadcast %581 : vector<8x1xf32> to vector<8x8xf32>
    %583 = arith.mulf %578, %582 : vector<8x8xf32>
    %584 = vector.broadcast %567 : vector<1x32xf32> to vector<8x32xf32>
    %585 = arith.mulf %495, %584 : vector<8x32xf32>
    %cst_245 = arith.constant dense<0.000000e+00> : vector<8x32xf32>
    %586 = tpu.matmul %583, %585, %cst_245 {dimension_numbers = #tpu.dot_dimension_numbers<[1], [0], [0], [1], [0, 0, 1, 1], [], []>} : vector<8x8xf32>, vector<8x32xf32>, vector<8x32xf32> -> vector<8x32xf32>
    %587 = arith.addf %559, %586 : vector<8x32xf32>
    %c24_i32_246 = arith.constant 24 : i32
    %588 = vector.broadcast %c24_i32_246 : i32 to vector<1x32xi32>
    %589 = arith.cmpi sge, %496, %588 : vector<1x32xi32>
    %c32_i32_247 = arith.constant 32 : i32
    %590 = vector.broadcast %c32_i32_247 : i32 to vector<1x32xi32>
    %591 = arith.cmpi slt, %496, %590 : vector<1x32xi32>
    %592 = arith.andi %589, %591 : vector<1x32xi1>
    %cst_248 = arith.constant 1.000000e+00 : f32
    %cst_249 = arith.constant 0.000000e+00 : f32
    %593 = vector.broadcast %cst_248 : f32 to vector<1x32xf32>
    %594 = vector.broadcast %cst_249 : f32 to vector<1x32xf32>
    %595 = arith.select %592, %593, %594 : vector<1x32xi1>, vector<1x32xf32>
    %596 = vector.broadcast %595 : vector<1x32xf32> to vector<8x32xf32>
    %597 = arith.mulf %481, %596 : vector<8x32xf32>
    %cst_250 = arith.constant dense<0.000000e+00> : vector<8x8xf32>
    %598 = tpu.matmul %597, %488, %cst_250 {dimension_numbers = #tpu.dot_dimension_numbers<[1], [1], [0], [0], [0, 0, 1, 0], [], []>} : vector<8x32xf32>, vector<8x32xf32>, vector<8x8xf32> -> vector<8x8xf32>
    %cst_251 = arith.constant 0.353553385 : f32
    %599 = vector.broadcast %cst_251 : f32 to vector<8x8xf32>
    %600 = arith.mulf %598, %599 : vector<8x8xf32>
    %601 = arith.addf %600, %502 : vector<8x8xf32>
    %cst_252 = arith.constant dense<0xFF800000> : vector<8xf32>
    %602 = vector.multi_reduction <maximumf>, %601, %cst_252 [1] : vector<8x8xf32> to vector<8xf32>
    %603 = vector.shape_cast %602 : vector<8xf32> to vector<8x1xf32>
    %604 = vector.broadcast %603 : vector<8x1xf32> to vector<8x8xf32>
    %605 = arith.subf %601, %604 : vector<8x8xf32>
    %606 = math.exp %605 : vector<8x8xf32>
    %cst_253 = arith.constant dense<0.000000e+00> : vector<8xf32>
    %607 = vector.multi_reduction <add>, %606, %cst_253 [1] : vector<8x8xf32> to vector<8xf32>
    %608 = vector.shape_cast %607 : vector<8xf32> to vector<8x1xf32>
    %609 = tpu.reciprocal %608 {approx = true} : vector<8x1xf32> -> vector<8x1xf32>
    %610 = vector.broadcast %609 : vector<8x1xf32> to vector<8x8xf32>
    %611 = arith.mulf %606, %610 : vector<8x8xf32>
    %612 = vector.broadcast %595 : vector<1x32xf32> to vector<8x32xf32>
    %613 = arith.mulf %495, %612 : vector<8x32xf32>
    %cst_254 = arith.constant dense<0.000000e+00> : vector<8x32xf32>
    %614 = tpu.matmul %611, %613, %cst_254 {dimension_numbers = #tpu.dot_dimension_numbers<[1], [0], [0], [1], [0, 0, 1, 1], [], []>} : vector<8x8xf32>, vector<8x32xf32>, vector<8x32xf32> -> vector<8x32xf32>
    %615 = arith.addf %587, %614 : vector<8x32xf32>
    %cst_255 = arith.constant dense<0.000000e+00> : vector<8x32xf32>
    %616 = tpu.matmul %615, %472, %cst_255 {dimension_numbers = #tpu.dot_dimension_numbers<[1], [0], [0], [1], [0, 0, 1, 1], [], []>} : vector<8x32xf32>, vector<32x32xf32>, vector<8x32xf32> -> vector<8x32xf32>
    %617 = vector.broadcast %474 : vector<1x32xf32> to vector<8x32xf32>
    %618 = arith.addf %616, %617 : vector<8x32xf32>
    %619 = arith.addf %8, %618 : vector<8x32xf32>
    %c0_256 = arith.constant 0 : index
    %c0_257 = arith.constant 0 : index
    %c0_258 = arith.constant 0 : index
    %620 = vector.load %arg23[%c0_256, %c0_257, %c0_258] : memref<2x1x32xf32, #tpu.memory_space<vmem>>, vector<1x1x32xf32>
    %621 = vector.shape_cast %620 : vector<1x1x32xf32> to vector<1x32xf32>
    %c0_259 = arith.constant 0 : index
    %c0_260 = arith.constant 0 : index
    %c0_261 = arith.constant 0 : index
    %622 = vector.load %arg24[%c0_259, %c0_260, %c0_261] : memref<2x1x32xf32, #tpu.memory_space<vmem>>, vector<1x1x32xf32>
    %623 = vector.shape_cast %622 : vector<1x1x32xf32> to vector<1x32xf32>
    %cst_262 = arith.constant dense<0.000000e+00> : vector<8xf32>
    %624 = vector.multi_reduction <add>, %619, %cst_262 [1] : vector<8x32xf32> to vector<8xf32>
    %625 = vector.shape_cast %624 : vector<8xf32> to vector<8x1xf32>
    %cst_263 = arith.constant 3.200000e+01 : f32
    %626 = vector.broadcast %cst_263 : f32 to vector<8x1xf32>
    %627 = arith.divf %625, %626 : vector<8x1xf32>
    %628 = vector.broadcast %627 : vector<8x1xf32> to vector<8x32xf32>
    %629 = arith.subf %619, %628 : vector<8x32xf32>
    %630 = arith.mulf %629, %629 : vector<8x32xf32>
    %cst_264 = arith.constant dense<0.000000e+00> : vector<8xf32>
    %631 = vector.multi_reduction <add>, %630, %cst_264 [1] : vector<8x32xf32> to vector<8xf32>
    %632 = vector.shape_cast %631 : vector<8xf32> to vector<8x1xf32>
    %cst_265 = arith.constant 3.200000e+01 : f32
    %633 = vector.broadcast %cst_265 : f32 to vector<8x1xf32>
    %634 = arith.divf %632, %633 : vector<8x1xf32>
    %cst_266 = arith.constant 9.99999974E-6 : f32
    %635 = vector.broadcast %cst_266 : f32 to vector<8x1xf32>
    %636 = arith.addf %634, %635 : vector<8x1xf32>
    %637 = math.rsqrt %636 : vector<8x1xf32>
    %638 = vector.broadcast %637 : vector<8x1xf32> to vector<8x32xf32>
    %639 = arith.mulf %629, %638 : vector<8x32xf32>
    %640 = vector.broadcast %621 : vector<1x32xf32> to vector<8x32xf32>
    %641 = arith.mulf %639, %640 : vector<8x32xf32>
    %642 = vector.broadcast %623 : vector<1x32xf32> to vector<8x32xf32>
    %643 = arith.addf %641, %642 : vector<8x32xf32>
    %c0_267 = arith.constant 0 : index
    %c0_268 = arith.constant 0 : index
    %c0_269 = arith.constant 0 : index
    %c0_270 = arith.constant 0 : index
    %644 = vector.load %arg25[%c0_267, %c0_268, %c0_269, %c0_270] : memref<2x3x32x32xf32, #tpu.memory_space<vmem>>, vector<1x3x32x32xf32>
    %645 = vector.shape_cast %644 : vector<1x3x32x32xf32> to vector<3x32x32xf32>
    %c0_271 = arith.constant 0 : index
    %c0_272 = arith.constant 0 : index
    %c0_273 = arith.constant 0 : index
    %c0_274 = arith.constant 0 : index
    %646 = vector.load %arg26[%c0_271, %c0_272, %c0_273, %c0_274] : memref<2x3x1x32xf32, #tpu.memory_space<vmem>>, vector<1x3x1x32xf32>
    %647 = vector.shape_cast %646 : vector<1x3x1x32xf32> to vector<3x1x32xf32>
    %c0_275 = arith.constant 0 : index
    %c0_276 = arith.constant 0 : index
    %c0_277 = arith.constant 0 : index
    %648 = vector.load %arg27[%c0_275, %c0_276, %c0_277] : memref<2x32x32xf32, #tpu.memory_space<vmem>>, vector<1x32x32xf32>
    %649 = vector.shape_cast %648 : vector<1x32x32xf32> to vector<32x32xf32>
    %c0_278 = arith.constant 0 : index
    %c0_279 = arith.constant 0 : index
    %c0_280 = arith.constant 0 : index
    %650 = vector.load %arg28[%c0_278, %c0_279, %c0_280] : memref<2x1x32xf32, #tpu.memory_space<vmem>>, vector<1x1x32xf32>
    %651 = vector.shape_cast %650 : vector<1x1x32xf32> to vector<1x32xf32>
    %652 = vector.extract_strided_slice %645 {offsets = [0, 0, 0], sizes = [1, 32, 32], strides = [1, 1, 1]} : vector<3x32x32xf32> to vector<1x32x32xf32>
    %653 = vector.shape_cast %652 : vector<1x32x32xf32> to vector<32x32xf32>
    %cst_281 = arith.constant dense<0.000000e+00> : vector<8x32xf32>
    %654 = tpu.matmul %643, %653, %cst_281 {dimension_numbers = #tpu.dot_dimension_numbers<[1], [0], [0], [1], [0, 0, 1, 1], [], []>} : vector<8x32xf32>, vector<32x32xf32>, vector<8x32xf32> -> vector<8x32xf32>
    %655 = vector.extract_strided_slice %647 {offsets = [0, 0, 0], sizes = [1, 1, 32], strides = [1, 1, 1]} : vector<3x1x32xf32> to vector<1x1x32xf32>
    %656 = vector.shape_cast %655 : vector<1x1x32xf32> to vector<1x32xf32>
    %657 = vector.broadcast %656 : vector<1x32xf32> to vector<8x32xf32>
    %658 = arith.addf %654, %657 : vector<8x32xf32>
    %659 = vector.extract_strided_slice %645 {offsets = [1, 0, 0], sizes = [1, 32, 32], strides = [1, 1, 1]} : vector<3x32x32xf32> to vector<1x32x32xf32>
    %660 = vector.shape_cast %659 : vector<1x32x32xf32> to vector<32x32xf32>
    %cst_282 = arith.constant dense<0.000000e+00> : vector<8x32xf32>
    %661 = tpu.matmul %466, %660, %cst_282 {dimension_numbers = #tpu.dot_dimension_numbers<[1], [0], [0], [1], [0, 0, 1, 1], [], []>} : vector<8x32xf32>, vector<32x32xf32>, vector<8x32xf32> -> vector<8x32xf32>
    %662 = vector.extract_strided_slice %647 {offsets = [1, 0, 0], sizes = [1, 1, 32], strides = [1, 1, 1]} : vector<3x1x32xf32> to vector<1x1x32xf32>
    %663 = vector.shape_cast %662 : vector<1x1x32xf32> to vector<1x32xf32>
    %664 = vector.broadcast %663 : vector<1x32xf32> to vector<8x32xf32>
    %665 = arith.addf %661, %664 : vector<8x32xf32>
    %666 = vector.extract_strided_slice %645 {offsets = [2, 0, 0], sizes = [1, 32, 32], strides = [1, 1, 1]} : vector<3x32x32xf32> to vector<1x32x32xf32>
    %667 = vector.shape_cast %666 : vector<1x32x32xf32> to vector<32x32xf32>
    %cst_283 = arith.constant dense<0.000000e+00> : vector<8x32xf32>
    %668 = tpu.matmul %466, %667, %cst_283 {dimension_numbers = #tpu.dot_dimension_numbers<[1], [0], [0], [1], [0, 0, 1, 1], [], []>} : vector<8x32xf32>, vector<32x32xf32>, vector<8x32xf32> -> vector<8x32xf32>
    %669 = vector.extract_strided_slice %647 {offsets = [2, 0, 0], sizes = [1, 1, 32], strides = [1, 1, 1]} : vector<3x1x32xf32> to vector<1x1x32xf32>
    %670 = vector.shape_cast %669 : vector<1x1x32xf32> to vector<1x32xf32>
    %671 = vector.broadcast %670 : vector<1x32xf32> to vector<8x32xf32>
    %672 = arith.addf %668, %671 : vector<8x32xf32>
    %673 = tpu.iota {dimensions = array<i32: 1>} : vector<1x32xi32>
    %cst_284 = arith.constant 0.000000e+00 : f32
    %674 = vector.broadcast %cst_284 : f32 to vector<8x32xf32>
    %c0_i32_285 = arith.constant 0 : i32
    %675 = vector.broadcast %c0_i32_285 : i32 to vector<1x32xi32>
    %676 = arith.cmpi sge, %673, %675 : vector<1x32xi32>
    %c8_i32_286 = arith.constant 8 : i32
    %677 = vector.broadcast %c8_i32_286 : i32 to vector<1x32xi32>
    %678 = arith.cmpi slt, %673, %677 : vector<1x32xi32>
    %679 = arith.andi %676, %678 : vector<1x32xi1>
    %cst_287 = arith.constant 1.000000e+00 : f32
    %cst_288 = arith.constant 0.000000e+00 : f32
    %680 = vector.broadcast %cst_287 : f32 to vector<1x32xf32>
    %681 = vector.broadcast %cst_288 : f32 to vector<1x32xf32>
    %682 = arith.select %679, %680, %681 : vector<1x32xi1>, vector<1x32xf32>
    %683 = vector.broadcast %682 : vector<1x32xf32> to vector<8x32xf32>
    %684 = arith.mulf %658, %683 : vector<8x32xf32>
    %cst_289 = arith.constant dense<0.000000e+00> : vector<8x8xf32>
    %685 = tpu.matmul %684, %665, %cst_289 {dimension_numbers = #tpu.dot_dimension_numbers<[1], [1], [0], [0], [0, 0, 1, 0], [], []>} : vector<8x32xf32>, vector<8x32xf32>, vector<8x8xf32> -> vector<8x8xf32>
    %cst_290 = arith.constant 0.353553385 : f32
    %686 = vector.broadcast %cst_290 : f32 to vector<8x8xf32>
    %687 = arith.mulf %685, %686 : vector<8x8xf32>
    %cst_291 = arith.constant dense<0xFF800000> : vector<8xf32>
    %688 = vector.multi_reduction <maximumf>, %687, %cst_291 [1] : vector<8x8xf32> to vector<8xf32>
    %689 = vector.shape_cast %688 : vector<8xf32> to vector<8x1xf32>
    %690 = vector.broadcast %689 : vector<8x1xf32> to vector<8x8xf32>
    %691 = arith.subf %687, %690 : vector<8x8xf32>
    %692 = math.exp %691 : vector<8x8xf32>
    %cst_292 = arith.constant dense<0.000000e+00> : vector<8xf32>
    %693 = vector.multi_reduction <add>, %692, %cst_292 [1] : vector<8x8xf32> to vector<8xf32>
    %694 = vector.shape_cast %693 : vector<8xf32> to vector<8x1xf32>
    %695 = tpu.reciprocal %694 {approx = true} : vector<8x1xf32> -> vector<8x1xf32>
    %696 = vector.broadcast %695 : vector<8x1xf32> to vector<8x8xf32>
    %697 = arith.mulf %692, %696 : vector<8x8xf32>
    %698 = vector.broadcast %682 : vector<1x32xf32> to vector<8x32xf32>
    %699 = arith.mulf %672, %698 : vector<8x32xf32>
    %cst_293 = arith.constant dense<0.000000e+00> : vector<8x32xf32>
    %700 = tpu.matmul %697, %699, %cst_293 {dimension_numbers = #tpu.dot_dimension_numbers<[1], [0], [0], [1], [0, 0, 1, 1], [], []>} : vector<8x8xf32>, vector<8x32xf32>, vector<8x32xf32> -> vector<8x32xf32>
    %701 = arith.addf %674, %700 : vector<8x32xf32>
    %c8_i32_294 = arith.constant 8 : i32
    %702 = vector.broadcast %c8_i32_294 : i32 to vector<1x32xi32>
    %703 = arith.cmpi sge, %673, %702 : vector<1x32xi32>
    %c16_i32_295 = arith.constant 16 : i32
    %704 = vector.broadcast %c16_i32_295 : i32 to vector<1x32xi32>
    %705 = arith.cmpi slt, %673, %704 : vector<1x32xi32>
    %706 = arith.andi %703, %705 : vector<1x32xi1>
    %cst_296 = arith.constant 1.000000e+00 : f32
    %cst_297 = arith.constant 0.000000e+00 : f32
    %707 = vector.broadcast %cst_296 : f32 to vector<1x32xf32>
    %708 = vector.broadcast %cst_297 : f32 to vector<1x32xf32>
    %709 = arith.select %706, %707, %708 : vector<1x32xi1>, vector<1x32xf32>
    %710 = vector.broadcast %709 : vector<1x32xf32> to vector<8x32xf32>
    %711 = arith.mulf %658, %710 : vector<8x32xf32>
    %cst_298 = arith.constant dense<0.000000e+00> : vector<8x8xf32>
    %712 = tpu.matmul %711, %665, %cst_298 {dimension_numbers = #tpu.dot_dimension_numbers<[1], [1], [0], [0], [0, 0, 1, 0], [], []>} : vector<8x32xf32>, vector<8x32xf32>, vector<8x8xf32> -> vector<8x8xf32>
    %cst_299 = arith.constant 0.353553385 : f32
    %713 = vector.broadcast %cst_299 : f32 to vector<8x8xf32>
    %714 = arith.mulf %712, %713 : vector<8x8xf32>
    %cst_300 = arith.constant dense<0xFF800000> : vector<8xf32>
    %715 = vector.multi_reduction <maximumf>, %714, %cst_300 [1] : vector<8x8xf32> to vector<8xf32>
    %716 = vector.shape_cast %715 : vector<8xf32> to vector<8x1xf32>
    %717 = vector.broadcast %716 : vector<8x1xf32> to vector<8x8xf32>
    %718 = arith.subf %714, %717 : vector<8x8xf32>
    %719 = math.exp %718 : vector<8x8xf32>
    %cst_301 = arith.constant dense<0.000000e+00> : vector<8xf32>
    %720 = vector.multi_reduction <add>, %719, %cst_301 [1] : vector<8x8xf32> to vector<8xf32>
    %721 = vector.shape_cast %720 : vector<8xf32> to vector<8x1xf32>
    %722 = tpu.reciprocal %721 {approx = true} : vector<8x1xf32> -> vector<8x1xf32>
    %723 = vector.broadcast %722 : vector<8x1xf32> to vector<8x8xf32>
    %724 = arith.mulf %719, %723 : vector<8x8xf32>
    %725 = vector.broadcast %709 : vector<1x32xf32> to vector<8x32xf32>
    %726 = arith.mulf %672, %725 : vector<8x32xf32>
    %cst_302 = arith.constant dense<0.000000e+00> : vector<8x32xf32>
    %727 = tpu.matmul %724, %726, %cst_302 {dimension_numbers = #tpu.dot_dimension_numbers<[1], [0], [0], [1], [0, 0, 1, 1], [], []>} : vector<8x8xf32>, vector<8x32xf32>, vector<8x32xf32> -> vector<8x32xf32>
    %728 = arith.addf %701, %727 : vector<8x32xf32>
    %c16_i32_303 = arith.constant 16 : i32
    %729 = vector.broadcast %c16_i32_303 : i32 to vector<1x32xi32>
    %730 = arith.cmpi sge, %673, %729 : vector<1x32xi32>
    %c24_i32_304 = arith.constant 24 : i32
    %731 = vector.broadcast %c24_i32_304 : i32 to vector<1x32xi32>
    %732 = arith.cmpi slt, %673, %731 : vector<1x32xi32>
    %733 = arith.andi %730, %732 : vector<1x32xi1>
    %cst_305 = arith.constant 1.000000e+00 : f32
    %cst_306 = arith.constant 0.000000e+00 : f32
    %734 = vector.broadcast %cst_305 : f32 to vector<1x32xf32>
    %735 = vector.broadcast %cst_306 : f32 to vector<1x32xf32>
    %736 = arith.select %733, %734, %735 : vector<1x32xi1>, vector<1x32xf32>
    %737 = vector.broadcast %736 : vector<1x32xf32> to vector<8x32xf32>
    %738 = arith.mulf %658, %737 : vector<8x32xf32>
    %cst_307 = arith.constant dense<0.000000e+00> : vector<8x8xf32>
    %739 = tpu.matmul %738, %665, %cst_307 {dimension_numbers = #tpu.dot_dimension_numbers<[1], [1], [0], [0], [0, 0, 1, 0], [], []>} : vector<8x32xf32>, vector<8x32xf32>, vector<8x8xf32> -> vector<8x8xf32>
    %cst_308 = arith.constant 0.353553385 : f32
    %740 = vector.broadcast %cst_308 : f32 to vector<8x8xf32>
    %741 = arith.mulf %739, %740 : vector<8x8xf32>
    %cst_309 = arith.constant dense<0xFF800000> : vector<8xf32>
    %742 = vector.multi_reduction <maximumf>, %741, %cst_309 [1] : vector<8x8xf32> to vector<8xf32>
    %743 = vector.shape_cast %742 : vector<8xf32> to vector<8x1xf32>
    %744 = vector.broadcast %743 : vector<8x1xf32> to vector<8x8xf32>
    %745 = arith.subf %741, %744 : vector<8x8xf32>
    %746 = math.exp %745 : vector<8x8xf32>
    %cst_310 = arith.constant dense<0.000000e+00> : vector<8xf32>
    %747 = vector.multi_reduction <add>, %746, %cst_310 [1] : vector<8x8xf32> to vector<8xf32>
    %748 = vector.shape_cast %747 : vector<8xf32> to vector<8x1xf32>
    %749 = tpu.reciprocal %748 {approx = true} : vector<8x1xf32> -> vector<8x1xf32>
    %750 = vector.broadcast %749 : vector<8x1xf32> to vector<8x8xf32>
    %751 = arith.mulf %746, %750 : vector<8x8xf32>
    %752 = vector.broadcast %736 : vector<1x32xf32> to vector<8x32xf32>
    %753 = arith.mulf %672, %752 : vector<8x32xf32>
    %cst_311 = arith.constant dense<0.000000e+00> : vector<8x32xf32>
    %754 = tpu.matmul %751, %753, %cst_311 {dimension_numbers = #tpu.dot_dimension_numbers<[1], [0], [0], [1], [0, 0, 1, 1], [], []>} : vector<8x8xf32>, vector<8x32xf32>, vector<8x32xf32> -> vector<8x32xf32>
    %755 = arith.addf %728, %754 : vector<8x32xf32>
    %c24_i32_312 = arith.constant 24 : i32
    %756 = vector.broadcast %c24_i32_312 : i32 to vector<1x32xi32>
    %757 = arith.cmpi sge, %673, %756 : vector<1x32xi32>
    %c32_i32_313 = arith.constant 32 : i32
    %758 = vector.broadcast %c32_i32_313 : i32 to vector<1x32xi32>
    %759 = arith.cmpi slt, %673, %758 : vector<1x32xi32>
    %760 = arith.andi %757, %759 : vector<1x32xi1>
    %cst_314 = arith.constant 1.000000e+00 : f32
    %cst_315 = arith.constant 0.000000e+00 : f32
    %761 = vector.broadcast %cst_314 : f32 to vector<1x32xf32>
    %762 = vector.broadcast %cst_315 : f32 to vector<1x32xf32>
    %763 = arith.select %760, %761, %762 : vector<1x32xi1>, vector<1x32xf32>
    %764 = vector.broadcast %763 : vector<1x32xf32> to vector<8x32xf32>
    %765 = arith.mulf %658, %764 : vector<8x32xf32>
    %cst_316 = arith.constant dense<0.000000e+00> : vector<8x8xf32>
    %766 = tpu.matmul %765, %665, %cst_316 {dimension_numbers = #tpu.dot_dimension_numbers<[1], [1], [0], [0], [0, 0, 1, 0], [], []>} : vector<8x32xf32>, vector<8x32xf32>, vector<8x8xf32> -> vector<8x8xf32>
    %cst_317 = arith.constant 0.353553385 : f32
    %767 = vector.broadcast %cst_317 : f32 to vector<8x8xf32>
    %768 = arith.mulf %766, %767 : vector<8x8xf32>
    %cst_318 = arith.constant dense<0xFF800000> : vector<8xf32>
    %769 = vector.multi_reduction <maximumf>, %768, %cst_318 [1] : vector<8x8xf32> to vector<8xf32>
    %770 = vector.shape_cast %769 : vector<8xf32> to vector<8x1xf32>
    %771 = vector.broadcast %770 : vector<8x1xf32> to vector<8x8xf32>
    %772 = arith.subf %768, %771 : vector<8x8xf32>
    %773 = math.exp %772 : vector<8x8xf32>
    %cst_319 = arith.constant dense<0.000000e+00> : vector<8xf32>
    %774 = vector.multi_reduction <add>, %773, %cst_319 [1] : vector<8x8xf32> to vector<8xf32>
    %775 = vector.shape_cast %774 : vector<8xf32> to vector<8x1xf32>
    %776 = tpu.reciprocal %775 {approx = true} : vector<8x1xf32> -> vector<8x1xf32>
    %777 = vector.broadcast %776 : vector<8x1xf32> to vector<8x8xf32>
    %778 = arith.mulf %773, %777 : vector<8x8xf32>
    %779 = vector.broadcast %763 : vector<1x32xf32> to vector<8x32xf32>
    %780 = arith.mulf %672, %779 : vector<8x32xf32>
    %cst_320 = arith.constant dense<0.000000e+00> : vector<8x32xf32>
    %781 = tpu.matmul %778, %780, %cst_320 {dimension_numbers = #tpu.dot_dimension_numbers<[1], [0], [0], [1], [0, 0, 1, 1], [], []>} : vector<8x8xf32>, vector<8x32xf32>, vector<8x32xf32> -> vector<8x32xf32>
    %782 = arith.addf %755, %781 : vector<8x32xf32>
    %cst_321 = arith.constant dense<0.000000e+00> : vector<8x32xf32>
    %783 = tpu.matmul %782, %649, %cst_321 {dimension_numbers = #tpu.dot_dimension_numbers<[1], [0], [0], [1], [0, 0, 1, 1], [], []>} : vector<8x32xf32>, vector<32x32xf32>, vector<8x32xf32> -> vector<8x32xf32>
    %784 = vector.broadcast %651 : vector<1x32xf32> to vector<8x32xf32>
    %785 = arith.addf %783, %784 : vector<8x32xf32>
    %786 = arith.addf %643, %785 : vector<8x32xf32>
    %c0_322 = arith.constant 0 : index
    %c0_323 = arith.constant 0 : index
    %c0_324 = arith.constant 0 : index
    %787 = vector.load %arg29[%c0_322, %c0_323, %c0_324] : memref<2x1x32xf32, #tpu.memory_space<vmem>>, vector<1x1x32xf32>
    %788 = vector.shape_cast %787 : vector<1x1x32xf32> to vector<1x32xf32>
    %c0_325 = arith.constant 0 : index
    %c0_326 = arith.constant 0 : index
    %c0_327 = arith.constant 0 : index
    %789 = vector.load %arg30[%c0_325, %c0_326, %c0_327] : memref<2x1x32xf32, #tpu.memory_space<vmem>>, vector<1x1x32xf32>
    %790 = vector.shape_cast %789 : vector<1x1x32xf32> to vector<1x32xf32>
    %cst_328 = arith.constant dense<0.000000e+00> : vector<8xf32>
    %791 = vector.multi_reduction <add>, %786, %cst_328 [1] : vector<8x32xf32> to vector<8xf32>
    %792 = vector.shape_cast %791 : vector<8xf32> to vector<8x1xf32>
    %cst_329 = arith.constant 3.200000e+01 : f32
    %793 = vector.broadcast %cst_329 : f32 to vector<8x1xf32>
    %794 = arith.divf %792, %793 : vector<8x1xf32>
    %795 = vector.broadcast %794 : vector<8x1xf32> to vector<8x32xf32>
    %796 = arith.subf %786, %795 : vector<8x32xf32>
    %797 = arith.mulf %796, %796 : vector<8x32xf32>
    %cst_330 = arith.constant dense<0.000000e+00> : vector<8xf32>
    %798 = vector.multi_reduction <add>, %797, %cst_330 [1] : vector<8x32xf32> to vector<8xf32>
    %799 = vector.shape_cast %798 : vector<8xf32> to vector<8x1xf32>
    %cst_331 = arith.constant 3.200000e+01 : f32
    %800 = vector.broadcast %cst_331 : f32 to vector<8x1xf32>
    %801 = arith.divf %799, %800 : vector<8x1xf32>
    %cst_332 = arith.constant 9.99999974E-6 : f32
    %802 = vector.broadcast %cst_332 : f32 to vector<8x1xf32>
    %803 = arith.addf %801, %802 : vector<8x1xf32>
    %804 = math.rsqrt %803 : vector<8x1xf32>
    %805 = vector.broadcast %804 : vector<8x1xf32> to vector<8x32xf32>
    %806 = arith.mulf %796, %805 : vector<8x32xf32>
    %807 = vector.broadcast %788 : vector<1x32xf32> to vector<8x32xf32>
    %808 = arith.mulf %806, %807 : vector<8x32xf32>
    %809 = vector.broadcast %790 : vector<1x32xf32> to vector<8x32xf32>
    %810 = arith.addf %808, %809 : vector<8x32xf32>
    %c0_333 = arith.constant 0 : index
    %c0_334 = arith.constant 0 : index
    %c0_335 = arith.constant 0 : index
    %811 = vector.load %arg31[%c0_333, %c0_334, %c0_335] : memref<2x32x2048xf32, #tpu.memory_space<vmem>>, vector<1x32x2048xf32>
    %812 = vector.shape_cast %811 : vector<1x32x2048xf32> to vector<32x2048xf32>
    %c0_336 = arith.constant 0 : index
    %c0_337 = arith.constant 0 : index
    %c0_338 = arith.constant 0 : index
    %813 = vector.load %arg32[%c0_336, %c0_337, %c0_338] : memref<2x1x2048xf32, #tpu.memory_space<vmem>>, vector<1x1x2048xf32>
    %814 = vector.shape_cast %813 : vector<1x1x2048xf32> to vector<1x2048xf32>
    %c0_339 = arith.constant 0 : index
    %c0_340 = arith.constant 0 : index
    %c0_341 = arith.constant 0 : index
    %815 = vector.load %arg33[%c0_339, %c0_340, %c0_341] : memref<2x32x2048xf32, #tpu.memory_space<vmem>>, vector<1x32x2048xf32>
    %816 = vector.shape_cast %815 : vector<1x32x2048xf32> to vector<32x2048xf32>
    %c0_342 = arith.constant 0 : index
    %c0_343 = arith.constant 0 : index
    %c0_344 = arith.constant 0 : index
    %817 = vector.load %arg34[%c0_342, %c0_343, %c0_344] : memref<2x1x32xf32, #tpu.memory_space<vmem>>, vector<1x1x32xf32>
    %818 = vector.shape_cast %817 : vector<1x1x32xf32> to vector<1x32xf32>
    %cst_345 = arith.constant dense<0.000000e+00> : vector<8x2048xf32>
    %819 = tpu.matmul %810, %812, %cst_345 {dimension_numbers = #tpu.dot_dimension_numbers<[1], [0], [0], [1], [0, 0, 1, 1], [], []>} : vector<8x32xf32>, vector<32x2048xf32>, vector<8x2048xf32> -> vector<8x2048xf32>
    %820 = vector.broadcast %814 : vector<1x2048xf32> to vector<8x2048xf32>
    %821 = arith.addf %819, %820 : vector<8x2048xf32>
    %cst_346 = arith.constant 0.000000e+00 : f32
    %822 = vector.broadcast %cst_346 : f32 to vector<8x2048xf32>
    %823 = arith.maximumf %821, %822 : vector<8x2048xf32>
    %cst_347 = arith.constant dense<0.000000e+00> : vector<8x32xf32>
    %824 = tpu.matmul %823, %816, %cst_347 {dimension_numbers = #tpu.dot_dimension_numbers<[1], [1], [0], [0], [0, 0, 1, 0], [], []>} : vector<8x2048xf32>, vector<32x2048xf32>, vector<8x32xf32> -> vector<8x32xf32>
    %825 = vector.broadcast %818 : vector<1x32xf32> to vector<8x32xf32>
    %826 = arith.addf %824, %825 : vector<8x32xf32>
    %827 = arith.addf %810, %826 : vector<8x32xf32>
    %c0_348 = arith.constant 0 : index
    %c0_349 = arith.constant 0 : index
    %c0_350 = arith.constant 0 : index
    %828 = vector.load %arg35[%c0_348, %c0_349, %c0_350] : memref<2x1x32xf32, #tpu.memory_space<vmem>>, vector<1x1x32xf32>
    %829 = vector.shape_cast %828 : vector<1x1x32xf32> to vector<1x32xf32>
    %c0_351 = arith.constant 0 : index
    %c0_352 = arith.constant 0 : index
    %c0_353 = arith.constant 0 : index
    %830 = vector.load %arg36[%c0_351, %c0_352, %c0_353] : memref<2x1x32xf32, #tpu.memory_space<vmem>>, vector<1x1x32xf32>
    %831 = vector.shape_cast %830 : vector<1x1x32xf32> to vector<1x32xf32>
    %cst_354 = arith.constant dense<0.000000e+00> : vector<8xf32>
    %832 = vector.multi_reduction <add>, %827, %cst_354 [1] : vector<8x32xf32> to vector<8xf32>
    %833 = vector.shape_cast %832 : vector<8xf32> to vector<8x1xf32>
    %cst_355 = arith.constant 3.200000e+01 : f32
    %834 = vector.broadcast %cst_355 : f32 to vector<8x1xf32>
    %835 = arith.divf %833, %834 : vector<8x1xf32>
    %836 = vector.broadcast %835 : vector<8x1xf32> to vector<8x32xf32>
    %837 = arith.subf %827, %836 : vector<8x32xf32>
    %838 = arith.mulf %837, %837 : vector<8x32xf32>
    %cst_356 = arith.constant dense<0.000000e+00> : vector<8xf32>
    %839 = vector.multi_reduction <add>, %838, %cst_356 [1] : vector<8x32xf32> to vector<8xf32>
    %840 = vector.shape_cast %839 : vector<8xf32> to vector<8x1xf32>
    %cst_357 = arith.constant 3.200000e+01 : f32
    %841 = vector.broadcast %cst_357 : f32 to vector<8x1xf32>
    %842 = arith.divf %840, %841 : vector<8x1xf32>
    %cst_358 = arith.constant 9.99999974E-6 : f32
    %843 = vector.broadcast %cst_358 : f32 to vector<8x1xf32>
    %844 = arith.addf %842, %843 : vector<8x1xf32>
    %845 = math.rsqrt %844 : vector<8x1xf32>
    %846 = vector.broadcast %845 : vector<8x1xf32> to vector<8x32xf32>
    %847 = arith.mulf %837, %846 : vector<8x32xf32>
    %848 = vector.broadcast %829 : vector<1x32xf32> to vector<8x32xf32>
    %849 = arith.mulf %847, %848 : vector<8x32xf32>
    %850 = vector.broadcast %831 : vector<1x32xf32> to vector<8x32xf32>
    %851 = arith.addf %849, %850 : vector<8x32xf32>
    %c1_359 = arith.constant 1 : index
    %c0_360 = arith.constant 0 : index
    %c0_361 = arith.constant 0 : index
    %c0_362 = arith.constant 0 : index
    %852 = vector.load %arg19[%c1_359, %c0_360, %c0_361, %c0_362] : memref<2x3x32x32xf32, #tpu.memory_space<vmem>>, vector<1x3x32x32xf32>
    %853 = vector.shape_cast %852 : vector<1x3x32x32xf32> to vector<3x32x32xf32>
    %c1_363 = arith.constant 1 : index
    %c0_364 = arith.constant 0 : index
    %c0_365 = arith.constant 0 : index
    %c0_366 = arith.constant 0 : index
    %854 = vector.load %arg20[%c1_363, %c0_364, %c0_365, %c0_366] : memref<2x3x1x32xf32, #tpu.memory_space<vmem>>, vector<1x3x1x32xf32>
    %855 = vector.shape_cast %854 : vector<1x3x1x32xf32> to vector<3x1x32xf32>
    %c1_367 = arith.constant 1 : index
    %c0_368 = arith.constant 0 : index
    %c0_369 = arith.constant 0 : index
    %856 = vector.load %arg21[%c1_367, %c0_368, %c0_369] : memref<2x32x32xf32, #tpu.memory_space<vmem>>, vector<1x32x32xf32>
    %857 = vector.shape_cast %856 : vector<1x32x32xf32> to vector<32x32xf32>
    %c1_370 = arith.constant 1 : index
    %c0_371 = arith.constant 0 : index
    %c0_372 = arith.constant 0 : index
    %858 = vector.load %arg22[%c1_370, %c0_371, %c0_372] : memref<2x1x32xf32, #tpu.memory_space<vmem>>, vector<1x1x32xf32>
    %859 = vector.shape_cast %858 : vector<1x1x32xf32> to vector<1x32xf32>
    %860 = vector.extract_strided_slice %853 {offsets = [0, 0, 0], sizes = [1, 32, 32], strides = [1, 1, 1]} : vector<3x32x32xf32> to vector<1x32x32xf32>
    %861 = vector.shape_cast %860 : vector<1x32x32xf32> to vector<32x32xf32>
    %cst_373 = arith.constant dense<0.000000e+00> : vector<8x32xf32>
    %862 = tpu.matmul %851, %861, %cst_373 {dimension_numbers = #tpu.dot_dimension_numbers<[1], [0], [0], [1], [0, 0, 1, 1], [], []>} : vector<8x32xf32>, vector<32x32xf32>, vector<8x32xf32> -> vector<8x32xf32>
    %863 = vector.extract_strided_slice %855 {offsets = [0, 0, 0], sizes = [1, 1, 32], strides = [1, 1, 1]} : vector<3x1x32xf32> to vector<1x1x32xf32>
    %864 = vector.shape_cast %863 : vector<1x1x32xf32> to vector<1x32xf32>
    %865 = vector.broadcast %864 : vector<1x32xf32> to vector<8x32xf32>
    %866 = arith.addf %862, %865 : vector<8x32xf32>
    %867 = vector.extract_strided_slice %853 {offsets = [1, 0, 0], sizes = [1, 32, 32], strides = [1, 1, 1]} : vector<3x32x32xf32> to vector<1x32x32xf32>
    %868 = vector.shape_cast %867 : vector<1x32x32xf32> to vector<32x32xf32>
    %cst_374 = arith.constant dense<0.000000e+00> : vector<8x32xf32>
    %869 = tpu.matmul %851, %868, %cst_374 {dimension_numbers = #tpu.dot_dimension_numbers<[1], [0], [0], [1], [0, 0, 1, 1], [], []>} : vector<8x32xf32>, vector<32x32xf32>, vector<8x32xf32> -> vector<8x32xf32>
    %870 = vector.extract_strided_slice %855 {offsets = [1, 0, 0], sizes = [1, 1, 32], strides = [1, 1, 1]} : vector<3x1x32xf32> to vector<1x1x32xf32>
    %871 = vector.shape_cast %870 : vector<1x1x32xf32> to vector<1x32xf32>
    %872 = vector.broadcast %871 : vector<1x32xf32> to vector<8x32xf32>
    %873 = arith.addf %869, %872 : vector<8x32xf32>
    %874 = vector.extract_strided_slice %853 {offsets = [2, 0, 0], sizes = [1, 32, 32], strides = [1, 1, 1]} : vector<3x32x32xf32> to vector<1x32x32xf32>
    %875 = vector.shape_cast %874 : vector<1x32x32xf32> to vector<32x32xf32>
    %cst_375 = arith.constant dense<0.000000e+00> : vector<8x32xf32>
    %876 = tpu.matmul %851, %875, %cst_375 {dimension_numbers = #tpu.dot_dimension_numbers<[1], [0], [0], [1], [0, 0, 1, 1], [], []>} : vector<8x32xf32>, vector<32x32xf32>, vector<8x32xf32> -> vector<8x32xf32>
    %877 = vector.extract_strided_slice %855 {offsets = [2, 0, 0], sizes = [1, 1, 32], strides = [1, 1, 1]} : vector<3x1x32xf32> to vector<1x1x32xf32>
    %878 = vector.shape_cast %877 : vector<1x1x32xf32> to vector<1x32xf32>
    %879 = vector.broadcast %878 : vector<1x32xf32> to vector<8x32xf32>
    %880 = arith.addf %876, %879 : vector<8x32xf32>
    %881 = tpu.iota {dimensions = array<i32: 1>} : vector<1x32xi32>
    %882 = tpu.iota {dimensions = array<i32: 0>} : vector<8x8xi32>
    %883 = tpu.iota {dimensions = array<i32: 1>} : vector<8x8xi32>
    %884 = arith.cmpi sge, %883, %882 : vector<8x8xi32>
    %cst_376 = arith.constant 0.000000e+00 : f32
    %cst_377 = arith.constant -1.000000e+30 : f32
    %885 = vector.broadcast %cst_376 : f32 to vector<8x8xf32>
    %886 = vector.broadcast %cst_377 : f32 to vector<8x8xf32>
    %887 = arith.select %884, %885, %886 : vector<8x8xi1>, vector<8x8xf32>
    %cst_378 = arith.constant 0.000000e+00 : f32
    %888 = vector.broadcast %cst_378 : f32 to vector<8x32xf32>
    %c0_i32_379 = arith.constant 0 : i32
    %889 = vector.broadcast %c0_i32_379 : i32 to vector<1x32xi32>
    %890 = arith.cmpi sge, %881, %889 : vector<1x32xi32>
    %c8_i32_380 = arith.constant 8 : i32
    %891 = vector.broadcast %c8_i32_380 : i32 to vector<1x32xi32>
    %892 = arith.cmpi slt, %881, %891 : vector<1x32xi32>
    %893 = arith.andi %890, %892 : vector<1x32xi1>
    %cst_381 = arith.constant 1.000000e+00 : f32
    %cst_382 = arith.constant 0.000000e+00 : f32
    %894 = vector.broadcast %cst_381 : f32 to vector<1x32xf32>
    %895 = vector.broadcast %cst_382 : f32 to vector<1x32xf32>
    %896 = arith.select %893, %894, %895 : vector<1x32xi1>, vector<1x32xf32>
    %897 = vector.broadcast %896 : vector<1x32xf32> to vector<8x32xf32>
    %898 = arith.mulf %866, %897 : vector<8x32xf32>
    %cst_383 = arith.constant dense<0.000000e+00> : vector<8x8xf32>
    %899 = tpu.matmul %898, %873, %cst_383 {dimension_numbers = #tpu.dot_dimension_numbers<[1], [1], [0], [0], [0, 0, 1, 0], [], []>} : vector<8x32xf32>, vector<8x32xf32>, vector<8x8xf32> -> vector<8x8xf32>
    %cst_384 = arith.constant 0.353553385 : f32
    %900 = vector.broadcast %cst_384 : f32 to vector<8x8xf32>
    %901 = arith.mulf %899, %900 : vector<8x8xf32>
    %902 = arith.addf %901, %887 : vector<8x8xf32>
    %cst_385 = arith.constant dense<0xFF800000> : vector<8xf32>
    %903 = vector.multi_reduction <maximumf>, %902, %cst_385 [1] : vector<8x8xf32> to vector<8xf32>
    %904 = vector.shape_cast %903 : vector<8xf32> to vector<8x1xf32>
    %905 = vector.broadcast %904 : vector<8x1xf32> to vector<8x8xf32>
    %906 = arith.subf %902, %905 : vector<8x8xf32>
    %907 = math.exp %906 : vector<8x8xf32>
    %cst_386 = arith.constant dense<0.000000e+00> : vector<8xf32>
    %908 = vector.multi_reduction <add>, %907, %cst_386 [1] : vector<8x8xf32> to vector<8xf32>
    %909 = vector.shape_cast %908 : vector<8xf32> to vector<8x1xf32>
    %910 = tpu.reciprocal %909 {approx = true} : vector<8x1xf32> -> vector<8x1xf32>
    %911 = vector.broadcast %910 : vector<8x1xf32> to vector<8x8xf32>
    %912 = arith.mulf %907, %911 : vector<8x8xf32>
    %913 = vector.broadcast %896 : vector<1x32xf32> to vector<8x32xf32>
    %914 = arith.mulf %880, %913 : vector<8x32xf32>
    %cst_387 = arith.constant dense<0.000000e+00> : vector<8x32xf32>
    %915 = tpu.matmul %912, %914, %cst_387 {dimension_numbers = #tpu.dot_dimension_numbers<[1], [0], [0], [1], [0, 0, 1, 1], [], []>} : vector<8x8xf32>, vector<8x32xf32>, vector<8x32xf32> -> vector<8x32xf32>
    %916 = arith.addf %888, %915 : vector<8x32xf32>
    %c8_i32_388 = arith.constant 8 : i32
    %917 = vector.broadcast %c8_i32_388 : i32 to vector<1x32xi32>
    %918 = arith.cmpi sge, %881, %917 : vector<1x32xi32>
    %c16_i32_389 = arith.constant 16 : i32
    %919 = vector.broadcast %c16_i32_389 : i32 to vector<1x32xi32>
    %920 = arith.cmpi slt, %881, %919 : vector<1x32xi32>
    %921 = arith.andi %918, %920 : vector<1x32xi1>
    %cst_390 = arith.constant 1.000000e+00 : f32
    %cst_391 = arith.constant 0.000000e+00 : f32
    %922 = vector.broadcast %cst_390 : f32 to vector<1x32xf32>
    %923 = vector.broadcast %cst_391 : f32 to vector<1x32xf32>
    %924 = arith.select %921, %922, %923 : vector<1x32xi1>, vector<1x32xf32>
    %925 = vector.broadcast %924 : vector<1x32xf32> to vector<8x32xf32>
    %926 = arith.mulf %866, %925 : vector<8x32xf32>
    %cst_392 = arith.constant dense<0.000000e+00> : vector<8x8xf32>
    %927 = tpu.matmul %926, %873, %cst_392 {dimension_numbers = #tpu.dot_dimension_numbers<[1], [1], [0], [0], [0, 0, 1, 0], [], []>} : vector<8x32xf32>, vector<8x32xf32>, vector<8x8xf32> -> vector<8x8xf32>
    %cst_393 = arith.constant 0.353553385 : f32
    %928 = vector.broadcast %cst_393 : f32 to vector<8x8xf32>
    %929 = arith.mulf %927, %928 : vector<8x8xf32>
    %930 = arith.addf %929, %887 : vector<8x8xf32>
    %cst_394 = arith.constant dense<0xFF800000> : vector<8xf32>
    %931 = vector.multi_reduction <maximumf>, %930, %cst_394 [1] : vector<8x8xf32> to vector<8xf32>
    %932 = vector.shape_cast %931 : vector<8xf32> to vector<8x1xf32>
    %933 = vector.broadcast %932 : vector<8x1xf32> to vector<8x8xf32>
    %934 = arith.subf %930, %933 : vector<8x8xf32>
    %935 = math.exp %934 : vector<8x8xf32>
    %cst_395 = arith.constant dense<0.000000e+00> : vector<8xf32>
    %936 = vector.multi_reduction <add>, %935, %cst_395 [1] : vector<8x8xf32> to vector<8xf32>
    %937 = vector.shape_cast %936 : vector<8xf32> to vector<8x1xf32>
    %938 = tpu.reciprocal %937 {approx = true} : vector<8x1xf32> -> vector<8x1xf32>
    %939 = vector.broadcast %938 : vector<8x1xf32> to vector<8x8xf32>
    %940 = arith.mulf %935, %939 : vector<8x8xf32>
    %941 = vector.broadcast %924 : vector<1x32xf32> to vector<8x32xf32>
    %942 = arith.mulf %880, %941 : vector<8x32xf32>
    %cst_396 = arith.constant dense<0.000000e+00> : vector<8x32xf32>
    %943 = tpu.matmul %940, %942, %cst_396 {dimension_numbers = #tpu.dot_dimension_numbers<[1], [0], [0], [1], [0, 0, 1, 1], [], []>} : vector<8x8xf32>, vector<8x32xf32>, vector<8x32xf32> -> vector<8x32xf32>
    %944 = arith.addf %916, %943 : vector<8x32xf32>
    %c16_i32_397 = arith.constant 16 : i32
    %945 = vector.broadcast %c16_i32_397 : i32 to vector<1x32xi32>
    %946 = arith.cmpi sge, %881, %945 : vector<1x32xi32>
    %c24_i32_398 = arith.constant 24 : i32
    %947 = vector.broadcast %c24_i32_398 : i32 to vector<1x32xi32>
    %948 = arith.cmpi slt, %881, %947 : vector<1x32xi32>
    %949 = arith.andi %946, %948 : vector<1x32xi1>
    %cst_399 = arith.constant 1.000000e+00 : f32
    %cst_400 = arith.constant 0.000000e+00 : f32
    %950 = vector.broadcast %cst_399 : f32 to vector<1x32xf32>
    %951 = vector.broadcast %cst_400 : f32 to vector<1x32xf32>
    %952 = arith.select %949, %950, %951 : vector<1x32xi1>, vector<1x32xf32>
    %953 = vector.broadcast %952 : vector<1x32xf32> to vector<8x32xf32>
    %954 = arith.mulf %866, %953 : vector<8x32xf32>
    %cst_401 = arith.constant dense<0.000000e+00> : vector<8x8xf32>
    %955 = tpu.matmul %954, %873, %cst_401 {dimension_numbers = #tpu.dot_dimension_numbers<[1], [1], [0], [0], [0, 0, 1, 0], [], []>} : vector<8x32xf32>, vector<8x32xf32>, vector<8x8xf32> -> vector<8x8xf32>
    %cst_402 = arith.constant 0.353553385 : f32
    %956 = vector.broadcast %cst_402 : f32 to vector<8x8xf32>
    %957 = arith.mulf %955, %956 : vector<8x8xf32>
    %958 = arith.addf %957, %887 : vector<8x8xf32>
    %cst_403 = arith.constant dense<0xFF800000> : vector<8xf32>
    %959 = vector.multi_reduction <maximumf>, %958, %cst_403 [1] : vector<8x8xf32> to vector<8xf32>
    %960 = vector.shape_cast %959 : vector<8xf32> to vector<8x1xf32>
    %961 = vector.broadcast %960 : vector<8x1xf32> to vector<8x8xf32>
    %962 = arith.subf %958, %961 : vector<8x8xf32>
    %963 = math.exp %962 : vector<8x8xf32>
    %cst_404 = arith.constant dense<0.000000e+00> : vector<8xf32>
    %964 = vector.multi_reduction <add>, %963, %cst_404 [1] : vector<8x8xf32> to vector<8xf32>
    %965 = vector.shape_cast %964 : vector<8xf32> to vector<8x1xf32>
    %966 = tpu.reciprocal %965 {approx = true} : vector<8x1xf32> -> vector<8x1xf32>
    %967 = vector.broadcast %966 : vector<8x1xf32> to vector<8x8xf32>
    %968 = arith.mulf %963, %967 : vector<8x8xf32>
    %969 = vector.broadcast %952 : vector<1x32xf32> to vector<8x32xf32>
    %970 = arith.mulf %880, %969 : vector<8x32xf32>
    %cst_405 = arith.constant dense<0.000000e+00> : vector<8x32xf32>
    %971 = tpu.matmul %968, %970, %cst_405 {dimension_numbers = #tpu.dot_dimension_numbers<[1], [0], [0], [1], [0, 0, 1, 1], [], []>} : vector<8x8xf32>, vector<8x32xf32>, vector<8x32xf32> -> vector<8x32xf32>
    %972 = arith.addf %944, %971 : vector<8x32xf32>
    %c24_i32_406 = arith.constant 24 : i32
    %973 = vector.broadcast %c24_i32_406 : i32 to vector<1x32xi32>
    %974 = arith.cmpi sge, %881, %973 : vector<1x32xi32>
    %c32_i32_407 = arith.constant 32 : i32
    %975 = vector.broadcast %c32_i32_407 : i32 to vector<1x32xi32>
    %976 = arith.cmpi slt, %881, %975 : vector<1x32xi32>
    %977 = arith.andi %974, %976 : vector<1x32xi1>
    %cst_408 = arith.constant 1.000000e+00 : f32
    %cst_409 = arith.constant 0.000000e+00 : f32
    %978 = vector.broadcast %cst_408 : f32 to vector<1x32xf32>
    %979 = vector.broadcast %cst_409 : f32 to vector<1x32xf32>
    %980 = arith.select %977, %978, %979 : vector<1x32xi1>, vector<1x32xf32>
    %981 = vector.broadcast %980 : vector<1x32xf32> to vector<8x32xf32>
    %982 = arith.mulf %866, %981 : vector<8x32xf32>
    %cst_410 = arith.constant dense<0.000000e+00> : vector<8x8xf32>
    %983 = tpu.matmul %982, %873, %cst_410 {dimension_numbers = #tpu.dot_dimension_numbers<[1], [1], [0], [0], [0, 0, 1, 0], [], []>} : vector<8x32xf32>, vector<8x32xf32>, vector<8x8xf32> -> vector<8x8xf32>
    %cst_411 = arith.constant 0.353553385 : f32
    %984 = vector.broadcast %cst_411 : f32 to vector<8x8xf32>
    %985 = arith.mulf %983, %984 : vector<8x8xf32>
    %986 = arith.addf %985, %887 : vector<8x8xf32>
    %cst_412 = arith.constant dense<0xFF800000> : vector<8xf32>
    %987 = vector.multi_reduction <maximumf>, %986, %cst_412 [1] : vector<8x8xf32> to vector<8xf32>
    %988 = vector.shape_cast %987 : vector<8xf32> to vector<8x1xf32>
    %989 = vector.broadcast %988 : vector<8x1xf32> to vector<8x8xf32>
    %990 = arith.subf %986, %989 : vector<8x8xf32>
    %991 = math.exp %990 : vector<8x8xf32>
    %cst_413 = arith.constant dense<0.000000e+00> : vector<8xf32>
    %992 = vector.multi_reduction <add>, %991, %cst_413 [1] : vector<8x8xf32> to vector<8xf32>
    %993 = vector.shape_cast %992 : vector<8xf32> to vector<8x1xf32>
    %994 = tpu.reciprocal %993 {approx = true} : vector<8x1xf32> -> vector<8x1xf32>
    %995 = vector.broadcast %994 : vector<8x1xf32> to vector<8x8xf32>
    %996 = arith.mulf %991, %995 : vector<8x8xf32>
    %997 = vector.broadcast %980 : vector<1x32xf32> to vector<8x32xf32>
    %998 = arith.mulf %880, %997 : vector<8x32xf32>
    %cst_414 = arith.constant dense<0.000000e+00> : vector<8x32xf32>
    %999 = tpu.matmul %996, %998, %cst_414 {dimension_numbers = #tpu.dot_dimension_numbers<[1], [0], [0], [1], [0, 0, 1, 1], [], []>} : vector<8x8xf32>, vector<8x32xf32>, vector<8x32xf32> -> vector<8x32xf32>
    %1000 = arith.addf %972, %999 : vector<8x32xf32>
    %cst_415 = arith.constant dense<0.000000e+00> : vector<8x32xf32>
    %1001 = tpu.matmul %1000, %857, %cst_415 {dimension_numbers = #tpu.dot_dimension_numbers<[1], [0], [0], [1], [0, 0, 1, 1], [], []>} : vector<8x32xf32>, vector<32x32xf32>, vector<8x32xf32> -> vector<8x32xf32>
    %1002 = vector.broadcast %859 : vector<1x32xf32> to vector<8x32xf32>
    %1003 = arith.addf %1001, %1002 : vector<8x32xf32>
    %1004 = arith.addf %851, %1003 : vector<8x32xf32>
    %c1_416 = arith.constant 1 : index
    %c0_417 = arith.constant 0 : index
    %c0_418 = arith.constant 0 : index
    %1005 = vector.load %arg23[%c1_416, %c0_417, %c0_418] : memref<2x1x32xf32, #tpu.memory_space<vmem>>, vector<1x1x32xf32>
    %1006 = vector.shape_cast %1005 : vector<1x1x32xf32> to vector<1x32xf32>
    %c1_419 = arith.constant 1 : index
    %c0_420 = arith.constant 0 : index
    %c0_421 = arith.constant 0 : index
    %1007 = vector.load %arg24[%c1_419, %c0_420, %c0_421] : memref<2x1x32xf32, #tpu.memory_space<vmem>>, vector<1x1x32xf32>
    %1008 = vector.shape_cast %1007 : vector<1x1x32xf32> to vector<1x32xf32>
    %cst_422 = arith.constant dense<0.000000e+00> : vector<8xf32>
    %1009 = vector.multi_reduction <add>, %1004, %cst_422 [1] : vector<8x32xf32> to vector<8xf32>
    %1010 = vector.shape_cast %1009 : vector<8xf32> to vector<8x1xf32>
    %cst_423 = arith.constant 3.200000e+01 : f32
    %1011 = vector.broadcast %cst_423 : f32 to vector<8x1xf32>
    %1012 = arith.divf %1010, %1011 : vector<8x1xf32>
    %1013 = vector.broadcast %1012 : vector<8x1xf32> to vector<8x32xf32>
    %1014 = arith.subf %1004, %1013 : vector<8x32xf32>
    %1015 = arith.mulf %1014, %1014 : vector<8x32xf32>
    %cst_424 = arith.constant dense<0.000000e+00> : vector<8xf32>
    %1016 = vector.multi_reduction <add>, %1015, %cst_424 [1] : vector<8x32xf32> to vector<8xf32>
    %1017 = vector.shape_cast %1016 : vector<8xf32> to vector<8x1xf32>
    %cst_425 = arith.constant 3.200000e+01 : f32
    %1018 = vector.broadcast %cst_425 : f32 to vector<8x1xf32>
    %1019 = arith.divf %1017, %1018 : vector<8x1xf32>
    %cst_426 = arith.constant 9.99999974E-6 : f32
    %1020 = vector.broadcast %cst_426 : f32 to vector<8x1xf32>
    %1021 = arith.addf %1019, %1020 : vector<8x1xf32>
    %1022 = math.rsqrt %1021 : vector<8x1xf32>
    %1023 = vector.broadcast %1022 : vector<8x1xf32> to vector<8x32xf32>
    %1024 = arith.mulf %1014, %1023 : vector<8x32xf32>
    %1025 = vector.broadcast %1006 : vector<1x32xf32> to vector<8x32xf32>
    %1026 = arith.mulf %1024, %1025 : vector<8x32xf32>
    %1027 = vector.broadcast %1008 : vector<1x32xf32> to vector<8x32xf32>
    %1028 = arith.addf %1026, %1027 : vector<8x32xf32>
    %c1_427 = arith.constant 1 : index
    %c0_428 = arith.constant 0 : index
    %c0_429 = arith.constant 0 : index
    %c0_430 = arith.constant 0 : index
    %1029 = vector.load %arg25[%c1_427, %c0_428, %c0_429, %c0_430] : memref<2x3x32x32xf32, #tpu.memory_space<vmem>>, vector<1x3x32x32xf32>
    %1030 = vector.shape_cast %1029 : vector<1x3x32x32xf32> to vector<3x32x32xf32>
    %c1_431 = arith.constant 1 : index
    %c0_432 = arith.constant 0 : index
    %c0_433 = arith.constant 0 : index
    %c0_434 = arith.constant 0 : index
    %1031 = vector.load %arg26[%c1_431, %c0_432, %c0_433, %c0_434] : memref<2x3x1x32xf32, #tpu.memory_space<vmem>>, vector<1x3x1x32xf32>
    %1032 = vector.shape_cast %1031 : vector<1x3x1x32xf32> to vector<3x1x32xf32>
    %c1_435 = arith.constant 1 : index
    %c0_436 = arith.constant 0 : index
    %c0_437 = arith.constant 0 : index
    %1033 = vector.load %arg27[%c1_435, %c0_436, %c0_437] : memref<2x32x32xf32, #tpu.memory_space<vmem>>, vector<1x32x32xf32>
    %1034 = vector.shape_cast %1033 : vector<1x32x32xf32> to vector<32x32xf32>
    %c1_438 = arith.constant 1 : index
    %c0_439 = arith.constant 0 : index
    %c0_440 = arith.constant 0 : index
    %1035 = vector.load %arg28[%c1_438, %c0_439, %c0_440] : memref<2x1x32xf32, #tpu.memory_space<vmem>>, vector<1x1x32xf32>
    %1036 = vector.shape_cast %1035 : vector<1x1x32xf32> to vector<1x32xf32>
    %1037 = vector.extract_strided_slice %1030 {offsets = [0, 0, 0], sizes = [1, 32, 32], strides = [1, 1, 1]} : vector<3x32x32xf32> to vector<1x32x32xf32>
    %1038 = vector.shape_cast %1037 : vector<1x32x32xf32> to vector<32x32xf32>
    %cst_441 = arith.constant dense<0.000000e+00> : vector<8x32xf32>
    %1039 = tpu.matmul %1028, %1038, %cst_441 {dimension_numbers = #tpu.dot_dimension_numbers<[1], [0], [0], [1], [0, 0, 1, 1], [], []>} : vector<8x32xf32>, vector<32x32xf32>, vector<8x32xf32> -> vector<8x32xf32>
    %1040 = vector.extract_strided_slice %1032 {offsets = [0, 0, 0], sizes = [1, 1, 32], strides = [1, 1, 1]} : vector<3x1x32xf32> to vector<1x1x32xf32>
    %1041 = vector.shape_cast %1040 : vector<1x1x32xf32> to vector<1x32xf32>
    %1042 = vector.broadcast %1041 : vector<1x32xf32> to vector<8x32xf32>
    %1043 = arith.addf %1039, %1042 : vector<8x32xf32>
    %1044 = vector.extract_strided_slice %1030 {offsets = [1, 0, 0], sizes = [1, 32, 32], strides = [1, 1, 1]} : vector<3x32x32xf32> to vector<1x32x32xf32>
    %1045 = vector.shape_cast %1044 : vector<1x32x32xf32> to vector<32x32xf32>
    %cst_442 = arith.constant dense<0.000000e+00> : vector<8x32xf32>
    %1046 = tpu.matmul %466, %1045, %cst_442 {dimension_numbers = #tpu.dot_dimension_numbers<[1], [0], [0], [1], [0, 0, 1, 1], [], []>} : vector<8x32xf32>, vector<32x32xf32>, vector<8x32xf32> -> vector<8x32xf32>
    %1047 = vector.extract_strided_slice %1032 {offsets = [1, 0, 0], sizes = [1, 1, 32], strides = [1, 1, 1]} : vector<3x1x32xf32> to vector<1x1x32xf32>
    %1048 = vector.shape_cast %1047 : vector<1x1x32xf32> to vector<1x32xf32>
    %1049 = vector.broadcast %1048 : vector<1x32xf32> to vector<8x32xf32>
    %1050 = arith.addf %1046, %1049 : vector<8x32xf32>
    %1051 = vector.extract_strided_slice %1030 {offsets = [2, 0, 0], sizes = [1, 32, 32], strides = [1, 1, 1]} : vector<3x32x32xf32> to vector<1x32x32xf32>
    %1052 = vector.shape_cast %1051 : vector<1x32x32xf32> to vector<32x32xf32>
    %cst_443 = arith.constant dense<0.000000e+00> : vector<8x32xf32>
    %1053 = tpu.matmul %466, %1052, %cst_443 {dimension_numbers = #tpu.dot_dimension_numbers<[1], [0], [0], [1], [0, 0, 1, 1], [], []>} : vector<8x32xf32>, vector<32x32xf32>, vector<8x32xf32> -> vector<8x32xf32>
    %1054 = vector.extract_strided_slice %1032 {offsets = [2, 0, 0], sizes = [1, 1, 32], strides = [1, 1, 1]} : vector<3x1x32xf32> to vector<1x1x32xf32>
    %1055 = vector.shape_cast %1054 : vector<1x1x32xf32> to vector<1x32xf32>
    %1056 = vector.broadcast %1055 : vector<1x32xf32> to vector<8x32xf32>
    %1057 = arith.addf %1053, %1056 : vector<8x32xf32>
    %1058 = tpu.iota {dimensions = array<i32: 1>} : vector<1x32xi32>
    %cst_444 = arith.constant 0.000000e+00 : f32
    %1059 = vector.broadcast %cst_444 : f32 to vector<8x32xf32>
    %c0_i32_445 = arith.constant 0 : i32
    %1060 = vector.broadcast %c0_i32_445 : i32 to vector<1x32xi32>
    %1061 = arith.cmpi sge, %1058, %1060 : vector<1x32xi32>
    %c8_i32_446 = arith.constant 8 : i32
    %1062 = vector.broadcast %c8_i32_446 : i32 to vector<1x32xi32>
    %1063 = arith.cmpi slt, %1058, %1062 : vector<1x32xi32>
    %1064 = arith.andi %1061, %1063 : vector<1x32xi1>
    %cst_447 = arith.constant 1.000000e+00 : f32
    %cst_448 = arith.constant 0.000000e+00 : f32
    %1065 = vector.broadcast %cst_447 : f32 to vector<1x32xf32>
    %1066 = vector.broadcast %cst_448 : f32 to vector<1x32xf32>
    %1067 = arith.select %1064, %1065, %1066 : vector<1x32xi1>, vector<1x32xf32>
    %1068 = vector.broadcast %1067 : vector<1x32xf32> to vector<8x32xf32>
    %1069 = arith.mulf %1043, %1068 : vector<8x32xf32>
    %cst_449 = arith.constant dense<0.000000e+00> : vector<8x8xf32>
    %1070 = tpu.matmul %1069, %1050, %cst_449 {dimension_numbers = #tpu.dot_dimension_numbers<[1], [1], [0], [0], [0, 0, 1, 0], [], []>} : vector<8x32xf32>, vector<8x32xf32>, vector<8x8xf32> -> vector<8x8xf32>
    %cst_450 = arith.constant 0.353553385 : f32
    %1071 = vector.broadcast %cst_450 : f32 to vector<8x8xf32>
    %1072 = arith.mulf %1070, %1071 : vector<8x8xf32>
    %cst_451 = arith.constant dense<0xFF800000> : vector<8xf32>
    %1073 = vector.multi_reduction <maximumf>, %1072, %cst_451 [1] : vector<8x8xf32> to vector<8xf32>
    %1074 = vector.shape_cast %1073 : vector<8xf32> to vector<8x1xf32>
    %1075 = vector.broadcast %1074 : vector<8x1xf32> to vector<8x8xf32>
    %1076 = arith.subf %1072, %1075 : vector<8x8xf32>
    %1077 = math.exp %1076 : vector<8x8xf32>
    %cst_452 = arith.constant dense<0.000000e+00> : vector<8xf32>
    %1078 = vector.multi_reduction <add>, %1077, %cst_452 [1] : vector<8x8xf32> to vector<8xf32>
    %1079 = vector.shape_cast %1078 : vector<8xf32> to vector<8x1xf32>
    %1080 = tpu.reciprocal %1079 {approx = true} : vector<8x1xf32> -> vector<8x1xf32>
    %1081 = vector.broadcast %1080 : vector<8x1xf32> to vector<8x8xf32>
    %1082 = arith.mulf %1077, %1081 : vector<8x8xf32>
    %1083 = vector.broadcast %1067 : vector<1x32xf32> to vector<8x32xf32>
    %1084 = arith.mulf %1057, %1083 : vector<8x32xf32>
    %cst_453 = arith.constant dense<0.000000e+00> : vector<8x32xf32>
    %1085 = tpu.matmul %1082, %1084, %cst_453 {dimension_numbers = #tpu.dot_dimension_numbers<[1], [0], [0], [1], [0, 0, 1, 1], [], []>} : vector<8x8xf32>, vector<8x32xf32>, vector<8x32xf32> -> vector<8x32xf32>
    %1086 = arith.addf %1059, %1085 : vector<8x32xf32>
    %c8_i32_454 = arith.constant 8 : i32
    %1087 = vector.broadcast %c8_i32_454 : i32 to vector<1x32xi32>
    %1088 = arith.cmpi sge, %1058, %1087 : vector<1x32xi32>
    %c16_i32_455 = arith.constant 16 : i32
    %1089 = vector.broadcast %c16_i32_455 : i32 to vector<1x32xi32>
    %1090 = arith.cmpi slt, %1058, %1089 : vector<1x32xi32>
    %1091 = arith.andi %1088, %1090 : vector<1x32xi1>
    %cst_456 = arith.constant 1.000000e+00 : f32
    %cst_457 = arith.constant 0.000000e+00 : f32
    %1092 = vector.broadcast %cst_456 : f32 to vector<1x32xf32>
    %1093 = vector.broadcast %cst_457 : f32 to vector<1x32xf32>
    %1094 = arith.select %1091, %1092, %1093 : vector<1x32xi1>, vector<1x32xf32>
    %1095 = vector.broadcast %1094 : vector<1x32xf32> to vector<8x32xf32>
    %1096 = arith.mulf %1043, %1095 : vector<8x32xf32>
    %cst_458 = arith.constant dense<0.000000e+00> : vector<8x8xf32>
    %1097 = tpu.matmul %1096, %1050, %cst_458 {dimension_numbers = #tpu.dot_dimension_numbers<[1], [1], [0], [0], [0, 0, 1, 0], [], []>} : vector<8x32xf32>, vector<8x32xf32>, vector<8x8xf32> -> vector<8x8xf32>
    %cst_459 = arith.constant 0.353553385 : f32
    %1098 = vector.broadcast %cst_459 : f32 to vector<8x8xf32>
    %1099 = arith.mulf %1097, %1098 : vector<8x8xf32>
    %cst_460 = arith.constant dense<0xFF800000> : vector<8xf32>
    %1100 = vector.multi_reduction <maximumf>, %1099, %cst_460 [1] : vector<8x8xf32> to vector<8xf32>
    %1101 = vector.shape_cast %1100 : vector<8xf32> to vector<8x1xf32>
    %1102 = vector.broadcast %1101 : vector<8x1xf32> to vector<8x8xf32>
    %1103 = arith.subf %1099, %1102 : vector<8x8xf32>
    %1104 = math.exp %1103 : vector<8x8xf32>
    %cst_461 = arith.constant dense<0.000000e+00> : vector<8xf32>
    %1105 = vector.multi_reduction <add>, %1104, %cst_461 [1] : vector<8x8xf32> to vector<8xf32>
    %1106 = vector.shape_cast %1105 : vector<8xf32> to vector<8x1xf32>
    %1107 = tpu.reciprocal %1106 {approx = true} : vector<8x1xf32> -> vector<8x1xf32>
    %1108 = vector.broadcast %1107 : vector<8x1xf32> to vector<8x8xf32>
    %1109 = arith.mulf %1104, %1108 : vector<8x8xf32>
    %1110 = vector.broadcast %1094 : vector<1x32xf32> to vector<8x32xf32>
    %1111 = arith.mulf %1057, %1110 : vector<8x32xf32>
    %cst_462 = arith.constant dense<0.000000e+00> : vector<8x32xf32>
    %1112 = tpu.matmul %1109, %1111, %cst_462 {dimension_numbers = #tpu.dot_dimension_numbers<[1], [0], [0], [1], [0, 0, 1, 1], [], []>} : vector<8x8xf32>, vector<8x32xf32>, vector<8x32xf32> -> vector<8x32xf32>
    %1113 = arith.addf %1086, %1112 : vector<8x32xf32>
    %c16_i32_463 = arith.constant 16 : i32
    %1114 = vector.broadcast %c16_i32_463 : i32 to vector<1x32xi32>
    %1115 = arith.cmpi sge, %1058, %1114 : vector<1x32xi32>
    %c24_i32_464 = arith.constant 24 : i32
    %1116 = vector.broadcast %c24_i32_464 : i32 to vector<1x32xi32>
    %1117 = arith.cmpi slt, %1058, %1116 : vector<1x32xi32>
    %1118 = arith.andi %1115, %1117 : vector<1x32xi1>
    %cst_465 = arith.constant 1.000000e+00 : f32
    %cst_466 = arith.constant 0.000000e+00 : f32
    %1119 = vector.broadcast %cst_465 : f32 to vector<1x32xf32>
    %1120 = vector.broadcast %cst_466 : f32 to vector<1x32xf32>
    %1121 = arith.select %1118, %1119, %1120 : vector<1x32xi1>, vector<1x32xf32>
    %1122 = vector.broadcast %1121 : vector<1x32xf32> to vector<8x32xf32>
    %1123 = arith.mulf %1043, %1122 : vector<8x32xf32>
    %cst_467 = arith.constant dense<0.000000e+00> : vector<8x8xf32>
    %1124 = tpu.matmul %1123, %1050, %cst_467 {dimension_numbers = #tpu.dot_dimension_numbers<[1], [1], [0], [0], [0, 0, 1, 0], [], []>} : vector<8x32xf32>, vector<8x32xf32>, vector<8x8xf32> -> vector<8x8xf32>
    %cst_468 = arith.constant 0.353553385 : f32
    %1125 = vector.broadcast %cst_468 : f32 to vector<8x8xf32>
    %1126 = arith.mulf %1124, %1125 : vector<8x8xf32>
    %cst_469 = arith.constant dense<0xFF800000> : vector<8xf32>
    %1127 = vector.multi_reduction <maximumf>, %1126, %cst_469 [1] : vector<8x8xf32> to vector<8xf32>
    %1128 = vector.shape_cast %1127 : vector<8xf32> to vector<8x1xf32>
    %1129 = vector.broadcast %1128 : vector<8x1xf32> to vector<8x8xf32>
    %1130 = arith.subf %1126, %1129 : vector<8x8xf32>
    %1131 = math.exp %1130 : vector<8x8xf32>
    %cst_470 = arith.constant dense<0.000000e+00> : vector<8xf32>
    %1132 = vector.multi_reduction <add>, %1131, %cst_470 [1] : vector<8x8xf32> to vector<8xf32>
    %1133 = vector.shape_cast %1132 : vector<8xf32> to vector<8x1xf32>
    %1134 = tpu.reciprocal %1133 {approx = true} : vector<8x1xf32> -> vector<8x1xf32>
    %1135 = vector.broadcast %1134 : vector<8x1xf32> to vector<8x8xf32>
    %1136 = arith.mulf %1131, %1135 : vector<8x8xf32>
    %1137 = vector.broadcast %1121 : vector<1x32xf32> to vector<8x32xf32>
    %1138 = arith.mulf %1057, %1137 : vector<8x32xf32>
    %cst_471 = arith.constant dense<0.000000e+00> : vector<8x32xf32>
    %1139 = tpu.matmul %1136, %1138, %cst_471 {dimension_numbers = #tpu.dot_dimension_numbers<[1], [0], [0], [1], [0, 0, 1, 1], [], []>} : vector<8x8xf32>, vector<8x32xf32>, vector<8x32xf32> -> vector<8x32xf32>
    %1140 = arith.addf %1113, %1139 : vector<8x32xf32>
    %c24_i32_472 = arith.constant 24 : i32
    %1141 = vector.broadcast %c24_i32_472 : i32 to vector<1x32xi32>
    %1142 = arith.cmpi sge, %1058, %1141 : vector<1x32xi32>
    %c32_i32_473 = arith.constant 32 : i32
    %1143 = vector.broadcast %c32_i32_473 : i32 to vector<1x32xi32>
    %1144 = arith.cmpi slt, %1058, %1143 : vector<1x32xi32>
    %1145 = arith.andi %1142, %1144 : vector<1x32xi1>
    %cst_474 = arith.constant 1.000000e+00 : f32
    %cst_475 = arith.constant 0.000000e+00 : f32
    %1146 = vector.broadcast %cst_474 : f32 to vector<1x32xf32>
    %1147 = vector.broadcast %cst_475 : f32 to vector<1x32xf32>
    %1148 = arith.select %1145, %1146, %1147 : vector<1x32xi1>, vector<1x32xf32>
    %1149 = vector.broadcast %1148 : vector<1x32xf32> to vector<8x32xf32>
    %1150 = arith.mulf %1043, %1149 : vector<8x32xf32>
    %cst_476 = arith.constant dense<0.000000e+00> : vector<8x8xf32>
    %1151 = tpu.matmul %1150, %1050, %cst_476 {dimension_numbers = #tpu.dot_dimension_numbers<[1], [1], [0], [0], [0, 0, 1, 0], [], []>} : vector<8x32xf32>, vector<8x32xf32>, vector<8x8xf32> -> vector<8x8xf32>
    %cst_477 = arith.constant 0.353553385 : f32
    %1152 = vector.broadcast %cst_477 : f32 to vector<8x8xf32>
    %1153 = arith.mulf %1151, %1152 : vector<8x8xf32>
    %cst_478 = arith.constant dense<0xFF800000> : vector<8xf32>
    %1154 = vector.multi_reduction <maximumf>, %1153, %cst_478 [1] : vector<8x8xf32> to vector<8xf32>
    %1155 = vector.shape_cast %1154 : vector<8xf32> to vector<8x1xf32>
    %1156 = vector.broadcast %1155 : vector<8x1xf32> to vector<8x8xf32>
    %1157 = arith.subf %1153, %1156 : vector<8x8xf32>
    %1158 = math.exp %1157 : vector<8x8xf32>
    %cst_479 = arith.constant dense<0.000000e+00> : vector<8xf32>
    %1159 = vector.multi_reduction <add>, %1158, %cst_479 [1] : vector<8x8xf32> to vector<8xf32>
    %1160 = vector.shape_cast %1159 : vector<8xf32> to vector<8x1xf32>
    %1161 = tpu.reciprocal %1160 {approx = true} : vector<8x1xf32> -> vector<8x1xf32>
    %1162 = vector.broadcast %1161 : vector<8x1xf32> to vector<8x8xf32>
    %1163 = arith.mulf %1158, %1162 : vector<8x8xf32>
    %1164 = vector.broadcast %1148 : vector<1x32xf32> to vector<8x32xf32>
    %1165 = arith.mulf %1057, %1164 : vector<8x32xf32>
    %cst_480 = arith.constant dense<0.000000e+00> : vector<8x32xf32>
    %1166 = tpu.matmul %1163, %1165, %cst_480 {dimension_numbers = #tpu.dot_dimension_numbers<[1], [0], [0], [1], [0, 0, 1, 1], [], []>} : vector<8x8xf32>, vector<8x32xf32>, vector<8x32xf32> -> vector<8x32xf32>
    %1167 = arith.addf %1140, %1166 : vector<8x32xf32>
    %cst_481 = arith.constant dense<0.000000e+00> : vector<8x32xf32>
    %1168 = tpu.matmul %1167, %1034, %cst_481 {dimension_numbers = #tpu.dot_dimension_numbers<[1], [0], [0], [1], [0, 0, 1, 1], [], []>} : vector<8x32xf32>, vector<32x32xf32>, vector<8x32xf32> -> vector<8x32xf32>
    %1169 = vector.broadcast %1036 : vector<1x32xf32> to vector<8x32xf32>
    %1170 = arith.addf %1168, %1169 : vector<8x32xf32>
    %1171 = arith.addf %1028, %1170 : vector<8x32xf32>
    %c1_482 = arith.constant 1 : index
    %c0_483 = arith.constant 0 : index
    %c0_484 = arith.constant 0 : index
    %1172 = vector.load %arg29[%c1_482, %c0_483, %c0_484] : memref<2x1x32xf32, #tpu.memory_space<vmem>>, vector<1x1x32xf32>
    %1173 = vector.shape_cast %1172 : vector<1x1x32xf32> to vector<1x32xf32>
    %c1_485 = arith.constant 1 : index
    %c0_486 = arith.constant 0 : index
    %c0_487 = arith.constant 0 : index
    %1174 = vector.load %arg30[%c1_485, %c0_486, %c0_487] : memref<2x1x32xf32, #tpu.memory_space<vmem>>, vector<1x1x32xf32>
    %1175 = vector.shape_cast %1174 : vector<1x1x32xf32> to vector<1x32xf32>
    %cst_488 = arith.constant dense<0.000000e+00> : vector<8xf32>
    %1176 = vector.multi_reduction <add>, %1171, %cst_488 [1] : vector<8x32xf32> to vector<8xf32>
    %1177 = vector.shape_cast %1176 : vector<8xf32> to vector<8x1xf32>
    %cst_489 = arith.constant 3.200000e+01 : f32
    %1178 = vector.broadcast %cst_489 : f32 to vector<8x1xf32>
    %1179 = arith.divf %1177, %1178 : vector<8x1xf32>
    %1180 = vector.broadcast %1179 : vector<8x1xf32> to vector<8x32xf32>
    %1181 = arith.subf %1171, %1180 : vector<8x32xf32>
    %1182 = arith.mulf %1181, %1181 : vector<8x32xf32>
    %cst_490 = arith.constant dense<0.000000e+00> : vector<8xf32>
    %1183 = vector.multi_reduction <add>, %1182, %cst_490 [1] : vector<8x32xf32> to vector<8xf32>
    %1184 = vector.shape_cast %1183 : vector<8xf32> to vector<8x1xf32>
    %cst_491 = arith.constant 3.200000e+01 : f32
    %1185 = vector.broadcast %cst_491 : f32 to vector<8x1xf32>
    %1186 = arith.divf %1184, %1185 : vector<8x1xf32>
    %cst_492 = arith.constant 9.99999974E-6 : f32
    %1187 = vector.broadcast %cst_492 : f32 to vector<8x1xf32>
    %1188 = arith.addf %1186, %1187 : vector<8x1xf32>
    %1189 = math.rsqrt %1188 : vector<8x1xf32>
    %1190 = vector.broadcast %1189 : vector<8x1xf32> to vector<8x32xf32>
    %1191 = arith.mulf %1181, %1190 : vector<8x32xf32>
    %1192 = vector.broadcast %1173 : vector<1x32xf32> to vector<8x32xf32>
    %1193 = arith.mulf %1191, %1192 : vector<8x32xf32>
    %1194 = vector.broadcast %1175 : vector<1x32xf32> to vector<8x32xf32>
    %1195 = arith.addf %1193, %1194 : vector<8x32xf32>
    %c1_493 = arith.constant 1 : index
    %c0_494 = arith.constant 0 : index
    %c0_495 = arith.constant 0 : index
    %1196 = vector.load %arg31[%c1_493, %c0_494, %c0_495] : memref<2x32x2048xf32, #tpu.memory_space<vmem>>, vector<1x32x2048xf32>
    %1197 = vector.shape_cast %1196 : vector<1x32x2048xf32> to vector<32x2048xf32>
    %c1_496 = arith.constant 1 : index
    %c0_497 = arith.constant 0 : index
    %c0_498 = arith.constant 0 : index
    %1198 = vector.load %arg32[%c1_496, %c0_497, %c0_498] : memref<2x1x2048xf32, #tpu.memory_space<vmem>>, vector<1x1x2048xf32>
    %1199 = vector.shape_cast %1198 : vector<1x1x2048xf32> to vector<1x2048xf32>
    %c1_499 = arith.constant 1 : index
    %c0_500 = arith.constant 0 : index
    %c0_501 = arith.constant 0 : index
    %1200 = vector.load %arg33[%c1_499, %c0_500, %c0_501] : memref<2x32x2048xf32, #tpu.memory_space<vmem>>, vector<1x32x2048xf32>
    %1201 = vector.shape_cast %1200 : vector<1x32x2048xf32> to vector<32x2048xf32>
    %c1_502 = arith.constant 1 : index
    %c0_503 = arith.constant 0 : index
    %c0_504 = arith.constant 0 : index
    %1202 = vector.load %arg34[%c1_502, %c0_503, %c0_504] : memref<2x1x32xf32, #tpu.memory_space<vmem>>, vector<1x1x32xf32>
    %1203 = vector.shape_cast %1202 : vector<1x1x32xf32> to vector<1x32xf32>
    %cst_505 = arith.constant dense<0.000000e+00> : vector<8x2048xf32>
    %1204 = tpu.matmul %1195, %1197, %cst_505 {dimension_numbers = #tpu.dot_dimension_numbers<[1], [0], [0], [1], [0, 0, 1, 1], [], []>} : vector<8x32xf32>, vector<32x2048xf32>, vector<8x2048xf32> -> vector<8x2048xf32>
    %1205 = vector.broadcast %1199 : vector<1x2048xf32> to vector<8x2048xf32>
    %1206 = arith.addf %1204, %1205 : vector<8x2048xf32>
    %cst_506 = arith.constant 0.000000e+00 : f32
    %1207 = vector.broadcast %cst_506 : f32 to vector<8x2048xf32>
    %1208 = arith.maximumf %1206, %1207 : vector<8x2048xf32>
    %cst_507 = arith.constant dense<0.000000e+00> : vector<8x32xf32>
    %1209 = tpu.matmul %1208, %1201, %cst_507 {dimension_numbers = #tpu.dot_dimension_numbers<[1], [1], [0], [0], [0, 0, 1, 0], [], []>} : vector<8x2048xf32>, vector<32x2048xf32>, vector<8x32xf32> -> vector<8x32xf32>
    %1210 = vector.broadcast %1203 : vector<1x32xf32> to vector<8x32xf32>
    %1211 = arith.addf %1209, %1210 : vector<8x32xf32>
    %1212 = arith.addf %1195, %1211 : vector<8x32xf32>
    %c1_508 = arith.constant 1 : index
    %c0_509 = arith.constant 0 : index
    %c0_510 = arith.constant 0 : index
    %1213 = vector.load %arg35[%c1_508, %c0_509, %c0_510] : memref<2x1x32xf32, #tpu.memory_space<vmem>>, vector<1x1x32xf32>
    %1214 = vector.shape_cast %1213 : vector<1x1x32xf32> to vector<1x32xf32>
    %c1_511 = arith.constant 1 : index
    %c0_512 = arith.constant 0 : index
    %c0_513 = arith.constant 0 : index
    %1215 = vector.load %arg36[%c1_511, %c0_512, %c0_513] : memref<2x1x32xf32, #tpu.memory_space<vmem>>, vector<1x1x32xf32>
    %1216 = vector.shape_cast %1215 : vector<1x1x32xf32> to vector<1x32xf32>
    %cst_514 = arith.constant dense<0.000000e+00> : vector<8xf32>
    %1217 = vector.multi_reduction <add>, %1212, %cst_514 [1] : vector<8x32xf32> to vector<8xf32>
    %1218 = vector.shape_cast %1217 : vector<8xf32> to vector<8x1xf32>
    %cst_515 = arith.constant 3.200000e+01 : f32
    %1219 = vector.broadcast %cst_515 : f32 to vector<8x1xf32>
    %1220 = arith.divf %1218, %1219 : vector<8x1xf32>
    %1221 = vector.broadcast %1220 : vector<8x1xf32> to vector<8x32xf32>
    %1222 = arith.subf %1212, %1221 : vector<8x32xf32>
    %1223 = arith.mulf %1222, %1222 : vector<8x32xf32>
    %cst_516 = arith.constant dense<0.000000e+00> : vector<8xf32>
    %1224 = vector.multi_reduction <add>, %1223, %cst_516 [1] : vector<8x32xf32> to vector<8xf32>
    %1225 = vector.shape_cast %1224 : vector<8xf32> to vector<8x1xf32>
    %cst_517 = arith.constant 3.200000e+01 : f32
    %1226 = vector.broadcast %cst_517 : f32 to vector<8x1xf32>
    %1227 = arith.divf %1225, %1226 : vector<8x1xf32>
    %cst_518 = arith.constant 9.99999974E-6 : f32
    %1228 = vector.broadcast %cst_518 : f32 to vector<8x1xf32>
    %1229 = arith.addf %1227, %1228 : vector<8x1xf32>
    %1230 = math.rsqrt %1229 : vector<8x1xf32>
    %1231 = vector.broadcast %1230 : vector<8x1xf32> to vector<8x32xf32>
    %1232 = arith.mulf %1222, %1231 : vector<8x32xf32>
    %1233 = vector.broadcast %1214 : vector<1x32xf32> to vector<8x32xf32>
    %1234 = arith.mulf %1232, %1233 : vector<8x32xf32>
    %1235 = vector.broadcast %1216 : vector<1x32xf32> to vector<8x32xf32>
    %1236 = arith.addf %1234, %1235 : vector<8x32xf32>
    %1237 = vector.extract_strided_slice %1236 {offsets = [7, 0], sizes = [1, 32], strides = [1, 1]} : vector<8x32xf32> to vector<1x32xf32>
    %c0_519 = arith.constant 0 : index
    %c0_520 = arith.constant 0 : index
    %1238 = vector.load %arg37[%c0_519, %c0_520] : memref<1x32xf32, #tpu.memory_space<vmem>>, vector<1x32xf32>
    %c0_521 = arith.constant 0 : index
    %c0_522 = arith.constant 0 : index
    %1239 = vector.load %arg38[%c0_521, %c0_522] : memref<1x32xf32, #tpu.memory_space<vmem>>, vector<1x32xf32>
    %cst_523 = arith.constant dense<0.000000e+00> : vector<1xf32>
    %1240 = vector.multi_reduction <add>, %1237, %cst_523 [1] : vector<1x32xf32> to vector<1xf32>
    %1241 = vector.shape_cast %1240 : vector<1xf32> to vector<1x1xf32>
    %cst_524 = arith.constant 3.200000e+01 : f32
    %1242 = vector.broadcast %cst_524 : f32 to vector<1x1xf32>
    %1243 = arith.divf %1241, %1242 : vector<1x1xf32>
    %1244 = vector.broadcast %1243 : vector<1x1xf32> to vector<1x32xf32>
    %1245 = arith.subf %1237, %1244 : vector<1x32xf32>
    %1246 = arith.mulf %1245, %1245 : vector<1x32xf32>
    %cst_525 = arith.constant dense<0.000000e+00> : vector<1xf32>
    %1247 = vector.multi_reduction <add>, %1246, %cst_525 [1] : vector<1x32xf32> to vector<1xf32>
    %1248 = vector.shape_cast %1247 : vector<1xf32> to vector<1x1xf32>
    %cst_526 = arith.constant 3.200000e+01 : f32
    %1249 = vector.broadcast %cst_526 : f32 to vector<1x1xf32>
    %1250 = arith.divf %1248, %1249 : vector<1x1xf32>
    %cst_527 = arith.constant 9.99999974E-6 : f32
    %1251 = vector.broadcast %cst_527 : f32 to vector<1x1xf32>
    %1252 = arith.addf %1250, %1251 : vector<1x1xf32>
    %1253 = math.rsqrt %1252 : vector<1x1xf32>
    %1254 = vector.broadcast %1253 : vector<1x1xf32> to vector<1x32xf32>
    %1255 = arith.mulf %1245, %1254 : vector<1x32xf32>
    %1256 = arith.mulf %1255, %1238 : vector<1x32xf32>
    %1257 = arith.addf %1256, %1239 : vector<1x32xf32>
    %c0_528 = arith.constant 0 : index
    %c0_529 = arith.constant 0 : index
    %1258 = vector.load %arg39[%c0_528, %c0_529] : memref<32x8xf32, #tpu.memory_space<vmem>>, vector<32x8xf32>
    %cst_530 = arith.constant dense<0.000000e+00> : vector<1x8xf32>
    %1259 = tpu.matmul %1257, %1258, %cst_530 {dimension_numbers = #tpu.dot_dimension_numbers<[1], [0], [0], [1], [0, 0, 1, 1], [], []>} : vector<1x32xf32>, vector<32x8xf32>, vector<1x8xf32> -> vector<1x8xf32>
    %c0_531 = arith.constant 0 : index
    %c0_532 = arith.constant 0 : index
    %1260 = vector.load %arg40[%c0_531, %c0_532] : memref<1x8xf32, #tpu.memory_space<vmem>>, vector<1x8xf32>
    %1261 = arith.addf %1259, %1260 : vector<1x8xf32>
    %c0_533 = arith.constant 0 : index
    %c0_534 = arith.constant 0 : index
    %c0_535 = arith.constant 0 : index
    %1262 = vector.load %arg41[%c0_533, %c0_534, %c0_535] : memref<1x1x8xf32, #tpu.memory_space<vmem>>, vector<1x1x8xf32>
    %1263 = vector.shape_cast %1262 : vector<1x1x8xf32> to vector<1x8xf32>
    %1264 = vector.shape_cast %1261 : vector<1x8xf32> to vector<1x1x8xf32>
    tpu.vector_store %arg41[%c0_533, %c0_534, %c0_535], %1264 {strides = array<i32>} : memref<1x1x8xf32, #tpu.memory_space<vmem>>, vector<1x1x8xf32>,
    return
  }
  func.func @transform_0(%arg0: i32) -> (i32, i32, i32) {
    %c0_i32 = arith.constant 0 : i32
    %c0_i32_0 = arith.constant 0 : i32
    %c0_i32_1 = arith.constant 0 : i32
    return %arg0, %c0_i32, %c0_i32_0 : i32, i32, i32
  }
  func.func @transform_1(%arg0: i32) -> (i32, i32) {
    %c0_i32 = arith.constant 0 : i32
    %c0_i32_0 = arith.constant 0 : i32
    %c0_i32_1 = arith.constant 0 : i32
    return %c0_i32, %c0_i32_0 : i32, i32
  }
  func.func @transform_2(%arg0: i32) -> (i32, i32) {
    %c0_i32 = arith.constant 0 : i32
    %c0_i32_0 = arith.constant 0 : i32
    %c0_i32_1 = arith.constant 0 : i32
    return %c0_i32, %c0_i32_0 : i32, i32
  }
  func.func @transform_3(%arg0: i32) -> (i32, i32) {
    %c0_i32 = arith.constant 0 : i32
    %c0_i32_0 = arith.constant 0 : i32
    %c0_i32_1 = arith.constant 0 : i32
    return %c0_i32, %c0_i32_0 : i32, i32
  }
  func.func @transform_4(%arg0: i32) -> (i32, i32, i32, i32) {
    %c0_i32 = arith.constant 0 : i32
    %c0_i32_0 = arith.constant 0 : i32
    %c0_i32_1 = arith.constant 0 : i32
    %c0_i32_2 = arith.constant 0 : i32
    %c0_i32_3 = arith.constant 0 : i32
    return %c0_i32, %c0_i32_0, %c0_i32_1, %c0_i32_2 : i32, i32, i32, i32
  }
  func.func @transform_5(%arg0: i32) -> (i32, i32, i32, i32) {
    %c0_i32 = arith.constant 0 : i32
    %c0_i32_0 = arith.constant 0 : i32
    %c0_i32_1 = arith.constant 0 : i32
    %c0_i32_2 = arith.constant 0 : i32
    %c0_i32_3 = arith.constant 0 : i32
    return %c0_i32, %c0_i32_0, %c0_i32_1, %c0_i32_2 : i32, i32, i32, i32
  }
  func.func @transform_6(%arg0: i32) -> (i32, i32, i32) {
    %c0_i32 = arith.constant 0 : i32
    %c0_i32_0 = arith.constant 0 : i32
    %c0_i32_1 = arith.constant 0 : i32
    %c0_i32_2 = arith.constant 0 : i32
    return %c0_i32, %c0_i32_0, %c0_i32_1 : i32, i32, i32
  }
  func.func @transform_7(%arg0: i32) -> (i32, i32, i32) {
    %c0_i32 = arith.constant 0 : i32
    %c0_i32_0 = arith.constant 0 : i32
    %c0_i32_1 = arith.constant 0 : i32
    %c0_i32_2 = arith.constant 0 : i32
    return %c0_i32, %c0_i32_0, %c0_i32_1 : i32, i32, i32
  }
  func.func @transform_8(%arg0: i32) -> (i32, i32, i32) {
    %c0_i32 = arith.constant 0 : i32
    %c0_i32_0 = arith.constant 0 : i32
    %c0_i32_1 = arith.constant 0 : i32
    %c0_i32_2 = arith.constant 0 : i32
    return %c0_i32, %c0_i32_0, %c0_i32_1 : i32, i32, i32
  }
  func.func @transform_9(%arg0: i32) -> (i32, i32, i32) {
    %c0_i32 = arith.constant 0 : i32
    %c0_i32_0 = arith.constant 0 : i32
    %c0_i32_1 = arith.constant 0 : i32
    %c0_i32_2 = arith.constant 0 : i32
    return %c0_i32, %c0_i32_0, %c0_i32_1 : i32, i32, i32
  }
  func.func @transform_10(%arg0: i32) -> (i32, i32, i32) {
    %c0_i32 = arith.constant 0 : i32
    %c0_i32_0 = arith.constant 0 : i32
    %c0_i32_1 = arith.constant 0 : i32
    %c0_i32_2 = arith.constant 0 : i32
    return %c0_i32, %c0_i32_0, %c0_i32_1 : i32, i32, i32
  }
  func.func @transform_11(%arg0: i32) -> (i32, i32, i32) {
    %c0_i32 = arith.constant 0 : i32
    %c0_i32_0 = arith.constant 0 : i32
    %c0_i32_1 = arith.constant 0 : i32
    %c0_i32_2 = arith.constant 0 : i32
    return %c0_i32, %c0_i32_0, %c0_i32_1 : i32, i32, i32
  }
  func.func @transform_12(%arg0: i32) -> (i32, i32, i32) {
    %c0_i32 = arith.constant 0 : i32
    %c0_i32_0 = arith.constant 0 : i32
    %c0_i32_1 = arith.constant 0 : i32
    %c0_i32_2 = arith.constant 0 : i32
    return %c0_i32, %c0_i32_0, %c0_i32_1 : i32, i32, i32
  }
  func.func @transform_13(%arg0: i32) -> (i32, i32, i32) {
    %c0_i32 = arith.constant 0 : i32
    %c0_i32_0 = arith.constant 0 : i32
    %c0_i32_1 = arith.constant 0 : i32
    %c0_i32_2 = arith.constant 0 : i32
    return %c0_i32, %c0_i32_0, %c0_i32_1 : i32, i32, i32
  }
  func.func @transform_14(%arg0: i32) -> (i32, i32, i32) {
    %c0_i32 = arith.constant 0 : i32
    %c0_i32_0 = arith.constant 0 : i32
    %c0_i32_1 = arith.constant 0 : i32
    %c0_i32_2 = arith.constant 0 : i32
    return %c0_i32, %c0_i32_0, %c0_i32_1 : i32, i32, i32
  }
  func.func @transform_15(%arg0: i32) -> (i32, i32, i32) {
    %c0_i32 = arith.constant 0 : i32
    %c0_i32_0 = arith.constant 0 : i32
    %c0_i32_1 = arith.constant 0 : i32
    %c0_i32_2 = arith.constant 0 : i32
    return %c0_i32, %c0_i32_0, %c0_i32_1 : i32, i32, i32
  }
  func.func @transform_16(%arg0: i32) -> (i32, i32) {
    %c0_i32 = arith.constant 0 : i32
    %c0_i32_0 = arith.constant 0 : i32
    %c0_i32_1 = arith.constant 0 : i32
    return %c0_i32, %c0_i32_0 : i32, i32
  }
  func.func @transform_17(%arg0: i32) -> (i32, i32) {
    %c0_i32 = arith.constant 0 : i32
    %c0_i32_0 = arith.constant 0 : i32
    %c0_i32_1 = arith.constant 0 : i32
    return %c0_i32, %c0_i32_0 : i32, i32
  }
  func.func @transform_18(%arg0: i32) -> (i32, i32, i32, i32) {
    %c0_i32 = arith.constant 0 : i32
    %c0_i32_0 = arith.constant 0 : i32
    %c0_i32_1 = arith.constant 0 : i32
    %c0_i32_2 = arith.constant 0 : i32
    %c0_i32_3 = arith.constant 0 : i32
    return %c0_i32, %c0_i32_0, %c0_i32_1, %c0_i32_2 : i32, i32, i32, i32
  }
  func.func @transform_19(%arg0: i32) -> (i32, i32, i32, i32) {
    %c0_i32 = arith.constant 0 : i32
    %c0_i32_0 = arith.constant 0 : i32
    %c0_i32_1 = arith.constant 0 : i32
    %c0_i32_2 = arith.constant 0 : i32
    %c0_i32_3 = arith.constant 0 : i32
    return %c0_i32, %c0_i32_0, %c0_i32_1, %c0_i32_2 : i32, i32, i32, i32
  }
  func.func @transform_20(%arg0: i32) -> (i32, i32, i32) {
    %c0_i32 = arith.constant 0 : i32
    %c0_i32_0 = arith.constant 0 : i32
    %c0_i32_1 = arith.constant 0 : i32
    %c0_i32_2 = arith.constant 0 : i32
    return %c0_i32, %c0_i32_0, %c0_i32_1 : i32, i32, i32
  }
  func.func @transform_21(%arg0: i32) -> (i32, i32, i32) {
    %c0_i32 = arith.constant 0 : i32
    %c0_i32_0 = arith.constant 0 : i32
    %c0_i32_1 = arith.constant 0 : i32
    %c0_i32_2 = arith.constant 0 : i32
    return %c0_i32, %c0_i32_0, %c0_i32_1 : i32, i32, i32
  }
  func.func @transform_22(%arg0: i32) -> (i32, i32, i32) {
    %c0_i32 = arith.constant 0 : i32
    %c0_i32_0 = arith.constant 0 : i32
    %c0_i32_1 = arith.constant 0 : i32
    %c0_i32_2 = arith.constant 0 : i32
    return %c0_i32, %c0_i32_0, %c0_i32_1 : i32, i32, i32
  }
  func.func @transform_23(%arg0: i32) -> (i32, i32, i32) {
    %c0_i32 = arith.constant 0 : i32
    %c0_i32_0 = arith.constant 0 : i32
    %c0_i32_1 = arith.constant 0 : i32
    %c0_i32_2 = arith.constant 0 : i32
    return %c0_i32, %c0_i32_0, %c0_i32_1 : i32, i32, i32
  }
  func.func @transform_24(%arg0: i32) -> (i32, i32, i32, i32) {
    %c0_i32 = arith.constant 0 : i32
    %c0_i32_0 = arith.constant 0 : i32
    %c0_i32_1 = arith.constant 0 : i32
    %c0_i32_2 = arith.constant 0 : i32
    %c0_i32_3 = arith.constant 0 : i32
    return %c0_i32, %c0_i32_0, %c0_i32_1, %c0_i32_2 : i32, i32, i32, i32
  }
  func.func @transform_25(%arg0: i32) -> (i32, i32, i32, i32) {
    %c0_i32 = arith.constant 0 : i32
    %c0_i32_0 = arith.constant 0 : i32
    %c0_i32_1 = arith.constant 0 : i32
    %c0_i32_2 = arith.constant 0 : i32
    %c0_i32_3 = arith.constant 0 : i32
    return %c0_i32, %c0_i32_0, %c0_i32_1, %c0_i32_2 : i32, i32, i32, i32
  }
  func.func @transform_26(%arg0: i32) -> (i32, i32, i32) {
    %c0_i32 = arith.constant 0 : i32
    %c0_i32_0 = arith.constant 0 : i32
    %c0_i32_1 = arith.constant 0 : i32
    %c0_i32_2 = arith.constant 0 : i32
    return %c0_i32, %c0_i32_0, %c0_i32_1 : i32, i32, i32
  }
  func.func @transform_27(%arg0: i32) -> (i32, i32, i32) {
    %c0_i32 = arith.constant 0 : i32
    %c0_i32_0 = arith.constant 0 : i32
    %c0_i32_1 = arith.constant 0 : i32
    %c0_i32_2 = arith.constant 0 : i32
    return %c0_i32, %c0_i32_0, %c0_i32_1 : i32, i32, i32
  }
  func.func @transform_28(%arg0: i32) -> (i32, i32, i32) {
    %c0_i32 = arith.constant 0 : i32
    %c0_i32_0 = arith.constant 0 : i32
    %c0_i32_1 = arith.constant 0 : i32
    %c0_i32_2 = arith.constant 0 : i32
    return %c0_i32, %c0_i32_0, %c0_i32_1 : i32, i32, i32
  }
  func.func @transform_29(%arg0: i32) -> (i32, i32, i32) {
    %c0_i32 = arith.constant 0 : i32
    %c0_i32_0 = arith.constant 0 : i32
    %c0_i32_1 = arith.constant 0 : i32
    %c0_i32_2 = arith.constant 0 : i32
    return %c0_i32, %c0_i32_0, %c0_i32_1 : i32, i32, i32
  }
  func.func @transform_30(%arg0: i32) -> (i32, i32, i32) {
    %c0_i32 = arith.constant 0 : i32
    %c0_i32_0 = arith.constant 0 : i32
    %c0_i32_1 = arith.constant 0 : i32
    %c0_i32_2 = arith.constant 0 : i32
    return %c0_i32, %c0_i32_0, %c0_i32_1 : i32, i32, i32
  }
  func.func @transform_31(%arg0: i32) -> (i32, i32, i32) {
    %c0_i32 = arith.constant 0 : i32
    %c0_i32_0 = arith.constant 0 : i32
    %c0_i32_1 = arith.constant 0 : i32
    %c0_i32_2 = arith.constant 0 : i32
    return %c0_i32, %c0_i32_0, %c0_i32_1 : i32, i32, i32
  }
  func.func @transform_32(%arg0: i32) -> (i32, i32, i32) {
    %c0_i32 = arith.constant 0 : i32
    %c0_i32_0 = arith.constant 0 : i32
    %c0_i32_1 = arith.constant 0 : i32
    %c0_i32_2 = arith.constant 0 : i32
    return %c0_i32, %c0_i32_0, %c0_i32_1 : i32, i32, i32
  }
  func.func @transform_33(%arg0: i32) -> (i32, i32, i32) {
    %c0_i32 = arith.constant 0 : i32
    %c0_i32_0 = arith.constant 0 : i32
    %c0_i32_1 = arith.constant 0 : i32
    %c0_i32_2 = arith.constant 0 : i32
    return %c0_i32, %c0_i32_0, %c0_i32_1 : i32, i32, i32
  }
  func.func @transform_34(%arg0: i32) -> (i32, i32, i32) {
    %c0_i32 = arith.constant 0 : i32
    %c0_i32_0 = arith.constant 0 : i32
    %c0_i32_1 = arith.constant 0 : i32
    %c0_i32_2 = arith.constant 0 : i32
    return %c0_i32, %c0_i32_0, %c0_i32_1 : i32, i32, i32
  }
  func.func @transform_35(%arg0: i32) -> (i32, i32, i32) {
    %c0_i32 = arith.constant 0 : i32
    %c0_i32_0 = arith.constant 0 : i32
    %c0_i32_1 = arith.constant 0 : i32
    %c0_i32_2 = arith.constant 0 : i32
    return %c0_i32, %c0_i32_0, %c0_i32_1 : i32, i32, i32
  }
  func.func @transform_36(%arg0: i32) -> (i32, i32) {
    %c0_i32 = arith.constant 0 : i32
    %c0_i32_0 = arith.constant 0 : i32
    %c0_i32_1 = arith.constant 0 : i32
    return %c0_i32, %c0_i32_0 : i32, i32
  }
  func.func @transform_37(%arg0: i32) -> (i32, i32) {
    %c0_i32 = arith.constant 0 : i32
    %c0_i32_0 = arith.constant 0 : i32
    %c0_i32_1 = arith.constant 0 : i32
    return %c0_i32, %c0_i32_0 : i32, i32
  }
  func.func @transform_38(%arg0: i32) -> (i32, i32) {
    %c0_i32 = arith.constant 0 : i32
    %c0_i32_0 = arith.constant 0 : i32
    %c0_i32_1 = arith.constant 0 : i32
    return %c0_i32, %c0_i32_0 : i32, i32
  }
  func.func @transform_39(%arg0: i32) -> (i32, i32) {
    %c0_i32 = arith.constant 0 : i32
    %c0_i32_0 = arith.constant 0 : i32
    %c0_i32_1 = arith.constant 0 : i32
    return %c0_i32, %c0_i32_0 : i32, i32
  }
  func.func @transform_40(%arg0: i32) -> (i32, i32, i32) {
    %c0_i32 = arith.constant 0 : i32
    %c0_i32_0 = arith.constant 0 : i32
    %c0_i32_1 = arith.constant 0 : i32
    return %arg0, %c0_i32, %c0_i32_0 : i32, i32, i32
  }
}

</mosaic_0001>

<bundles_post_ra>
// kernel: transformer_model_forward.1
= control target key start
LH: loop header
LB: loop body
LE: loop exit
PB: predicated region body
PF: predicated region fallthrough
CT: control target
= control target key end

     0   :  { %s17168_s6 = smov 1   ;;  %s17169_s10 = smov 2   ;;  %s19050_s0 = inlined_call_operand.smem [shape: u32[41], index: -1, kind: input, shape index: {}] }
   0x1   :  { %s17260_s5 = sld [smem:[%s19050_s0]]   ;;  %s17170_s14 = smov 3  }
   0x2   :  { %s17265_s9 = sld [smem:[%s19050_s0 + %s17168_s6]]   ;;  %s17171_s18 = smov 4  }
   0x3   :  { %s17270_s13 = sld [smem:[%s19050_s0 + %s17169_s10]]   ;;  %s17172_s22 = smov 5  }
   0x4   :  { %s17275_s17 = sld [smem:[%s19050_s0 + %s17170_s14]]   ;;  %s17173_s26 = smov 6  }
   0x5   :  { %s17280_s21 = sld [smem:[%s19050_s0 + %s17171_s18]]   ;;  %s17174_s30 = smov 7  }
   0x6   :  { %s17285_s25 = sld [smem:[%s19050_s0 + %s17172_s22]]   ;;  %s17175_s4 = smov 8  }
   0x7   :  { %19120 = sst [smem:[#allocation72_spill]] %s17260_s5  ;;  %s17176_s10 = smov 9  }
   0x8   :  { %19121 = sst [smem:[#allocation73_spill]] %s17265_s9  ;;  %s17177_s15 = smov 10  }
   0x9   :  { %19122 = sst [smem:[#allocation74_spill]] %s17270_s13  ;;  %s17178_s20 = smov 11  }
   0xa   :  { %19123 = sst [smem:[#allocation75_spill]] %s17275_s17  ;;  %s17180_s1 = smov 13  }
   0xb   :  { %s17290_s29 = sld [smem:[%s19050_s0 + %s17173_s26]]   ;;  %s17179_s26 = smov 12  }
   0xc   :  { %19124 = sst [smem:[#allocation76_spill]] %s17285_s25  ;;  %s17181_s7 = smov 14  }
   0xd   :  { %s17295_s3 = sld [smem:[%s19050_s0 + %s17174_s30]]   ;;  %s17183_s22 = smov 16  }
   0xe   :  { %s17300_s8 = sld [smem:[%s19050_s0 + %s17175_s4]]   ;;  %s17184_s28 = smov 17  }
   0xf   :  { %s17305_s14 = sld [smem:[%s19050_s0 + %s17176_s10]]  }
  0x10   :  { %s17310_s19 = sld [smem:[%s19050_s0 + %s17177_s15]]   ;;  %s17182_s15 = smov 15  }
  0x11   :  { %s17315_s24 = sld [smem:[%s19050_s0 + %s17178_s20]]  }
  0x12   :  { %s17320_s30 = sld [smem:[%s19050_s0 + %s17179_s26]]  }
  0x13   :  { %19125 = sst [smem:[#allocation77_spill]] %s17295_s3 }
  0x14   :  { %19126 = sst [smem:[#allocation78_spill]] %s17300_s8 }
  0x15   :  { %19127 = sst [smem:[#allocation79_spill]] %s17305_s14 }
  0x16   :  { %s17325_s6 = sld [smem:[%s19050_s0 + %s17180_s1]]  }
  0x17   :  { %19128 = sst [smem:[#allocation80_spill]] %s17315_s24 }
  0x18   :  { %s17330_s12 = sld [smem:[%s19050_s0 + %s17181_s7]]   ;;  %s17185_s7 = smov 18  }
  0x19   :  { %s17335_s20 = sld [smem:[%s19050_s0 + %s17182_s15]]   ;;  %s17186_s15 = smov 19  }
  0x1a   :  { %s17340_s27 = sld [smem:[%s19050_s0 + %s17183_s22]]   ;;  %s17187_s22 = smov 20  }
  0x1b   :  { %s17345_s4 = sld [smem:[%s19050_s0 + %s17184_s28]]   ;;  %s17188_s28 = smov 21  }
  0x1c   :  { %19129 = sst [smem:[#allocation81_spill]] %s17325_s6 }
  0x1d   :  { %s17350_s17 = sld [smem:[%s19050_s0 + %s17185_s7]]   ;;  %s17189_s7 = smov 22  }
  0x1e   :  { %19130 = sst [smem:[#allocation82_spill]] %s17330_s12 }
  0x1f   :  { %19131 = sst [smem:[#allocation83_spill]] %s17335_s20 }
  0x20   :  { %s17355_s5 = sld [smem:[%s19050_s0 + %s17186_s15]]   ;;  %s17190_s15 = smov 23  }
  0x21   :  { %19132 = sst [smem:[#allocation84_spill]] %s17345_s4 }
  0x22   :  { %s17360_s20 = sld [smem:[%s19050_s0 + %s17187_s22]]   ;;  %s17191_s22 = smov 24  }
  0x23   :  { %19133 = sst [smem:[#allocation85_spill]] %s17350_s17 }
  0x24   :  { %s17365_s4 = sld [smem:[%s19050_s0 + %s17188_s28]]   ;;  %s17192_s28 = smov 25  }
  0x25   :  { %s17370_s17 = sld [smem:[%s19050_s0 + %s17189_s7]]   ;;  %s17193_s7 = smov 26  }
  0x26   :  { %19134 = sst [smem:[#allocation86_spill]] %s17355_s5 }
  0x27   :  { %s17375_s6 = sld [smem:[%s19050_s0 + %s17190_s15]]   ;;  %s17194_s15 = smov 27  }
  0x28   :  { %19135 = sst [smem:[#allocation87_spill]] %s17360_s20 }
  0x29   :  { %s17380_s20 = sld [smem:[%s19050_s0 + %s17191_s22]]   ;;  %s17195_s22 = smov 28  }
  0x2a   :  { %19136 = sst [smem:[#allocation88_spill]] %s17365_s4 }
  0x2b   :  { %19137 = sst [smem:[#allocation89_spill]] %s17370_s17 }
  0x2c   :  { %s17385_s24 = sld [smem:[%s19050_s0 + %s17192_s28]]   ;;  %s17196_s28 = smov 29  }
  0x2d   :  { %19138 = sst [smem:[#allocation90_spill]] %s17375_s6 }
  0x2e   :  { %s17390_s17 = sld [smem:[%s19050_s0 + %s17193_s7]]   ;;  %s17197_s7 = smov 30  }
  0x2f   :  { %19139 = sst [smem:[#allocation91_spill]] %s17380_s20 }
  0x30   :  { %s17395_s14 = sld [smem:[%s19050_s0 + %s17194_s15]]   ;;  %s17198_s15 = smov 31  }
  0x31   :  { %s17400_s20 = sld [smem:[%s19050_s0 + %s17195_s22]]   ;;  %s17199_s22 = smov 32  }
  0x32   :  { %19140 = sst [smem:[#allocation92_spill]] %s17385_s24 }
  0x33   :  { %s17405_s24 = sld [smem:[%s19050_s0 + %s17196_s28]]   ;;  %s17200_s28 = smov 33  }
  0x34   :  { %19141 = sst [smem:[#allocation93_spill]] %s17390_s17 }
  0x35   :  { %s17410_s3 = sld [smem:[%s19050_s0 + %s17197_s7]]   ;;  %s17201_s7 = smov 34  }
  0x36   :  { %19142 = sst [smem:[#allocation94_spill]] %s17395_s14 }
  0x37   :  { %19143 = sst [smem:[#allocation95_spill]] %s17400_s20 }
  0x38   :  { %s17415_s14 = sld [smem:[%s19050_s0 + %s17198_s15]]   ;;  %s17202_s15 = smov 35  }
  0x39   :  { %s17420_s20 = sld [smem:[%s19050_s0 + %s17199_s22]]   ;;  %s17203_s22 = smov 36  }
  0x3a   :  { %s17425_s25 = sld [smem:[%s19050_s0 + %s17200_s28]]   ;;  %s17204_s28 = smov 37  }
  0x3b   :  { %19144 = sst [smem:[#allocation96_spill]] %s17410_s3 }
  0x3c   :  { %s17430_s3 = sld [smem:[%s19050_s0 + %s17201_s7]]   ;;  %s17205_s7 = smov 38  }
  0x3d   :  { %s17440_s13 = sld [smem:[%s19050_s0 + %s17203_s22]]   ;;  %s17207_s22 = smov 40  }
  0x3e   :  { %19145 = sst [smem:[#allocation97_spill]] %s17415_s14 }
  0x3f   :  { %s17435_s14 = sld [smem:[%s19050_s0 + %s17202_s15]]   ;;  %s17206_s15 = smov 39  }
  0x40   :  { %19146 = sst [smem:[#allocation98_spill]] %s17425_s25 }
  0x41   :  { %s17445_s25 = sld [smem:[%s19050_s0 + %s17204_s28]]  }
  0x42   :  { %19147 = sst [smem:[#allocation99_spill]] %s17430_s3 }
  0x43   :  { %19149 = sst [smem:[#allocation101_spill]] %s17440_s13 }
  0x44   :  { %s17450_s3 = sld [smem:[%s19050_s0 + %s17205_s7]]  }
  0x45   :  { %19148 = sst [smem:[#allocation100_spill]] %s17435_s14 }
  0x46   :  { %s17455_s14 = sld [smem:[%s19050_s0 + %s17206_s15]]  }
  0x47   :  { %s17460_s13 = sld [smem:[%s19050_s0 + %s17207_s22]]  }
  0x4a   :  { %19150 = sst [smem:[#allocation102_spill]] %s17450_s3 }
  0x4d   :  { %19151 = sst [smem:[#allocation103_spill]] %s17460_s13 }
  0x4e   :  { %86 = vsyncpa [#allocation3], 0 }
  0x4f   :  { %88 = vsyncpa [#allocation3 + $0x1], 0 }
  0x50   :  { %89 = vsyncpa [#allocation6], 0 }
  0x51   :  { %90 = vsyncpa [#allocation9], 0 }
  0x52   :  { %91 = vsyncpa [#allocation12], 0 }
  0x53   :  { %92 = vsyncpa [#allocation15], 0 }
  0x54   :  { %93 = vsyncpa [#allocation18], 0 }
  0x55   :  { %94 = vsyncpa [#allocation21], 0 }
  0x56   :  { %95 = vsyncpa [#allocation24], 0 }
  0x57   :  { %96 = vsyncpa [#allocation27], 0 }
  0x58   :  { %97 = vsyncpa [#allocation30], 0 }
  0x59   :  { %98 = vsyncpa [#allocation33], 0 }
  0x5a   :  { %99 = vsyncpa [#allocation36], 0 }
  0x5b   :  { %100 = vsyncpa [#allocation39], 0 }
  0x5c   :  { %101 = vsyncpa [#allocation42], 0 }
  0x5d   :  { %102 = vsyncpa [#allocation45], 0 }
  0x5e   :  { %103 = vsyncpa [#allocation48], 0 }
  0x5f   :  { %104 = vsyncpa [#allocation51], 0 }
  0x60   :  { %105 = vsyncpa [#allocation4], 0 }
  0x61   :  { %107 = vsyncpa [#allocation4 + $0x1], 0  ;;  %s17462_s0 = smov 0   ;;  %s17464_s28 = smov 0  }
  0x62   :  { %s17466_s1 = smov 0   ;;  %s17468_s2 = smov 0  }
  0x63 LB: > { %s19152_s17 = sld [smem:[#allocation93_spill]]  ;;  %s19153_s12 = sld [smem:[#allocation82_spill]]  ;;  %s17162_s1 = sphi %s17466_s1, %s19245_s1   ;;  %s17158_s28 = sphi %s17464_s28, %s19244_s28   ;;  %s17154_s0 = sphi %s17462_s0, %s19243_s0   ;;  %s17166_s2 = sphi %s17468_s2, %s19241_s2  }
  0x64   : > { %s19154_s9 = sld [smem:[#allocation73_spill]]  ;;  %s19155_s8 = sld [smem:[#allocation78_spill]] }
  0x65   : > { %s19156_s6 = sld [smem:[#allocation90_spill]]  ;;  %s19157_s5 = sld [smem:[#allocation86_spill]] }
  0x66   : > { %s19158_s4 = sld [smem:[#allocation88_spill]]  ;;  %19159 = sst [smem:[#allocation104_spill]] %s17154_s0 }
  0x67   : > { %s17483_s7 = sadd.s32 4294967295, %s17166_s2   ;;  %s14011_s10 = sadd.s32 4294967294, %s17166_s2  }
  0x68   : > { %s17487_s11 = sadd.s32 1, %s17166_s2   ;;  %s120_s15 = sadd.s32 1, %s17162_s1 }
  0x69   : > { %19160 = sst [smem:[#allocation105_spill]] %s17487_s11  ;;  %s117_s16 = ssub.s32 %s17166_s2, %s17487_s11 }
  0x6a   : > { %p127_p0 = scmp.ne.s32.totalorder %s17162_s1, %s17158_s28  ;;  %p118_p1 = scmp.eq.s32.totalorder %s117_s16, 0 }
  0x6b   : > { %p128_p2 = scmp.eq.s32.totalorder %s17166_s2, 0  ;;  %p133_p3 = scmp.ne.s32.totalorder %s17158_s28, %s17154_s0 }
  0x6c   : > { %p19113_p4 = scmp.eq.s32.totalorder %s17483_s7, 0  ;;  %p976_p7 = scmp.eq.s32.totalorder %s17483_s7, 1 }
  0x6d   : > { %s17499_s18 = scalar_select %p118_p1, %s17162_s1, %s120_s15  }
  0x6e   : > { %p17501_p5 = por %p128_p2, %p127_p0  ;;  %p17507_p6 = por %p19113_p4, %p133_p3 }
  0x6f   : > { %19161 = sst [smem:[#allocation106_spill]] %s17499_s18  ;;  %p982_p8 = scmp.eq.s32.totalorder %s14011_s10, 1 }
  0x70   : > { %s19163_s23 = scalar_select %p17507_p6, 1, 0 }
  0x71   : > { %p14012_p9 = scmp.ge.s32.totalorder %s17166_s2, 1  ;;  %p989_p10 = scmp.lt.s32.totalorder %s17166_s2, 3 }
  0x72   : > { %19164 = sst [smem:[#allocation107_spill]] %s19163_s23  ;;  %p17514_p11 = por %p976_p7, %p127_p0 }
  0x73   : > { %p17518_p12 = por %p982_p8, %p133_p3  ;;  %p17522_p13 = pnand %p14012_p9, %p989_p10 }
  0x74   : > { %s19165_s26 = scalar_select %p17514_p11, 1, 0 }
  0x75   : > { %s19167_s15 = scalar_select %p17518_p12, 1, 0 }
  0x76   : > { %19166 = sst [smem:[#allocation108_spill]] %s19165_s26  ;;  %993 = sbr.rel (%p17522_p13) target bundleno = 893 (0x37d), region = 12 }
  0x77   : > { %19168 = sst [smem:[#allocation109_spill]] %s19167_s15  ;;  %s17208_s18 = smov (!%p17522_p13), [#allocation5]  }
  0x78   : > { %s19169_s16 = scalar_select %p17522_p13, 1, 0 }
  0x79   : > { %s1001_s10 = sshll.u32 (!%p17522_p13), %s17208_s18, 4  ;;  %s16174_s11 = scalar_lea.hbm (!%p17522_p13), %s19154_s9, 256  ;;  %s1002_s10 = int_to_ptr.vmem [resolvable:$true] %s1001_s10 }
  0x7a   : > { %p16175_p0 = scmp.ne.s32.totalorder (!%p17522_p13), %s19154_s9, %s16174_s11  ;;  %p16180_p3 = scmp.lt.u32.totalorder (!%p17522_p13), %s16174_s11, %s19154_s9 }
  0x7c   : > { %p16176_p1 = pnand (!%p17522_p13), %p16175_p0, %p19113_p4 }
  0x7e   : > { %p16177_p2 = pneg %p16176_p1 }
  0x80   : > { %p16182_p7 = pnand %p16180_p3, %p16177_p2 }
  0x82   : > { %16185 = shalt.err (!%p16182_p7)
}
  0x83   : > { %s16186_s15 = scalar_lea.vmem %s1002_s10, 256  ;;  %p16193_p12 = scmp.lt.s32.totalorder %s1002_s10, %s1002_s10 }
  0x84   : > { %p16187_p8 = scmp.ne.s32.totalorder %s1002_s10, %s16186_s15  ;;  %p16194_p11 = scmp.lt.s32.totalorder %s16186_s15, %s16186_s15 }
  0x86   : > { %p16188_p9 = pnand %p16187_p8, %p19113_p4  ;;  %p16195_p6 = por %p16194_p11, %p16193_p12 }
  0x88   : > { %p16189_p10 = pneg %p16188_p9 }
  0x8a   : > { %p16196_p13 = pnand %p16195_p6, %p16189_p10 }
  0x8c   : > { %16199 = shalt.err (!%p16196_p13)
}
  0x8d   : > { %s19094_s18 = smov 128   ;;  %s19086_s11 = smov 8  }
  0x8e   : > { %15735 = dma.hbm_to_vmem [thread:$0]  (%p19113_p4), %s19154_s9, 256, %s1002_s10, [#allocation6], %s19094_s18, %s19094_s18, %s19086_s11  }
  0x8f   : > { %s17211_s0 = smov [#allocation8]   ;;  %s17212_s13 = smov [#allocation11]  }
  0x90   : > { %s1028_s26 = sshll.u32 %s17211_s0, 4  ;;  %s1054_s15 = sshll.u32 %s17212_s13, 4  ;;  %s1029_s26 = int_to_ptr.vmem [resolvable:$true] %s1028_s26  ;;  %s17541_s15 = int_to_ptr.vmem [resolvable:$true] %s1054_s15 }
  0x91   : > { %s16200_s3 = scalar_lea.hbm %s17280_s21, 3072 }
  0x92   : > { %p16201_p6 = scmp.ne.s32.totalorder %s17280_s21, %s16200_s3  ;;  %p16206_p13 = scmp.lt.u32.totalorder %s16200_s3, %s17280_s21 }
  0x94   : > { %p16202_p11 = pnand %p16201_p6, %p19113_p4 }
  0x96   : > { %p16203_p12 = pneg %p16202_p11 }
  0x98   : > { %p16208_p0 = pnand %p16206_p13, %p16203_p12 }
  0x9a   : > { %16211 = shalt.err (!%p16208_p0)
}
  0x9b   : > { %s16212_s23 = scalar_lea.vmem %s1029_s26, 3072  ;;  %p16219_p7 = scmp.lt.s32.totalorder %s1029_s26, %s1029_s26 }
  0x9c   : > { %p16213_p1 = scmp.ne.s32.totalorder %s1029_s26, %s16212_s23  ;;  %p16220_p8 = scmp.lt.s32.totalorder %s16212_s23, %s16212_s23 }
  0x9e   : > { %p16214_p2 = pnand %p16213_p1, %p19113_p4  ;;  %p16221_p9 = por %p16220_p8, %p16219_p7 }
  0xa0   : > { %p16215_p3 = pneg %p16214_p2 }
  0xa2   : > { %p16222_p10 = pnand %p16221_p9, %p16215_p3 }
  0xa4   : > { %16225 = shalt.err (!%p16222_p10)
}
  0xa5   : > { %15739 = dma.hbm_to_vmem [thread:$0]  (%p19113_p4), %s17280_s21, 3072, %s1029_s26, [#allocation9], %s19094_s18, %s19094_s18, %s19086_s11  }
  0xa6   : > { %s16226_s13 = scalar_lea.hbm %s17290_s29, 1024 }
  0xa7   : > { %p16227_p6 = scmp.ne.s32.totalorder %s17290_s29, %s16226_s13  ;;  %p16232_p13 = scmp.lt.u32.totalorder %s16226_s13, %s17290_s29 }
  0xa9   : > { %p16228_p11 = pnand %p16227_p6, %p19113_p4 }
  0xab   : > { %p16229_p12 = pneg %p16228_p11 }
  0xad   : > { %p16234_p0 = pnand %p16232_p13, %p16229_p12 }
  0xaf   : > { %16237 = shalt.err (!%p16234_p0)
}
  0xb0   : > { %s16238_s3 = scalar_lea.vmem %s17541_s15, 1024  ;;  %p16245_p7 = scmp.lt.s32.totalorder %s17541_s15, %s17541_s15 }
  0xb1   : > { %p16239_p1 = scmp.ne.s32.totalorder %s17541_s15, %s16238_s3  ;;  %p16246_p8 = scmp.lt.s32.totalorder %s16238_s3, %s16238_s3 }
  0xb3   : > { %p16240_p2 = pnand %p16239_p1, %p19113_p4  ;;  %p16247_p9 = por %p16246_p8, %p16245_p7 }
  0xb5   : > { %p16241_p3 = pneg %p16240_p2 }
  0xb7   : > { %p16248_p10 = pnand %p16247_p9, %p16241_p3 }
  0xb9   : > { %16251 = shalt.err (!%p16248_p10)
}
  0xba   : > { %15743 = dma.hbm_to_vmem [thread:$0]  (%p19113_p4), %s17290_s29, 1024, %s17541_s15, [#allocation12], %s19094_s18, %s19094_s18, %s19086_s11  }
  0xbb   : > { %s17213_s0 = smov [#allocation14]   ;;  %s17214_s26 = smov [#allocation17]  }
  0xbc   : > { %s1080_s23 = sshll.u32 %s17213_s0, 4  ;;  %s1106_s10 = sshll.u32 %s17214_s26, 4  ;;  %s1081_s23 = int_to_ptr.vmem [resolvable:$true] %s1080_s23  ;;  %s17574_s10 = int_to_ptr.vmem [resolvable:$true] %s1106_s10 }
  0xbd   : > { %s16252_s13 = scalar_lea.hbm %s19155_s8, 32 }
  0xbe   : > { %p16253_p6 = scmp.ne.s32.totalorder %s19155_s8, %s16252_s13  ;;  %p16258_p13 = scmp.lt.u32.totalorder %s16252_s13, %s19155_s8 }
  0xc0   : > { %p16254_p11 = pnand %p16253_p6, %p19113_p4 }
  0xc2   : > { %p16255_p12 = pneg %p16254_p11 }
  0xc4   : > { %p16260_p0 = pnand %p16258_p13, %p16255_p12 }
  0xc6   : > { %16263 = shalt.err (!%p16260_p0)
}
  0xc7   : > { %s16264_s3 = scalar_lea.vmem %s1081_s23, 32  ;;  %p16271_p7 = scmp.lt.s32.totalorder %s1081_s23, %s1081_s23 }
  0xc8   : > { %p16265_p1 = scmp.ne.s32.totalorder %s1081_s23, %s16264_s3  ;;  %p16272_p8 = scmp.lt.s32.totalorder %s16264_s3, %s16264_s3 }
  0xca   : > { %p16266_p2 = pnand %p16265_p1, %p19113_p4  ;;  %p16273_p9 = por %p16272_p8, %p16271_p7 }
  0xcc   : > { %p16267_p3 = pneg %p16266_p2 }
  0xce   : > { %p16274_p10 = pnand %p16273_p9, %p16267_p3 }
  0xd0   : > { %16277 = shalt.err (!%p16274_p10)
}
  0xd1   : > { %s19088_s15 = smov 16   ;;  %s19090_s0 = smov 1  }
  0xd2   : > { %15747 = dma.hbm_to_vmem [thread:$0]  (%p19113_p4), %s19155_s8, 32, %s1081_s23, [#allocation15], %s19088_s15, %s19088_s15, %s19090_s0  }
  0xd3   : > { %s16278_s26 = scalar_lea.hbm %s17310_s19, 16384 }
  0xd4   : > { %p16279_p6 = scmp.ne.s32.totalorder %s17310_s19, %s16278_s26  ;;  %p16284_p13 = scmp.lt.u32.totalorder %s16278_s26, %s17310_s19 }
  0xd6   : > { %p16280_p11 = pnand %p16279_p6, %p19113_p4 }
  0xd8   : > { %p16281_p12 = pneg %p16280_p11 }
  0xda   : > { %p16286_p0 = pnand %p16284_p13, %p16281_p12 }
  0xdc   : > { %16289 = shalt.err (!%p16286_p0)
}
  0xdd   : > { %s16290_s13 = scalar_lea.vmem %s17574_s10, 16384  ;;  %p16297_p7 = scmp.lt.s32.totalorder %s17574_s10, %s17574_s10 }
  0xde   : > { %p16291_p1 = scmp.ne.s32.totalorder %s17574_s10, %s16290_s13  ;;  %p16298_p8 = scmp.lt.s32.totalorder %s16290_s13, %s16290_s13 }
  0xe0   : > { %p16292_p2 = pnand %p16291_p1, %p19113_p4  ;;  %p16299_p9 = por %p16298_p8, %p16297_p7 }
  0xe2   : > { %p16293_p3 = pneg %p16292_p2 }
  0xe4   : > { %p16300_p10 = pnand %p16299_p9, %p16293_p3 }
  0xe6   : > { %16303 = shalt.err (!%p16300_p10)
}
  0xe7   : > { %s19092_s23 = smov 2048   ;;  %s17218_s3 = smov [#allocation20]  }
  0xe8   : > { %15751 = dma.hbm_to_vmem [thread:$0]  (%p19113_p4), %s17310_s19, 16384, %s17574_s10, [#allocation18], %s19092_s23, %s19092_s23, %s19094_s18  }
  0xe9   : > { %s1132_s26 = sshll.u32 %s17218_s3, 4  ;;  %s17219_s13 = smov [#allocation23]   ;;  %s1133_s26 = int_to_ptr.vmem [resolvable:$true] %s1132_s26 }
  0xea   : > { %s1158_s11 = sshll.u32 %s17219_s13, 4  ;;  %s16304_s15 = scalar_lea.hbm %s17320_s30, 16384  ;;  %s1159_s11 = int_to_ptr.vmem [resolvable:$true] %s1158_s11 }
  0xeb   : > { %p16305_p6 = scmp.ne.s32.totalorder %s17320_s30, %s16304_s15  ;;  %p16310_p13 = scmp.lt.u32.totalorder %s16304_s15, %s17320_s30 }
  0xed   : > { %p16306_p11 = pnand %p16305_p6, %p19113_p4 }
  0xef   : > { %p16307_p12 = pneg %p16306_p11 }
  0xf1   : > { %p16312_p0 = pnand %p16310_p13, %p16307_p12 }
  0xf3   : > { %16315 = shalt.err (!%p16312_p0)
}
  0xf4   : > { %s16316_s0 = scalar_lea.vmem %s1133_s26, 16384  ;;  %p16323_p7 = scmp.lt.s32.totalorder %s1133_s26, %s1133_s26 }
  0xf5   : > { %p16317_p1 = scmp.ne.s32.totalorder %s1133_s26, %s16316_s0  ;;  %p16324_p8 = scmp.lt.s32.totalorder %s16316_s0, %s16316_s0 }
  0xf7   : > { %p16318_p2 = pnand %p16317_p1, %p19113_p4  ;;  %p16325_p9 = por %p16324_p8, %p16323_p7 }
  0xf9   : > { %p16319_p3 = pneg %p16318_p2 }
  0xfb   : > { %p16326_p10 = pnand %p16325_p9, %p16319_p3 }
  0xfd   : > { %16329 = shalt.err (!%p16326_p10)
}
  0xfe   : > { %15755 = dma.hbm_to_vmem [thread:$0]  (%p19113_p4), %s17320_s30, 16384, %s1133_s26, [#allocation21], %s19092_s23, %s19092_s23, %s19094_s18  }
  0xff   : > { %s16330_s10 = scalar_lea.hbm %s19153_s12, 32 }
 0x100   : > { %p16331_p6 = scmp.ne.s32.totalorder %s19153_s12, %s16330_s10  ;;  %p16336_p13 = scmp.lt.u32.totalorder %s16330_s10, %s19153_s12 }
 0x102   : > { %p16332_p11 = pnand %p16331_p6, %p19113_p4 }
 0x104   : > { %p16333_p12 = pneg %p16332_p11 }
 0x106   : > { %p16338_p0 = pnand %p16336_p13, %p16333_p12 }
 0x108   : > { %16341 = shalt.err (!%p16338_p0)
}
 0x109   : > { %s16342_s15 = scalar_lea.vmem %s1159_s11, 32  ;;  %p16349_p7 = scmp.lt.s32.totalorder %s1159_s11, %s1159_s11 }
 0x10a   : > { %p16343_p1 = scmp.ne.s32.totalorder %s1159_s11, %s16342_s15  ;;  %p16350_p8 = scmp.lt.s32.totalorder %s16342_s15, %s16342_s15 }
 0x10c   : > { %p16344_p2 = pnand %p16343_p1, %p19113_p4  ;;  %p16351_p9 = por %p16350_p8, %p16349_p7 }
 0x10e   : > { %p16345_p3 = pneg %p16344_p2 }
 0x110   : > { %p16352_p10 = pnand %p16351_p9, %p16345_p3 }
 0x112   : > { %16355 = shalt.err (!%p16352_p10)
}
 0x113   : > { %s19170_s0 = smov 1   ;;  %s19171_s3 = smov 16  }
 0x114   : > { %15759 = dma.hbm_to_vmem [thread:$0]  (%p19113_p4), %s19153_s12, 32, %s1159_s11, [#allocation24], %s19171_s3, %s19171_s3, %s19170_s0  }
 0x115   : > { %s17220_s26 = smov [#allocation26]   ;;  %s17221_s10 = smov [#allocation29]  }
 0x116   : > { %s1185_s13 = sshll.u32 %s17220_s26, 4  ;;  %s1209_s23 = sshll.u32 %s17221_s10, 4  ;;  %s1186_s13 = int_to_ptr.vmem [resolvable:$true] %s1185_s13  ;;  %s1210_s23 = int_to_ptr.vmem [resolvable:$true] %s1209_s23 }
 0x117   : > { %s16356_s15 = scalar_lea.hbm %s17340_s27, 16 }
 0x118   : > { %p16357_p6 = scmp.ne.s32.totalorder %s17340_s27, %s16356_s15  ;;  %p16362_p13 = scmp.lt.u32.totalorder %s16356_s15, %s17340_s27 }
 0x11a   : > { %p16358_p11 = pnand %p16357_p6, %p19113_p4 }
 0x11c   : > { %p16359_p12 = pneg %p16358_p11 }
 0x11e   : > { %p16364_p0 = pnand %p16362_p13, %p16359_p12 }
 0x120   : > { %16367 = shalt.err (!%p16364_p0)
}
 0x121   : > { %s16368_s18 = scalar_lea.vmem %s1186_s13, 16  ;;  %s16374_s11 = scalar_lea.vmem %s1186_s13, 32 }
 0x122   : > { %p16369_p1 = scmp.ne.s32.totalorder %s1186_s13, %s16368_s18  ;;  %p16375_p7 = scmp.lt.s32.totalorder %s1186_s13, %s1186_s13 }
 0x123   : > { %p16376_p8 = scmp.lt.s32.totalorder %s16374_s11, %s16368_s18 }
 0x124   : > { %p16370_p2 = pnand %p16369_p1, %p19113_p4 }
 0x125   : > { %p16377_p9 = por %p16376_p8, %p16375_p7 }
 0x126   : > { %p16371_p3 = pneg %p16370_p2 }
 0x128   : > { %p16378_p10 = pnand %p16377_p9, %p16371_p3 }
 0x12a   : > { %16381 = shalt.err (!%p16378_p10)
}
 0x12b   : > { %15763 = dma.hbm_to_vmem [thread:$0]  (%p19113_p4), %s17340_s27, 16, %s1186_s13, [#allocation27]  }
 0x12c   : > { %s16382_s26 = scalar_lea.hbm %s19157_s5, 96 }
 0x12d   : > { %p16383_p6 = scmp.ne.s32.totalorder %s19157_s5, %s16382_s26  ;;  %p16388_p13 = scmp.lt.u32.totalorder %s16382_s26, %s19157_s5 }
 0x12f   : > { %p16384_p11 = pnand %p16383_p6, %p19113_p4 }
 0x131   : > { %p16385_p12 = pneg %p16384_p11 }
 0x133   : > { %p16390_p0 = pnand %p16388_p13, %p16385_p12 }
 0x135   : > { %16393 = shalt.err (!%p16390_p0)
}
 0x136   : > { %s16394_s18 = scalar_lea.vmem %s1210_s23, 96  ;;  %p16401_p7 = scmp.lt.s32.totalorder %s1210_s23, %s1210_s23 }
 0x137   : > { %p16395_p1 = scmp.ne.s32.totalorder %s1210_s23, %s16394_s18  ;;  %p16402_p8 = scmp.lt.s32.totalorder %s16394_s18, %s16394_s18 }
 0x139   : > { %p16396_p2 = pnand %p16395_p1, %p19113_p4  ;;  %p16403_p9 = por %p16402_p8, %p16401_p7 }
 0x13b   : > { %p16397_p3 = pneg %p16396_p2 }
 0x13d   : > { %p16404_p10 = pnand %p16403_p9, %p16397_p3 }
 0x13f   : > { %16407 = shalt.err (!%p16404_p10)
}
 0x140   : > { %15767 = dma.hbm_to_vmem [thread:$0]  (%p19113_p4), %s19157_s5, 96, %s1210_s23, [#allocation30], %s19171_s3, %s19171_s3, %s19170_s0  }
 0x141   : > { %s17222_s13 = smov [#allocation32]   ;;  %s17223_s15 = smov [#allocation35]  }
 0x142   : > { %s1235_s10 = sshll.u32 %s17222_s13, 4  ;;  %s1261_s11 = sshll.u32 %s17223_s15, 4  ;;  %s1236_s10 = int_to_ptr.vmem [resolvable:$true] %s1235_s10  ;;  %s1262_s11 = int_to_ptr.vmem [resolvable:$true] %s1261_s11 }
 0x143   : > { %s16408_s26 = scalar_lea.hbm %s19158_s4, 32 }
 0x144   : > { %p16409_p6 = scmp.ne.s32.totalorder %s19158_s4, %s16408_s26  ;;  %p16414_p13 = scmp.lt.u32.totalorder %s16408_s26, %s19158_s4 }
 0x146   : > { %p16410_p11 = pnand %p16409_p6, %p19113_p4 }
 0x148   : > { %p16411_p12 = pneg %p16410_p11 }
 0x14a   : > { %p16416_p0 = pnand %p16414_p13, %p16411_p12 }
 0x14c   : > { %16419 = shalt.err (!%p16416_p0)
}
 0x14d   : > { %s16420_s18 = scalar_lea.vmem %s1236_s10, 32  ;;  %p16427_p7 = scmp.lt.s32.totalorder %s1236_s10, %s1236_s10 }
 0x14e   : > { %p16421_p1 = scmp.ne.s32.totalorder %s1236_s10, %s16420_s18  ;;  %p16428_p8 = scmp.lt.s32.totalorder %s16420_s18, %s16420_s18 }
 0x150   : > { %p16422_p2 = pnand %p16421_p1, %p19113_p4  ;;  %p16429_p9 = por %p16428_p8, %p16427_p7 }
 0x152   : > { %p16423_p3 = pneg %p16422_p2 }
 0x154   : > { %p16430_p10 = pnand %p16429_p9, %p16423_p3 }
 0x156   : > { %16433 = shalt.err (!%p16430_p10)
}
 0x157   : > { %15771 = dma.hbm_to_vmem [thread:$0]  (%p19113_p4), %s19158_s4, 32, %s1236_s10, [#allocation33], %s19171_s3, %s19171_s3, %s19170_s0  }
 0x158   : > { %s16434_s23 = scalar_lea.hbm %s19156_s6, 32 }
 0x159   : > { %p16435_p6 = scmp.ne.s32.totalorder %s19156_s6, %s16434_s23  ;;  %p16440_p13 = scmp.lt.u32.totalorder %s16434_s23, %s19156_s6 }
 0x15b   : > { %p16436_p11 = pnand %p16435_p6, %p19113_p4 }
 0x15d   : > { %p16437_p12 = pneg %p16436_p11 }
 0x15f   : > { %p16442_p0 = pnand %p16440_p13, %p16437_p12 }
 0x161   : > { %16445 = shalt.err (!%p16442_p0)
}
 0x162   : > { %s16446_s13 = scalar_lea.vmem %s1262_s11, 32  ;;  %p16453_p7 = scmp.lt.s32.totalorder %s1262_s11, %s1262_s11 }
 0x163   : > { %p16447_p1 = scmp.ne.s32.totalorder %s1262_s11, %s16446_s13  ;;  %p16454_p8 = scmp.lt.s32.totalorder %s16446_s13, %s16446_s13 }
 0x165   : > { %p16448_p2 = pnand %p16447_p1, %p19113_p4  ;;  %p16455_p9 = por %p16454_p8, %p16453_p7 }
 0x167   : > { %p16449_p3 = pneg %p16448_p2 }
 0x169   : > { %p16456_p10 = pnand %p16455_p9, %p16449_p3 }
 0x16b   : > { %16459 = shalt.err (!%p16456_p10)
}
 0x16c   : > { %15775 = dma.hbm_to_vmem [thread:$0]  (%p19113_p4), %s19156_s6, 32, %s1262_s11, [#allocation36], %s19171_s3, %s19171_s3, %s19170_s0  }
 0x16d   : > { %s17224_s10 = smov [#allocation38]   ;;  %s17225_s26 = smov [#allocation41]  }
 0x16e   : > { %s1290_s15 = sshll.u32 %s17224_s10, 4  ;;  %s1319_s18 = sshll.u32 %s17225_s26, 4  ;;  %s1291_s15 = int_to_ptr.vmem [resolvable:$true] %s1290_s15  ;;  %s1320_s18 = int_to_ptr.vmem [resolvable:$true] %s1319_s18 }
 0x16f   : > { %s16460_s23 = scalar_lea.hbm %s19152_s17, 1024 }
 0x170   : > { %p16461_p6 = scmp.ne.s32.totalorder %s19152_s17, %s16460_s23  ;;  %p16466_p13 = scmp.lt.u32.totalorder %s16460_s23, %s19152_s17 }
 0x172   : > { %p16462_p11 = pnand %p16461_p6, %p19113_p4 }
 0x174   : > { %p16463_p12 = pneg %p16462_p11 }
 0x176   : > { %p16468_p0 = pnand %p16466_p13, %p16463_p12 }
 0x178   : > { %16471 = shalt.err (!%p16468_p0)
}
 0x179   : > { %s16472_s13 = scalar_lea.vmem %s1291_s15, 1024  ;;  %p16479_p7 = scmp.lt.s32.totalorder %s1291_s15, %s1291_s15 }
 0x17a   : > { %p16473_p1 = scmp.ne.s32.totalorder %s1291_s15, %s16472_s13  ;;  %p16480_p8 = scmp.lt.s32.totalorder %s16472_s13, %s16472_s13 }
 0x17c   : > { %p16474_p2 = pnand %p16473_p1, %p19113_p4  ;;  %p16481_p9 = por %p16480_p8, %p16479_p7 }
 0x17e   : > { %p16475_p3 = pneg %p16474_p2 }
 0x180   : > { %p16482_p10 = pnand %p16481_p9, %p16475_p3 }
 0x182   : > { %16485 = shalt.err (!%p16482_p10)
}
 0x183   : > { %s19172_s11 = smov 8   ;;  %s19173_s10 = smov 128  }
 0x184   : > { %15779 = dma.hbm_to_vmem [thread:$0]  (%p19113_p4), %s19152_s17, 1024, %s1291_s15, [#allocation39], %s19173_s10, %s19173_s10, %s19172_s11  }
 0x185   : > { %s16486_s26 = scalar_lea.hbm %s17405_s24, 32 }
 0x186   : > { %p16487_p6 = scmp.ne.s32.totalorder %s17405_s24, %s16486_s26  ;;  %p16492_p13 = scmp.lt.u32.totalorder %s16486_s26, %s17405_s24 }
 0x188   : > { %p16488_p11 = pnand %p16487_p6, %p19113_p4 }
 0x18a   : > { %p16489_p12 = pneg %p16488_p11 }
 0x18c   : > { %p16494_p0 = pnand %p16492_p13, %p16489_p12 }
 0x18e   : > { %16497 = shalt.err (!%p16494_p0)
}
 0x18f   : > { %s16498_s23 = scalar_lea.vmem %s1320_s18, 32  ;;  %p16505_p7 = scmp.lt.s32.totalorder %s1320_s18, %s1320_s18 }
 0x190   : > { %p16499_p1 = scmp.ne.s32.totalorder %s1320_s18, %s16498_s23  ;;  %p16506_p8 = scmp.lt.s32.totalorder %s16498_s23, %s16498_s23 }
 0x192   : > { %p16500_p2 = pnand %p16499_p1, %p19113_p4  ;;  %p16507_p9 = por %p16506_p8, %p16505_p7 }
 0x194   : > { %p16501_p3 = pneg %p16500_p2 }
 0x196   : > { %p16508_p10 = pnand %p16507_p9, %p16501_p3 }
 0x198   : > { %16511 = shalt.err (!%p16508_p10)
}
 0x199   : > { %15783 = dma.hbm_to_vmem [thread:$0]  (%p19113_p4), %s17405_s24, 32, %s1320_s18, [#allocation42], %s19171_s3, %s19171_s3, %s19170_s0  }
 0x19a   : > { %s17226_s15 = smov [#allocation44]   ;;  %s17227_s26 = smov [#allocation47]  }
 0x19b   : > { %s1348_s13 = sshll.u32 %s17226_s15, 4  ;;  %s1377_s4 = sshll.u32 %s17227_s26, 4  ;;  %s1349_s13 = int_to_ptr.vmem [resolvable:$true] %s1348_s13  ;;  %s1378_s4 = int_to_ptr.vmem [resolvable:$true] %s1377_s4 }
 0x19c   : > { %s16512_s23 = scalar_lea.hbm %s17420_s20, 16384 }
 0x19d   : > { %p16513_p6 = scmp.ne.s32.totalorder %s17420_s20, %s16512_s23  ;;  %p16518_p13 = scmp.lt.u32.totalorder %s16512_s23, %s17420_s20 }
 0x19f   : > { %p16514_p11 = pnand %p16513_p6, %p19113_p4 }
 0x1a1   : > { %p16515_p12 = pneg %p16514_p11 }
 0x1a3   : > { %p16520_p0 = pnand %p16518_p13, %p16515_p12 }
 0x1a5   : > { %16523 = shalt.err (!%p16520_p0)
}
 0x1a6   : > { %s16524_s5 = scalar_lea.vmem %s1349_s13, 16384  ;;  %p16531_p7 = scmp.lt.s32.totalorder %s1349_s13, %s1349_s13 }
 0x1a7   : > { %p16525_p1 = scmp.ne.s32.totalorder %s1349_s13, %s16524_s5  ;;  %p16532_p8 = scmp.lt.s32.totalorder %s16524_s5, %s16524_s5 }
 0x1a9   : > { %p16526_p2 = pnand %p16525_p1, %p19113_p4  ;;  %p16533_p9 = por %p16532_p8, %p16531_p7 }
 0x1ab   : > { %p16527_p3 = pneg %p16526_p2 }
 0x1ad   : > { %p16534_p10 = pnand %p16533_p9, %p16527_p3 }
 0x1af   : > { %16537 = shalt.err (!%p16534_p10)
}
 0x1b0   : > { %s19174_s18 = smov 2048   ;;  %s19175_s15 = sld [smem:[#allocation100_spill]] }
 0x1b1   : > { %15787 = dma.hbm_to_vmem [thread:$0]  (%p19113_p4), %s17420_s20, 16384, %s1349_s13, [#allocation45], %s19174_s18, %s19174_s18, %s19173_s10  }
 0x1b6   : > { %s16538_s26 = scalar_lea.hbm %s19175_s15, 32 }
 0x1b7   : > { %p16539_p6 = scmp.ne.s32.totalorder %s19175_s15, %s16538_s26  ;;  %p16544_p13 = scmp.lt.u32.totalorder %s16538_s26, %s19175_s15 }
 0x1b9   : > { %p16540_p11 = pnand %p16539_p6, %p19113_p4 }
 0x1bb   : > { %p16541_p12 = pneg %p16540_p11 }
 0x1bd   : > { %p16546_p0 = pnand %p16544_p13, %p16541_p12 }
 0x1bf   : > { %16549 = shalt.err (!%p16546_p0)
}
 0x1c0   : > { %s16550_s5 = scalar_lea.vmem %s1378_s4, 32  ;;  %p16557_p7 = scmp.lt.s32.totalorder %s1378_s4, %s1378_s4 }
 0x1c1   : > { %p16551_p1 = scmp.ne.s32.totalorder %s1378_s4, %s16550_s5  ;;  %p16558_p8 = scmp.lt.s32.totalorder %s16550_s5, %s16550_s5 }
 0x1c3   : > { %p16552_p2 = pnand %p16551_p1, %p19113_p4  ;;  %p16559_p9 = por %p16558_p8, %p16557_p7 }
 0x1c5   : > { %p16553_p3 = pneg %p16552_p2 }
 0x1c7   : > { %p16560_p10 = pnand %p16559_p9, %p16553_p3 }
 0x1c9   : > { %16563 = shalt.err (!%p16560_p10)
}
 0x1ca   : > { %15791 = dma.hbm_to_vmem [thread:$0]  (%p19113_p4), %s19175_s15, 32, %s1378_s4, [#allocation48], %s19171_s3, %s19171_s3, %s19170_s0  }
 0x1cb   : > { %s17228_s13 = smov [#allocation50]   ;;  %s17229_s26 = smov [#allocation7]  }
 0x1cc   : > { %s1402_s23 = sshll.u32 %s17228_s13, 4  ;;  %s1015_s6 = sshll.u32 %s17229_s26, 4  ;;  %s1403_s23 = int_to_ptr.vmem [resolvable:$true] %s1402_s23  ;;  %s1016_s6 = int_to_ptr.vmem [resolvable:$true] %s1015_s6 }
 0x1cd   : > { %s16564_s5 = scalar_lea.hbm %s17445_s25, 16 }
 0x1ce   : > { %p16565_p6 = scmp.ne.s32.totalorder %s17445_s25, %s16564_s5  ;;  %p16570_p13 = scmp.lt.u32.totalorder %s16564_s5, %s17445_s25 }
 0x1d0   : > { %p16566_p11 = pnand %p16565_p6, %p19113_p4 }
 0x1d2   : > { %p16567_p12 = pneg %p16566_p11 }
 0x1d4   : > { %p16572_p0 = pnand %p16570_p13, %p16567_p12 }
 0x1d6   : > { %16575 = shalt.err (!%p16572_p0)
}
 0x1d7   : > { %s16576_s8 = scalar_lea.vmem %s1403_s23, 16  ;;  %s16582_s4 = scalar_lea.vmem %s1403_s23, 32 }
 0x1d8   : > { %p16577_p1 = scmp.ne.s32.totalorder %s1403_s23, %s16576_s8  ;;  %p16583_p7 = scmp.lt.s32.totalorder %s1403_s23, %s1403_s23 }
 0x1d9   : > { %p16584_p8 = scmp.lt.s32.totalorder %s16582_s4, %s16576_s8 }
 0x1da   : > { %p16578_p2 = pnand %p16577_p1, %p19113_p4 }
 0x1db   : > { %p16585_p9 = por %p16584_p8, %p16583_p7 }
 0x1dc   : > { %p16579_p3 = pneg %p16578_p2 }
 0x1de   : > { %p16586_p10 = pnand %p16585_p9, %p16579_p3 }
 0x1e0   : > { %16589 = shalt.err (!%p16586_p10)
}
 0x1e1   : > { %s19176_s13 = sld [smem:[#allocation74_spill]] }
 0x1e2   : > { %15795 = dma.hbm_to_vmem [thread:$0]  (%p19113_p4), %s17445_s25, 16, %s1403_s23, [#allocation51]  }
 0x1e7   : > { %s16590_s26 = scalar_lea.hbm %s19176_s13, 16 }
 0x1e8   : > { %p16591_p6 = scmp.ne.s32.totalorder %s19176_s13, %s16590_s26  ;;  %p16596_p13 = scmp.lt.u32.totalorder %s16590_s26, %s19176_s13 }
 0x1ea   : > { %p16592_p11 = pnand %p16591_p6, %p19113_p4 }
 0x1ec   : > { %p16593_p12 = pneg %p16592_p11 }
 0x1ee   : > { %p16598_p0 = pnand %p16596_p13, %p16593_p12 }
 0x1f0   : > { %16601 = shalt.err (!%p16598_p0)
}
 0x1f1   : > { %s16602_s8 = scalar_lea.vmem %s1016_s6, 16  ;;  %s16608_s5 = scalar_lea.vmem %s1016_s6, 32 }
 0x1f2   : > { %p16603_p1 = scmp.ne.s32.totalorder %s1016_s6, %s16602_s8  ;;  %p16609_p7 = scmp.lt.s32.totalorder %s1016_s6, %s1016_s6 }
 0x1f3   : > { %p16610_p8 = scmp.lt.s32.totalorder %s16608_s5, %s16602_s8 }
 0x1f4   : > { %p16604_p2 = pnand %p16603_p1, %p19113_p4 }
 0x1f5   : > { %p16611_p9 = por %p16610_p8, %p16609_p7 }
 0x1f6   : > { %p16605_p3 = pneg %p16604_p2 }
 0x1f8   : > { %p16612_p10 = pnand %p16611_p9, %p16605_p3 }
 0x1fa   : > { %16615 = shalt.err (!%p16612_p10)
}
 0x1fb   : > { %s19177_s23 = sld [smem:[#allocation76_spill]]  ;;  %s17230_s4 = smov [#allocation10]  }
 0x1fc   : > { %15737 = dma.hbm_to_vmem [thread:$0]  (%p19113_p4), %s19176_s13, 16, %s1016_s6, [#allocation6]  }
 0x1fd   : > { %s1041_s26 = sshll.u32 %s17230_s4, 4  ;;  %s17231_s9 = smov [#allocation13]   ;;  %s1042_s26 = int_to_ptr.vmem [resolvable:$true] %s1041_s26 }
 0x1fe   : > { %s1067_s12 = sshll.u32 %s17231_s9, 4  ;;  %s1068_s12 = int_to_ptr.vmem [resolvable:$true] %s1067_s12 }
 0x201   : > { %s16616_s15 = scalar_lea.hbm %s19177_s23, 96 }
 0x202   : > { %p16617_p6 = scmp.ne.s32.totalorder %s19177_s23, %s16616_s15  ;;  %p16622_p13 = scmp.lt.u32.totalorder %s16616_s15, %s19177_s23 }
 0x204   : > { %p16618_p11 = pnand %p16617_p6, %p19113_p4 }
 0x206   : > { %p16619_p12 = pneg %p16618_p11 }
 0x208   : > { %p16624_p0 = pnand %p16622_p13, %p16619_p12 }
 0x20a   : > { %16627 = shalt.err (!%p16624_p0)
}
 0x20b   : > { %s16628_s8 = scalar_lea.vmem %s1042_s26, 96  ;;  %p16635_p7 = scmp.lt.s32.totalorder %s1042_s26, %s1042_s26 }
 0x20c   : > { %p16629_p1 = scmp.ne.s32.totalorder %s1042_s26, %s16628_s8  ;;  %p16636_p8 = scmp.lt.s32.totalorder %s16628_s8, %s16628_s8 }
 0x20e   : > { %p16630_p2 = pnand %p16629_p1, %p19113_p4  ;;  %p16637_p9 = por %p16636_p8, %p16635_p7 }
 0x210   : > { %p16631_p3 = pneg %p16630_p2 }
 0x212   : > { %p16638_p10 = pnand %p16637_p9, %p16631_p3 }
 0x214   : > { %16641 = shalt.err (!%p16638_p10)
}
 0x215   : > { %s19178_s9 = sld [smem:[#allocation77_spill]] }
 0x216   : > { %15741 = dma.hbm_to_vmem [thread:$0]  (%p19113_p4), %s19177_s23, 96, %s1042_s26, [#allocation9], %s19171_s3, %s19171_s3, %s19170_s0  }
 0x21b   : > { %s16642_s6 = scalar_lea.hbm %s19178_s9, 32 }
 0x21c   : > { %p16643_p6 = scmp.ne.s32.totalorder %s19178_s9, %s16642_s6  ;;  %p16648_p13 = scmp.lt.u32.totalorder %s16642_s6, %s19178_s9 }
 0x21e   : > { %p16644_p11 = pnand %p16643_p6, %p19113_p4 }
 0x220   : > { %p16645_p12 = pneg %p16644_p11 }
 0x222   : > { %p16650_p0 = pnand %p16648_p13, %p16645_p12 }
 0x224   : > { %16653 = shalt.err (!%p16650_p0)
}
 0x225   : > { %s16654_s15 = scalar_lea.vmem %s1068_s12, 32  ;;  %p16661_p7 = scmp.lt.s32.totalorder %s1068_s12, %s1068_s12 }
 0x226   : > { %p16655_p1 = scmp.ne.s32.totalorder %s1068_s12, %s16654_s15  ;;  %p16662_p8 = scmp.lt.s32.totalorder %s16654_s15, %s16654_s15 }
 0x228   : > { %p16656_p2 = pnand %p16655_p1, %p19113_p4  ;;  %p16663_p9 = por %p16662_p8, %p16661_p7 }
 0x22a   : > { %p16657_p3 = pneg %p16656_p2 }
 0x22c   : > { %p16664_p10 = pnand %p16663_p9, %p16657_p3 }
 0x22e   : > { %16667 = shalt.err (!%p16664_p10)
}
 0x22f   : > { %s19179_s5 = sld [smem:[#allocation79_spill]]  ;;  %s17232_s4 = smov [#allocation16]  }
 0x230   : > { %15745 = dma.hbm_to_vmem [thread:$0]  (%p19113_p4), %s19178_s9, 32, %s1068_s12, [#allocation12], %s19171_s3, %s19171_s3, %s19170_s0  }
 0x231   : > { %s1093_s26 = sshll.u32 %s17232_s4, 4  ;;  %s17233_s8 = smov [#allocation19]   ;;  %s1094_s26 = int_to_ptr.vmem [resolvable:$true] %s1093_s26 }
 0x232   : > { %s1119_s6 = sshll.u32 %s17233_s8, 4  ;;  %s1120_s6 = int_to_ptr.vmem [resolvable:$true] %s1119_s6 }
 0x235   : > { %s16668_s15 = scalar_lea.hbm %s19179_s5, 32 }
 0x236   : > { %p16669_p6 = scmp.ne.s32.totalorder %s19179_s5, %s16668_s15  ;;  %p16674_p13 = scmp.lt.u32.totalorder %s16668_s15, %s19179_s5 }
 0x238   : > { %p16670_p11 = pnand %p16669_p6, %p19113_p4 }
 0x23a   : > { %p16671_p12 = pneg %p16670_p11 }
 0x23c   : > { %p16676_p0 = pnand %p16674_p13, %p16671_p12 }
 0x23e   : > { %16679 = shalt.err (!%p16676_p0)
}
 0x23f   : > { %s16680_s13 = scalar_lea.vmem %s1094_s26, 32  ;;  %p16687_p7 = scmp.lt.s32.totalorder %s1094_s26, %s1094_s26 }
 0x240   : > { %p16681_p1 = scmp.ne.s32.totalorder %s1094_s26, %s16680_s13  ;;  %p16688_p8 = scmp.lt.s32.totalorder %s16680_s13, %s16680_s13 }
 0x242   : > { %p16682_p2 = pnand %p16681_p1, %p19113_p4  ;;  %p16689_p9 = por %p16688_p8, %p16687_p7 }
 0x244   : > { %p16683_p3 = pneg %p16682_p2 }
 0x246   : > { %p16690_p10 = pnand %p16689_p9, %p16683_p3 }
 0x248   : > { %16693 = shalt.err (!%p16690_p10)
}
 0x249   : > { %s19180_s12 = sld [smem:[#allocation80_spill]] }
 0x24a   : > { %15749 = dma.hbm_to_vmem [thread:$0]  (%p19113_p4), %s19179_s5, 32, %s1094_s26, [#allocation15], %s19171_s3, %s19171_s3, %s19170_s0  }
 0x24f   : > { %s16694_s4 = scalar_lea.hbm %s19180_s12, 512 }
 0x250   : > { %p16695_p6 = scmp.ne.s32.totalorder %s19180_s12, %s16694_s4  ;;  %p16700_p13 = scmp.lt.u32.totalorder %s16694_s4, %s19180_s12 }
 0x252   : > { %p16696_p11 = pnand %p16695_p6, %p19113_p4 }
 0x254   : > { %p16697_p12 = pneg %p16696_p11 }
 0x256   : > { %p16702_p0 = pnand %p16700_p13, %p16697_p12 }
 0x258   : > { %16705 = shalt.err (!%p16702_p0)
}
 0x259   : > { %s16706_s13 = scalar_lea.vmem %s1120_s6, 512  ;;  %p16713_p7 = scmp.lt.s32.totalorder %s1120_s6, %s1120_s6 }
 0x25a   : > { %p16707_p1 = scmp.ne.s32.totalorder %s1120_s6, %s16706_s13  ;;  %p16714_p8 = scmp.lt.s32.totalorder %s16706_s13, %s16706_s13 }
 0x25c   : > { %p16708_p2 = pnand %p16707_p1, %p19113_p4  ;;  %p16715_p9 = por %p16714_p8, %p16713_p7 }
 0x25e   : > { %p16709_p3 = pneg %p16708_p2 }
 0x260   : > { %p16716_p10 = pnand %p16715_p9, %p16709_p3 }
 0x262   : > { %16719 = shalt.err (!%p16716_p10)
}
 0x263   : > { %s17234_s26 = smov 256   ;;  %s19181_s8 = sld [smem:[#allocation81_spill]] }
 0x264   : > { %15753 = dma.hbm_to_vmem [thread:$0]  (%p19113_p4), %s19180_s12, 512, %s1120_s6, [#allocation18], %s17234_s26, %s17234_s26, %s19171_s3  }
 0x265   : > { %s17235_s15 = smov [#allocation22]   ;;  %s17236_s5 = smov [#allocation25]  }
 0x266   : > { %s1145_s4 = sshll.u32 %s17235_s15, 4  ;;  %s1171_s9 = sshll.u32 %s17236_s5, 4  ;;  %s1146_s4 = int_to_ptr.vmem [resolvable:$true] %s1145_s4  ;;  %s17804_s9 = int_to_ptr.vmem [resolvable:$true] %s1171_s9 }
 0x269   : > { %s16720_s13 = scalar_lea.hbm %s19181_s8, 32 }
 0x26a   : > { %p16721_p6 = scmp.ne.s32.totalorder %s19181_s8, %s16720_s13  ;;  %p16726_p13 = scmp.lt.u32.totalorder %s16720_s13, %s19181_s8 }
 0x26c   : > { %p16722_p11 = pnand %p16721_p6, %p19113_p4 }
 0x26e   : > { %p16723_p12 = pneg %p16722_p11 }
 0x270   : > { %p16728_p0 = pnand %p16726_p13, %p16723_p12 }
 0x272   : > { %16731 = shalt.err (!%p16728_p0)
}
 0x273   : > { %s16732_s17 = scalar_lea.vmem %s1146_s4, 32  ;;  %p16739_p7 = scmp.lt.s32.totalorder %s1146_s4, %s1146_s4 }
 0x274   : > { %p16733_p1 = scmp.ne.s32.totalorder %s1146_s4, %s16732_s17  ;;  %p16740_p8 = scmp.lt.s32.totalorder %s16732_s17, %s16732_s17 }
 0x276   : > { %p16734_p2 = pnand %p16733_p1, %p19113_p4  ;;  %p16741_p9 = por %p16740_p8, %p16739_p7 }
 0x278   : > { %p16735_p3 = pneg %p16734_p2 }
 0x27a   : > { %p16742_p10 = pnand %p16741_p9, %p16735_p3 }
 0x27c   : > { %16745 = shalt.err (!%p16742_p10)
}
 0x27d   : > { %s19182_s5 = sld [smem:[#allocation83_spill]] }
 0x27e   : > { %15757 = dma.hbm_to_vmem [thread:$0]  (%p19113_p4), %s19181_s8, 32, %s1146_s4, [#allocation21], %s19171_s3, %s19171_s3, %s19170_s0  }
 0x283   : > { %s16746_s6 = scalar_lea.hbm %s19182_s5, 32 }
 0x284   : > { %p16747_p6 = scmp.ne.s32.totalorder %s19182_s5, %s16746_s6  ;;  %p16752_p13 = scmp.lt.u32.totalorder %s16746_s6, %s19182_s5 }
 0x286   : > { %p16748_p11 = pnand %p16747_p6, %p19113_p4 }
 0x288   : > { %p16749_p12 = pneg %p16748_p11 }
 0x28a   : > { %p16754_p0 = pnand %p16752_p13, %p16749_p12 }
 0x28c   : > { %16757 = shalt.err (!%p16754_p0)
}
 0x28d   : > { %s16758_s17 = scalar_lea.vmem %s17804_s9, 32  ;;  %p16765_p7 = scmp.lt.s32.totalorder %s17804_s9, %s17804_s9 }
 0x28e   : > { %p16759_p1 = scmp.ne.s32.totalorder %s17804_s9, %s16758_s17  ;;  %p16766_p8 = scmp.lt.s32.totalorder %s16758_s17, %s16758_s17 }
 0x290   : > { %p16760_p2 = pnand %p16759_p1, %p19113_p4  ;;  %p16767_p9 = por %p16766_p8, %p16765_p7 }
 0x292   : > { %p16761_p3 = pneg %p16760_p2 }
 0x294   : > { %p16768_p10 = pnand %p16767_p9, %p16761_p3 }
 0x296   : > { %16771 = shalt.err (!%p16768_p10)
}
 0x297   : > { %s19183_s26 = sld [smem:[#allocation84_spill]]  ;;  %s17237_s15 = smov [#allocation28]  }
 0x298   : > { %15761 = dma.hbm_to_vmem [thread:$0]  (%p19113_p4), %s19182_s5, 32, %s17804_s9, [#allocation24], %s19171_s3, %s19171_s3, %s19170_s0  }
 0x299   : > { %s1196_s4 = sshll.u32 %s17237_s15, 4  ;;  %s17238_s13 = smov [#allocation31]   ;;  %s1197_s4 = int_to_ptr.vmem [resolvable:$true] %s1196_s4 }
 0x29a   : > { %s1222_s6 = sshll.u32 %s17238_s13, 4  ;;  %s17837_s6 = int_to_ptr.vmem [resolvable:$true] %s1222_s6 }
 0x29d   : > { %s16772_s17 = scalar_lea.hbm %s19183_s26, 16 }
 0x29e   : > { %p16773_p6 = scmp.ne.s32.totalorder %s19183_s26, %s16772_s17  ;;  %p16778_p13 = scmp.lt.u32.totalorder %s16772_s17, %s19183_s26 }
 0x2a0   : > { %p16774_p11 = pnand %p16773_p6, %p19113_p4 }
 0x2a2   : > { %p16775_p12 = pneg %p16774_p11 }
 0x2a4   : > { %p16780_p0 = pnand %p16778_p13, %p16775_p12 }
 0x2a6   : > { %16783 = shalt.err (!%p16780_p0)
}
 0x2a7   : > { %s16784_s8 = scalar_lea.vmem %s1197_s4, 16  ;;  %s16790_s9 = scalar_lea.vmem %s1197_s4, 32 }
 0x2a8   : > { %p16785_p1 = scmp.ne.s32.totalorder %s1197_s4, %s16784_s8  ;;  %p16791_p7 = scmp.lt.s32.totalorder %s1197_s4, %s1197_s4 }
 0x2a9   : > { %p16792_p8 = scmp.lt.s32.totalorder %s16790_s9, %s16784_s8 }
 0x2aa   : > { %p16786_p2 = pnand %p16785_p1, %p19113_p4 }
 0x2ab   : > { %p16793_p9 = por %p16792_p8, %p16791_p7 }
 0x2ac   : > { %p16787_p3 = pneg %p16786_p2 }
 0x2ae   : > { %p16794_p10 = pnand %p16793_p9, %p16787_p3 }
 0x2b0   : > { %16797 = shalt.err (!%p16794_p10)
}
 0x2b1   : > { %s19184_s15 = sld [smem:[#allocation87_spill]] }
 0x2b2   : > { %15765 = dma.hbm_to_vmem [thread:$0]  (%p19113_p4), %s19183_s26, 16, %s1197_s4, [#allocation27]  }
 0x2b7   : > { %s16798_s13 = scalar_lea.hbm %s19184_s15, 1024 }
 0x2b8   : > { %p16799_p6 = scmp.ne.s32.totalorder %s19184_s15, %s16798_s13  ;;  %p16804_p13 = scmp.lt.u32.totalorder %s16798_s13, %s19184_s15 }
 0x2ba   : > { %p16800_p11 = pnand %p16799_p6, %p19113_p4 }
 0x2bc   : > { %p16801_p12 = pneg %p16800_p11 }
 0x2be   : > { %p16806_p0 = pnand %p16804_p13, %p16801_p12 }
 0x2c0   : > { %16809 = shalt.err (!%p16806_p0)
}
 0x2c1   : > { %s16810_s8 = scalar_lea.vmem %s17837_s6, 1024  ;;  %p16817_p7 = scmp.lt.s32.totalorder %s17837_s6, %s17837_s6 }
 0x2c2   : > { %p16811_p1 = scmp.ne.s32.totalorder %s17837_s6, %s16810_s8  ;;  %p16818_p8 = scmp.lt.s32.totalorder %s16810_s8, %s16810_s8 }
 0x2c4   : > { %p16812_p2 = pnand %p16811_p1, %p19113_p4  ;;  %p16819_p9 = por %p16818_p8, %p16817_p7 }
 0x2c6   : > { %p16813_p3 = pneg %p16812_p2 }
 0x2c8   : > { %p16820_p10 = pnand %p16819_p9, %p16813_p3 }
 0x2ca   : > { %16823 = shalt.err (!%p16820_p10)
}
 0x2cb   : > { %s19185_s4 = sld [smem:[#allocation89_spill]]  ;;  %s17239_s17 = smov [#allocation34]  }
 0x2cc   : > { %15769 = dma.hbm_to_vmem [thread:$0]  (%p19113_p4), %s19184_s15, 1024, %s17837_s6, [#allocation30], %s19173_s10, %s19173_s10, %s19172_s11  }
 0x2cd   : > { %s1248_s9 = sshll.u32 %s17239_s17, 4  ;;  %s17240_s13 = smov [#allocation37]   ;;  %s1249_s9 = int_to_ptr.vmem [resolvable:$true] %s1248_s9 }
 0x2ce   : > { %s1274_s5 = sshll.u32 %s17240_s13, 4  ;;  %s17867_s5 = int_to_ptr.vmem [resolvable:$true] %s1274_s5 }
 0x2d1   : > { %s16824_s8 = scalar_lea.hbm %s19185_s4, 32 }
 0x2d2   : > { %p16825_p6 = scmp.ne.s32.totalorder %s19185_s4, %s16824_s8  ;;  %p16830_p13 = scmp.lt.u32.totalorder %s16824_s8, %s19185_s4 }
 0x2d4   : > { %p16826_p11 = pnand %p16825_p6, %p19113_p4 }
 0x2d6   : > { %p16827_p12 = pneg %p16826_p11 }
 0x2d8   : > { %p16832_p0 = pnand %p16830_p13, %p16827_p12 }
 0x2da   : > { %16835 = shalt.err (!%p16832_p0)
}
 0x2db   : > { %s16836_s12 = scalar_lea.vmem %s1249_s9, 32  ;;  %p16843_p7 = scmp.lt.s32.totalorder %s1249_s9, %s1249_s9 }
 0x2dc   : > { %p16837_p1 = scmp.ne.s32.totalorder %s1249_s9, %s16836_s12  ;;  %p16844_p8 = scmp.lt.s32.totalorder %s16836_s12, %s16836_s12 }
 0x2de   : > { %p16838_p2 = pnand %p16837_p1, %p19113_p4  ;;  %p16845_p9 = por %p16844_p8, %p16843_p7 }
 0x2e0   : > { %p16839_p3 = pneg %p16838_p2 }
 0x2e2   : > { %p16846_p10 = pnand %p16845_p9, %p16839_p3 }
 0x2e4   : > { %16849 = shalt.err (!%p16846_p10)
}
 0x2e5   : > { %s19186_s6 = sld [smem:[#allocation91_spill]] }
 0x2e6   : > { %15773 = dma.hbm_to_vmem [thread:$0]  (%p19113_p4), %s19185_s4, 32, %s1249_s9, [#allocation33], %s19171_s3, %s19171_s3, %s19170_s0  }
 0x2eb   : > { %s16850_s17 = scalar_lea.hbm %s19186_s6, 3072 }
 0x2ec   : > { %p16851_p6 = scmp.ne.s32.totalorder %s19186_s6, %s16850_s17  ;;  %p16856_p13 = scmp.lt.u32.totalorder %s16850_s17, %s19186_s6 }
 0x2ee   : > { %p16852_p11 = pnand %p16851_p6, %p19113_p4 }
 0x2f0   : > { %p16853_p12 = pneg %p16852_p11 }
 0x2f2   : > { %p16858_p0 = pnand %p16856_p13, %p16853_p12 }
 0x2f4   : > { %16861 = shalt.err (!%p16858_p0)
}
 0x2f5   : > { %s16862_s12 = scalar_lea.vmem %s17867_s5, 3072  ;;  %p16869_p7 = scmp.lt.s32.totalorder %s17867_s5, %s17867_s5 }
 0x2f6   : > { %p16863_p1 = scmp.ne.s32.totalorder %s17867_s5, %s16862_s12  ;;  %p16870_p8 = scmp.lt.s32.totalorder %s16862_s12, %s16862_s12 }
 0x2f8   : > { %p16864_p2 = pnand %p16863_p1, %p19113_p4  ;;  %p16871_p9 = por %p16870_p8, %p16869_p7 }
 0x2fa   : > { %p16865_p3 = pneg %p16864_p2 }
 0x2fc   : > { %p16872_p10 = pnand %p16871_p9, %p16865_p3 }
 0x2fe   : > { %16875 = shalt.err (!%p16872_p10)
}
 0x2ff   : > { %s19187_s9 = sld [smem:[#allocation95_spill]]  ;;  %s17241_s13 = smov [#allocation40]  }
 0x300   : > { %15777 = dma.hbm_to_vmem [thread:$0]  (%p19113_p4), %s19186_s6, 3072, %s17867_s5, [#allocation36], %s19173_s10, %s19173_s10, %s19172_s11  }
 0x301   : > { %s1306_s8 = sshll.u32 %s17241_s13, 4  ;;  %s17242_s17 = smov [#allocation43]   ;;  %s1307_s8 = int_to_ptr.vmem [resolvable:$true] %s1306_s8 }
 0x302   : > { %s1332_s4 = sshll.u32 %s17242_s17, 4  ;;  %s17900_s4 = int_to_ptr.vmem [resolvable:$true] %s1332_s4 }
 0x305   : > { %s16876_s12 = scalar_lea.hbm %s19187_s9, 32 }
 0x306   : > { %p16877_p6 = scmp.ne.s32.totalorder %s19187_s9, %s16876_s12  ;;  %p16882_p13 = scmp.lt.u32.totalorder %s16876_s12, %s19187_s9 }
 0x308   : > { %p16878_p11 = pnand %p16877_p6, %p19113_p4 }
 0x30a   : > { %p16879_p12 = pneg %p16878_p11 }
 0x30c   : > { %p16884_p0 = pnand %p16882_p13, %p16879_p12 }
 0x30e   : > { %16887 = shalt.err (!%p16884_p0)
}
 0x30f   : > { %s16888_s15 = scalar_lea.vmem %s1307_s8, 32  ;;  %p16895_p7 = scmp.lt.s32.totalorder %s1307_s8, %s1307_s8 }
 0x310   : > { %p16889_p1 = scmp.ne.s32.totalorder %s1307_s8, %s16888_s15  ;;  %p16896_p8 = scmp.lt.s32.totalorder %s16888_s15, %s16888_s15 }
 0x312   : > { %p16890_p2 = pnand %p16889_p1, %p19113_p4  ;;  %p16897_p9 = por %p16896_p8, %p16895_p7 }
 0x314   : > { %p16891_p3 = pneg %p16890_p2 }
 0x316   : > { %p16898_p10 = pnand %p16897_p9, %p16891_p3 }
 0x318   : > { %16901 = shalt.err (!%p16898_p10)
}
 0x319   : > { %s19188_s11 = sld [smem:[#allocation96_spill]] }
 0x31a   : > { %15781 = dma.hbm_to_vmem [thread:$0]  (%p19113_p4), %s19187_s9, 32, %s1307_s8, [#allocation39], %s19171_s3, %s19171_s3, %s19170_s0  }
 0x31f   : > { %s16902_s5 = scalar_lea.hbm %s19188_s11, 16384 }
 0x320   : > { %p16903_p6 = scmp.ne.s32.totalorder %s19188_s11, %s16902_s5  ;;  %p16908_p13 = scmp.lt.u32.totalorder %s16902_s5, %s19188_s11 }
 0x322   : > { %p16904_p11 = pnand %p16903_p6, %p19113_p4 }
 0x324   : > { %p16905_p12 = pneg %p16904_p11 }
 0x326   : > { %p16910_p0 = pnand %p16908_p13, %p16905_p12 }
 0x328   : > { %16913 = shalt.err (!%p16910_p0)
}
 0x329   : > { %s16914_s15 = scalar_lea.vmem %s17900_s4, 16384  ;;  %p16921_p7 = scmp.lt.s32.totalorder %s17900_s4, %s17900_s4 }
 0x32a   : > { %p16915_p1 = scmp.ne.s32.totalorder %s17900_s4, %s16914_s15  ;;  %p16922_p8 = scmp.lt.s32.totalorder %s16914_s15, %s16914_s15 }
 0x32c   : > { %p16916_p2 = pnand %p16915_p1, %p19113_p4  ;;  %p16923_p9 = por %p16922_p8, %p16921_p7 }
 0x32e   : > { %p16917_p3 = pneg %p16916_p2 }
 0x330   : > { %p16924_p10 = pnand %p16923_p9, %p16917_p3 }
 0x332   : > { %16927 = shalt.err (!%p16924_p10)
}
 0x333   : > { %s19189_s13 = sld [smem:[#allocation99_spill]]  ;;  %s17243_s8 = smov [#allocation46]  }
 0x334   : > { %15785 = dma.hbm_to_vmem [thread:$0]  (%p19113_p4), %s19188_s11, 16384, %s17900_s4, [#allocation42], %s19174_s18, %s19174_s18, %s19173_s10  }
 0x335   : > { %s1364_s17 = sshll.u32 %s17243_s8, 4  ;;  %s17244_s12 = smov [#allocation49]   ;;  %s1365_s17 = int_to_ptr.vmem [resolvable:$true] %s1364_s17 }
 0x336   : > { %s1391_s5 = sshll.u32 %s17244_s12, 4  ;;  %s17933_s5 = int_to_ptr.vmem [resolvable:$true] %s1391_s5 }
 0x339   : > { %s16928_s15 = scalar_lea.hbm %s19189_s13, 32 }
 0x33a   : > { %p16929_p6 = scmp.ne.s32.totalorder %s19189_s13, %s16928_s15  ;;  %p16934_p13 = scmp.lt.u32.totalorder %s16928_s15, %s19189_s13 }
 0x33c   : > { %p16930_p11 = pnand %p16929_p6, %p19113_p4 }
 0x33e   : > { %p16931_p12 = pneg %p16930_p11 }
 0x340   : > { %p16936_p0 = pnand %p16934_p13, %p16931_p12 }
 0x342   : > { %16939 = shalt.err (!%p16936_p0)
}
 0x343   : > { %s16940_s6 = scalar_lea.vmem %s1365_s17, 32  ;;  %p16947_p7 = scmp.lt.s32.totalorder %s1365_s17, %s1365_s17 }
 0x344   : > { %p16941_p1 = scmp.ne.s32.totalorder %s1365_s17, %s16940_s6  ;;  %p16948_p8 = scmp.lt.s32.totalorder %s16940_s6, %s16940_s6 }
 0x346   : > { %p16942_p2 = pnand %p16941_p1, %p19113_p4  ;;  %p16949_p9 = por %p16948_p8, %p16947_p7 }
 0x348   : > { %p16943_p3 = pneg %p16942_p2 }
 0x34a   : > { %p16950_p10 = pnand %p16949_p9, %p16943_p3 }
 0x34c   : > { %16953 = shalt.err (!%p16950_p10)
}
 0x34d   : > { %s19190_s10 = sld [smem:[#allocation101_spill]] }
 0x34e   : > { %15789 = dma.hbm_to_vmem [thread:$0]  (%p19113_p4), %s19189_s13, 32, %s1365_s17, [#allocation45], %s19171_s3, %s19171_s3, %s19170_s0  }
 0x353   : > { %s16954_s18 = scalar_lea.hbm %s19190_s10, 16 }
 0x354   : > { %p16955_p6 = scmp.ne.s32.totalorder %s19190_s10, %s16954_s18  ;;  %p16960_p13 = scmp.lt.u32.totalorder %s16954_s18, %s19190_s10 }
 0x356   : > { %p16956_p11 = pnand %p16955_p6, %p19113_p4 }
 0x358   : > { %p16957_p12 = pneg %p16956_p11 }
 0x35a   : > { %p16962_p0 = pnand %p16960_p13, %p16957_p12 }
 0x35c   : > { %16965 = shalt.err (!%p16962_p0)
}
 0x35d   : > { %s16966_s4 = scalar_lea.vmem %s17933_s5, 16  ;;  %s16972_s6 = scalar_lea.vmem %s17933_s5, 32 }
 0x35e   : > { %p16967_p1 = scmp.ne.s32.totalorder %s17933_s5, %s16966_s4  ;;  %p16973_p7 = scmp.lt.s32.totalorder %s17933_s5, %s17933_s5 }
 0x35f   : > { %p16974_p8 = scmp.lt.s32.totalorder %s16972_s6, %s16966_s4 }
 0x360   : > { %p16968_p2 = pnand %p16967_p1, %p19113_p4 }
 0x361   : > { %p16975_p9 = por %p16974_p8, %p16973_p7 }
 0x362   : > { %p16969_p3 = pneg %p16968_p2 }
 0x364   : > { %p16976_p10 = pnand %p16975_p9, %p16969_p3 }
 0x366   : > { %16979 = shalt.err (!%p16976_p10)
}
 0x367   : > { %15793 = dma.hbm_to_vmem [thread:$0]  (%p19113_p4), %s19190_s10, 16, %s17933_s5, [#allocation48]  }
 0x368   : > { %s17245_s0 = smov [#allocation52]   ;;  %s16980_s8 = scalar_lea.hbm %s17455_s14, 16 }
 0x369   : > { %s1416_s3 = sshll.u32 %s17245_s0, 4  ;;  %p16981_p6 = scmp.ne.s32.totalorder %s17455_s14, %s16980_s8  ;;  %s1417_s3 = int_to_ptr.vmem [resolvable:$true] %s1416_s3 }
 0x36a   : > { %p16986_p13 = scmp.lt.u32.totalorder %s16980_s8, %s17455_s14 }
 0x36b   : > { %p16982_p11 = pnand %p16981_p6, %p19113_p4 }
 0x36d   : > { %p16983_p12 = pneg %p16982_p11 }
 0x36f   : > { %p16988_p0 = pnand %p16986_p13, %p16983_p12 }
 0x371   : > { %16991 = shalt.err (!%p16988_p0)
}
 0x372   : > { %s16992_s17 = scalar_lea.vmem %s1417_s3, 16  ;;  %s16998_s12 = scalar_lea.vmem %s1417_s3, 32 }
 0x373   : > { %p16993_p1 = scmp.ne.s32.totalorder %s1417_s3, %s16992_s17  ;;  %p16999_p7 = scmp.lt.s32.totalorder %s1417_s3, %s1417_s3 }
 0x374   : > { %p17000_p8 = scmp.lt.s32.totalorder %s16998_s12, %s16992_s17 }
 0x375   : > { %p16994_p2 = pnand %p16993_p1, %p19113_p4 }
 0x376   : > { %p17001_p9 = por %p17000_p8, %p16999_p7 }
 0x377   : > { %p16995_p3 = pneg %p16994_p2 }
 0x379   : > { %p17002_p10 = pnand %p17001_p9, %p16995_p3 }
 0x37b   : > { %17005 = shalt.err (!%p17002_p10)
}
 0x37c   : > { %15797 = dma.hbm_to_vmem [thread:$0]  (%p19113_p4), %s17455_s14, 16, %s1417_s3, [#allocation51]  }
 0x37d PF: > { %s19191_s5 = sld [smem:[#allocation72_spill]]  ;;  %p15906_p11 = scmp.lt.s32.totalorder %s17166_s2, 2 }
 0x37e   : > { %s1427_s15 = sand.u32 1, %s17162_s1   ;;  %s14047_s18 = sshll.u32 %s17166_s2, 7 }
 0x37f   : > { %s14046_s4 = sshll.u32 %s1427_s15, 3  ;;  %p17983_p12 = pnand %p15906_p11, %p17501_p5 }
 0x380   : > { %s1431_s0 = scalar_lea.vmem [#allocation2], %s14046_s4  ;;  %s1428_s17 = scalar_lea.sflag [#allocation3], %s1427_s15 }
 0x381   : > { %s1438_s3 = sshll.u32 %s1431_s0, 4  ;;  %p17008_p0 = pneg %p17983_p12  ;;  %s17987_s3 = int_to_ptr.vmem [resolvable:$true] %s1438_s3 }
 0x383   : > { %s17979_s6 = scalar_lea.hbm %s19191_s5, %s14047_s18  ;;  %s17011_s18 = scalar_lea.hbm %s19191_s5, 256 }
 0x384   : > { %s17006_s12 = scalar_lea.hbm %s17979_s6, 128  ;;  %p17012_p3 = scmp.lt.u32.totalorder %s17979_s6, %s19191_s5 }
 0x385   : > { %p17007_p13 = scmp.ne.s32.totalorder %s17979_s6, %s17006_s12  ;;  %p17013_p7 = scmp.lt.u32.totalorder %s17011_s18, %s17006_s12 }
 0x386   : > { %p17015_p8 = scmp.lt.u32.totalorder %s17006_s12, %s17979_s6 }
 0x387   : > { %p17009_p1 = pnand %p17008_p0, %p17007_p13  ;;  %p17014_p5 = por %p17013_p7, %p17012_p3 }
 0x389   : > { %p17010_p2 = pneg %p17009_p1  ;;  %p17016_p9 = por %p17015_p8, %p17014_p5 }
 0x38b   : > { %p17017_p10 = pnand %p17016_p9, %p17010_p2 }
 0x38d   : > { %17020 = shalt.err (!%p17017_p10)
}
 0x38e   : > { %s17021_s22 = scalar_lea.vmem %s17987_s3, 128  ;;  %s17246_s15 = smov [#allocation2]  }
 0x38f   : > { %p17022_p11 = scmp.ne.s32.totalorder %s17987_s3, %s17021_s22  ;;  %s17026_s4 = sshll.u32 %s17246_s15, 4  ;;  %s17027_s4 = int_to_ptr.vmem [resolvable:$false] %s17026_s4 }
 0x390   : > { %s17028_s0 = scalar_lea.vmem %s17027_s4, 256  ;;  %p17029_p13 = scmp.lt.s32.totalorder %s17987_s3, %s17027_s4 }
 0x391   : > { %p17024_p6 = pnand %p17022_p11, %p17008_p0  ;;  %p17030_p1 = scmp.lt.s32.totalorder %s17028_s0, %s17021_s22 }
 0x393   : > { %p17025_p4 = pneg %p17024_p6  ;;  %p17031_p3 = por %p17030_p1, %p17029_p13 }
 0x395   : > { %p17032_p7 = pnand %p17031_p3, %p17025_p4 }
 0x397   : > { %17035 = shalt.err (!%p17032_p7)
}
 0x398   : > { %15869 = dma.hbm_to_vmem [thread:$0]  (!%p17983_p12), %s17979_s6, 128, %s17987_s3, %s1428_s17  }
 0x399   : > { %p19193_p2 = scmp.ne.s32.totalorder %s19169_s16, 0 }
 0x39a   : > { %s19194_s12 = sld [smem:[#allocation107_spill]] (!%p19193_p2)  ;;  %s18013_s18 = sand.u32 (!%p19193_p2), 1, %s17158_s28  }
 0x39b   : > { %1447 = sbr.rel (%p19193_p2) target bundleno = 13500 (0x34bc), region = 180  ;;  %s14049_s15 = sshll.u32 (!%p19193_p2), %s18013_s18, 3 }
 0x39c   : > { %s1450_s4 = scalar_lea.sflag (!%p19193_p2), [#allocation3], %s18013_s18  ;;  %s18017_s22 = scalar_lea.vmem (!%p19193_p2), [#allocation2], %s14049_s15 }
 0x3a0   : > { %p19195_p4 = scmp.ne.s32.totalorder (!%p19193_p2), %s19194_s12, 0 }
 0x3a2   : > { %17081 = dma.done.wait (%p19195_p4), %s1450_s4, 128  }
 0x3a3   : > { %17083 = vsyncadd (%p19195_p4), %s1450_s4, 4294967168  ;;  %p19196_p6 = scmp.eq.s32.totalorder %s17483_s7, 0 }
 0x3a5   : > { %17085 = dma.done.wait (%p19196_p6), [#allocation6], 272   ;;  %p19197_p12 = pmov %p19196_p6 }
 0x3a6   : > { %p19198_p0 = pmov %p19196_p6 }
 0x3a7   : > { %17087 = vsyncadd (%p19197_p12), [#allocation6], 4294967024 }
 0x3a8   : > { %17089 = dma.done.wait (%p19198_p0), [#allocation9], 3168   ;;  %p19199_p5 = pmov %p19198_p0 }
 0x3a9   : > { %p19200_p8 = pmov %p19198_p0 }
 0x3aa   : > { %17091 = vsyncadd (%p19199_p5), [#allocation9], 4294964128 }
 0x3ab   : > { %17093 = dma.done.wait (%p19200_p8), [#allocation12], 1056   ;;  %p19201_p9 = pmov %p19198_p0 }
 0x3ac   : > { %p19202_p10 = pmov %p19198_p0 }
 0x3ad   : > { %17095 = vsyncadd (%p19201_p9), [#allocation12], 4294966240 }
 0x3ae   : > { %17097 = dma.done.wait (%p19202_p10), [#allocation15], 64   ;;  %p19203_p11 = pmov %p19198_p0 }
 0x3af   : > { %p19204_p13 = pmov %p19198_p0 }
 0x3b0   : > { %17099 = vsyncadd (%p19203_p11), [#allocation15], 4294967232 }
 0x3b1   : > { %17101 = dma.done.wait (%p19204_p13), [#allocation18], 16896   ;;  %p19205_p1 = pmov %p19198_p0 }
 0x3b2   : > { %p19206_p3 = pmov %p19198_p0 }
 0x3b3   : > { %17103 = vsyncadd (%p19205_p1), [#allocation18], 4294950400 }
 0x3b4   : > { %17105 = dma.done.wait (%p19206_p3), [#allocation21], 16416   ;;  %p19207_p7 = pmov %p19198_p0 }
 0x3b5   : > { %p19208_p2 = pmov %p19198_p0 }
 0x3b6   : > { %17107 = vsyncadd (%p19207_p7), [#allocation21], 4294950880 }
 0x3b7   : > { %17109 = dma.done.wait (%p19208_p2), [#allocation24], 64   ;;  %p19209_p4 = pmov %p19198_p0 }
 0x3b8   : > { %p19210_p6 = pmov %p19198_p0 }
 0x3b9   : > { %17111 = vsyncadd (%p19209_p4), [#allocation24], 4294967232 }
 0x3ba   : > { %17113 = dma.done.wait (%p19210_p6), [#allocation27], 32   ;;  %p19211_p12 = pmov %p19198_p0 }
 0x3bc   : > { %17115 = vsyncadd (%p19211_p12), [#allocation27], 4294967264 }
 0x3bd   : > { %17117 = dma.done.wait (%p19198_p0), [#allocation30], 1120   ;;  %p19212_p5 = pmov %p19198_p0 }
 0x3be   : > { %p19213_p8 = pmov %p19198_p0 }
 0x3bf   : > { %17119 = vsyncadd (%p19212_p5), [#allocation30], 4294966176 }
 0x3c0   : > { %17121 = dma.done.wait (%p19213_p8), [#allocation33], 64   ;;  %p19214_p9 = pmov %p19198_p0 }
 0x3c1   : > { %p19215_p10 = pmov %p19198_p0 }
 0x3c2   : > { %17123 = vsyncadd (%p19214_p9), [#allocation33], 4294967232 }
 0x3c3   : > { %17125 = dma.done.wait (%p19215_p10), [#allocation36], 3104   ;;  %p19216_p11 = pmov %p19198_p0 }
 0x3c4   : > { %p19217_p13 = pmov %p19198_p0 }
 0x3c5   : > { %17127 = vsyncadd (%p19216_p11), [#allocation36], 4294964192 }
 0x3c6   : > { %17129 = dma.done.wait (%p19217_p13), [#allocation39], 1056   ;;  %p19218_p1 = pmov %p19198_p0 }
 0x3c7   : > { %p19219_p3 = pmov %p19198_p0 }
 0x3c8   : > { %17131 = vsyncadd (%p19218_p1), [#allocation39], 4294966240 }
 0x3c9   : > { %17133 = dma.done.wait (%p19219_p3), [#allocation42], 16416   ;;  %p19220_p7 = pmov %p19198_p0 }
 0x3ca   : > { %p19221_p2 = pmov %p19198_p0 }
 0x3cb   : > { %17135 = vsyncadd (%p19220_p7), [#allocation42], 4294950880 }
 0x3cc   : > { %17137 = dma.done.wait (%p19221_p2), [#allocation45], 16416   ;;  %p19222_p4 = pmov %p19198_p0 }
 0x3cd   : > { %p19223_p6 = pmov %p19198_p0 }
 0x3ce   : > { %17139 = vsyncadd (%p19222_p4), [#allocation45], 4294950880 }
 0x3cf   : > { %17141 = dma.done.wait (%p19223_p6), [#allocation48], 48   ;;  %p19224_p12 = pmov %p19198_p0 }
 0x3d1   : > { %17143 = vsyncadd (%p19224_p12), [#allocation48], 4294967248 }
 0x3d2   : > { %17145 = dma.done.wait (%p19198_p0), [#allocation51], 32   ;;  %p19225_p5 = pmov %p19198_p0 }
 0x3d3   : > { %v17247_v0 = vmov 0.0|0.0   ;;  %vm17248_vm0 = vmmov 0   ;;  %v17249_v1 = vmov 0.0   ;;  %v1678_v2 = vld [vmem:[#allocation5] sm:$0xff]  ;;  %v1679_v3 = vld [vmem:[#allocation5 + $0x8] sm:$0xff]  ;;  %v1763_v5 = vld [vmem:[#allocation8] sm:$0xff]  ;;  %v2015_v30 = vlaneseq }
 0x3d4   : > { %17147 = vsyncadd (%p19225_p5), [#allocation51], 4294967264  ;;  %15033 = vmatprep.subr.bf16.mxu0 %v17247_v0  ;;  %14515 = vmatprep.mubr.msk.f32.mxu0 %vm17248_vm0, %v17249_v1  ;;  %v15034_v4 = vpack.c.bf16 %v1679_v3, %v1678_v2  ;;  %v1764_v6 = vld [vmem:[#allocation8 + $0x8] sm:$0xff]  ;;  %v1767_v7 = vld [vmem:[#allocation8 + $0x20] sm:$0xff]  ;;  %vm1687_vm1 = vcmask 130048   ;;  %s19226_s16 = sld [smem:[#allocation75_spill]] }
 0x3d5   : > { %15036 = vmatprep.subr.bf16.mxu1 %v17247_v0  ;;  %14526 = vmatprep.mubr.msk.f32.mxu1 %vm17248_vm0, %v17249_v1  ;;  %v15037_v8 = vpack.c.bf16 %v1764_v6, %v1763_v5  ;;  %v1768_v9 = vld [vmem:[#allocation8 + $0x28] sm:$0xff]  ;;  %v1765_v12 = vld [vmem:[#allocation8 + $0x10] sm:$0xff]  ;;  %v1766_v13 = vld [vmem:[#allocation8 + $0x18] sm:$0xff]  ;;  %vm1789_vm2 = vcmask 261120   ;;  %v2016_v31 = vand.u32 127, %v2015_v30  ;;  %v18159_v53 = vshrl.u32 %v2015_v30, 7 }
 0x3d6   : > { %15035 = vmatpush3.bf16.msra.mxu0 %v15034_v4  ;;  %v1677_v10 = vld [vmem:[%s18017_s22] sm:$0xff]  ;;  %v15043_v11 = vpack.c.bf16 %v1768_v9, %v1767_v7  ;;  %v15040_v14 = vpack.c.bf16 %v1766_v13, %v1765_v12  ;;  %v1769_v15 = vld [vmem:[#allocation8 + $0x30] sm:$0xff]  ;;  %v17250_v60 = vmov -1e+30   ;;  %vm2104_vm14 = vcmask 64512   ;;  %s19227_s6 = sld [smem:[#allocation85_spill]] }
 0x3d7   : > { %15038 = vmatpush3.bf16.msra.mxu1 %v15037_v8  ;;  %15042 = vmatprep.subr.bf16.mxu0 %v17247_v0  ;;  %v1770_v16 = vld [vmem:[#allocation8 + $0x38] sm:$0xff]  ;;  %v1771_v19 = vld [vmem:[#allocation8 + $0x40] sm:$0xff]  ;;  %v1772_v20 = vld [vmem:[#allocation8 + $0x48] sm:$0xff]  ;;  %vm2022_vm3 = vcmp.lt.s32.totalorder %v2016_v31, 8  ;;  %vm2117_vm4 = vcmp.ge.s32.totalorder %v2016_v31, 8  ;;  %vm2118_vm5 = vcmp.lt.s32.totalorder %v2016_v31, 16  ;;  %vm2019_vm13 = vcmp.ge.s32.totalorder %v2016_v31, %v18159_v53 }
 0x3d8   : > { %15039 = vmatprep.subr.bf16.mxu1 %v17247_v0  ;;  %v15046_v17 = vpack.c.bf16 %v1770_v16, %v1769_v15  ;;  %v14082_v18 = vld [vmem:[#allocation7] ss:$0 sm:$0xff]  ;;  %v15049_v25 = vpack.c.bf16 %v1772_v20, %v1771_v19  ;;  %v1773_v27 = vld [vmem:[#allocation8 + $0x50] sm:$0xff]  ;;  %v14084_v32 = vld [vmem:[#allocation10] ss:$0 sm:$0xff]  ;;  %v18119_v35 = vsel %vm2022_vm3, 1.0, %v17249_v1 }
 0x3d9   : > { %14516 = vmatmul.mubr.msk.f32.vlgmr.msra.gmra.mrb[0].mxu0 %vm1687_vm1, %v1677_v10  ;;  %v1774_v28 = vld [vmem:[#allocation8 + $0x58] sm:$0xff]  ;;  %v14086_v33 = vld [vmem:[#allocation10 + $0x1] ss:$0 sm:$0xff]  ;;  %vm2119_vm6 = vmand %vm2117_vm4, %vm2118_vm5  ;;  %vm2355_vm7 = vcmp.ge.s32.totalorder %v2016_v31, 16  ;;  %vm2356_vm8 = vcmp.lt.s32.totalorder %v2016_v31, 24  ;;  %vm2521_vm10 = vcmp.ge.s32.totalorder %v2016_v31, 24 }
 0x3da   : > { %15044 = vmatpush3.bf16.msra.mxu0 %v15043_v11  ;;  %14537 = vmatprep.mubr.msk.f32.mxu0 %vm17248_vm0, %v17249_v1  ;;  %v1761_v22 = vld [vmem:[%s19226_s16] sm:$0xff]  ;;  %v15052_v29 = vpack.c.bf16 %v1774_v28, %v1773_v27  ;;  %v18125_v42 = vsel %vm2119_vm6, 1.0, %v17249_v1  ;;  %vm2357_vm9 = vmand %vm2355_vm7, %vm2356_vm8  ;;  %vm2522_vm11 = vcmp.lt.s32.totalorder %v2016_v31, 32  ;;  %v18162_v61 = vsel %vm2019_vm13, 0.0, %v17250_v60  ;;  %s19228_s3 = sld [smem:[#allocation92_spill]]  ;;  %s19229_s8 = sld [smem:[#allocation94_spill]] }
 0x3db   : > { %15045 = vmatprep.subr.bf16.mxu0 %v17247_v0  ;;  %15041 = vmatpush3.bf16.msra.mxu1 %v15040_v14  ;;  %v14088_v43 = vld [vmem:[#allocation10 + $0x2] ss:$0 sm:$0xff]  ;;  %v18134_v46 = vsel %vm2357_vm9, 1.0, %v17249_v1  ;;  %vm2523_vm12 = vmand %vm2521_vm10, %vm2522_vm11  ;;  %s19230_s17 = sld [smem:[#allocation97_spill]]  ;;  %s19231_s0 = sld [smem:[#allocation98_spill]]  ;;  %vm13479_vm15 = vcmask 261127  }
 0x3dc   : > { %15048 = vmatprep.subr.bf16.mxu1 %v17247_v0  ;;  %v18147_v51 = vsel %vm2523_vm12, 1.0, %v17249_v1  ;;  %s19233_s15 = sld [smem:[#allocation102_spill]]  ;;  %s19234_s4 = sld [smem:[#allocation103_spill]] }
 0x3dd   : > { %s19235_s22 = sld [smem:[#allocation108_spill]]  ;;  %s14284_s16 = sshll.u32 %s17483_s7, 4 }
 0x3de   : > { %15047 = vmatpush3.bf16.msra.mxu0 %v15046_v17  ;;  %s17251_s7 = smov [#allocation53]  }
 0x3df   : > { %14551 = vmatprep.subr.mxu0 %v17249_v1  ;;  %s17040_s9 = sshll.u32 %s17251_s7, 4  ;;  %s17041_s9 = int_to_ptr.vmem [resolvable:$false] %s17040_s9 }
 0x3e0   : > { %s17042_s10 = scalar_lea.vmem %s17041_s9, 32 }
 0x3e1   : > { %s19232_s12 = smov %s19231_s0 }
 0x3e2   : > { %s19010_s5 = scalar_lea.hbm %s19234_s4, %s14284_s16 }
 0x3e3   : > { %p19236_p9 = scmp.ne.s32.totalorder %s19235_s22, 0 }
 0x4ac   : > { %v1757_v21 = vpop.f32.mrb[0].mxu0 }
 0x4ad   : > { %v1758_v23 = vadd.f32 %v14082_v18, %v1757_v21  ;;  %v14517_v24 = vpop.f32.mrb[1].mxu0 }
 0x4af   : > { %v18102_v26 = vadd.f32 %v1761_v22, %v1758_v23 }
 0x4b1   : > { %14527 = vmatmul.mubr.msk.f32.vlgmr.msra.gmra.mrb[0].mxu1 %vm1789_vm2, %v18102_v26  ;;  %14538 = vmatmul.mubr.msk.f32.vlgmr.msra.gmra.mrb[2].mxu0 %vm1789_vm2, %v18102_v26 }
 0x4b2   : > { %15050 = vmatpush3.bf16.msra.mxu1 %v15049_v25  ;;  %14548 = vmatprep.mubr.msk.f32.mxu1 %vm17248_vm0, %v17249_v1 }
 0x4b3   : > { %15051 = vmatprep.subr.bf16.mxu1 %v17247_v0  ;;  %14553 = vmatprep.mubr.msk.f32.mxu0 %vm17248_vm0, %v17249_v1 }
 0x4b6   : > { %15053 = vmatpush3.bf16.msra.mxu1 %v15052_v29 }
 0x4b7   : > { %14561 = vmatprep.subr.mxu1 %v17249_v1 }
 0x4b9   : > { %14549 = vmatmul.mubr.msk.f32.vlgmr.msra.gmra.mrb[2].mxu1 %vm1789_vm2, %v18102_v26 }
 0x4ba   : > { %14563 = vmatprep.mubr.msk.f32.mxu1 %vm17248_vm0, %v17249_v1 }
 0x584   : > { %v1859_v34 = vpop.f32.mrb[0].mxu1  ;;  %v1935_v36 = vpop.f32.mrb[2].mxu0 }
 0x585   : > { %v1860_v37 = vadd.f32 %v14084_v32, %v1859_v34  ;;  %v1936_v38 = vadd.f32 %v14086_v33, %v1935_v36  ;;  %v14528_v39 = vpop.f32.mrb[1].mxu1  ;;  %v14539_v40 = vpop.f32.mrb[3].mxu0  ;;  %v1778_v36 = vld [vmem:[#allocation11] sm:$0xff] }
 0x586   : > { %v1781_v40 = vld [vmem:[#allocation11 + $0x18] sm:$0xff] }
 0x587   : > { %v2025_v41 = vmul.f32 %v18119_v35, %v1860_v37  ;;  %14552 = vmatpush3.xpose.msk.msra.mxu0 %vm1789_vm2, %v1936_v38  ;;  %v2121_v44 = vmul.f32 %v18125_v42, %v1860_v37  ;;  %v2359_v50 = vmul.f32 %v18134_v46, %v1860_v37  ;;  %v2525_v52 = vmul.f32 %v18147_v51, %v1860_v37  ;;  %v1779_v37 = vld [vmem:[#allocation11 + $0x8] sm:$0xff] }
 0x588   : > { %14556 = vmatprep.subr.mxu0 %v17249_v1  ;;  %v15055_v39 = vpack.c.bf16 %v1779_v37, %v1778_v36  ;;  %v2831_v36 = vld [vmem:[#allocation17 + $0x110] sm:$0xff] }
 0x589   : > { %v2847_v37 = vld [vmem:[#allocation17 + $0x190] sm:$0xff] }
 0x58a   : > { %14554 = vmatmul.mubr.msk.f32.vlgmr.msra.gmra.mrb[4].mxu0 %vm1789_vm2, %v2025_v41 }
 0x58b   : > { %14557 = vmatpush3.xpose.msk.msra.mxu0 %vm1789_vm2, %v1936_v38  ;;  %14558 = vmatprep.mubr.msk.f32.mxu0 %vm17248_vm0, %v17249_v1 }
 0x58c   : > { %v2011_v45 = vpop.f32.mrb[2].mxu1  ;;  %14571 = vmatprep.subr.mxu0 %v17249_v1 }
 0x58d   : > { %v18136_v47 = vadd.f32 %v14088_v43, %v2011_v45  ;;  %v14550_v48 = vpop.f32.mrb[3].mxu1 }
 0x58e   : > { %14559 = vmatmul.mubr.msk.f32.vlgmr.msra.gmra.mrb[6].mxu0 %vm1789_vm2, %v2121_v44 }
 0x58f   : > { %14572 = vmatpush3.xpose.msk.msra.mxu0 %vm1789_vm2, %v1936_v38  ;;  %v2208_v49 = vmul.f32 %v18125_v42, %v18136_v47  ;;  %14573 = vmatprep.mubr.msk.f32.mxu0 %vm17248_vm0, %v17249_v1 }
 0x590   : > { %14581 = vmatprep.subr.mxu0 %v17249_v1 }
 0x591   : > { %14562 = vmatpush3.msra.mxu1 %v2208_v49 }
 0x592   : > { %14574 = vmatmul.mubr.msk.f32.vlgmr.msra.gmra.mrb[8].mxu0 %vm1789_vm2, %v2359_v50  ;;  %14566 = vmatprep.subr.mxu1 %v17249_v1  ;;  %v2116_v50 = vmul.f32 %v18119_v35, %v18136_v47 }
 0x593   : > { %14582 = vmatpush3.xpose.msk.msra.mxu0 %vm1789_vm2, %v1936_v38  ;;  %14583 = vmatprep.mubr.msk.f32.mxu0 %vm17248_vm0, %v17249_v1  ;;  %v1780_v38 = vld [vmem:[#allocation11 + $0x10] sm:$0xff] }
 0x594   : > { %15054 = vmatprep.subr.bf16.mxu0 %v17247_v0  ;;  %v15058_v41 = vpack.c.bf16 %v1781_v40, %v1780_v38  ;;  %v15074_v38 = vpack.c.bf16 %v2847_v37, %v2831_v36  ;;  %v2818_v40 = vld [vmem:[#allocation17 + $0xa8] sm:$0xff]  ;;  %v2839_v37 = vld [vmem:[#allocation17 + $0x150] sm:$0xff] }
 0x596   : > { %14584 = vmatmul.mubr.msk.f32.vlgmr.msra.gmra.mrb[10].mxu0 %vm1789_vm2, %v2525_v52 }
 0x597   : > { %14599 = vmatprep.mubr.msk.f32.mxu0 %vm17248_vm0, %v17249_v1  ;;  %15056 = vmatpush3.bf16.msra.mxu0 %v15055_v39  ;;  %v2802_v39 = vld [vmem:[#allocation17 + $0x28] sm:$0xff] }
 0x598   : > { %15057 = vmatprep.subr.bf16.mxu0 %v17247_v0 }
 0x59b   : > { %15059 = vmatpush3.bf16.msra.mxu0 %v15058_v41  ;;  %v2804_v41 = vld [vmem:[#allocation17 + $0x38] sm:$0xff] }
 0x65d   : > { %v2098_v54 = vpop.f32.mrb[4].mxu0 }
 0x65e   : > { %v14555_v55 = vpop.f32.mrb[5].mxu0  ;;  %v2102_v57 = vmul.f32 0.35355338, %v2098_v54 }
 0x660   : > { %v2103_v5 = vadd.f32 %v2102_v57, %v18162_v61 }
 0x661   : > { %v2191_v56 = vpop.f32.mrb[6].mxu0 }
 0x662   : > { %v2195_v58 = vmul.f32 0.35355338, %v2191_v56  ;;  %v14560_v59 = vpop.f32.mrb[7].mxu0  ;;  %v2105_v10 = vsel %vm2104_vm14, %v2103_v5, -inf  ;;  %v2446_v56 = vmul.f32 %v18134_v46, %v18136_v47 }
 0x663   : > { %v2612_v59 = vmul.f32 %v18147_v51, %v18136_v47 }
 0x664   : > { %v2196_v62 = vadd.f32 %v2195_v58, %v18162_v61 }
 0x665   : > { %v2429_v63 = vpop.f32.mrb[8].mxu0 }
 0x666   : > { %v2433_v2 = vmul.f32 0.35355338, %v2429_v63  ;;  %v14575_v3 = vpop.f32.mrb[9].mxu0  ;;  %v2197_v4 = vsel %vm2104_vm14, %v2196_v62, -inf }
 0x667   : > { %2198 = vmax.xlane.f32.xlu0 %v2197_v4  ;;  %v14102_v3 = vld [vmem:[#allocation13] ss:$0 sm:$0xff] }
 0x668   : > { %v2434_v6 = vadd.f32 %v2433_v2, %v18162_v61 }
 0x669   : > { %v2595_v7 = vpop.f32.mrb[10].mxu0 }
 0x66a   : > { %v2599_v8 = vmul.f32 0.35355338, %v2595_v7  ;;  %v14585_v9 = vpop.f32.mrb[11].mxu0  ;;  %v2435_v11 = vsel %vm2104_vm14, %v2434_v6, -inf }
 0x66b   : > { %2106 = vmax.xlane.f32.xlu0 %v2105_v10  ;;  %2436 = vmax.xlane.f32.xlu1 %v2435_v11 }
 0x66c   : > { %v2600_v12 = vadd.f32 %v2599_v8, %v18162_v61 }
 0x66e   : > { %v2601_v13 = vsel %vm2104_vm14, %v2600_v12, -inf }
 0x66f   : > { %2602 = vmax.xlane.f32.xlu1 %v2601_v13  ;;  %v2798_v13 = vld [vmem:[#allocation17 + $0x8] sm:$0xff] }
 0x6f4   : > { %v2199_v14 = vpop.xlane.xlu0 %2198 }
 0x6f5   : > { %v2200_v15 = vsub.f32 %v2196_v62, %v2199_v14  ;;  %v2814_v14 = vld [vmem:[#allocation17 + $0x88] sm:$0xff] }
 0x6f7   : > { %v2201_v16 = vmul.f32 1.442695, %v2200_v15  ;;  %v2800_v15 = vld [vmem:[#allocation17 + $0x18] sm:$0xff] }
 0x6f8   : > { %v2107_v17 = vpop.xlane.xlu0 %2106  ;;  %v2437_v18 = vpop.xlane.xlu1 %2436 }
 0x6f9   : > { %16054 = vpow2.f32 %v2201_v16  ;;  %v2108_v19 = vsub.f32 %v2103_v5, %v2107_v17  ;;  %v2438_v20 = vsub.f32 %v2434_v6, %v2437_v18  ;;  %v15060_v16 = vpack.c.bf16 %v2814_v14, %v2798_v13  ;;  %v2816_v17 = vld [vmem:[#allocation17 + $0x98] sm:$0xff]  ;;  %v2797_v18 = vld [vmem:[#allocation17] sm:$0xff]  ;;  %v2851_v13 = vld [vmem:[#allocation17 + $0x1b0] sm:$0xff] }
 0x6fa   : > { %v2806_v14 = vld [vmem:[#allocation17 + $0x48] sm:$0xff] }
 0x6fb   : > { %v2109_v21 = vmul.f32 1.442695, %v2108_v19  ;;  %v2439_v22 = vmul.f32 1.442695, %v2438_v20  ;;  %v2813_v19 = vld [vmem:[#allocation17 + $0x80] sm:$0xff]  ;;  %v15068_v20 = vpack.c.bf16 %v2816_v17, %v2800_v15  ;;  %v2822_v15 = vld [vmem:[#allocation17 + $0xc8] sm:$0xff] }
 0x6fc   : > { %v2603_v23 = vpop.xlane.xlu1 %2602 }
 0x6fd   : > { %16056 = vpow2.f32 %v2109_v21  ;;  %v2604_v24 = vsub.f32 %v2600_v12, %v2603_v23  ;;  %v15062_v21 = vpack.c.bf16 %v2813_v19, %v2797_v18  ;;  %v2815_v23 = vld [vmem:[#allocation17 + $0x90] sm:$0xff]  ;;  %15069 = vmatprep.subr.bf16.mxu0 %v15068_v20  ;;  %v2805_v19 = vld [vmem:[#allocation17 + $0x40] sm:$0xff] }
 0x6fe   : > { %16058 = vpow2.f32 %v2439_v22  ;;  %v2799_v22 = vld [vmem:[#allocation17 + $0x10] sm:$0xff]  ;;  %v2821_v20 = vld [vmem:[#allocation17 + $0xc0] sm:$0xff] }
 0x6ff   : > { %v2605_v25 = vmul.f32 1.442695, %v2604_v24  ;;  %v15070_v24 = vpack.c.bf16 %v2815_v23, %v2799_v22  ;;  %v2807_v23 = vld [vmem:[#allocation17 + $0x50] sm:$0xff] }
 0x701   : > { %16060 = vpow2.f32 %v2605_v25  ;;  %v2830_v25 = vld [vmem:[#allocation17 + $0x108] sm:$0xff] }
 0x703   : > { %v16055_v27 = vpop.eup %16054 }
 0x704   : > { %v2203_v28 = vsel %vm2104_vm14, %v16055_v27, 0.0 }
 0x705   : > { %2204 = vadd.xlane.f32.xlu0 %v2203_v28  ;;  %v2832_v28 = vld [vmem:[#allocation17 + $0x118] sm:$0xff] }
 0x707   : > { %v16057_v29 = vpop.eup %16056 }
 0x708   : > { %v16059_v30 = vpop.eup %16058  ;;  %v2111_v31 = vsel %vm2104_vm14, %v16057_v29, 0.0 }
 0x709   : > { %v2441_v32 = vsel %vm2104_vm14, %v16059_v30, 0.0  ;;  %2112 = vadd.xlane.f32.xlu1 %v2111_v31  ;;  %v2829_v31 = vld [vmem:[#allocation17 + $0x100] sm:$0xff] }
 0x70a   : > { %2442 = vadd.xlane.f32.xlu0 %v2441_v32  ;;  %v2845_v32 = vld [vmem:[#allocation17 + $0x180] sm:$0xff] }
 0x70b   : > { %v16061_v33 = vpop.eup %16060 }
 0x70c   : > { %v2607_v34 = vsel %vm2104_vm14, %v16061_v33, 0.0 }
 0x70d   : > { %2608 = vadd.xlane.f32.xlu1 %v2607_v34  ;;  %v15066_v34 = vpack.c.bf16 %v2845_v32, %v2829_v31  ;;  %v2837_v32 = vld [vmem:[#allocation17 + $0x140] sm:$0xff] }
 0x792   : > { %v2205_v43 = vpop.xlane.xlu0 %2204 }
 0x793   : > { %16062 = vrcp.f32 %v2205_v43  ;;  %v15076_v43 = vpack.c.bf16 %v2818_v40, %v2802_v39  ;;  %v2810_v39 = vld [vmem:[#allocation17 + $0x68] sm:$0xff] }
 0x794   : > { %v2826_v40 = vld [vmem:[#allocation17 + $0xe8] sm:$0xff] }
 0x796   : > { %v2113_v44 = vpop.xlane.xlu1 %2112 }
 0x797   : > { %16064 = vrcp.f32 %v2113_v44  ;;  %v2443_v49 = vpop.xlane.xlu0 %2442  ;;  %v2820_v44 = vld [vmem:[#allocation17 + $0xb8] sm:$0xff] }
 0x798   : > { %16066 = vrcp.f32 %v2443_v49 }
 0x79a   : > { %v2609_v55 = vpop.xlane.xlu1 %2608 }
 0x79b   : > { %16068 = vrcp.f32 %v2609_v55  ;;  %v14105_v55 = vld [vmem:[#allocation16] ss:$0 sm:$0xff] }
 0x79d   : > { %v16063_v45 = vpop.eup %16062 }
 0x79e   : > { %v2207_v48 = vmul.f32 %v16063_v45, %v16055_v27  ;;  %v2846_v27 = vld [vmem:[#allocation17 + $0x188] sm:$0xff]  ;;  %v15084_v45 = vpack.c.bf16 %v2820_v44, %v2804_v41  ;;  %v2812_v41 = vld [vmem:[#allocation17 + $0x78] sm:$0xff] }
 0x7a0   : > { %14564 = vmatmul.mubr.msk.f32.vlgmr.msra.gmra.mrb[4].mxu1 %vm2104_vm14, %v2207_v48 }
 0x7a1   : > { %14567 = vmatpush3.msra.mxu1 %v2116_v50  ;;  %14568 = vmatprep.mubr.msk.f32.mxu1 %vm17248_vm0, %v17249_v1  ;;  %v16065_v52 = vpop.eup %16064 }
 0x7a2   : > { %14576 = vmatprep.subr.mxu1 %v17249_v1  ;;  %v2115_v54 = vmul.f32 %v16065_v52, %v16057_v29  ;;  %v16067_v57 = vpop.eup %16066  ;;  %v15064_v29 = vpack.c.bf16 %v2846_v27, %v2830_v25  ;;  %v14104_v52 = vld [vmem:[#allocation14] ss:$0 sm:$0xff]  ;;  %v2838_v25 = vld [vmem:[#allocation17 + $0x148] sm:$0xff] }
 0x7a3   : > { %v2445_v58 = vmul.f32 %v16067_v57, %v16059_v30  ;;  %v2848_v30 = vld [vmem:[#allocation17 + $0x198] sm:$0xff]  ;;  %v2817_v57 = vld [vmem:[#allocation17 + $0xa0] sm:$0xff]  ;;  %v2854_v27 = vld [vmem:[#allocation17 + $0x1c8] sm:$0xff] }
 0x7a5   : > { %v16069_v60 = vpop.eup %16068 }
 0x7a6   : > { %v2611_v62 = vmul.f32 %v16069_v60, %v16061_v33  ;;  %v15072_v33 = vpack.c.bf16 %v2848_v30, %v2832_v28  ;;  %v2819_v60 = vld [vmem:[#allocation17 + $0xb0] sm:$0xff]  ;;  %v2840_v28 = vld [vmem:[#allocation17 + $0x158] sm:$0xff]  ;;  %v15094_v30 = vpack.c.bf16 %v2821_v20, %v2805_v19  ;;  %v2896_v19 = vld [vmem:[#allocation20 + $0x108] sm:$0xff] }
 0x7a7   : > { %v2912_v20 = vld [vmem:[#allocation20 + $0x188] sm:$0xff] }
 0x7a8   : > { %14569 = vmatmul.mubr.msk.f32.vlgmr.msra.gmra.mrb[4].mxu1 %vm2104_vm14, %v2115_v54 }
 0x7a9   : > { %14577 = vmatpush3.msra.mxu1 %v2446_v56  ;;  %14578 = vmatprep.mubr.msk.f32.mxu1 %vm17248_vm0, %v17249_v1  ;;  %v2801_v56 = vld [vmem:[#allocation17 + $0x20] sm:$0xff] }
 0x7aa   : > { %14586 = vmatprep.subr.mxu1 %v17249_v1 }
 0x7b0   : > { %14579 = vmatmul.mubr.msk.f32.vlgmr.msra.gmra.mrb[4].mxu1 %vm2104_vm14, %v2445_v58 }
 0x7b1   : > { %14587 = vmatpush3.msra.mxu1 %v2612_v59  ;;  %14588 = vmatprep.mubr.msk.f32.mxu1 %vm17248_vm0, %v17249_v1  ;;  %v2803_v59 = vld [vmem:[#allocation17 + $0x30] sm:$0xff] }
 0x7b2   : > { %15061 = vmatprep.subr.bf16.mxu1 %v15060_v16  ;;  %v2824_v16 = vld [vmem:[#allocation17 + $0xd8] sm:$0xff] }
 0x7b8   : > { %14589 = vmatmul.mubr.msk.f32.vlgmr.msra.gmra.mrb[4].mxu1 %vm2104_vm14, %v2611_v62  ;;  %v2834_v62 = vld [vmem:[#allocation17 + $0x128] sm:$0xff] }
 0x7b9   : > { %3077 = vmatprep.mubr.f32.mxu1 %v17249_v1  ;;  %15063 = vmatpush1.bf16.msra.mxu1 %v15062_v21  ;;  %v15092_v21 = vpack.c.bf16 %v2822_v15, %v2806_v14 }
 0x7ba   : > { %15065 = vmatprep.subr.bf16.mxu1 %v15064_v29  ;;  %v2856_v29 = vld [vmem:[#allocation17 + $0x1d8] sm:$0xff] }
 0x7bb   : > { %v15104_v36 = vpack.c.bf16 %v2856_v29, %v2840_v28  ;;  %v2895_v28 = vld [vmem:[#allocation20 + $0x100] sm:$0xff] }
 0x7bc   : > { %v2911_v29 = vld [vmem:[#allocation20 + $0x180] sm:$0xff] }
 0x7bd   : > { %15067 = vmatpush1.bf16.msra.mxu1 %v15066_v34  ;;  %v15096_v34 = vpack.c.bf16 %v2854_v27, %v2838_v25  ;;  %v15128_v25 = vpack.c.bf16 %v2912_v20, %v2896_v19 }
 0x7be   : > { %15077 = vmatprep.subr.bf16.mxu1 %v15076_v43  ;;  %v2828_v43 = vld [vmem:[#allocation17 + $0xf8] sm:$0xff] }
 0x88b   : > { %v2682_v63 = vpop.f32.mrb[4].mxu1 }
 0x88c   : > { %v14590_v2 = vpop.f32.mrb[5].mxu1  ;;  %14600 = vmatmul.mubr.msk.f32.vlgmr.msra.gmra.mrb[12].mxu0 %vm1789_vm2, %v2682_v63  ;;  %v2850_v63 = vld [vmem:[#allocation17 + $0x1a8] sm:$0xff] }
 0x88d   : > { %3148 = vmatprep.mubr.f32.mxu0 %v17249_v1  ;;  %15071 = vmatpush1.bf16.msra.mxu0 %v15070_v24  ;;  %v2836_v2 = vld [vmem:[#allocation17 + $0x138] sm:$0xff]  ;;  %v2823_v24 = vld [vmem:[#allocation17 + $0xd0] sm:$0xff] }
 0x88e   : > { %15073 = vmatprep.subr.bf16.mxu0 %v15072_v33  ;;  %v15102_v31 = vpack.c.bf16 %v2823_v24, %v2807_v23  ;;  %v2853_v33 = vld [vmem:[#allocation17 + $0x1c0] sm:$0xff] }
 0x88f   : > { %v15098_v44 = vpack.c.bf16 %v2853_v33, %v2837_v32  ;;  %v15130_v32 = vpack.c.bf16 %v2911_v29, %v2895_v28  ;;  %v18261_v28 = vsub.s32 6, %v18159_v53 }
 0x891   : > { %15075 = vmatpush1.bf16.msra.mxu0 %v15074_v38  ;;  %v2855_v38 = vld [vmem:[#allocation17 + $0x1d0] sm:$0xff] }
 0x892   : > { %15085 = vmatprep.subr.bf16.mxu0 %v15084_v45  ;;  %v15106_v45 = vpack.c.bf16 %v2855_v38, %v2839_v37  ;;  %v2870_v37 = vld [vmem:[#allocation20 + $0x38] sm:$0xff] }
 0x95f   : > { %v2762_v47 = vpop.f32.mrb[12].mxu0 }
 0x960   : > { %v2763_v4 = vadd.f32 %v14102_v3, %v2762_v47  ;;  %v14601_v5 = vpop.f32.mrb[13].mxu0  ;;  %v2852_v3 = vld [vmem:[#allocation17 + $0x1b8] sm:$0xff] }
 0x961   : > { %v15086_v5 = vpack.c.bf16 %v2819_v60, %v2803_v59  ;;  %v2860_v59 = vld [vmem:[#allocation17 + $0x1f8] sm:$0xff] }
 0x962   : > { %v2766_v6 = vadd.f32 %v2763_v4, %v18102_v26  ;;  %v15078_v4 = vpack.c.bf16 %v2817_v57, %v2801_v56  ;;  %v2842_v56 = vld [vmem:[#allocation17 + $0x168] sm:$0xff] }
 0x963   : > { %v2858_v57 = vld [vmem:[#allocation17 + $0x1e8] sm:$0xff] }
 0x964   : > { %v2769_v7 = vsel %vm1789_vm2, %v2766_v6, 0.0 }
 0x965   : > { %2770 = vadd.xlane.f32.xlu0 %v2769_v7  ;;  %v2849_v7 = vld [vmem:[#allocation17 + $0x1a0] sm:$0xff] }
 0x9f2   : > { %v2771_v8 = vpop.xlane.xlu0 %2770 }
 0x9f3   : > { %v2773_v9 = vmul.f32 0.03125, %v2771_v8 }
 0x9f5   : > { %v2774_v10 = vsub.f32 %v2766_v6, %v2773_v9  ;;  %v2833_v6 = vld [vmem:[#allocation17 + $0x120] sm:$0xff]  ;;  %v15080_v9 = vpack.c.bf16 %v2850_v63, %v2834_v62 }
 0x9f6   : > { %v15082_v17 = vpack.c.bf16 %v2849_v7, %v2833_v6  ;;  %v2841_v63 = vld [vmem:[#allocation17 + $0x160] sm:$0xff]  ;;  %v2864_v6 = vld [vmem:[#allocation20 + $0x8] sm:$0xff] }
 0x9f7   : > { %v2775_v11 = vmul.f32 %v2774_v10, %v2774_v10  ;;  %v2880_v7 = vld [vmem:[#allocation20 + $0x88] sm:$0xff] }
 0x9f8   : > { %v15124_v14 = vpack.c.bf16 %v2880_v7, %v2864_v6  ;;  %v18248_v6 = vsub.s32 5, %v18159_v53  ;;  %v18251_v7 = vsub.s32 7, %v18159_v53 }
 0x9f9   : > { %v2776_v12 = vsel %vm1789_vm2, %v2775_v11, 0.0  ;;  %v15088_v11 = vpack.c.bf16 %v2852_v3, %v2836_v2  ;;  %v2857_v2 = vld [vmem:[#allocation17 + $0x1e0] sm:$0xff]  ;;  %v15112_v3 = vpack.c.bf16 %v2858_v57, %v2842_v56 }
 0x9fa   : > { %2777 = vadd.xlane.f32.xlu1 %v2776_v12  ;;  %v2835_v12 = vld [vmem:[#allocation17 + $0x130] sm:$0xff]  ;;  %v2867_v57 = vld [vmem:[#allocation20 + $0x20] sm:$0xff] }
 0x9fb   : > { %v15090_v18 = vpack.c.bf16 %v2851_v13, %v2835_v12  ;;  %v15114_v12 = vpack.c.bf16 %v2857_v2, %v2841_v63  ;;  %v2869_v2 = vld [vmem:[#allocation20 + $0x30] sm:$0xff] }
 0xa87   : > { %v2778_v48 = vpop.xlane.xlu1 %2777 }
 0xa88   : > { %v2779_v49 = vmul.f32 0.03125, %v2778_v48  ;;  %v2809_v48 = vld [vmem:[#allocation17 + $0x60] sm:$0xff] }
 0xa8a   : > { %v2780_v50 = vadd.f32 1e-05, %v2779_v49  ;;  %v2825_v49 = vld [vmem:[#allocation17 + $0xe0] sm:$0xff] }
 0xa8b   : > { %v15110_v60 = vpack.c.bf16 %v2825_v49, %v2809_v48  ;;  %v18237_v48 = vsub.s32 3, %v18159_v53 }
 0xa8c   : > { %16070 = vrsqrt.f32 %v2780_v50  ;;  %v15108_v50 = vpack.c.bf16 %v2826_v40, %v2810_v39  ;;  %v2886_v39 = vld [vmem:[#allocation20 + $0xb8] sm:$0xff] }
 0xa8d   : > { %v15148_v40 = vpack.c.bf16 %v2886_v39, %v2870_v37  ;;  %v2888_v37 = vld [vmem:[#allocation20 + $0xc8] sm:$0xff]  ;;  %v2890_v39 = vld [vmem:[#allocation20 + $0xd8] sm:$0xff] }
 0xa96   : > { %v16071_v54 = vpop.eup %16070 }
 0xa97   : > { %v2782_v58 = vmul.f32 %v16071_v54, %v2774_v10  ;;  %v2808_v10 = vld [vmem:[#allocation17 + $0x58] sm:$0xff]  ;;  %v2811_v54 = vld [vmem:[#allocation17 + $0x70] sm:$0xff] }
 0xa98   : > { %v15100_v22 = vpack.c.bf16 %v2824_v16, %v2808_v10  ;;  %v2863_v10 = vld [vmem:[#allocation20] sm:$0xff] }
 0xa99   : > { %v2789_v47 = vmul.f32 %v14104_v52, %v2782_v58  ;;  %v15116_v52 = vpack.c.bf16 %v2828_v43, %v2812_v41  ;;  %v2844_v58 = vld [vmem:[#allocation17 + $0x178] sm:$0xff]  ;;  %v2879_v16 = vld [vmem:[#allocation20 + $0x80] sm:$0xff]  ;;  %v18226_v41 = vsub.s32 0, %v18159_v53  ;;  %v18229_v43 = vsub.s32 2, %v18159_v53 }
 0xa9a   : > { %v15126_v23 = vpack.c.bf16 %v2879_v16, %v2863_v10 }
 0xa9b   : > { %v18201_v8 = vadd.f32 %v14105_v55, %v2789_v47  ;;  %v2827_v55 = vld [vmem:[#allocation17 + $0xf0] sm:$0xff]  ;;  %v15120_v47 = vpack.c.bf16 %v2860_v59, %v2844_v58  ;;  %v2883_v58 = vld [vmem:[#allocation20 + $0xa0] sm:$0xff] }
 0xa9c   : > { %v15118_v62 = vpack.c.bf16 %v2827_v55, %v2811_v54 }
 0xa9d   : > { %14106 = vmatmul.mubr.msk.f32.vlgmr.msra.gmra.mrb[6].mxu1 %vm1789_vm2, %v18201_v8  ;;  %14107 = vmatmul.mubr.msk.f32.vlgmr.msra.gmra.mrb[14].mxu0 %vm1789_vm2, %v18201_v8 }
 0xa9e   : > { %15079 = vmatpush1.bf16.msra.mxu1 %v15078_v4  ;;  %15087 = vmatpush1.bf16.msra.mxu0 %v15086_v5  ;;  %v2843_v4 = vld [vmem:[#allocation17 + $0x170] sm:$0xff] }
 0xa9f   : > { %15081 = vmatprep.subr.bf16.mxu1 %v15080_v9  ;;  %15089 = vmatprep.subr.bf16.mxu0 %v15088_v11  ;;  %v2859_v5 = vld [vmem:[#allocation17 + $0x1f0] sm:$0xff]  ;;  %v2866_v9 = vld [vmem:[#allocation20 + $0x18] sm:$0xff] }
 0xaa0   : > { %3219 = vmatprep.mubr.f32.mxu1 %v17249_v1  ;;  %3290 = vmatprep.mubr.f32.mxu0 %v17249_v1  ;;  %v2882_v11 = vld [vmem:[#allocation20 + $0x98] sm:$0xff]  ;;  %v15122_v13 = vpack.c.bf16 %v2859_v5, %v2843_v4 }
 0xaa1   : > { %v15132_v15 = vpack.c.bf16 %v2882_v11, %v2866_v9  ;;  %v2916_v9 = vld [vmem:[#allocation20 + $0x1a8] sm:$0xff]  ;;  %v2902_v11 = vld [vmem:[#allocation20 + $0x138] sm:$0xff] }
 0xaa2   : > { %15083 = vmatpush1.bf16.msra.mxu1 %v15082_v17  ;;  %15091 = vmatpush1.bf16.msra.mxu0 %v15090_v18  ;;  %v2865_v17 = vld [vmem:[#allocation20 + $0x10] sm:$0xff] }
 0xaa3   : > { %15093 = vmatprep.subr.bf16.mxu1 %v15092_v21  ;;  %15101 = vmatprep.subr.bf16.mxu0 %v15100_v22  ;;  %v2881_v18 = vld [vmem:[#allocation20 + $0x90] sm:$0xff]  ;;  %v2898_v21 = vld [vmem:[#allocation20 + $0x118] sm:$0xff] }
 0xaa4   : > { %v2914_v22 = vld [vmem:[#allocation20 + $0x198] sm:$0xff]  ;;  %v15134_v24 = vpack.c.bf16 %v2881_v18, %v2865_v17 }
 0xaa5   : > { %14108 = vmatmul.mubr.msk.f32.vlgmr.msra.gmra.mrb[8].mxu1 %vm1789_vm2, %v18201_v8  ;;  %14109 = vmatmul.mubr.msk.f32.vlgmr.msra.gmra.mrb[16].mxu0 %vm1789_vm2, %v18201_v8  ;;  %v15136_v27 = vpack.c.bf16 %v2914_v22, %v2898_v21  ;;  %v18258_v22 = vsub.s32 4, %v18159_v53 }
 0xaa6   : > { %15095 = vmatpush1.bf16.msra.mxu1 %v15094_v30  ;;  %15103 = vmatpush1.bf16.msra.mxu0 %v15102_v31  ;;  %v2897_v30 = vld [vmem:[#allocation20 + $0x110] sm:$0xff] }
 0xaa7   : > { %15097 = vmatprep.subr.bf16.mxu1 %v15096_v34  ;;  %15105 = vmatprep.subr.bf16.mxu0 %v15104_v36  ;;  %v2913_v31 = vld [vmem:[#allocation20 + $0x190] sm:$0xff]  ;;  %v2868_v34 = vld [vmem:[#allocation20 + $0x28] sm:$0xff] }
 0xaa8   : > { %3361 = vmatprep.mubr.f32.mxu1 %v17249_v1  ;;  %3432 = vmatprep.mubr.f32.mxu0 %v17249_v1  ;;  %v15138_v33 = vpack.c.bf16 %v2913_v31, %v2897_v30  ;;  %v2884_v36 = vld [vmem:[#allocation20 + $0xa8] sm:$0xff]  ;;  %v2901_v31 = vld [vmem:[#allocation20 + $0x130] sm:$0xff] }
 0xaa9   : > { %v15140_v38 = vpack.c.bf16 %v2884_v36, %v2868_v34 }
 0xaaa   : > { %15099 = vmatpush1.bf16.msra.mxu1 %v15098_v44  ;;  %15107 = vmatpush1.bf16.msra.mxu0 %v15106_v45  ;;  %v18231_v44 = vld [vmem:[#allocation19] sm:$0xff]  ;;  %v18234_v45 = vsub.s32 1, %v18159_v53 }
 0xaab   : > { %15109 = vmatprep.subr.bf16.mxu1 %v15108_v50  ;;  %15117 = vmatprep.subr.bf16.mxu0 %v15116_v52  ;;  %v2933_v49 = vrot.slane %v18231_v44, %v18226_v41  ;;  %v2941_v50 = vrot.slane %v18231_v44, %v18229_v43  ;;  %v2945_v54 = vrot.slane %v18231_v44, %v18237_v48 }
 0xaac   : > { %v2937_v52 = vrot.slane %v18231_v44, %v18234_v45  ;;  %v2953_v20 = vrot.slane %v18231_v44, %v18248_v6  ;;  %v2961_v21 = vrot.slane %v18231_v44, %v18251_v7  ;;  %v2949_v53 = vrot.slane %v18231_v44, %v18258_v22 }
 0xaad   : > { %14110 = vmatmul.mubr.msk.f32.vlgmr.msra.gmra.mrb[10].mxu1 %vm1789_vm2, %v18201_v8  ;;  %14111 = vmatmul.mubr.msk.f32.vlgmr.msra.gmra.mrb[18].mxu0 %vm1789_vm2, %v18201_v8 }
 0xaae   : > { %15111 = vmatpush1.bf16.msra.mxu1 %v15110_v60  ;;  %15119 = vmatpush1.bf16.msra.mxu0 %v15118_v62 }
 0xaaf   : > { %15113 = vmatprep.subr.bf16.mxu1 %v15112_v3  ;;  %15121 = vmatprep.subr.bf16.mxu0 %v15120_v47  ;;  %v2885_v3 = vld [vmem:[#allocation20 + $0xb0] sm:$0xff]  ;;  %v2900_v47 = vld [vmem:[#allocation20 + $0x128] sm:$0xff] }
 0xab0   : > { %3503 = vmatprep.mubr.f32.mxu1 %v17249_v1  ;;  %3574 = vmatprep.mubr.f32.mxu0 %v17249_v1  ;;  %v15150_v10 = vpack.c.bf16 %v2885_v3, %v2869_v2  ;;  %v15144_v18 = vpack.c.bf16 %v2916_v9, %v2900_v47  ;;  %v2873_v9 = vld [vmem:[#allocation20 + $0x50] sm:$0xff] }
 0xab2   : > { %15115 = vmatpush1.bf16.msra.mxu1 %v15114_v12  ;;  %15123 = vmatpush1.bf16.msra.mxu0 %v15122_v13  ;;  %v2918_v12 = vld [vmem:[#allocation20 + $0x1b8] sm:$0xff] }
 0xab3   : > { %15125 = vmatprep.subr.bf16.mxu1 %v15124_v14  ;;  %15133 = vmatprep.subr.bf16.mxu0 %v15132_v15  ;;  %v15142_v15 = vpack.c.bf16 %v2883_v58, %v2867_v57  ;;  %v15152_v19 = vpack.c.bf16 %v2918_v12, %v2902_v11  ;;  %v2889_v11 = vld [vmem:[#allocation20 + $0xd0] sm:$0xff]  ;;  %v2904_v12 = vld [vmem:[#allocation20 + $0x148] sm:$0xff] }
 0xab5   : > { %14112 = vmatmul.mubr.msk.f32.vlgmr.msra.gmra.mrb[12].mxu1 %vm1789_vm2, %v18201_v8  ;;  %14113 = vmatmul.mubr.msk.f32.vlgmr.msra.gmra.mrb[20].mxu0 %vm1789_vm2, %v18201_v8 }
 0xabb   : > { %15127 = vmatpush1.bf16.xpose.msra.mxu1 %v15126_v23  ;;  %15135 = vmatpush1.bf16.xpose.msra.mxu0 %v15134_v24 }
 0xabc   : > { %15129 = vmatprep.subr.bf16.mxu1 %v15128_v25  ;;  %15137 = vmatprep.subr.bf16.mxu0 %v15136_v27  ;;  %v2899_v25 = vld [vmem:[#allocation20 + $0x120] sm:$0xff] }
 0xabd   : > { %v2915_v27 = vld [vmem:[#allocation20 + $0x1a0] sm:$0xff] }
 0xac3   : > { %15131 = vmatpush1.bf16.xpose.msra.mxu1 %v15130_v32  ;;  %15139 = vmatpush1.bf16.xpose.msra.mxu0 %v15138_v33  ;;  %v2917_v32 = vld [vmem:[#allocation20 + $0x1b0] sm:$0xff]  ;;  %v2872_v33 = vld [vmem:[#allocation20 + $0x48] sm:$0xff] }
 0xac4   : > { %15141 = vmatprep.subr.bf16.mxu1 %v15140_v38  ;;  %15149 = vmatprep.subr.bf16.mxu0 %v15148_v40  ;;  %v2874_v38 = vld [vmem:[#allocation20 + $0x58] sm:$0xff]  ;;  %v18263_v40 = vld [vmem:[#allocation19 + $0x8] sm:$0xff] }
 0xac5   : > { %v15164_v57 = vpack.c.bf16 %v2890_v39, %v2874_v38  ;;  %v2969_v58 = vrot.slane %v18263_v40, %v18234_v45  ;;  %v2878_v38 = vld [vmem:[#allocation20 + $0x78] sm:$0xff] }
 0xac6   : > { %v2894_v39 = vld [vmem:[#allocation20 + $0xf8] sm:$0xff] }
 0xb70   : > { %v3079_v55 = vpop.f32.mrb[6].mxu1  ;;  %v3150_v56 = vpop.f32.mrb[14].mxu0 }
 0xb71   : > { %v3080_v59 = vadd.f32 %v3079_v55, %v2933_v49  ;;  %v3151_v60 = vadd.f32 %v3150_v56, %v2941_v50  ;;  %v3081_v62 = vpop.f32.mrb[7].mxu1  ;;  %v3152_v63 = vpop.f32.mrb[15].mxu0  ;;  %v2957_v55 = vrot.slane %v18231_v44, %v18261_v28  ;;  %v15156_v56 = vpack.c.bf16 %v2888_v37, %v2872_v33  ;;  %v2871_v44 = vld [vmem:[#allocation20 + $0x40] sm:$0xff]  ;;  %v2905_v33 = vld [vmem:[#allocation20 + $0x150] sm:$0xff]  ;;  %v2892_v37 = vld [vmem:[#allocation20 + $0xe8] sm:$0xff] }
 0xb72   : > { %v3082_v4 = vadd.f32 %v3081_v62, %v2937_v52  ;;  %v3153_v5 = vadd.f32 %v3152_v63, %v2945_v54  ;;  %v15146_v52 = vpack.c.bf16 %v2915_v27, %v2899_v25  ;;  %v15154_v54 = vpack.c.bf16 %v2917_v32, %v2901_v31  ;;  %v2903_v31 = vld [vmem:[#allocation20 + $0x140] sm:$0xff] }
 0xb73   : > { %v3581_v16 = vmax.f32 %v3080_v59, 0.0  ;;  %v3583_v17 = vmax.f32 %v3151_v60, 0.0  ;;  %v2977_v59 = vrot.slane %v18263_v40, %v18237_v48  ;;  %v2919_v32 = vld [vmem:[#allocation20 + $0x1c0] sm:$0xff] }
 0xb74   : > { %v3582_v13 = vmax.f32 %v3082_v4, 0.0  ;;  %v3584_v14 = vmax.f32 %v3153_v5, 0.0  ;;  %v2887_v4 = vld [vmem:[#allocation20 + $0xc0] sm:$0xff] }
 0xb76   : > { %3667 = vmatprep.mubr.f32.mxu1 %v3582_v13  ;;  %3737 = vmatprep.mubr.f32.mxu0 %v3584_v14  ;;  %v2920_v14 = vld [vmem:[#allocation20 + $0x1c8] sm:$0xff] }
 0xb77   : > { %3668 = vmatmul.mubr.f32.vlgmr.msra.gmra.mrb[14].mxu1 %v3581_v16  ;;  %3738 = vmatmul.mubr.f32.vlgmr.msra.gmra.mrb[22].mxu0 %v3583_v17  ;;  %v15158_v16 = vpack.c.bf16 %v2887_v4, %v2871_v44  ;;  %v2908_v4 = vld [vmem:[#allocation20 + $0x168] sm:$0xff] }
 0xb78   : > { %v3221_v23 = vpop.f32.mrb[8].mxu1  ;;  %v3292_v24 = vpop.f32.mrb[16].mxu0  ;;  %15143 = vmatpush1.bf16.xpose.msra.mxu1 %v15142_v15  ;;  %15151 = vmatpush1.bf16.xpose.msra.mxu0 %v15150_v10  ;;  %v2906_v15 = vld [vmem:[#allocation20 + $0x158] sm:$0xff] }
 0xb79   : > { %v3223_v29 = vpop.f32.mrb[9].mxu1  ;;  %v3294_v30 = vpop.f32.mrb[17].mxu0  ;;  %15145 = vmatprep.subr.bf16.mxu1 %v15144_v18  ;;  %15153 = vmatprep.subr.bf16.mxu0 %v15152_v19  ;;  %v3222_v63 = vadd.f32 %v3221_v23, %v2949_v53  ;;  %v3293_v2 = vadd.f32 %v3292_v24, %v2957_v55  ;;  %v2922_v10 = vld [vmem:[#allocation20 + $0x1d8] sm:$0xff]  ;;  %v15166_v19 = vpack.c.bf16 %v2889_v11, %v2873_v9 }
 0xb7a   : > { %v3224_v34 = vadd.f32 %v3223_v29, %v2953_v20  ;;  %v3295_v36 = vadd.f32 %v3294_v30, %v2961_v21  ;;  %v15160_v21 = vpack.c.bf16 %v2920_v14, %v2904_v12  ;;  %v15168_v23 = vpack.c.bf16 %v2922_v10, %v2906_v15  ;;  %v2910_v12 = vld [vmem:[#allocation20 + $0x178] sm:$0xff] }
 0xb7b   : > { %v3585_v17 = vmax.f32 %v3222_v63, 0.0  ;;  %v3587_v18 = vmax.f32 %v3293_v2, 0.0  ;;  %v2973_v53 = vrot.slane %v18263_v40, %v18229_v43  ;;  %v15180_v55 = vpack.c.bf16 %v2894_v39, %v2878_v38  ;;  %v2891_v63 = vld [vmem:[#allocation20 + $0xe0] sm:$0xff] }
 0xb7c   : > { %v3586_v49 = vmax.f32 %v3224_v34, 0.0  ;;  %v3588_v50 = vmax.f32 %v3295_v36, 0.0  ;;  %v2921_v34 = vld [vmem:[#allocation20 + $0x1d0] sm:$0xff]  ;;  %v2876_v36 = vld [vmem:[#allocation20 + $0x68] sm:$0xff] }
 0xb7e   : > { %3807 = vmatprep.mubr.f32.mxu1 %v3586_v49  ;;  %3877 = vmatprep.mubr.f32.mxu0 %v3588_v50  ;;  %v15162_v49 = vpack.c.bf16 %v2919_v32, %v2903_v31  ;;  %v2965_v50 = vrot.slane %v18263_v40, %v18226_v41 }
 0xb80   : > { %v3363_v60 = vpop.f32.mrb[10].mxu1  ;;  %v3434_v62 = vpop.f32.mrb[18].mxu0  ;;  %15147 = vmatpush1.bf16.xpose.msra.mxu1 %v15146_v52  ;;  %15155 = vmatpush1.bf16.xpose.msra.mxu0 %v15154_v54  ;;  %v15170_v52 = vpack.c.bf16 %v2921_v34, %v2905_v33  ;;  %v15172_v54 = vpack.c.bf16 %v2892_v37, %v2876_v36 }
 0xb81   : > { %v3365_v3 = vpop.f32.mrb[11].mxu1  ;;  %v3436_v47 = vpop.f32.mrb[19].mxu0  ;;  %15157 = vmatprep.subr.bf16.mxu1 %v15156_v56  ;;  %15165 = vmatprep.subr.bf16.mxu0 %v15164_v57  ;;  %v2985_v56 = vrot.slane %v18263_v40, %v18248_v6  ;;  %v2993_v57 = vrot.slane %v18263_v40, %v18251_v7  ;;  %v3435_v2 = vadd.f32 %v3434_v62, %v2973_v53  ;;  %v2907_v62 = vld [vmem:[#allocation20 + $0x160] sm:$0xff] }
 0xb82   : > { %v3366_v5 = vadd.f32 %v3365_v3, %v2969_v58  ;;  %v3437_v13 = vadd.f32 %v3436_v47, %v2977_v59  ;;  %v3364_v58 = vadd.f32 %v3363_v60, %v2965_v50  ;;  %v2875_v59 = vld [vmem:[#allocation20 + $0x60] sm:$0xff]  ;;  %v2877_v3 = vld [vmem:[#allocation20 + $0x70] sm:$0xff] }
 0xb83   : > { %v2893_v47 = vld [vmem:[#allocation20 + $0xf0] sm:$0xff]  ;;  %v15174_v11 = vpack.c.bf16 %v2891_v63, %v2875_v59  ;;  %v3591_v10 = vmax.f32 %v3435_v2, 0.0 }
 0xb84   : > { %v3590_v20 = vmax.f32 %v3366_v5, 0.0  ;;  %v3592_v24 = vmax.f32 %v3437_v13, 0.0  ;;  %v2924_v5 = vld [vmem:[#allocation20 + $0x1e8] sm:$0xff]  ;;  %v2926_v13 = vld [vmem:[#allocation20 + $0x1f8] sm:$0xff]  ;;  %v3589_v14 = vmax.f32 %v3364_v58, 0.0  ;;  %v15182_v15 = vpack.c.bf16 %v2893_v47, %v2877_v3 }
 0xb87   : > { %3808 = vmatmul.mubr.f32.vlgmr.msra.gmra.mrb[16].mxu1 %v3585_v17  ;;  %3878 = vmatmul.mubr.f32.vlgmr.msra.gmra.mrb[24].mxu0 %v3587_v18  ;;  %v15184_v17 = vpack.c.bf16 %v2926_v13, %v2910_v12 }
 0xb88   : > { %v18273_v25 = vpop.f32.mrb[12].mxu1  ;;  %v18275_v27 = vpop.f32.mrb[20].mxu0  ;;  %15159 = vmatpush1.bf16.xpose.msra.mxu1 %v15158_v16  ;;  %3947 = vmatprep.mubr.f32.mxu1 %v3590_v20  ;;  %v15176_v16 = vpack.c.bf16 %v2924_v5, %v2908_v4  ;;  %v2909_v20 = vld [vmem:[#allocation20 + $0x170] sm:$0xff] }
 0xb89   : > { %15167 = vmatpush1.bf16.xpose.msra.mxu0 %v15166_v19  ;;  %4017 = vmatprep.mubr.f32.mxu0 %v3592_v24  ;;  %v3507_v29 = vpop.f32.mrb[13].mxu1  ;;  %v3578_v30 = vpop.f32.mrb[21].mxu0  ;;  %v2923_v19 = vld [vmem:[#allocation20 + $0x1e0] sm:$0xff]  ;;  %v2981_v24 = vrot.slane %v18263_v40, %v18258_v22 }
 0xb8a   : > { %15161 = vmatprep.subr.bf16.mxu1 %v15160_v21  ;;  %15169 = vmatprep.subr.bf16.mxu0 %v15168_v23  ;;  %v3508_v44 = vadd.f32 %v3507_v29, %v2985_v56  ;;  %v3579_v9 = vadd.f32 %v3578_v30, %v2993_v57  ;;  %v2925_v21 = vld [vmem:[#allocation20 + $0x1f0] sm:$0xff]  ;;  %v15178_v23 = vpack.c.bf16 %v2923_v19, %v2907_v62  ;;  %v4199_v19 = vld [vmem:[#allocation8 + $0x88] sm:$0xff] }
 0xb8b   : > { %v15186_v29 = vpack.c.bf16 %v2925_v21, %v2909_v20  ;;  %v2989_v30 = vrot.slane %v18263_v40, %v18261_v28  ;;  %v3506_v31 = vadd.f32 %v18273_v25, %v2981_v24  ;;  %v14114_v40 = vld [vmem:[#allocation22] ss:$0 sm:$0xff]  ;;  %v4198_v62 = vld [vmem:[#allocation8 + $0x80] sm:$0xff]  ;;  %v4196_v21 = vld [vmem:[#allocation8 + $0x70] sm:$0xff] }
 0xb8c   : > { %v3594_v60 = vmax.f32 %v3508_v44, 0.0  ;;  %v3596_v18 = vmax.f32 %v3579_v9, 0.0  ;;  %v15195_v20 = vpack.c.bf16 %v4199_v19, %v4198_v62 }
 0xb8d   : > { %v3577_v32 = vadd.f32 %v18275_v27, %v2989_v30  ;;  %v3593_v33 = vmax.f32 %v3506_v31, 0.0 }
 0xb8f   : > { %v3595_v34 = vmax.f32 %v3577_v32, 0.0 }
 0xb90   : > { %15163 = vmatpush1.bf16.xpose.msra.mxu1 %v15162_v49 }
 0xb91   : > { %15171 = vmatpush1.bf16.xpose.msra.mxu0 %v15170_v52  ;;  %15173 = vmatprep.subr.bf16.mxu1 %v15172_v54 }
 0xb92   : > { %15181 = vmatprep.subr.bf16.mxu0 %v15180_v55 }
 0xb97   : > { %3948 = vmatmul.mubr.f32.vlgmr.msra.gmra.mrb[18].mxu1 %v3589_v14 }
 0xb98   : > { %4018 = vmatmul.mubr.f32.vlgmr.msra.gmra.mrb[26].mxu0 %v3591_v10  ;;  %15175 = vmatpush1.bf16.xpose.msra.mxu1 %v15174_v11 }
 0xb99   : > { %4087 = vmatprep.mubr.f32.mxu1 %v3594_v60  ;;  %15183 = vmatpush1.bf16.xpose.msra.mxu0 %v15182_v15  ;;  %v4194_v60 = vld [vmem:[#allocation8 + $0x60] sm:$0xff] }
 0xb9a   : > { %4157 = vmatprep.mubr.f32.mxu0 %v3596_v18  ;;  %15177 = vmatprep.subr.bf16.mxu1 %v15176_v16 }
 0xb9b   : > { %15185 = vmatprep.subr.bf16.mxu0 %v15184_v17  ;;  %v4195_v17 = vld [vmem:[#allocation8 + $0x68] sm:$0xff] }
 0xb9c   : > { %v15189_v18 = vpack.c.bf16 %v4195_v17, %v4194_v60 }
 0xba0   : > { %15179 = vmatpush1.bf16.xpose.msra.mxu1 %v15178_v23  ;;  %v4197_v23 = vld [vmem:[#allocation8 + $0x78] sm:$0xff] }
 0xba1   : > { %15187 = vmatpush1.bf16.xpose.msra.mxu0 %v15186_v29  ;;  %15188 = vmatprep.subr.bf16.mxu1 %v17247_v0  ;;  %v15192_v24 = vpack.c.bf16 %v4197_v23, %v4196_v21  ;;  %v4201_v29 = vld [vmem:[#allocation8 + $0x98] sm:$0xff] }
 0xba2   : > { %15194 = vmatprep.subr.bf16.mxu0 %v17247_v0 }
 0xba7   : > { %4088 = vmatmul.mubr.f32.vlgmr.msra.gmra.mrb[20].mxu1 %v3593_v33 }
 0xba8   : > { %4158 = vmatmul.mubr.f32.vlgmr.msra.gmra.mrb[28].mxu0 %v3595_v34  ;;  %14610 = vmatprep.mubr.msk.f32.mxu1 %vm17248_vm0, %v17249_v1 }
 0xba9   : > { %14621 = vmatprep.mubr.msk.f32.mxu0 %vm17248_vm0, %v17249_v1  ;;  %15190 = vmatpush3.bf16.msra.mxu1 %v15189_v18 }
 0xbaa   : > { %15196 = vmatpush3.bf16.msra.mxu0 %v15195_v20  ;;  %15191 = vmatprep.subr.bf16.mxu1 %v17247_v0 }
 0xbab   : > { %15197 = vmatprep.subr.bf16.mxu0 %v17247_v0 }
 0xbad   : > { %15193 = vmatpush3.bf16.msra.mxu1 %v15192_v24 }
 0xbae   : > { %15200 = vmatprep.subr.bf16.mxu1 %v17247_v0 }
 0xc4a   : > { %v3669_v36 = vpop.f32.mrb[14].mxu1  ;;  %v3739_v25 = vpop.f32.mrb[22].mxu0 }
 0xc4b   : > { %v3670_v37 = vadd.f32 %v14114_v40, %v3669_v36  ;;  %v3671_v38 = vpop.f32.mrb[15].mxu1  ;;  %v3741_v39 = vpop.f32.mrb[23].mxu0  ;;  %v14115_v40 = vld [vmem:[#allocation23] ss:$0 sm:$0xff] }
 0xc4c   : > { %v14116_v38 = vld [vmem:[#allocation25] ss:$0 sm:$0xff] }
 0xc4d   : > { %v3740_v49 = vadd.f32 %v3739_v25, %v3670_v37  ;;  %v4202_v25 = vld [vmem:[#allocation8 + $0xa0] sm:$0xff]  ;;  %v4203_v37 = vld [vmem:[#allocation8 + $0xa8] sm:$0xff] }
 0xc5a   : > { %v3809_v27 = vpop.f32.mrb[16].mxu1  ;;  %v3879_v50 = vpop.f32.mrb[24].mxu0 }
 0xc5b   : > { %v3810_v52 = vadd.f32 %v3809_v27, %v3740_v49  ;;  %v3811_v54 = vpop.f32.mrb[17].mxu1  ;;  %v3881_v53 = vpop.f32.mrb[25].mxu0  ;;  %v15201_v49 = vpack.c.bf16 %v4203_v37, %v4202_v25 }
 0xc5c   : > { %v14117_v53 = vld [vmem:[#allocation10 + $0x3] ss:$0 sm:$0xff] }
 0xc5d   : > { %v3880_v55 = vadd.f32 %v3879_v50, %v3810_v52  ;;  %v4204_v50 = vld [vmem:[#allocation8 + $0xb0] sm:$0xff]  ;;  %v4205_v52 = vld [vmem:[#allocation8 + $0xb8] sm:$0xff] }
 0xc5e   : > { %v15204_v54 = vpack.c.bf16 %v4205_v52, %v4204_v50 }
 0xc6a   : > { %v3949_v56 = vpop.f32.mrb[18].mxu1 }
 0xc6b   : > { %v3950_v57 = vadd.f32 %v3949_v56, %v3880_v55  ;;  %v4019_v58 = vpop.f32.mrb[26].mxu0  ;;  %v3951_v59 = vpop.f32.mrb[19].mxu1  ;;  %v14119_v55 = vld [vmem:[#allocation10 + $0x4] ss:$0 sm:$0xff] }
 0xc6c   : > { %v4021_v63 = vpop.f32.mrb[27].mxu0 }
 0xc6d   : > { %v4020_v2 = vadd.f32 %v4019_v58, %v3950_v57 }
 0xc7a   : > { %v4089_v3 = vpop.f32.mrb[20].mxu1 }
 0xc7b   : > { %v4090_v47 = vadd.f32 %v4089_v3, %v4020_v2  ;;  %v4159_v44 = vpop.f32.mrb[28].mxu0  ;;  %v4091_v4 = vpop.f32.mrb[21].mxu1 }
 0xc7c   : > { %v4161_v5 = vpop.f32.mrb[29].mxu0 }
 0xc7d   : > { %v4160_v9 = vadd.f32 %v4159_v44, %v4090_v47  ;;  %v14121_v47 = vld [vmem:[#allocation10 + $0x5] ss:$0 sm:$0xff] }
 0xc7f   : > { %v4163_v11 = vadd.f32 %v4160_v9, %v18201_v8  ;;  %v4200_v8 = vld [vmem:[#allocation8 + $0x90] sm:$0xff] }
 0xc80   : > { %v15198_v30 = vpack.c.bf16 %v4201_v29, %v4200_v8 }
 0xc81   : > { %v4166_v12 = vsel %vm1789_vm2, %v4163_v11, 0.0 }
 0xc82   : > { %4167 = vadd.xlane.f32.xlu0 %v4166_v12  ;;  %15199 = vmatpush3.bf16.msra.mxu0 %v15198_v30 }
 0xc83   : > { %14635 = vmatprep.subr.mxu0 %v17249_v1 }
 0xd0f   : > { %v4168_v13 = vpop.xlane.xlu0 %4167 }
 0xd10   : > { %v4169_v14 = vmul.f32 0.03125, %v4168_v13 }
 0xd12   : > { %v4170_v15 = vsub.f32 %v4163_v11, %v4169_v14 }
 0xd14   : > { %v4171_v10 = vmul.f32 %v4170_v15, %v4170_v15 }
 0xd16   : > { %v4172_v16 = vsel %vm1789_vm2, %v4171_v10, 0.0 }
 0xd17   : > { %4173 = vadd.xlane.f32.xlu1 %v4172_v16 }
 0xda4   : > { %v4174_v31 = vpop.xlane.xlu1 %4173 }
 0xda5   : > { %v4175_v32 = vmul.f32 0.03125, %v4174_v31 }
 0xda7   : > { %v4176_v33 = vadd.f32 1e-05, %v4175_v32 }
 0xda9   : > { %16072 = vrsqrt.f32 %v4176_v33 }
 0xdb3   : > { %v16073_v34 = vpop.eup %16072 }
 0xdb4   : > { %v4178_v36 = vmul.f32 %v16073_v34, %v4170_v15 }
 0xdb6   : > { %v4185_v39 = vmul.f32 %v14115_v40, %v4178_v36 }
 0xdb8   : > { %v18304_v27 = vadd.f32 %v14116_v38, %v4185_v39 }
 0xdba   : > { %14611 = vmatmul.mubr.msk.f32.vlgmr.msra.gmra.mrb[22].mxu1 %vm1789_vm2, %v18304_v27  ;;  %14622 = vmatmul.mubr.msk.f32.vlgmr.msra.gmra.mrb[30].mxu0 %vm1789_vm2, %v18304_v27 }
 0xdbb   : > { %15202 = vmatpush3.bf16.msra.mxu1 %v15201_v49  ;;  %14632 = vmatprep.mubr.msk.f32.mxu1 %vm17248_vm0, %v17249_v1 }
 0xdbc   : > { %15203 = vmatprep.subr.bf16.mxu1 %v17247_v0  ;;  %14637 = vmatprep.mubr.msk.f32.mxu0 %vm17248_vm0, %v17249_v1 }
 0xdbf   : > { %15205 = vmatpush3.bf16.msra.mxu1 %v15204_v54 }
 0xdc0   : > { %14645 = vmatprep.subr.mxu1 %v17249_v1 }
 0xdc2   : > { %14633 = vmatmul.mubr.msk.f32.vlgmr.msra.gmra.mrb[24].mxu1 %vm1789_vm2, %v18304_v27 }
 0xdc3   : > { %14647 = vmatprep.mubr.msk.f32.mxu1 %vm17248_vm0, %v17249_v1 }
 0xe8d   : > { %v4292_v56 = vpop.f32.mrb[22].mxu1  ;;  %v4368_v57 = vpop.f32.mrb[30].mxu0 }
 0xe8e   : > { %v4293_v58 = vadd.f32 %v14117_v53, %v4292_v56  ;;  %v4369_v59 = vadd.f32 %v14119_v55, %v4368_v57  ;;  %v14612_v63 = vpop.f32.mrb[23].mxu1  ;;  %v14623_v2 = vpop.f32.mrb[31].mxu0 }
 0xe90   : > { %v4448_v3 = vmul.f32 %v4293_v58, %v18119_v35  ;;  %14636 = vmatpush3.xpose.msk.msra.mxu0 %vm1789_vm2, %v4369_v59  ;;  %v4539_v44 = vmul.f32 %v4293_v58, %v18125_v42  ;;  %v4773_v12 = vmul.f32 %v4293_v58, %v18134_v46  ;;  %v4935_v13 = vmul.f32 %v4293_v58, %v18147_v51 }
 0xe91   : > { %14640 = vmatprep.subr.mxu0 %v17249_v1 }
 0xe93   : > { %14638 = vmatmul.mubr.msk.f32.vlgmr.msra.gmra.mrb[32].mxu0 %vm1789_vm2, %v4448_v3 }
 0xe94   : > { %14641 = vmatpush3.xpose.msk.msra.mxu0 %vm1789_vm2, %v4369_v59  ;;  %14642 = vmatprep.mubr.msk.f32.mxu0 %vm17248_vm0, %v17249_v1 }
 0xe95   : > { %v4444_v4 = vpop.f32.mrb[24].mxu1  ;;  %14655 = vmatprep.subr.mxu0 %v17249_v1 }
 0xe96   : > { %v18329_v5 = vadd.f32 %v14121_v47, %v4444_v4  ;;  %v14634_v9 = vpop.f32.mrb[25].mxu1  ;;  %v4212_v4 = vld [vmem:[#allocation11 + $0x28] sm:$0xff] }
 0xe97   : > { %14643 = vmatmul.mubr.msk.f32.vlgmr.msra.gmra.mrb[34].mxu0 %vm1789_vm2, %v4539_v44  ;;  %v4211_v44 = vld [vmem:[#allocation11 + $0x20] sm:$0xff]  ;;  %v4213_v9 = vld [vmem:[#allocation11 + $0x30] sm:$0xff] }
 0xe98   : > { %14656 = vmatpush3.xpose.msk.msra.mxu0 %vm1789_vm2, %v4369_v59  ;;  %v4626_v11 = vmul.f32 %v18329_v5, %v18125_v42  ;;  %14657 = vmatprep.mubr.msk.f32.mxu0 %vm17248_vm0, %v17249_v1 }
 0xe99   : > { %14665 = vmatprep.subr.mxu0 %v17249_v1 }
 0xe9a   : > { %14646 = vmatpush3.msra.mxu1 %v4626_v11  ;;  %v15207_v11 = vpack.c.bf16 %v4212_v4, %v4211_v44  ;;  %v5244_v44 = vld [vmem:[#allocation17 + $0x318] sm:$0xff] }
 0xe9b   : > { %14658 = vmatmul.mubr.msk.f32.vlgmr.msra.gmra.mrb[36].mxu0 %vm1789_vm2, %v4773_v12  ;;  %14650 = vmatprep.subr.mxu1 %v17249_v1  ;;  %v4214_v12 = vld [vmem:[#allocation11 + $0x38] sm:$0xff] }
 0xe9c   : > { %14666 = vmatpush3.xpose.msk.msra.mxu0 %vm1789_vm2, %v4369_v59  ;;  %14667 = vmatprep.mubr.msk.f32.mxu0 %vm17248_vm0, %v17249_v1 }
 0xe9d   : > { %15206 = vmatprep.subr.bf16.mxu0 %v17247_v0 }
 0xe9f   : > { %14668 = vmatmul.mubr.msk.f32.vlgmr.msra.gmra.mrb[38].mxu0 %vm1789_vm2, %v4935_v13  ;;  %v15210_v13 = vpack.c.bf16 %v4214_v12, %v4213_v9  ;;  %v5260_v9 = vld [vmem:[#allocation17 + $0x398] sm:$0xff]  ;;  %v5257_v12 = vld [vmem:[#allocation17 + $0x380] sm:$0xff] }
 0xea0   : > { %14683 = vmatprep.mubr.msk.f32.mxu0 %vm17248_vm0, %v17249_v1  ;;  %15208 = vmatpush3.bf16.msra.mxu0 %v15207_v11  ;;  %v5241_v11 = vld [vmem:[#allocation17 + $0x300] sm:$0xff] }
 0xea1   : > { %15209 = vmatprep.subr.bf16.mxu0 %v17247_v0 }
 0xea4   : > { %15211 = vmatpush3.bf16.msra.mxu0 %v15210_v13  ;;  %v15224_v13 = vpack.c.bf16 %v5260_v9, %v5244_v44  ;;  %v5233_v44 = vld [vmem:[#allocation17 + $0x2c0] sm:$0xff] }
 0xf66   : > { %v4521_v14 = vpop.f32.mrb[32].mxu0 }
 0xf67   : > { %v4525_v15 = vmul.f32 0.35355338, %v4521_v14  ;;  %v14639_v10 = vpop.f32.mrb[33].mxu0 }
 0xf69   : > { %v4526_v16 = vadd.f32 %v4525_v15, %v18162_v61 }
 0xf6a   : > { %v4609_v60 = vpop.f32.mrb[34].mxu0 }
 0xf6b   : > { %v4613_v17 = vmul.f32 0.35355338, %v4609_v60  ;;  %v14644_v18 = vpop.f32.mrb[35].mxu0  ;;  %v4527_v62 = vsel %vm2104_vm14, %v4526_v16, -inf }
 0xf6c   : > { %4528 = vmax.xlane.f32.xlu1 %v4527_v62 }
 0xf6d   : > { %v4614_v19 = vadd.f32 %v4613_v17, %v18162_v61  ;;  %v4538_v17 = vmul.f32 %v18329_v5, %v18119_v35 }
 0xf6e   : > { %v4843_v20 = vpop.f32.mrb[36].mxu0 }
 0xf6f   : > { %v4847_v21 = vmul.f32 0.35355338, %v4843_v20  ;;  %v14659_v23 = vpop.f32.mrb[37].mxu0  ;;  %v4615_v8 = vsel %vm2104_vm14, %v4614_v19, -inf  ;;  %v4860_v20 = vmul.f32 %v18329_v5, %v18134_v46 }
 0xf70   : > { %4616 = vmax.xlane.f32.xlu0 %v4615_v8  ;;  %v5022_v8 = vmul.f32 %v18329_v5, %v18147_v51 }
 0xf71   : > { %v4848_v24 = vadd.f32 %v4847_v21, %v18162_v61 }
 0xf72   : > { %v5005_v29 = vpop.f32.mrb[38].mxu0 }
 0xf73   : > { %v5009_v30 = vmul.f32 0.35355338, %v5005_v29  ;;  %v14669_v31 = vpop.f32.mrb[39].mxu0  ;;  %v4849_v32 = vsel %vm2104_vm14, %v4848_v24, -inf }
 0xf74   : > { %4850 = vmax.xlane.f32.xlu0 %v4849_v32  ;;  %v14135_v32 = vld [vmem:[#allocation13 + $0x1] ss:$0 sm:$0xff] }
 0xf75   : > { %v5010_v33 = vadd.f32 %v5009_v30, %v18162_v61 }
 0xf77   : > { %v5011_v34 = vsel %vm2104_vm14, %v5010_v33, -inf }
 0xf78   : > { %5012 = vmax.xlane.f32.xlu1 %v5011_v34 }
 0xff9   : > { %v4529_v40 = vpop.xlane.xlu1 %4528 }
 0xffa   : > { %v4530_v36 = vsub.f32 %v4526_v16, %v4529_v40 }
 0xffc   : > { %v4531_v25 = vmul.f32 1.442695, %v4530_v36 }
 0xffd   : > { %v4617_v37 = vpop.xlane.xlu0 %4616 }
 0xffe   : > { %16074 = vpow2.f32 %v4531_v25  ;;  %v4618_v38 = vsub.f32 %v4614_v19, %v4617_v37 }
0x1000   : > { %v4619_v39 = vmul.f32 1.442695, %v4618_v38 }
0x1001   : > { %v4851_v49 = vpop.xlane.xlu0 %4850 }
0x1002   : > { %16076 = vpow2.f32 %v4619_v39  ;;  %v4852_v50 = vsub.f32 %v4848_v24, %v4851_v49 }
0x1004   : > { %v4853_v52 = vmul.f32 1.442695, %v4852_v50  ;;  %v5210_v50 = vld [vmem:[#allocation17 + $0x208] sm:$0xff] }
0x1005   : > { %v5013_v54 = vpop.xlane.xlu1 %5012 }
0x1006   : > { %16078 = vpow2.f32 %v4853_v52  ;;  %v5014_v53 = vsub.f32 %v5010_v33, %v5013_v54  ;;  %v5226_v52 = vld [vmem:[#allocation17 + $0x288] sm:$0xff]  ;;  %v5212_v54 = vld [vmem:[#allocation17 + $0x218] sm:$0xff] }
0x1008   : > { %v16075_v55 = vpop.eup %16074  ;;  %v5015_v56 = vmul.f32 1.442695, %v5014_v53  ;;  %v15212_v53 = vpack.c.bf16 %v5226_v52, %v5210_v50  ;;  %v5245_v52 = vld [vmem:[#allocation17 + $0x320] sm:$0xff] }
0x1009   : > { %v4533_v57 = vsel %vm2104_vm14, %v16075_v55, 0.0 }
0x100a   : > { %16080 = vpow2.f32 %v5015_v56  ;;  %4534 = vadd.xlane.f32.xlu1 %v4533_v57  ;;  %v5209_v56 = vld [vmem:[#allocation17 + $0x200] sm:$0xff] }
0x100b   : > { %v5225_v57 = vld [vmem:[#allocation17 + $0x280] sm:$0xff] }
0x100c   : > { %v16077_v58 = vpop.eup %16076 }
0x100d   : > { %v4621_v59 = vsel %vm2104_vm14, %v16077_v58, 0.0 }
0x100e   : > { %4622 = vadd.xlane.f32.xlu0 %v4621_v59  ;;  %v15214_v59 = vpack.c.bf16 %v5225_v57, %v5209_v56  ;;  %v5247_v57 = vld [vmem:[#allocation17 + $0x330] sm:$0xff] }
0x1010   : > { %v16079_v63 = vpop.eup %16078 }
0x1011   : > { %v4855_v2 = vsel %vm2104_vm14, %v16079_v63, 0.0 }
0x1012   : > { %4856 = vadd.xlane.f32.xlu0 %v4855_v2 }
0x1014   : > { %v16081_v3 = vpop.eup %16080 }
0x1015   : > { %v5017_v47 = vsel %vm2104_vm14, %v16081_v3, 0.0 }
0x1016   : > { %5018 = vadd.xlane.f32.xlu1 %v5017_v47  ;;  %v5258_v47 = vld [vmem:[#allocation17 + $0x388] sm:$0xff] }
0x1097   : > { %v4535_v15 = vpop.xlane.xlu1 %4534 }
0x109b   : > { %v4623_v14 = vpop.xlane.xlu0 %4622 }
0x109c   : > { %16082 = vrcp.f32 %v4623_v14  ;;  %v15218_v14 = vpack.c.bf16 %v5257_v12, %v5241_v11  ;;  %v5219_v11 = vld [vmem:[#allocation17 + $0x250] sm:$0xff] }
0x109d   : > { %16084 = vrcp.f32 %v4535_v15  ;;  %v5243_v15 = vld [vmem:[#allocation17 + $0x310] sm:$0xff] }
0x109e   : > { %v5235_v12 = vld [vmem:[#allocation17 + $0x2d0] sm:$0xff] }
0x109f   : > { %v4857_v60 = vpop.xlane.xlu0 %4856 }
0x10a0   : > { %16086 = vrcp.f32 %v4857_v60  ;;  %v5214_v60 = vld [vmem:[#allocation17 + $0x228] sm:$0xff] }
0x10a3   : > { %v5019_v19 = vpop.xlane.xlu1 %5018 }
0x10a4   : > { %16088 = vrcp.f32 %v5019_v19  ;;  %v5232_v19 = vld [vmem:[#allocation17 + $0x2b8] sm:$0xff] }
0x10a6   : > { %v16083_v10 = vpop.eup %16082 }
0x10a7   : > { %v4625_v16 = vmul.f32 %v16083_v10, %v16077_v58  ;;  %v16085_v18 = vpop.eup %16084  ;;  %v5259_v10 = vld [vmem:[#allocation17 + $0x390] sm:$0xff] }
0x10a8   : > { %v4537_v62 = vmul.f32 %v16085_v18, %v16075_v55  ;;  %v5228_v55 = vld [vmem:[#allocation17 + $0x298] sm:$0xff] }
0x10a9   : > { %14648 = vmatmul.mubr.msk.f32.vlgmr.msra.gmra.mrb[26].mxu1 %vm2104_vm14, %v4625_v16  ;;  %v15220_v58 = vpack.c.bf16 %v5228_v55, %v5212_v54  ;;  %v15226_v16 = vpack.c.bf16 %v5259_v10, %v5243_v15  ;;  %v5216_v18 = vld [vmem:[#allocation17 + $0x238] sm:$0xff]  ;;  %v5261_v54 = vld [vmem:[#allocation17 + $0x3a0] sm:$0xff] }
0x10aa   : > { %14651 = vmatpush3.msra.mxu1 %v4538_v17  ;;  %14652 = vmatprep.mubr.msk.f32.mxu1 %vm17248_vm0, %v17249_v1  ;;  %v16087_v21 = vpop.eup %16086  ;;  %v5230_v17 = vld [vmem:[#allocation17 + $0x2a8] sm:$0xff]  ;;  %v5252_v15 = vld [vmem:[#allocation17 + $0x358] sm:$0xff] }
0x10ab   : > { %14660 = vmatprep.subr.mxu1 %v17249_v1  ;;  %v4859_v23 = vmul.f32 %v16087_v21, %v16079_v63  ;;  %v5227_v63 = vld [vmem:[#allocation17 + $0x290] sm:$0xff]  ;;  %15221 = vmatprep.subr.bf16.mxu0 %v15220_v58  ;;  %v5268_v10 = vld [vmem:[#allocation17 + $0x3d8] sm:$0xff] }
0x10ac   : > { %v5263_v58 = vld [vmem:[#allocation17 + $0x3b0] sm:$0xff] }
0x10ae   : > { %v16089_v24 = vpop.eup %16088 }
0x10af   : > { %v5021_v29 = vmul.f32 %v16089_v24, %v16081_v3  ;;  %v5242_v3 = vld [vmem:[#allocation17 + $0x308] sm:$0xff]  ;;  %v14137_v24 = vld [vmem:[#allocation14 + $0x1] ss:$0 sm:$0xff] }
0x10b0   : > { %v15216_v4 = vpack.c.bf16 %v5258_v47, %v5242_v3  ;;  %v15242_v3 = vpack.c.bf16 %v5263_v58, %v5247_v57  ;;  %v5217_v47 = vld [vmem:[#allocation17 + $0x240] sm:$0xff]  ;;  %v5255_v58 = vld [vmem:[#allocation17 + $0x370] sm:$0xff] }
0x10b1   : > { %14653 = vmatmul.mubr.msk.f32.vlgmr.msra.gmra.mrb[26].mxu1 %vm2104_vm14, %v4537_v62  ;;  %v15228_v62 = vpack.c.bf16 %v5230_v17, %v5214_v60  ;;  %v15254_v60 = vpack.c.bf16 %v5235_v12, %v5219_v11  ;;  %v5249_v17 = vld [vmem:[#allocation17 + $0x340] sm:$0xff]  ;;  %v5279_v12 = vld [vmem:[#allocation20 + $0x210] sm:$0xff] }
0x10b2   : > { %14661 = vmatpush3.msra.mxu1 %v4860_v20  ;;  %14662 = vmatprep.mubr.msk.f32.mxu1 %vm17248_vm0, %v17249_v1  ;;  %v15236_v20 = vpack.c.bf16 %v5232_v19, %v5216_v18  ;;  %v5265_v18 = vld [vmem:[#allocation17 + $0x3c0] sm:$0xff]  ;;  %v15256_v19 = vpack.c.bf16 %v5268_v10, %v5252_v15  ;;  %v5326_v15 = vld [vmem:[#allocation20 + $0x388] sm:$0xff]  ;;  %v5312_v10 = vld [vmem:[#allocation20 + $0x318] sm:$0xff] }
0x10b3   : > { %14670 = vmatprep.subr.mxu1 %v17249_v1  ;;  %v5293_v11 = vld [vmem:[#allocation20 + $0x280] sm:$0xff] }
0x10b9   : > { %14663 = vmatmul.mubr.msk.f32.vlgmr.msra.gmra.mrb[26].mxu1 %vm2104_vm14, %v4859_v23 }
0x10ba   : > { %14671 = vmatpush3.msra.mxu1 %v5022_v8  ;;  %14672 = vmatprep.mubr.msk.f32.mxu1 %vm17248_vm0, %v17249_v1 }
0x10bb   : > { %15213 = vmatprep.subr.bf16.mxu1 %v15212_v53 }
0x10c1   : > { %14673 = vmatmul.mubr.msk.f32.vlgmr.msra.gmra.mrb[26].mxu1 %vm2104_vm14, %v5021_v29 }
0x10c2   : > { %5492 = vmatprep.mubr.f32.mxu1 %v17249_v1  ;;  %15215 = vmatpush1.bf16.msra.mxu1 %v15214_v59  ;;  %v5218_v59 = vld [vmem:[#allocation17 + $0x248] sm:$0xff] }
0x10c3   : > { %15217 = vmatprep.subr.bf16.mxu1 %v15216_v4 }
0x10c6   : > { %15219 = vmatpush1.bf16.msra.mxu1 %v15218_v14  ;;  %v5266_v14 = vld [vmem:[#allocation17 + $0x3c8] sm:$0xff] }
0x10c7   : > { %15229 = vmatprep.subr.bf16.mxu1 %v15228_v62 }
0x1194   : > { %v5092_v30 = vpop.f32.mrb[26].mxu1 }
0x1195   : > { %v14674_v31 = vpop.f32.mrb[27].mxu1  ;;  %14684 = vmatmul.mubr.msk.f32.vlgmr.msra.gmra.mrb[40].mxu0 %vm1789_vm2, %v5092_v30  ;;  %v14138_v30 = vld [vmem:[#allocation16 + $0x1] ss:$0 sm:$0xff] }
0x1196   : > { %5563 = vmatprep.mubr.f32.mxu0 %v17249_v1  ;;  %v5213_v31 = vld [vmem:[#allocation17 + $0x220] sm:$0xff] }
0x1268   : > { %v5172_v5 = vpop.f32.mrb[40].mxu0 }
0x1269   : > { %v5173_v33 = vadd.f32 %v14135_v32, %v5172_v5  ;;  %v14685_v34 = vpop.f32.mrb[41].mxu0  ;;  %v5229_v32 = vld [vmem:[#allocation17 + $0x2a0] sm:$0xff] }
0x126a   : > { %v5231_v34 = vld [vmem:[#allocation17 + $0x2b0] sm:$0xff] }
0x126b   : > { %v5176_v40 = vadd.f32 %v5173_v33, %v18304_v27  ;;  %v5211_v27 = vld [vmem:[#allocation17 + $0x210] sm:$0xff] }
0x126c   : > { %v15222_v2 = vpack.c.bf16 %v5227_v63, %v5211_v27  ;;  %v5215_v33 = vld [vmem:[#allocation17 + $0x230] sm:$0xff]  ;;  %v5234_v27 = vld [vmem:[#allocation17 + $0x2c8] sm:$0xff]  ;;  %v5236_v63 = vld [vmem:[#allocation17 + $0x2d8] sm:$0xff] }
0x126d   : > { %v5181_v36 = vsel %vm1789_vm2, %v5176_v40, 0.0  ;;  %v15238_v50 = vpack.c.bf16 %v5231_v34, %v5215_v33  ;;  %v15244_v4 = vpack.c.bf16 %v5234_v27, %v5218_v59  ;;  %v5271_v59 = vld [vmem:[#allocation17 + $0x3f0] sm:$0xff]  ;;  %v5278_v27 = vld [vmem:[#allocation20 + $0x208] sm:$0xff] }
0x126e   : > { %5182 = vadd.xlane.f32.xlu0 %v5181_v36  ;;  %15223 = vmatpush1.bf16.msra.mxu0 %v15222_v2  ;;  %v5262_v36 = vld [vmem:[#allocation17 + $0x3a8] sm:$0xff]  ;;  %v15234_v2 = vpack.c.bf16 %v5261_v54, %v5245_v52  ;;  %v5253_v54 = vld [vmem:[#allocation17 + $0x360] sm:$0xff] }
0x126f   : > { %15225 = vmatprep.subr.bf16.mxu0 %v15224_v13  ;;  %v5250_v13 = vld [vmem:[#allocation17 + $0x348] sm:$0xff] }
0x1270   : > { %v15248_v62 = vpack.c.bf16 %v5266_v14, %v5250_v13  ;;  %v5295_v13 = vld [vmem:[#allocation20 + $0x290] sm:$0xff]  ;;  %v5310_v14 = vld [vmem:[#allocation20 + $0x308] sm:$0xff] }
0x1272   : > { %15227 = vmatpush1.bf16.msra.mxu0 %v15226_v16  ;;  %v15246_v16 = vpack.c.bf16 %v5233_v44, %v5217_v47  ;;  %v15274_v47 = vpack.c.bf16 %v5271_v59, %v5255_v58  ;;  %v5283_v58 = vld [vmem:[#allocation20 + $0x230] sm:$0xff] }
0x1273   : > { %15237 = vmatprep.subr.bf16.mxu0 %v15236_v20  ;;  %v5251_v20 = vld [vmem:[#allocation17 + $0x350] sm:$0xff] }
0x1274   : > { %v5299_v59 = vld [vmem:[#allocation20 + $0x2b0] sm:$0xff] }
0x12fb   : > { %v5183_v25 = vpop.xlane.xlu0 %5182 }
0x12fc   : > { %v5184_v37 = vmul.f32 0.03125, %v5183_v25  ;;  %v5248_v25 = vld [vmem:[#allocation17 + $0x338] sm:$0xff] }
0x12fe   : > { %v5185_v38 = vsub.f32 %v5176_v40, %v5184_v37  ;;  %v5246_v40 = vld [vmem:[#allocation17 + $0x328] sm:$0xff]  ;;  %v5264_v37 = vld [vmem:[#allocation17 + $0x3b8] sm:$0xff] }
0x12ff   : > { %v15232_v55 = vpack.c.bf16 %v5262_v36, %v5246_v40  ;;  %v15240_v56 = vpack.c.bf16 %v5264_v37, %v5248_v25  ;;  %v5223_v40 = vld [vmem:[#allocation17 + $0x270] sm:$0xff]  ;;  %v5254_v25 = vld [vmem:[#allocation17 + $0x368] sm:$0xff] }
0x1300   : > { %v5186_v39 = vmul.f32 %v5185_v38, %v5185_v38  ;;  %v5239_v36 = vld [vmem:[#allocation17 + $0x2f0] sm:$0xff]  ;;  %v5270_v37 = vld [vmem:[#allocation17 + $0x3e8] sm:$0xff] }
0x1301   : > { %v15270_v52 = vpack.c.bf16 %v5239_v36, %v5223_v40 }
0x1302   : > { %v5187_v49 = vsel %vm1789_vm2, %v5186_v39, 0.0 }
0x1303   : > { %5188 = vadd.xlane.f32.xlu1 %v5187_v49  ;;  %v15230_v49 = vpack.c.bf16 %v5229_v32, %v5213_v31  ;;  %v5221_v32 = vld [vmem:[#allocation17 + $0x260] sm:$0xff] }
0x1390   : > { %v5189_v21 = vpop.xlane.xlu1 %5188 }
0x1391   : > { %v5190_v23 = vmul.f32 0.03125, %v5189_v21  ;;  %v5267_v21 = vld [vmem:[#allocation17 + $0x3d0] sm:$0xff] }
0x1392   : > { %v15258_v31 = vpack.c.bf16 %v5267_v21, %v5251_v20  ;;  %v5325_v20 = vld [vmem:[#allocation20 + $0x380] sm:$0xff]  ;;  %v5311_v21 = vld [vmem:[#allocation20 + $0x310] sm:$0xff] }
0x1393   : > { %v5191_v8 = vadd.f32 1e-05, %v5190_v23  ;;  %v5222_v23 = vld [vmem:[#allocation17 + $0x268] sm:$0xff] }
0x1395   : > { %16090 = vrsqrt.f32 %v5191_v8  ;;  %v5238_v8 = vld [vmem:[#allocation17 + $0x2e8] sm:$0xff] }
0x1396   : > { %v15260_v33 = vpack.c.bf16 %v5238_v8, %v5222_v23  ;;  %v5327_v23 = vld [vmem:[#allocation20 + $0x390] sm:$0xff] }
0x139f   : > { %v16091_v29 = vpop.eup %16090 }
0x13a0   : > { %v5193_v5 = vmul.f32 %v16091_v29, %v5185_v38  ;;  %v5220_v38 = vld [vmem:[#allocation17 + $0x258] sm:$0xff] }
0x13a1   : > { %v15252_v9 = vpack.c.bf16 %v5236_v63, %v5220_v38  ;;  %v5240_v29 = vld [vmem:[#allocation17 + $0x2f8] sm:$0xff]  ;;  %v5294_v38 = vld [vmem:[#allocation20 + $0x288] sm:$0xff] }
0x13a2   : > { %v5200_v39 = vmul.f32 %v14137_v24, %v5193_v5  ;;  %v5224_v24 = vld [vmem:[#allocation17 + $0x278] sm:$0xff]  ;;  %v5237_v5 = vld [vmem:[#allocation17 + $0x2e0] sm:$0xff]  ;;  %v15276_v44 = vpack.c.bf16 %v5294_v38, %v5278_v27  ;;  %v5314_v27 = vld [vmem:[#allocation20 + $0x328] sm:$0xff] }
0x13a3   : > { %v15268_v34 = vpack.c.bf16 %v5240_v29, %v5224_v24  ;;  %v5280_v63 = vld [vmem:[#allocation20 + $0x218] sm:$0xff]  ;;  %v15290_v24 = vpack.c.bf16 %v5327_v23, %v5311_v21  ;;  %v5282_v29 = vld [vmem:[#allocation20 + $0x228] sm:$0xff]  ;;  %v5315_v21 = vld [vmem:[#allocation20 + $0x330] sm:$0xff] }
0x13a4   : > { %v18386_v53 = vadd.f32 %v14138_v30, %v5200_v39  ;;  %v15250_v30 = vpack.c.bf16 %v5265_v18, %v5249_v17  ;;  %v5256_v39 = vld [vmem:[#allocation17 + $0x378] sm:$0xff]  ;;  %v15286_v17 = vpack.c.bf16 %v5295_v13, %v5279_v12  ;;  %v15280_v18 = vpack.c.bf16 %v5326_v15, %v5310_v14  ;;  %v5331_v23 = vld [vmem:[#allocation20 + $0x3b0] sm:$0xff] }
0x13a6   : > { %14139 = vmatmul.mubr.msk.f32.vlgmr.msra.gmra.mrb[28].mxu1 %vm1789_vm2, %v18386_v53  ;;  %14140 = vmatmul.mubr.msk.f32.vlgmr.msra.gmra.mrb[42].mxu0 %vm1789_vm2, %v18386_v53 }
0x13a7   : > { %15231 = vmatpush1.bf16.msra.mxu1 %v15230_v49  ;;  %15239 = vmatpush1.bf16.msra.mxu0 %v15238_v50  ;;  %v5272_v49 = vld [vmem:[#allocation17 + $0x3f8] sm:$0xff]  ;;  %v15262_v50 = vpack.c.bf16 %v5237_v5, %v5221_v32 }
0x13a8   : > { %15233 = vmatprep.subr.bf16.mxu1 %v15232_v55  ;;  %15241 = vmatprep.subr.bf16.mxu0 %v15240_v56  ;;  %v5269_v55 = vld [vmem:[#allocation17 + $0x3e0] sm:$0xff]  ;;  %v15264_v56 = vpack.c.bf16 %v5270_v37, %v5254_v25  ;;  %v15272_v57 = vpack.c.bf16 %v5272_v49, %v5256_v39  ;;  %v5300_v5 = vld [vmem:[#allocation20 + $0x2b8] sm:$0xff] }
0x13a9   : > { %5634 = vmatprep.mubr.f32.mxu1 %v17249_v1  ;;  %5705 = vmatprep.mubr.f32.mxu0 %v17249_v1 }
0x13ab   : > { %15235 = vmatpush1.bf16.msra.mxu1 %v15234_v2  ;;  %15243 = vmatpush1.bf16.msra.mxu0 %v15242_v3  ;;  %v5296_v2 = vld [vmem:[#allocation20 + $0x298] sm:$0xff]  ;;  %v15266_v3 = vpack.c.bf16 %v5269_v55, %v5253_v54 }
0x13ac   : > { %15245 = vmatprep.subr.bf16.mxu1 %v15244_v4  ;;  %15253 = vmatprep.subr.bf16.mxu0 %v15252_v9  ;;  %v15284_v4 = vpack.c.bf16 %v5296_v2, %v5280_v63  ;;  %v5277_v9 = vld [vmem:[#allocation20 + $0x200] sm:$0xff]  ;;  %v5330_v2 = vld [vmem:[#allocation20 + $0x3a8] sm:$0xff] }
0x13ad   : > { %v15296_v14 = vpack.c.bf16 %v5330_v2, %v5314_v27  ;;  %v5287_v2 = vld [vmem:[#allocation20 + $0x250] sm:$0xff] }
0x13ae   : > { %14141 = vmatmul.mubr.msk.f32.vlgmr.msra.gmra.mrb[30].mxu1 %vm1789_vm2, %v18386_v53  ;;  %14142 = vmatmul.mubr.msk.f32.vlgmr.msra.gmra.mrb[44].mxu0 %vm1789_vm2, %v18386_v53 }
0x13af   : > { %15247 = vmatpush1.bf16.msra.mxu1 %v15246_v16  ;;  %15255 = vmatpush1.bf16.msra.mxu0 %v15254_v60  ;;  %v5328_v16 = vld [vmem:[#allocation20 + $0x398] sm:$0xff]  ;;  %v15278_v60 = vpack.c.bf16 %v5293_v11, %v5277_v9  ;;  %v15302_v11 = vpack.c.bf16 %v5299_v59, %v5283_v58 }
0x13b0   : > { %15249 = vmatprep.subr.bf16.mxu1 %v15248_v62  ;;  %15257 = vmatprep.subr.bf16.mxu0 %v15256_v19  ;;  %v15288_v62 = vpack.c.bf16 %v5328_v16, %v5312_v10  ;;  %v5309_v19 = vld [vmem:[#allocation20 + $0x300] sm:$0xff] }
0x13b1   : > { %5776 = vmatprep.mubr.f32.mxu1 %v17249_v1  ;;  %5847 = vmatprep.mubr.f32.mxu0 %v17249_v1  ;;  %v15282_v8 = vpack.c.bf16 %v5325_v20, %v5309_v19 }
0x13b3   : > { %15251 = vmatpush1.bf16.msra.mxu1 %v15250_v30  ;;  %15259 = vmatpush1.bf16.msra.mxu0 %v15258_v31  ;;  %v5298_v30 = vld [vmem:[#allocation20 + $0x2a8] sm:$0xff]  ;;  %v5284_v31 = vld [vmem:[#allocation20 + $0x238] sm:$0xff] }
0x13b4   : > { %15261 = vmatprep.subr.bf16.mxu1 %v15260_v33  ;;  %15269 = vmatprep.subr.bf16.mxu0 %v15268_v34  ;;  %v15292_v32 = vpack.c.bf16 %v5298_v30, %v5282_v29  ;;  %v15300_v33 = vpack.c.bf16 %v5300_v5, %v5284_v31  ;;  %v18410_v34 = vld [vmem:[#allocation19 + $0x10] sm:$0xff]  ;;  %v5302_v30 = vld [vmem:[#allocation20 + $0x2c8] sm:$0xff]  ;;  %v5288_v31 = vld [vmem:[#allocation20 + $0x258] sm:$0xff] }
0x13b5   : > { %v5348_v40 = vrot.slane %v18410_v34, %v18226_v41  ;;  %v5356_v36 = vrot.slane %v18410_v34, %v18229_v43  ;;  %v5352_v25 = vrot.slane %v18410_v34, %v18234_v45  ;;  %v5360_v37 = vrot.slane %v18410_v34, %v18237_v48  ;;  %v18424_v5 = vld [vmem:[#allocation19 + $0x18] sm:$0xff] }
0x13b6   : > { %14143 = vmatmul.mubr.msk.f32.vlgmr.msra.gmra.mrb[32].mxu1 %vm1789_vm2, %v18386_v53  ;;  %14144 = vmatmul.mubr.msk.f32.vlgmr.msra.gmra.mrb[46].mxu0 %vm1789_vm2, %v18386_v53  ;;  %v5368_v10 = vrot.slane %v18410_v34, %v18248_v6  ;;  %v5376_v16 = vrot.slane %v18410_v34, %v18251_v7 }
0x13b7   : > { %15263 = vmatpush1.bf16.msra.mxu1 %v15262_v50  ;;  %15271 = vmatpush1.bf16.msra.mxu0 %v15270_v52  ;;  %v5281_v50 = vld [vmem:[#allocation20 + $0x220] sm:$0xff] }
0x13b8   : > { %15265 = vmatprep.subr.bf16.mxu1 %v15264_v56  ;;  %15273 = vmatprep.subr.bf16.mxu0 %v15272_v57  ;;  %v5297_v52 = vld [vmem:[#allocation20 + $0x2a0] sm:$0xff] }
0x13b9   : > { %5918 = vmatprep.mubr.f32.mxu1 %v17249_v1  ;;  %5989 = vmatprep.mubr.f32.mxu0 %v17249_v1  ;;  %v15294_v9 = vpack.c.bf16 %v5297_v52, %v5281_v50  ;;  %v5384_v52 = vrot.slane %v18424_v5, %v18234_v45 }
0x13bb   : > { %15267 = vmatpush1.bf16.msra.mxu1 %v15266_v3  ;;  %15275 = vmatpush1.bf16.msra.mxu0 %v15274_v47  ;;  %v5316_v3 = vld [vmem:[#allocation20 + $0x338] sm:$0xff] }
0x13bc   : > { %15277 = vmatprep.subr.bf16.mxu1 %v15276_v44  ;;  %15285 = vmatprep.subr.bf16.mxu0 %v15284_v4  ;;  %v5332_v47 = vld [vmem:[#allocation20 + $0x3b8] sm:$0xff] }
0x13bd   : > { %v15304_v15 = vpack.c.bf16 %v5332_v47, %v5316_v3  ;;  %v5303_v3 = vld [vmem:[#allocation20 + $0x2d0] sm:$0xff]  ;;  %v5318_v47 = vld [vmem:[#allocation20 + $0x348] sm:$0xff] }
0x13be   : > { %14145 = vmatmul.mubr.msk.f32.vlgmr.msra.gmra.mrb[34].mxu1 %vm1789_vm2, %v18386_v53  ;;  %14146 = vmatmul.mubr.msk.f32.vlgmr.msra.gmra.mrb[48].mxu0 %vm1789_vm2, %v18386_v53 }
0x13c4   : > { %15279 = vmatpush1.bf16.xpose.msra.mxu1 %v15278_v60  ;;  %15287 = vmatpush1.bf16.xpose.msra.mxu0 %v15286_v17 }
0x13c5   : > { %15281 = vmatprep.subr.bf16.mxu1 %v15280_v18  ;;  %15289 = vmatprep.subr.bf16.mxu0 %v15288_v62  ;;  %v5313_v18 = vld [vmem:[#allocation20 + $0x320] sm:$0xff] }
0x13c6   : > { %v5329_v62 = vld [vmem:[#allocation20 + $0x3a0] sm:$0xff] }
0x13cc   : > { %15283 = vmatpush1.bf16.xpose.msra.mxu1 %v15282_v8  ;;  %15291 = vmatpush1.bf16.xpose.msra.mxu0 %v15290_v24  ;;  %v5286_v8 = vld [vmem:[#allocation20 + $0x248] sm:$0xff] }
0x13cd   : > { %15293 = vmatprep.subr.bf16.mxu1 %v15292_v32  ;;  %15301 = vmatprep.subr.bf16.mxu0 %v15300_v33  ;;  %v5304_v32 = vld [vmem:[#allocation20 + $0x2d8] sm:$0xff] }
0x13ce   : > { %v15316_v50 = vpack.c.bf16 %v5304_v32, %v5288_v31  ;;  %v5292_v31 = vld [vmem:[#allocation20 + $0x278] sm:$0xff] }
0x13cf   : > { %v5308_v32 = vld [vmem:[#allocation20 + $0x2f8] sm:$0xff] }
0x1479   : > { %v5494_v39 = vpop.f32.mrb[28].mxu1  ;;  %v5565_v49 = vpop.f32.mrb[42].mxu0 }
0x147a   : > { %v5495_v54 = vadd.f32 %v5494_v39, %v5348_v40  ;;  %v5566_v55 = vadd.f32 %v5565_v49, %v5356_v36  ;;  %v5496_v56 = vpop.f32.mrb[29].mxu1  ;;  %v5567_v57 = vpop.f32.mrb[43].mxu0  ;;  %v15298_v36 = vpack.c.bf16 %v5329_v62, %v5313_v18  ;;  %v5372_v39 = vrot.slane %v18410_v34, %v18261_v28 }
0x147b   : > { %v5497_v38 = vadd.f32 %v5496_v56, %v5352_v25  ;;  %v5568_v63 = vadd.f32 %v5567_v57, %v5360_v37  ;;  %v15306_v25 = vpack.c.bf16 %v5331_v23, %v5315_v21  ;;  %v5364_v37 = vrot.slane %v18410_v34, %v18258_v22  ;;  %v5285_v34 = vld [vmem:[#allocation20 + $0x240] sm:$0xff] }
0x147c   : > { %v5996_v12 = vmax.f32 %v5495_v54, 0.0  ;;  %v5998_v13 = vmax.f32 %v5566_v55, 0.0  ;;  %v15308_v49 = vpack.c.bf16 %v5302_v30, %v5286_v8  ;;  %v5392_v54 = vrot.slane %v18424_v5, %v18237_v48  ;;  %v5317_v21 = vld [vmem:[#allocation20 + $0x340] sm:$0xff]  ;;  %v5319_v8 = vld [vmem:[#allocation20 + $0x350] sm:$0xff]  ;;  %v5306_v30 = vld [vmem:[#allocation20 + $0x2e8] sm:$0xff] }
0x147d   : > { %v5997_v44 = vmax.f32 %v5497_v38, 0.0  ;;  %v5999_v4 = vmax.f32 %v5568_v63, 0.0  ;;  %v5301_v38 = vld [vmem:[#allocation20 + $0x2c0] sm:$0xff] }
0x147e   : > { %v5333_v23 = vld [vmem:[#allocation20 + $0x3c0] sm:$0xff] }
0x147f   : > { %6082 = vmatprep.mubr.f32.mxu1 %v5997_v44  ;;  %6152 = vmatprep.mubr.f32.mxu0 %v5999_v4  ;;  %v5334_v4 = vld [vmem:[#allocation20 + $0x3c8] sm:$0xff] }
0x1480   : > { %6083 = vmatmul.mubr.f32.vlgmr.msra.gmra.mrb[36].mxu1 %v5996_v12  ;;  %6153 = vmatmul.mubr.f32.vlgmr.msra.gmra.mrb[50].mxu0 %v5998_v13  ;;  %v15310_v12 = vpack.c.bf16 %v5301_v38, %v5285_v34  ;;  %v5322_v38 = vld [vmem:[#allocation20 + $0x368] sm:$0xff] }
0x1481   : > { %v5636_v60 = vpop.f32.mrb[30].mxu1  ;;  %v5707_v17 = vpop.f32.mrb[44].mxu0  ;;  %15295 = vmatpush1.bf16.xpose.msra.mxu1 %v15294_v9  ;;  %15303 = vmatpush1.bf16.xpose.msra.mxu0 %v15302_v11  ;;  %v5320_v9 = vld [vmem:[#allocation20 + $0x358] sm:$0xff] }
0x1482   : > { %v5638_v19 = vpop.f32.mrb[31].mxu1  ;;  %v5709_v20 = vpop.f32.mrb[45].mxu0  ;;  %15297 = vmatprep.subr.bf16.mxu1 %v15296_v14  ;;  %15305 = vmatprep.subr.bf16.mxu0 %v15304_v15  ;;  %v5637_v57 = vadd.f32 %v5636_v60, %v5364_v37  ;;  %v5708_v58 = vadd.f32 %v5707_v17, %v5372_v39  ;;  %v5336_v11 = vld [vmem:[#allocation20 + $0x3d8] sm:$0xff]  ;;  %v15318_v15 = vpack.c.bf16 %v5303_v3, %v5287_v2 }
0x1483   : > { %v5639_v24 = vadd.f32 %v5638_v19, %v5368_v10  ;;  %v5710_v29 = vadd.f32 %v5709_v20, %v5376_v16  ;;  %v15312_v16 = vpack.c.bf16 %v5334_v4, %v5318_v47  ;;  %v15320_v60 = vpack.c.bf16 %v5336_v11, %v5320_v9  ;;  %v5324_v47 = vld [vmem:[#allocation20 + $0x378] sm:$0xff] }
0x1484   : > { %v6000_v13 = vmax.f32 %v5637_v57, 0.0  ;;  %v6002_v14 = vmax.f32 %v5708_v58, 0.0  ;;  %v5388_v37 = vrot.slane %v18424_v5, %v18229_v43  ;;  %v15332_v39 = vpack.c.bf16 %v5308_v32, %v5292_v31  ;;  %v5305_v57 = vld [vmem:[#allocation20 + $0x2e0] sm:$0xff] }
0x1485   : > { %v6001_v33 = vmax.f32 %v5639_v24, 0.0  ;;  %v6003_v40 = vmax.f32 %v5710_v29, 0.0  ;;  %v5335_v24 = vld [vmem:[#allocation20 + $0x3d0] sm:$0xff]  ;;  %v5290_v29 = vld [vmem:[#allocation20 + $0x268] sm:$0xff] }
0x1487   : > { %6222 = vmatprep.mubr.f32.mxu1 %v6001_v33  ;;  %6292 = vmatprep.mubr.f32.mxu0 %v6003_v40  ;;  %v15314_v33 = vpack.c.bf16 %v5333_v23, %v5317_v21  ;;  %v5380_v40 = vrot.slane %v18424_v5, %v18226_v41  ;;  %v6639_v23 = vld [vmem:[%s19227_s6] sm:$0xff] }
0x1489   : > { %v5778_v55 = vpop.f32.mrb[32].mxu1  ;;  %v5849_v56 = vpop.f32.mrb[46].mxu0  ;;  %15299 = vmatpush1.bf16.xpose.msra.mxu1 %v15298_v36  ;;  %15307 = vmatpush1.bf16.xpose.msra.mxu0 %v15306_v25  ;;  %v15322_v36 = vpack.c.bf16 %v5335_v24, %v5319_v8  ;;  %v15324_v25 = vpack.c.bf16 %v5306_v30, %v5290_v29  ;;  %v6640_v8 = vld [vmem:[%s19227_s6 + $0x8] sm:$0xff]  ;;  %v6643_v29 = vld [vmem:[%s19227_s6 + $0x20] sm:$0xff] }
0x148a   : > { %v5780_v59 = vpop.f32.mrb[33].mxu1  ;;  %v5851_v27 = vpop.f32.mrb[47].mxu0  ;;  %15309 = vmatprep.subr.bf16.mxu1 %v15308_v49  ;;  %15317 = vmatprep.subr.bf16.mxu0 %v15316_v50  ;;  %v5400_v49 = vrot.slane %v18424_v5, %v18248_v6  ;;  %v5408_v50 = vrot.slane %v18424_v5, %v18251_v7  ;;  %v5850_v58 = vadd.f32 %v5849_v56, %v5388_v37  ;;  %v5321_v56 = vld [vmem:[#allocation20 + $0x360] sm:$0xff] }
0x148b   : > { %v5781_v63 = vadd.f32 %v5780_v59, %v5384_v52  ;;  %v5852_v44 = vadd.f32 %v5851_v27, %v5392_v54  ;;  %v5779_v52 = vadd.f32 %v5778_v55, %v5380_v40  ;;  %v5289_v54 = vld [vmem:[#allocation20 + $0x260] sm:$0xff]  ;;  %v5291_v59 = vld [vmem:[#allocation20 + $0x270] sm:$0xff]  ;;  %v15341_v31 = vpack.c.bf16 %v6640_v8, %v6639_v23  ;;  %v14154_v23 = vld [vmem:[#allocation29 + $0x1] ss:$0 sm:$0xff] }
0x148c   : > { %v5307_v27 = vld [vmem:[#allocation20 + $0x2f0] sm:$0xff]  ;;  %v15326_v3 = vpack.c.bf16 %v5305_v57, %v5289_v54  ;;  %v6006_v11 = vmax.f32 %v5850_v58, 0.0  ;;  %v6644_v30 = vld [vmem:[%s19227_s6 + $0x28] sm:$0xff] }
0x148d   : > { %v6005_v10 = vmax.f32 %v5781_v63, 0.0  ;;  %v6007_v17 = vmax.f32 %v5852_v44, 0.0  ;;  %v5338_v63 = vld [vmem:[#allocation20 + $0x3e8] sm:$0xff]  ;;  %v5340_v44 = vld [vmem:[#allocation20 + $0x3f8] sm:$0xff]  ;;  %v6004_v4 = vmax.f32 %v5779_v52, 0.0  ;;  %v15334_v9 = vpack.c.bf16 %v5307_v27, %v5291_v59 }
0x148e   : > { %v15347_v32 = vpack.c.bf16 %v6644_v30, %v6643_v29  ;;  %v6642_v40 = vld [vmem:[%s19227_s6 + $0x18] sm:$0xff]  ;;  %v6649_v52 = vld [vmem:[%s19227_s6 + $0x50] sm:$0xff]  ;;  %v14147_v58 = vld [vmem:[#allocation22 + $0x1] ss:$0 sm:$0xff] }
0x148f   : > { %v6650_v54 = vld [vmem:[%s19227_s6 + $0x58] sm:$0xff] }
0x1490   : > { %6223 = vmatmul.mubr.f32.vlgmr.msra.gmra.mrb[38].mxu1 %v6000_v13  ;;  %6293 = vmatmul.mubr.f32.vlgmr.msra.gmra.mrb[52].mxu0 %v6002_v14  ;;  %v15336_v13 = vpack.c.bf16 %v5340_v44, %v5324_v47  ;;  %v15356_v57 = vpack.c.bf16 %v6650_v54, %v6649_v52 }
0x1491   : > { %v18434_v18 = vpop.f32.mrb[34].mxu1  ;;  %v18436_v62 = vpop.f32.mrb[48].mxu0  ;;  %15311 = vmatpush1.bf16.xpose.msra.mxu1 %v15310_v12  ;;  %6362 = vmatprep.mubr.f32.mxu1 %v6005_v10  ;;  %v15328_v12 = vpack.c.bf16 %v5338_v63, %v5322_v38  ;;  %v5323_v10 = vld [vmem:[#allocation20 + $0x370] sm:$0xff] }
0x1492   : > { %15319 = vmatpush1.bf16.xpose.msra.mxu0 %v15318_v15  ;;  %6432 = vmatprep.mubr.f32.mxu0 %v6007_v17  ;;  %v5922_v19 = vpop.f32.mrb[35].mxu1  ;;  %v5993_v20 = vpop.f32.mrb[49].mxu0  ;;  %v5337_v15 = vld [vmem:[#allocation20 + $0x3e0] sm:$0xff]  ;;  %v5396_v17 = vrot.slane %v18424_v5, %v18258_v22 }
0x1493   : > { %15313 = vmatprep.subr.bf16.mxu1 %v15312_v16  ;;  %15321 = vmatprep.subr.bf16.mxu0 %v15320_v60  ;;  %v5923_v34 = vadd.f32 %v5922_v19, %v5400_v49  ;;  %v5994_v2 = vadd.f32 %v5993_v20, %v5408_v50  ;;  %v5339_v16 = vld [vmem:[#allocation20 + $0x3f0] sm:$0xff]  ;;  %v15330_v60 = vpack.c.bf16 %v5337_v15, %v5321_v56  ;;  %v6648_v49 = vld [vmem:[%s19227_s6 + $0x48] sm:$0xff] }
0x1494   : > { %v15338_v19 = vpack.c.bf16 %v5339_v16, %v5323_v10  ;;  %v5404_v20 = vrot.slane %v18424_v5, %v18261_v28  ;;  %v5921_v21 = vadd.f32 %v18434_v18, %v5396_v17 }
0x1495   : > { %v6009_v55 = vmax.f32 %v5923_v34, 0.0  ;;  %v6011_v14 = vmax.f32 %v5994_v2, 0.0 }
0x1496   : > { %v5992_v24 = vadd.f32 %v18436_v62, %v5404_v20  ;;  %v6008_v5 = vmax.f32 %v5921_v21, 0.0  ;;  %v14152_v21 = vld [vmem:[#allocation29] ss:$0 sm:$0xff] }
0x1498   : > { %v6010_v18 = vmax.f32 %v5992_v24, 0.0 }
0x1499   : > { %15315 = vmatpush1.bf16.xpose.msra.mxu1 %v15314_v33  ;;  %v6641_v33 = vld [vmem:[%s19227_s6 + $0x10] sm:$0xff] }
0x149a   : > { %15323 = vmatpush1.bf16.xpose.msra.mxu0 %v15322_v36  ;;  %15325 = vmatprep.subr.bf16.mxu1 %v15324_v25  ;;  %v6645_v36 = vld [vmem:[%s19227_s6 + $0x30] sm:$0xff]  ;;  %v6646_v25 = vld [vmem:[%s19227_s6 + $0x38] sm:$0xff]  ;;  %v15344_v62 = vpack.c.bf16 %v6642_v40, %v6641_v33 }
0x149b   : > { %15333 = vmatprep.subr.bf16.mxu0 %v15332_v39  ;;  %v15350_v37 = vpack.c.bf16 %v6646_v25, %v6645_v36  ;;  %v6647_v39 = vld [vmem:[%s19227_s6 + $0x40] sm:$0xff]  ;;  %v14156_v33 = vld [vmem:[#allocation29 + $0x2] ss:$0 sm:$0xff] }
0x149c   : > { %v15353_v50 = vpack.c.bf16 %v6648_v49, %v6647_v39 }
0x14a0   : > { %6363 = vmatmul.mubr.f32.vlgmr.msra.gmra.mrb[40].mxu1 %v6004_v4 }
0x14a1   : > { %6433 = vmatmul.mubr.f32.vlgmr.msra.gmra.mrb[54].mxu0 %v6006_v11  ;;  %15327 = vmatpush1.bf16.xpose.msra.mxu1 %v15326_v3 }
0x14a2   : > { %6502 = vmatprep.mubr.f32.mxu1 %v6009_v55  ;;  %15335 = vmatpush1.bf16.xpose.msra.mxu0 %v15334_v9 }
0x14a3   : > { %6572 = vmatprep.mubr.f32.mxu0 %v6011_v14  ;;  %15329 = vmatprep.subr.bf16.mxu1 %v15328_v12 }
0x14a4   : > { %15337 = vmatprep.subr.bf16.mxu0 %v15336_v13 }
0x14a9   : > { %15331 = vmatpush1.bf16.xpose.msra.mxu1 %v15330_v60 }
0x14aa   : > { %15339 = vmatpush1.bf16.xpose.msra.mxu0 %v15338_v19  ;;  %15340 = vmatprep.subr.bf16.mxu1 %v17247_v0 }
0x14ab   : > { %15346 = vmatprep.subr.bf16.mxu0 %v17247_v0 }
0x14b0   : > { %6503 = vmatmul.mubr.f32.vlgmr.msra.gmra.mrb[42].mxu1 %v6008_v5 }
0x14b1   : > { %6573 = vmatmul.mubr.f32.vlgmr.msra.gmra.mrb[56].mxu0 %v6010_v18  ;;  %15342 = vmatpush3.bf16.msra.mxu1 %v15341_v31 }
0x14b2   : > { %15348 = vmatpush3.bf16.msra.mxu0 %v15347_v32  ;;  %15343 = vmatprep.subr.bf16.mxu1 %v17247_v0 }
0x14b3   : > { %15349 = vmatprep.subr.bf16.mxu0 %v17247_v0  ;;  %14694 = vmatprep.mubr.msk.f32.mxu1 %vm17248_vm0, %v17249_v1 }
0x14b4   : > { %14705 = vmatprep.mubr.msk.f32.mxu0 %vm17248_vm0, %v17249_v1 }
0x14b5   : > { %15345 = vmatpush3.bf16.msra.mxu1 %v15344_v62 }
0x14b6   : > { %15351 = vmatpush3.bf16.msra.mxu0 %v15350_v37  ;;  %15352 = vmatprep.subr.bf16.mxu1 %v17247_v0 }
0x14b7   : > { %14719 = vmatprep.subr.mxu0 %v17249_v1 }
0x14b8   : > { %14695 = vmatmul.mubr.msk.f32.vlgmr.msra.gmra.mrb[44].mxu1 %vm1789_vm2, %v18102_v26 }
0x14b9   : > { %14706 = vmatmul.mubr.msk.f32.vlgmr.msra.gmra.mrb[58].mxu0 %vm1789_vm2, %v18102_v26  ;;  %15354 = vmatpush3.bf16.msra.mxu1 %v15353_v50 }
0x14ba   : > { %15355 = vmatprep.subr.bf16.mxu1 %v17247_v0  ;;  %14716 = vmatprep.mubr.msk.f32.mxu1 %vm17248_vm0, %v17249_v1 }
0x14bb   : > { %14721 = vmatprep.mubr.msk.f32.mxu0 %vm17248_vm0, %v17249_v1 }
0x14bd   : > { %15357 = vmatpush3.bf16.msra.mxu1 %v15356_v57 }
0x14be   : > { %14729 = vmatprep.subr.mxu1 %v17249_v1 }
0x14c0   : > { %14717 = vmatmul.mubr.msk.f32.vlgmr.msra.gmra.mrb[46].mxu1 %vm1789_vm2, %v18102_v26 }
0x14c1   : > { %14731 = vmatprep.mubr.msk.f32.mxu1 %vm17248_vm0, %v17249_v1 }
0x1553   : > { %v6084_v59 = vpop.f32.mrb[36].mxu1  ;;  %v6154_v27 = vpop.f32.mrb[50].mxu0 }
0x1554   : > { %v6085_v34 = vadd.f32 %v14147_v58, %v6084_v59  ;;  %v6086_v38 = vpop.f32.mrb[37].mxu1  ;;  %v6156_v63 = vpop.f32.mrb[51].mxu0 }
0x1556   : > { %v6155_v2 = vadd.f32 %v6154_v27, %v6085_v34 }
0x1563   : > { %v6224_v3 = vpop.f32.mrb[38].mxu1  ;;  %v6294_v47 = vpop.f32.mrb[52].mxu0 }
0x1564   : > { %v6225_v44 = vadd.f32 %v6224_v3, %v6155_v2  ;;  %v6226_v4 = vpop.f32.mrb[39].mxu1  ;;  %v6296_v9 = vpop.f32.mrb[53].mxu0 }
0x1566   : > { %v6295_v11 = vadd.f32 %v6294_v47, %v6225_v44 }
0x1573   : > { %v6364_v12 = vpop.f32.mrb[40].mxu1 }
0x1574   : > { %v6365_v55 = vadd.f32 %v6364_v12, %v6295_v11  ;;  %v6434_v13 = vpop.f32.mrb[54].mxu0  ;;  %v6366_v14 = vpop.f32.mrb[41].mxu1 }
0x1575   : > { %v6436_v56 = vpop.f32.mrb[55].mxu0 }
0x1576   : > { %v6435_v15 = vadd.f32 %v6434_v13, %v6365_v55 }
0x1583   : > { %v6504_v10 = vpop.f32.mrb[42].mxu1 }
0x1584   : > { %v6505_v16 = vadd.f32 %v6504_v10, %v6435_v15  ;;  %v6574_v60 = vpop.f32.mrb[56].mxu0  ;;  %v6506_v17 = vpop.f32.mrb[43].mxu1 }
0x1585   : > { %v6576_v19 = vpop.f32.mrb[57].mxu0 }
0x1586   : > { %v18488_v20 = vadd.f32 %v6574_v60, %v6505_v16 }
0x158b   : > { %v6731_v8 = vpop.f32.mrb[44].mxu1 }
0x158c   : > { %v6732_v24 = vadd.f32 %v14152_v21, %v6731_v8  ;;  %v6807_v29 = vpop.f32.mrb[58].mxu0  ;;  %v14696_v30 = vpop.f32.mrb[45].mxu1 }
0x158d   : > { %v6808_v31 = vadd.f32 %v14154_v23, %v6807_v29  ;;  %v14707_v5 = vpop.f32.mrb[59].mxu0 }
0x158e   : > { %v6887_v32 = vmul.f32 %v6732_v24, %v18119_v35  ;;  %v6978_v18 = vmul.f32 %v6732_v24, %v18125_v42  ;;  %v7212_v37 = vmul.f32 %v6732_v24, %v18134_v46  ;;  %v7374_v39 = vmul.f32 %v6732_v24, %v18147_v51 }
0x158f   : > { %14720 = vmatpush3.xpose.msk.msra.mxu0 %vm1789_vm2, %v6808_v31 }
0x1590   : > { %14724 = vmatprep.subr.mxu0 %v17249_v1 }
0x1592   : > { %14722 = vmatmul.mubr.msk.f32.vlgmr.msra.gmra.mrb[60].mxu0 %vm1789_vm2, %v6887_v32 }
0x1593   : > { %14725 = vmatpush3.xpose.msk.msra.mxu0 %vm1789_vm2, %v6808_v31  ;;  %v6883_v40 = vpop.f32.mrb[46].mxu1  ;;  %14726 = vmatprep.mubr.msk.f32.mxu0 %vm17248_vm0, %v17249_v1 }
0x1594   : > { %v18498_v36 = vadd.f32 %v14156_v33, %v6883_v40  ;;  %v14718_v25 = vpop.f32.mrb[47].mxu1  ;;  %14739 = vmatprep.subr.mxu0 %v17249_v1  ;;  %v6578_v33 = vadd.f32 %v18488_v20, %v18386_v53 }
0x1596   : > { %14727 = vmatmul.mubr.msk.f32.vlgmr.msra.gmra.mrb[62].mxu0 %vm1789_vm2, %v6978_v18  ;;  %v7065_v62 = vmul.f32 %v18498_v36, %v18125_v42  ;;  %v6583_v25 = vsel %vm1789_vm2, %v6578_v33, 0.0  ;;  %v6977_v53 = vmul.f32 %v18498_v36, %v18119_v35 }
0x1597   : > { %14740 = vmatpush3.xpose.msk.msra.mxu0 %vm1789_vm2, %v6808_v31  ;;  %14741 = vmatprep.mubr.msk.f32.mxu0 %vm17248_vm0, %v17249_v1 }
0x1598   : > { %14730 = vmatpush3.msra.mxu1 %v7065_v62  ;;  %14749 = vmatprep.subr.mxu0 %v17249_v1 }
0x1599   : > { %14734 = vmatprep.subr.mxu1 %v17249_v1 }
0x159a   : > { %14742 = vmatmul.mubr.msk.f32.vlgmr.msra.gmra.mrb[64].mxu0 %vm1789_vm2, %v7212_v37 }
0x159b   : > { %14750 = vmatpush3.xpose.msk.msra.mxu0 %vm1789_vm2, %v6808_v31  ;;  %14751 = vmatprep.mubr.msk.f32.mxu0 %vm17248_vm0, %v17249_v1 }
0x159c   : > { %15358 = vmatprep.subr.bf16.mxu0 %v17247_v0 }
0x159e   : > { %14752 = vmatmul.mubr.msk.f32.vlgmr.msra.gmra.mrb[66].mxu0 %vm1789_vm2, %v7374_v39 }
0x159f   : > { %14767 = vmatprep.mubr.msk.f32.mxu0 %vm17248_vm0, %v17249_v1 }
0x1665   : > { %v6960_v49 = vpop.f32.mrb[60].mxu0 }
0x1666   : > { %v6964_v50 = vmul.f32 0.35355338, %v6960_v49  ;;  %v14723_v52 = vpop.f32.mrb[61].mxu0 }
0x1668   : > { %v6965_v54 = vadd.f32 %v6964_v50, %v18162_v61 }
0x1669   : > { %v7048_v57 = vpop.f32.mrb[62].mxu0 }
0x166a   : > { %v7052_v58 = vmul.f32 0.35355338, %v7048_v57  ;;  %v14728_v59 = vpop.f32.mrb[63].mxu0  ;;  %v6966_v27 = vsel %vm2104_vm14, %v6965_v54, -inf }
0x166b   : > { %6967 = vmax.xlane.f32.xlu1 %v6966_v27 }
0x166c   : > { %v7053_v34 = vadd.f32 %v7052_v58, %v18162_v61 }
0x166d   : > { %v7282_v38 = vpop.f32.mrb[64].mxu0 }
0x166e   : > { %v7286_v63 = vmul.f32 0.35355338, %v7282_v38  ;;  %v14743_v2 = vpop.f32.mrb[65].mxu0  ;;  %v7054_v3 = vsel %vm2104_vm14, %v7053_v34, -inf  ;;  %v7299_v38 = vmul.f32 %v18498_v36, %v18134_v46 }
0x166f   : > { %7055 = vmax.xlane.f32.xlu0 %v7054_v3  ;;  %v7461_v3 = vmul.f32 %v18498_v36, %v18147_v51  ;;  %v6657_v36 = vld [vmem:[#allocation31 + $0x18] sm:$0xff] }
0x1670   : > { %v7287_v47 = vadd.f32 %v7286_v63, %v18162_v61 }
0x1671   : > { %v7444_v44 = vpop.f32.mrb[66].mxu0 }
0x1672   : > { %v7448_v4 = vmul.f32 0.35355338, %v7444_v44  ;;  %v14753_v9 = vpop.f32.mrb[67].mxu0  ;;  %v7288_v11 = vsel %vm2104_vm14, %v7287_v47, -inf }
0x1673   : > { %7289 = vmax.xlane.f32.xlu0 %v7288_v11  ;;  %v6655_v9 = vld [vmem:[#allocation31 + $0x8] sm:$0xff]  ;;  %v6656_v11 = vld [vmem:[#allocation31 + $0x10] sm:$0xff] }
0x1674   : > { %v7449_v12 = vadd.f32 %v7448_v4, %v18162_v61  ;;  %v6654_v4 = vld [vmem:[#allocation31] sm:$0xff] }
0x1676   : > { %v7450_v55 = vsel %vm2104_vm14, %v7449_v12, -inf }
0x1677   : > { %7451 = vmax.xlane.f32.xlu1 %v7450_v55  ;;  %v15362_v55 = vpack.c.bf16 %v6657_v36, %v6656_v11  ;;  %v7648_v36 = vld [vmem:[#allocation37 + $0x18] sm:$0xff] }
0x16f8   : > { %v6968_v13 = vpop.xlane.xlu1 %6967 }
0x16f9   : > { %v6969_v14 = vsub.f32 %v6965_v54, %v6968_v13 }
0x16fb   : > { %v6970_v56 = vmul.f32 1.442695, %v6969_v14 }
0x16fc   : > { %v7056_v15 = vpop.xlane.xlu0 %7055 }
0x16fd   : > { %16092 = vpow2.f32 %v6970_v56  ;;  %v7057_v10 = vsub.f32 %v7053_v34, %v7056_v15 }
0x16ff   : > { %v7058_v16 = vmul.f32 1.442695, %v7057_v10  ;;  %v14148_v10 = vld [vmem:[#allocation23 + $0x1] ss:$0 sm:$0xff] }
0x1700   : > { %v7290_v60 = vpop.xlane.xlu0 %7289 }
0x1701   : > { %16094 = vpow2.f32 %v7058_v16  ;;  %v7291_v17 = vsub.f32 %v7287_v47, %v7290_v60  ;;  %v14149_v60 = vld [vmem:[#allocation25 + $0x1] ss:$0 sm:$0xff] }
0x1703   : > { %v7292_v19 = vmul.f32 1.442695, %v7291_v17 }
0x1704   : > { %v7452_v21 = vpop.xlane.xlu1 %7451 }
0x1705   : > { %16096 = vpow2.f32 %v7292_v19  ;;  %v7453_v23 = vsub.f32 %v7449_v12, %v7452_v21  ;;  %v15359_v12 = vpack.c.bf16 %v6655_v9, %v6654_v4  ;;  %v7645_v4 = vld [vmem:[#allocation37] sm:$0xff]  ;;  %v7646_v9 = vld [vmem:[#allocation37 + $0x8] sm:$0xff] }
0x1706   : > { %v15365_v11 = vpack.c.bf16 %v7646_v9, %v7645_v4 }
0x1707   : > { %v16093_v8 = vpop.eup %16092  ;;  %v7454_v24 = vmul.f32 1.442695, %v7453_v23  ;;  %15360 = vmatpush3.bf16.msra.mxu0 %v15359_v12  ;;  %v7647_v12 = vld [vmem:[#allocation37 + $0x10] sm:$0xff] }
0x1708   : > { %v6972_v29 = vsel %vm2104_vm14, %v16093_v8, 0.0  ;;  %15361 = vmatprep.subr.bf16.mxu0 %v17247_v0 }
0x1709   : > { %16098 = vpow2.f32 %v7454_v24  ;;  %6973 = vadd.xlane.f32.xlu1 %v6972_v29 }
0x170b   : > { %v16095_v30 = vpop.eup %16094  ;;  %15363 = vmatpush3.bf16.msra.mxu0 %v15362_v55  ;;  %v15368_v55 = vpack.c.bf16 %v7648_v36, %v7647_v12 }
0x170c   : > { %v7060_v31 = vsel %vm2104_vm14, %v16095_v30, 0.0  ;;  %15370 = vmatprep.subr.bf16.mxu0 %v17247_v0 }
0x170d   : > { %7061 = vadd.xlane.f32.xlu0 %v7060_v31 }
0x170f   : > { %v16097_v5 = vpop.eup %16096 }
0x1710   : > { %v7294_v32 = vsel %vm2104_vm14, %v16097_v5, 0.0 }
0x1711   : > { %7295 = vadd.xlane.f32.xlu0 %v7294_v32  ;;  %v7649_v32 = vld [vmem:[#allocation37 + $0x20] sm:$0xff] }
0x1713   : > { %v16099_v40 = vpop.eup %16098 }
0x1714   : > { %v7456_v18 = vsel %vm2104_vm14, %v16099_v40, 0.0 }
0x1715   : > { %7457 = vadd.xlane.f32.xlu1 %v7456_v18  ;;  %6584 = vadd.xlane.f32.xlu0 %v6583_v25  ;;  %v7651_v18 = vld [vmem:[#allocation37 + $0x30] sm:$0xff]  ;;  %v7652_v25 = vld [vmem:[#allocation37 + $0x38] sm:$0xff] }
0x1796   : > { %v6974_v37 = vpop.xlane.xlu1 %6973 }
0x179a   : > { %v7062_v62 = vpop.xlane.xlu0 %7061 }
0x179b   : > { %16100 = vrcp.f32 %v7062_v62  ;;  %v15374_v62 = vpack.c.bf16 %v7652_v25, %v7651_v18 }
0x179c   : > { %16102 = vrcp.f32 %v6974_v37  ;;  %v14170_v37 = vld [vmem:[#allocation32] ss:$0 sm:$0xff] }
0x179e   : > { %v7296_v39 = vpop.xlane.xlu0 %7295 }
0x179f   : > { %16104 = vrcp.f32 %v7296_v39 }
0x17a2   : > { %v6585_v49 = vpop.xlane.xlu0 %6584  ;;  %v7458_v34 = vpop.xlane.xlu1 %7457 }
0x17a3   : > { %v6586_v50 = vmul.f32 0.03125, %v6585_v49  ;;  %16106 = vrcp.f32 %v7458_v34  ;;  %v14151_v34 = vld [vmem:[#allocation28] ss:$0 sm:$0xff] }
0x17a5   : > { %v16101_v52 = vpop.eup %16100  ;;  %v6587_v54 = vsub.f32 %v6578_v33, %v6586_v50  ;;  %v7650_v33 = vld [vmem:[#allocation37 + $0x28] sm:$0xff] }
0x17a6   : > { %v7064_v57 = vmul.f32 %v16101_v52, %v16095_v30  ;;  %v16103_v59 = vpop.eup %16102 }
0x17a7   : > { %v6588_v20 = vmul.f32 %v6587_v54, %v6587_v54  ;;  %v6976_v27 = vmul.f32 %v16103_v59, %v16093_v8  ;;  %v14150_v59 = vld [vmem:[#allocation26] ss:$0 sm:$0xff] }
0x17a8   : > { %14732 = vmatmul.mubr.msk.f32.vlgmr.msra.gmra.mrb[48].mxu1 %vm2104_vm14, %v7064_v57 }
0x17a9   : > { %14735 = vmatpush3.msra.mxu1 %v6977_v53  ;;  %v6589_v58 = vsel %vm1789_vm2, %v6588_v20, 0.0  ;;  %14736 = vmatprep.mubr.msk.f32.mxu1 %vm17248_vm0, %v17249_v1  ;;  %v16105_v63 = vpop.eup %16104 }
0x17aa   : > { %6590 = vadd.xlane.f32.xlu1 %v6589_v58  ;;  %14744 = vmatprep.subr.mxu1 %v17249_v1  ;;  %v7298_v2 = vmul.f32 %v16105_v63, %v16097_v5 }
0x17ad   : > { %v16107_v47 = vpop.eup %16106 }
0x17ae   : > { %v7460_v44 = vmul.f32 %v16107_v47, %v16099_v40  ;;  %v15371_v40 = vpack.c.bf16 %v7650_v33, %v7649_v32  ;;  %v7656_v32 = vld [vmem:[#allocation37 + $0x58] sm:$0xff] }
0x17b0   : > { %14737 = vmatmul.mubr.msk.f32.vlgmr.msra.gmra.mrb[48].mxu1 %vm2104_vm14, %v6976_v27 }
0x17b1   : > { %14745 = vmatpush3.msra.mxu1 %v7299_v38  ;;  %14746 = vmatprep.mubr.msk.f32.mxu1 %vm17248_vm0, %v17249_v1 }
0x17b2   : > { %14754 = vmatprep.subr.mxu1 %v17249_v1 }
0x17b8   : > { %14747 = vmatmul.mubr.msk.f32.vlgmr.msra.gmra.mrb[48].mxu1 %vm2104_vm14, %v7298_v2 }
0x17b9   : > { %14755 = vmatpush3.msra.mxu1 %v7461_v3  ;;  %14756 = vmatprep.mubr.msk.f32.mxu1 %vm17248_vm0, %v17249_v1 }
0x17ba   : > { %15364 = vmatprep.subr.bf16.mxu1 %v17247_v0 }
0x17c0   : > { %14757 = vmatmul.mubr.msk.f32.vlgmr.msra.gmra.mrb[48].mxu1 %vm2104_vm14, %v7460_v44 }
0x17c1   : > { %14778 = vmatprep.mubr.msk.f32.mxu1 %vm17248_vm0, %v17249_v1  ;;  %15366 = vmatpush3.bf16.msra.mxu1 %v15365_v11 }
0x17c2   : > { %15367 = vmatprep.subr.bf16.mxu1 %v17247_v0 }
0x17c5   : > { %15369 = vmatpush3.bf16.msra.mxu1 %v15368_v55 }
0x17c6   : > { %15376 = vmatprep.subr.bf16.mxu1 %v17247_v0 }
0x1837   : > { %v6591_v13 = vpop.xlane.xlu1 %6590 }
0x1838   : > { %v6592_v14 = vmul.f32 0.03125, %v6591_v13  ;;  %v14176_v13 = vld [vmem:[%s19228_s3 + $0x1] ss:$0 sm:$0xff] }
0x183a   : > { %v6593_v56 = vadd.f32 1e-05, %v6592_v14 }
0x183c   : > { %16108 = vrsqrt.f32 %v6593_v56 }
0x1846   : > { %v16109_v15 = vpop.eup %16108 }
0x1847   : > { %v6595_v16 = vmul.f32 %v16109_v15, %v6587_v54 }
0x1849   : > { %v6602_v17 = vmul.f32 %v14148_v10, %v6595_v16 }
0x184b   : > { %v6609_v19 = vadd.f32 %v14149_v60, %v6602_v17 }
0x184d   : > { %v6612_v21 = vsel %vm1789_vm2, %v6609_v19, 0.0 }
0x184e   : > { %6613 = vadd.xlane.f32.xlu0 %v6612_v21 }
0x1893   : > { %v7531_v23 = vpop.f32.mrb[48].mxu1 }
0x1894   : > { %v14758_v8 = vpop.f32.mrb[49].mxu1  ;;  %14768 = vmatmul.mubr.msk.f32.vlgmr.msra.gmra.mrb[68].mxu0 %vm1789_vm2, %v7531_v23  ;;  %v7653_v23 = vld [vmem:[#allocation37 + $0x40] sm:$0xff] }
0x1895   : > { %14789 = vmatprep.mubr.msk.f32.mxu0 %vm17248_vm0, %v17249_v1  ;;  %15372 = vmatpush3.bf16.msra.mxu0 %v15371_v40  ;;  %v7654_v8 = vld [vmem:[#allocation37 + $0x48] sm:$0xff]  ;;  %v14174_v40 = vld [vmem:[%s19228_s3] ss:$0 sm:$0xff] }
0x1896   : > { %15373 = vmatprep.subr.bf16.mxu0 %v17247_v0 }
0x1899   : > { %15375 = vmatpush3.bf16.msra.mxu0 %v15374_v62 }
0x189a   : > { %14803 = vmatprep.subr.mxu0 %v17249_v1 }
0x18db   : > { %v6614_v24 = vpop.xlane.xlu0 %6613 }
0x18dc   : > { %v6615_v29 = vmul.f32 0.03125, %v6614_v24  ;;  %v14173_v24 = vld [vmem:[#allocation35] ss:$0 sm:$0xff] }
0x18de   : > { %v6616_v30 = vsub.f32 %v6609_v19, %v6615_v29  ;;  %v14172_v19 = vld [vmem:[#allocation34] ss:$0 sm:$0xff] }
0x18e0   : > { %v6617_v31 = vmul.f32 %v6616_v30, %v6616_v30 }
0x18e2   : > { %v6618_v5 = vsel %vm1789_vm2, %v6617_v31, 0.0 }
0x18e3   : > { %6619 = vadd.xlane.f32.xlu0 %v6618_v5  ;;  %v7655_v5 = vld [vmem:[#allocation37 + $0x50] sm:$0xff] }
0x18e4   : > { %v15380_v33 = vpack.c.bf16 %v7656_v32, %v7655_v5 }
0x1967   : > { %v7611_v39 = vpop.f32.mrb[68].mxu0 }
0x1968   : > { %v7612_v49 = vadd.f32 %v14170_v37, %v7611_v39  ;;  %v14769_v50 = vpop.f32.mrb[69].mxu0  ;;  %v14178_v39 = vld [vmem:[%s19228_s3 + $0x2] ss:$0 sm:$0xff] }
0x196a   : > { %v7615_v52 = vadd.f32 %v7612_v49, %v18102_v26 }
0x196c   : > { %v7618_v54 = vsel %vm1789_vm2, %v7615_v52, 0.0 }
0x196d   : > { %7619 = vadd.xlane.f32.xlu1 %v7618_v54 }
0x1970   : > { %v6620_v57 = vpop.xlane.xlu0 %6619 }
0x1971   : > { %v6621_v53 = vmul.f32 0.03125, %v6620_v57 }
0x1973   : > { %v6622_v20 = vadd.f32 1e-05, %v6621_v53 }
0x1975   : > { %16110 = vrsqrt.f32 %v6622_v20 }
0x197f   : > { %v16111_v58 = vpop.eup %16110 }
0x1980   : > { %v6624_v27 = vmul.f32 %v16111_v58, %v6616_v30  ;;  %v15377_v30 = vpack.c.bf16 %v7654_v8, %v7653_v23 }
0x1982   : > { %v6631_v38 = vmul.f32 %v14150_v59, %v6624_v27 }
0x1984   : > { %v18567_v63 = vadd.f32 %v14151_v34, %v6631_v38 }
0x1986   : > { %14790 = vmatmul.mubr.msk.f32.vlgmr.msra.gmra.mrb[70].mxu0 %vm1789_vm2, %v18567_v63 }
0x1987   : > { %14805 = vmatprep.mubr.msk.f32.mxu0 %vm17248_vm0, %v17249_v1 }
0x19fa   : > { %v7620_v26 = vpop.xlane.xlu1 %7619 }
0x19fb   : > { %v7621_v2 = vmul.f32 0.03125, %v7620_v26 }
0x19fd   : > { %v7622_v3 = vsub.f32 %v7615_v52, %v7621_v2 }
0x19ff   : > { %v7623_v47 = vmul.f32 %v7622_v3, %v7622_v3 }
0x1a01   : > { %v7624_v44 = vsel %vm1789_vm2, %v7623_v47, 0.0 }
0x1a02   : > { %7625 = vadd.xlane.f32.xlu1 %v7624_v44 }
0x1a59   : > { %v7819_v14 = vpop.f32.mrb[70].mxu0 }
0x1a5a   : > { %v7820_v56 = vadd.f32 %v14176_v13, %v7819_v14  ;;  %v14791_v15 = vpop.f32.mrb[71].mxu0 }
0x1a5c   : > { %14804 = vmatpush3.xpose.msk.msra.mxu0 %vm1789_vm2, %v7820_v56 }
0x1a5d   : > { %14808 = vmatprep.subr.mxu0 %v17249_v1 }
0x1a8f   : > { %v7626_v10 = vpop.xlane.xlu1 %7625 }
0x1a90   : > { %v7627_v16 = vmul.f32 0.03125, %v7626_v10 }
0x1a92   : > { %v7628_v60 = vadd.f32 1e-05, %v7627_v16 }
0x1a94   : > { %16112 = vrsqrt.f32 %v7628_v60 }
0x1a9e   : > { %v16113_v17 = vpop.eup %16112 }
0x1a9f   : > { %v7630_v21 = vmul.f32 %v16113_v17, %v7622_v3 }
0x1aa1   : > { %v7637_v29 = vmul.f32 %v14172_v19, %v7630_v21 }
0x1aa3   : > { %v18579_v31 = vadd.f32 %v14173_v24, %v7637_v29 }
0x1aa5   : > { %14779 = vmatmul.mubr.msk.f32.vlgmr.msra.gmra.mrb[50].mxu1 %vm1789_vm2, %v18579_v31 }
0x1aa6   : > { %15378 = vmatpush3.bf16.msra.mxu1 %v15377_v30  ;;  %14800 = vmatprep.mubr.msk.f32.mxu1 %vm17248_vm0, %v17249_v1 }
0x1aa7   : > { %15379 = vmatprep.subr.bf16.mxu1 %v17247_v0 }
0x1aaa   : > { %15381 = vmatpush3.bf16.msra.mxu1 %v15380_v33 }
0x1aab   : > { %14813 = vmatprep.subr.mxu1 %v17249_v1 }
0x1aad   : > { %14801 = vmatmul.mubr.msk.f32.vlgmr.msra.gmra.mrb[52].mxu1 %vm1789_vm2, %v18567_v63 }
0x1aae   : > { %14815 = vmatprep.mubr.msk.f32.mxu1 %vm17248_vm0, %v17249_v1 }
0x1b78   : > { %v7740_v18 = vpop.f32.mrb[50].mxu1 }
0x1b79   : > { %v7741_v25 = vadd.f32 %v14174_v40, %v7740_v18  ;;  %v14780_v62 = vpop.f32.mrb[51].mxu1 }
0x1b7a   : > { %v7661_v62 = vld [vmem:[#allocation38 + $0x8] sm:$0xff] }
0x1b7b   : > { %v7899_v37 = vmul.f32 %v7741_v25, %v18119_v35  ;;  %v7989_v49 = vmul.f32 %v7741_v25, %v18125_v42  ;;  %v8222_v57 = vmul.f32 %v7741_v25, %v18134_v46  ;;  %v8383_v20 = vmul.f32 %v7741_v25, %v18147_v51  ;;  %v7660_v25 = vld [vmem:[#allocation38] sm:$0xff] }
0x1b7d   : > { %14806 = vmatmul.mubr.msk.f32.vlgmr.msra.gmra.mrb[72].mxu0 %vm1789_vm2, %v7899_v37  ;;  %v7662_v37 = vld [vmem:[#allocation38 + $0x10] sm:$0xff] }
0x1b7e   : > { %14809 = vmatpush3.xpose.msk.msra.mxu0 %vm1789_vm2, %v7820_v56  ;;  %14810 = vmatprep.mubr.msk.f32.mxu0 %vm17248_vm0, %v17249_v1 }
0x1b7f   : > { %14823 = vmatprep.subr.mxu0 %v17249_v1 }
0x1b80   : > { %v7895_v50 = vpop.f32.mrb[52].mxu1 }
0x1b81   : > { %v18600_v52 = vadd.f32 %v14178_v39, %v7895_v50  ;;  %v14802_v54 = vpop.f32.mrb[53].mxu1  ;;  %14811 = vmatmul.mubr.msk.f32.vlgmr.msra.gmra.mrb[74].mxu0 %vm1789_vm2, %v7989_v49  ;;  %v15383_v39 = vpack.c.bf16 %v7661_v62, %v7660_v25  ;;  %v7663_v49 = vld [vmem:[#allocation38 + $0x18] sm:$0xff] }
0x1b82   : > { %14824 = vmatpush3.xpose.msk.msra.mxu0 %vm1789_vm2, %v7820_v56  ;;  %14825 = vmatprep.mubr.msk.f32.mxu0 %vm17248_vm0, %v17249_v1  ;;  %v15386_v50 = vpack.c.bf16 %v7663_v49, %v7662_v37  ;;  %v8688_v25 = vld [vmem:[#allocation43 + $0x118] sm:$0xff]  ;;  %v8701_v49 = vld [vmem:[#allocation43 + $0x180] sm:$0xff] }
0x1b83   : > { %v8075_v53 = vmul.f32 %v18600_v52, %v18125_v42  ;;  %14833 = vmatprep.subr.mxu0 %v17249_v1  ;;  %v8704_v37 = vld [vmem:[#allocation43 + $0x198] sm:$0xff] }
0x1b85   : > { %14814 = vmatpush3.msra.mxu1 %v8075_v53  ;;  %14826 = vmatmul.mubr.msk.f32.vlgmr.msra.gmra.mrb[76].mxu0 %vm1789_vm2, %v8222_v57 }
0x1b86   : > { %14834 = vmatpush3.xpose.msk.msra.mxu0 %vm1789_vm2, %v7820_v56  ;;  %14835 = vmatprep.mubr.msk.f32.mxu0 %vm17248_vm0, %v17249_v1 }
0x1b87   : > { %14818 = vmatprep.subr.mxu1 %v17249_v1  ;;  %15382 = vmatprep.subr.bf16.mxu0 %v17247_v0 }
0x1b89   : > { %14836 = vmatmul.mubr.msk.f32.vlgmr.msra.gmra.mrb[78].mxu0 %vm1789_vm2, %v8383_v20 }
0x1b8a   : > { %14851 = vmatprep.mubr.msk.f32.mxu0 %vm17248_vm0, %v17249_v1  ;;  %15384 = vmatpush3.bf16.msra.mxu0 %v15383_v39  ;;  %v8685_v39 = vld [vmem:[#allocation43 + $0x100] sm:$0xff] }
0x1b8b   : > { %15385 = vmatprep.subr.bf16.mxu0 %v17247_v0 }
0x1b8e   : > { %15387 = vmatpush3.bf16.msra.mxu0 %v15386_v50  ;;  %v15400_v50 = vpack.c.bf16 %v8704_v37, %v8688_v25  ;;  %v8677_v25 = vld [vmem:[#allocation43 + $0xc0] sm:$0xff] }
0x1c50   : > { %v7972_v58 = vpop.f32.mrb[72].mxu0 }
0x1c51   : > { %v7976_v59 = vmul.f32 0.35355338, %v7972_v58  ;;  %v14807_v27 = vpop.f32.mrb[73].mxu0 }
0x1c53   : > { %v7977_v34 = vsel %vm2104_vm14, %v7976_v59, -inf }
0x1c54   : > { %7978 = vmax.xlane.f32.xlu1 %v7977_v34  ;;  %v8059_v38 = vpop.f32.mrb[74].mxu0 }
0x1c55   : > { %v8063_v26 = vmul.f32 0.35355338, %v8059_v38  ;;  %v14812_v2 = vpop.f32.mrb[75].mxu0 }
0x1c57   : > { %v8064_v3 = vsel %vm2104_vm14, %v8063_v26, -inf }
0x1c58   : > { %8065 = vmax.xlane.f32.xlu0 %v8064_v3  ;;  %v8292_v47 = vpop.f32.mrb[76].mxu0 }
0x1c59   : > { %v8296_v44 = vmul.f32 0.35355338, %v8292_v47  ;;  %v14827_v4 = vpop.f32.mrb[77].mxu0  ;;  %v8469_v47 = vmul.f32 %v18600_v52, %v18147_v51 }
0x1c5b   : > { %v8297_v9 = vsel %vm2104_vm14, %v8296_v44, -inf }
0x1c5c   : > { %8298 = vmax.xlane.f32.xlu0 %v8297_v9  ;;  %v8453_v11 = vpop.f32.mrb[78].mxu0 }
0x1c5d   : > { %v8457_v12 = vmul.f32 0.35355338, %v8453_v11  ;;  %v14837_v36 = vpop.f32.mrb[79].mxu0 }
0x1c5f   : > { %v8458_v55 = vsel %vm2104_vm14, %v8457_v12, -inf }
0x1c60   : > { %8459 = vmax.xlane.f32.xlu1 %v8458_v55 }
0x1ce1   : > { %v7979_v13 = vpop.xlane.xlu1 %7978 }
0x1ce2   : > { %v7980_v14 = vsub.f32 %v7976_v59, %v7979_v13  ;;  %v7988_v59 = vmul.f32 %v18600_v52, %v18119_v35 }
0x1ce4   : > { %v7981_v56 = vmul.f32 1.442695, %v7980_v14 }
0x1ce5   : > { %v8066_v15 = vpop.xlane.xlu0 %8065 }
0x1ce6   : > { %16114 = vpow2.f32 %v7981_v56  ;;  %v8067_v10 = vsub.f32 %v8063_v26, %v8066_v15  ;;  %v8308_v26 = vmul.f32 %v18600_v52, %v18134_v46 }
0x1ce8   : > { %v8068_v16 = vmul.f32 1.442695, %v8067_v10 }
0x1ce9   : > { %v8299_v60 = vpop.xlane.xlu0 %8298 }
0x1cea   : > { %16116 = vpow2.f32 %v8068_v16  ;;  %v8300_v17 = vsub.f32 %v8296_v44, %v8299_v60 }
0x1cec   : > { %v8301_v19 = vmul.f32 1.442695, %v8300_v17  ;;  %v8654_v17 = vld [vmem:[#allocation43 + $0x8] sm:$0xff] }
0x1ced   : > { %v8460_v21 = vpop.xlane.xlu1 %8459 }
0x1cee   : > { %16118 = vpow2.f32 %v8301_v19  ;;  %v8461_v23 = vsub.f32 %v8457_v12, %v8460_v21  ;;  %v14192_v12 = vld [vmem:[%s19229_s8] ss:$0 sm:$0xff]  ;;  %v8670_v19 = vld [vmem:[#allocation43 + $0x88] sm:$0xff] }
0x1cef   : > { %v8656_v21 = vld [vmem:[#allocation43 + $0x18] sm:$0xff] }
0x1cf0   : > { %v16115_v8 = vpop.eup %16114  ;;  %v8462_v24 = vmul.f32 1.442695, %v8461_v23  ;;  %v15388_v23 = vpack.c.bf16 %v8670_v19, %v8654_v17  ;;  %v8689_v19 = vld [vmem:[#allocation43 + $0x120] sm:$0xff] }
0x1cf1   : > { %v7983_v29 = vsel %vm2104_vm14, %v16115_v8, 0.0 }
0x1cf2   : > { %16120 = vpow2.f32 %v8462_v24  ;;  %7984 = vadd.xlane.f32.xlu1 %v7983_v29  ;;  %v8653_v24 = vld [vmem:[#allocation43] sm:$0xff] }
0x1cf3   : > { %v8669_v29 = vld [vmem:[#allocation43 + $0x80] sm:$0xff] }
0x1cf4   : > { %v16117_v30 = vpop.eup %16116 }
0x1cf5   : > { %v8070_v5 = vsel %vm2104_vm14, %v16117_v30, 0.0 }
0x1cf6   : > { %8071 = vadd.xlane.f32.xlu0 %v8070_v5  ;;  %v15390_v5 = vpack.c.bf16 %v8669_v29, %v8653_v24  ;;  %v8691_v29 = vld [vmem:[#allocation43 + $0x130] sm:$0xff] }
0x1cf8   : > { %v16119_v32 = vpop.eup %16118 }
0x1cf9   : > { %v8303_v33 = vsel %vm2104_vm14, %v16119_v32, 0.0 }
0x1cfa   : > { %8304 = vadd.xlane.f32.xlu0 %v8303_v33 }
0x1cfc   : > { %v16121_v40 = vpop.eup %16120 }
0x1cfd   : > { %v8464_v18 = vsel %vm2104_vm14, %v16121_v40, 0.0 }
0x1cfe   : > { %8465 = vadd.xlane.f32.xlu1 %v8464_v18  ;;  %v8702_v18 = vld [vmem:[#allocation43 + $0x188] sm:$0xff] }
0x1d7f   : > { %v7985_v57 = vpop.xlane.xlu1 %7984 }
0x1d83   : > { %v8072_v54 = vpop.xlane.xlu0 %8071 }
0x1d84   : > { %16122 = vrcp.f32 %v8072_v54  ;;  %v15394_v54 = vpack.c.bf16 %v8701_v49, %v8685_v39  ;;  %v8663_v39 = vld [vmem:[#allocation43 + $0x50] sm:$0xff] }
0x1d85   : > { %16124 = vrcp.f32 %v7985_v57  ;;  %v8687_v57 = vld [vmem:[#allocation43 + $0x110] sm:$0xff] }
0x1d86   : > { %v8679_v49 = vld [vmem:[#allocation43 + $0xd0] sm:$0xff] }
0x1d87   : > { %v8305_v58 = vpop.xlane.xlu0 %8304 }
0x1d88   : > { %16126 = vrcp.f32 %v8305_v58  ;;  %v8658_v58 = vld [vmem:[#allocation43 + $0x28] sm:$0xff] }
0x1d8b   : > { %v8466_v38 = vpop.xlane.xlu1 %8465 }
0x1d8c   : > { %16128 = vrcp.f32 %v8466_v38  ;;  %v8676_v38 = vld [vmem:[#allocation43 + $0xb8] sm:$0xff] }
0x1d8e   : > { %v16123_v53 = vpop.eup %16122 }
0x1d8f   : > { %v8074_v20 = vmul.f32 %v16123_v53, %v16117_v30  ;;  %v16125_v27 = vpop.eup %16124  ;;  %v8703_v53 = vld [vmem:[#allocation43 + $0x190] sm:$0xff] }
0x1d90   : > { %v7987_v34 = vmul.f32 %v16125_v27, %v16115_v8  ;;  %v8672_v8 = vld [vmem:[#allocation43 + $0x98] sm:$0xff] }
0x1d91   : > { %14816 = vmatmul.mubr.msk.f32.vlgmr.msra.gmra.mrb[54].mxu1 %vm2104_vm14, %v8074_v20  ;;  %v15396_v30 = vpack.c.bf16 %v8672_v8, %v8656_v21  ;;  %v15402_v20 = vpack.c.bf16 %v8703_v53, %v8687_v57  ;;  %v8660_v27 = vld [vmem:[#allocation43 + $0x38] sm:$0xff]  ;;  %v8705_v21 = vld [vmem:[#allocation43 + $0x1a0] sm:$0xff] }
0x1d92   : > { %14819 = vmatpush3.msra.mxu1 %v7988_v59  ;;  %14820 = vmatprep.mubr.msk.f32.mxu1 %vm17248_vm0, %v17249_v1  ;;  %v16127_v2 = vpop.eup %16126  ;;  %v8674_v59 = vld [vmem:[#allocation43 + $0xa8] sm:$0xff]  ;;  %v8696_v57 = vld [vmem:[#allocation43 + $0x158] sm:$0xff] }
0x1d93   : > { %14828 = vmatprep.subr.mxu1 %v17249_v1  ;;  %v8307_v3 = vmul.f32 %v16127_v2, %v16119_v32  ;;  %v8671_v32 = vld [vmem:[#allocation43 + $0x90] sm:$0xff]  ;;  %15397 = vmatprep.subr.bf16.mxu0 %v15396_v30  ;;  %v8712_v53 = vld [vmem:[#allocation43 + $0x1d8] sm:$0xff] }
0x1d94   : > { %v8707_v30 = vld [vmem:[#allocation43 + $0x1b0] sm:$0xff] }
0x1d96   : > { %v16129_v44 = vpop.eup %16128 }
0x1d97   : > { %v8468_v4 = vmul.f32 %v16129_v44, %v16121_v40  ;;  %v8686_v40 = vld [vmem:[#allocation43 + $0x108] sm:$0xff]  ;;  %v14194_v44 = vld [vmem:[#allocation40] ss:$0 sm:$0xff] }
0x1d98   : > { %v15392_v62 = vpack.c.bf16 %v8702_v18, %v8686_v40  ;;  %v15418_v40 = vpack.c.bf16 %v8707_v30, %v8691_v29  ;;  %v8661_v18 = vld [vmem:[#allocation43 + $0x40] sm:$0xff]  ;;  %v8699_v30 = vld [vmem:[#allocation43 + $0x170] sm:$0xff] }
0x1d99   : > { %14821 = vmatmul.mubr.msk.f32.vlgmr.msra.gmra.mrb[54].mxu1 %vm2104_vm14, %v7987_v34  ;;  %v15404_v34 = vpack.c.bf16 %v8674_v59, %v8658_v58  ;;  %v15430_v58 = vpack.c.bf16 %v8679_v49, %v8663_v39  ;;  %v8693_v59 = vld [vmem:[#allocation43 + $0x140] sm:$0xff]  ;;  %v8721_v49 = vld [vmem:[#allocation44 + $0x10] sm:$0xff] }
0x1d9a   : > { %14829 = vmatpush3.msra.mxu1 %v8308_v26  ;;  %14830 = vmatprep.mubr.msk.f32.mxu1 %vm17248_vm0, %v17249_v1  ;;  %v15412_v26 = vpack.c.bf16 %v8676_v38, %v8660_v27  ;;  %v8709_v27 = vld [vmem:[#allocation43 + $0x1c0] sm:$0xff]  ;;  %v15432_v38 = vpack.c.bf16 %v8712_v53, %v8696_v57  ;;  %v8768_v57 = vld [vmem:[#allocation44 + $0x188] sm:$0xff]  ;;  %v8754_v53 = vld [vmem:[#allocation44 + $0x118] sm:$0xff] }
0x1d9b   : > { %14838 = vmatprep.subr.mxu1 %v17249_v1  ;;  %v8735_v39 = vld [vmem:[#allocation44 + $0x80] sm:$0xff] }
0x1da1   : > { %14831 = vmatmul.mubr.msk.f32.vlgmr.msra.gmra.mrb[54].mxu1 %vm2104_vm14, %v8307_v3 }
0x1da2   : > { %14839 = vmatpush3.msra.mxu1 %v8469_v47  ;;  %14840 = vmatprep.mubr.msk.f32.mxu1 %vm17248_vm0, %v17249_v1 }
0x1da3   : > { %15389 = vmatprep.subr.bf16.mxu1 %v15388_v23 }
0x1da9   : > { %14841 = vmatmul.mubr.msk.f32.vlgmr.msra.gmra.mrb[54].mxu1 %vm2104_vm14, %v8468_v4 }
0x1daa   : > { %8933 = vmatprep.mubr.f32.mxu1 %v17249_v1  ;;  %15391 = vmatpush1.bf16.msra.mxu1 %v15390_v5  ;;  %v8662_v5 = vld [vmem:[#allocation43 + $0x48] sm:$0xff] }
0x1dab   : > { %15393 = vmatprep.subr.bf16.mxu1 %v15392_v62 }
0x1dae   : > { %15395 = vmatpush1.bf16.msra.mxu1 %v15394_v54  ;;  %v8710_v54 = vld [vmem:[#allocation43 + $0x1c8] sm:$0xff] }
0x1daf   : > { %15405 = vmatprep.subr.bf16.mxu1 %v15404_v34 }
0x1e7c   : > { %v8539_v9 = vpop.f32.mrb[54].mxu1 }
0x1e7d   : > { %v14842_v11 = vpop.f32.mrb[55].mxu1  ;;  %14852 = vmatmul.mubr.msk.f32.vlgmr.msra.gmra.mrb[80].mxu0 %vm1789_vm2, %v8539_v9  ;;  %v14195_v9 = vld [vmem:[#allocation41] ss:$0 sm:$0xff] }
0x1e7e   : > { %9004 = vmatprep.mubr.f32.mxu0 %v17249_v1  ;;  %v8657_v11 = vld [vmem:[#allocation43 + $0x20] sm:$0xff] }
0x1f50   : > { %v8619_v52 = vpop.f32.mrb[80].mxu0 }
0x1f51   : > { %v8620_v36 = vadd.f32 %v14192_v12, %v8619_v52  ;;  %v14853_v55 = vpop.f32.mrb[81].mxu0  ;;  %v8673_v12 = vld [vmem:[#allocation43 + $0xa0] sm:$0xff] }
0x1f52   : > { %v8675_v55 = vld [vmem:[#allocation43 + $0xb0] sm:$0xff] }
0x1f53   : > { %v8623_v13 = vadd.f32 %v8620_v36, %v18579_v31  ;;  %v8655_v31 = vld [vmem:[#allocation43 + $0x10] sm:$0xff] }
0x1f54   : > { %v15398_v33 = vpack.c.bf16 %v8671_v32, %v8655_v31  ;;  %v8659_v36 = vld [vmem:[#allocation43 + $0x30] sm:$0xff]  ;;  %v8678_v31 = vld [vmem:[#allocation43 + $0xc8] sm:$0xff]  ;;  %v8680_v32 = vld [vmem:[#allocation43 + $0xd8] sm:$0xff] }
0x1f55   : > { %v8626_v14 = vsel %vm1789_vm2, %v8623_v13, 0.0  ;;  %v15414_v17 = vpack.c.bf16 %v8675_v55, %v8659_v36  ;;  %v15420_v62 = vpack.c.bf16 %v8678_v31, %v8662_v5  ;;  %v8715_v5 = vld [vmem:[#allocation43 + $0x1f0] sm:$0xff]  ;;  %v8720_v31 = vld [vmem:[#allocation44 + $0x8] sm:$0xff] }
0x1f56   : > { %8627 = vadd.xlane.f32.xlu0 %v8626_v14  ;;  %15399 = vmatpush1.bf16.msra.mxu0 %v15398_v33  ;;  %v8706_v14 = vld [vmem:[#allocation43 + $0x1a8] sm:$0xff]  ;;  %v15410_v33 = vpack.c.bf16 %v8705_v21, %v8689_v19  ;;  %v8697_v21 = vld [vmem:[#allocation43 + $0x160] sm:$0xff] }
0x1f57   : > { %15401 = vmatprep.subr.bf16.mxu0 %v15400_v50  ;;  %v8694_v50 = vld [vmem:[#allocation43 + $0x148] sm:$0xff] }
0x1f58   : > { %v15424_v34 = vpack.c.bf16 %v8710_v54, %v8694_v50  ;;  %v8737_v50 = vld [vmem:[#allocation44 + $0x90] sm:$0xff]  ;;  %v8752_v54 = vld [vmem:[#allocation44 + $0x108] sm:$0xff] }
0x1f5a   : > { %15403 = vmatpush1.bf16.msra.mxu0 %v15402_v20  ;;  %v15422_v20 = vpack.c.bf16 %v8677_v25, %v8661_v18  ;;  %v15450_v18 = vpack.c.bf16 %v8715_v5, %v8699_v30  ;;  %v8725_v30 = vld [vmem:[#allocation44 + $0x30] sm:$0xff] }
0x1f5b   : > { %15413 = vmatprep.subr.bf16.mxu0 %v15412_v26  ;;  %v8695_v26 = vld [vmem:[#allocation43 + $0x150] sm:$0xff] }
0x1f5c   : > { %v8741_v5 = vld [vmem:[#allocation44 + $0xb0] sm:$0xff] }
0x1fe3   : > { %v8628_v56 = vpop.xlane.xlu0 %8627 }
0x1fe4   : > { %v8629_v15 = vmul.f32 0.03125, %v8628_v56  ;;  %v8692_v56 = vld [vmem:[#allocation43 + $0x138] sm:$0xff] }
0x1fe6   : > { %v8630_v10 = vsub.f32 %v8623_v13, %v8629_v15  ;;  %v8690_v13 = vld [vmem:[#allocation43 + $0x128] sm:$0xff]  ;;  %v8708_v15 = vld [vmem:[#allocation43 + $0x1b8] sm:$0xff] }
0x1fe7   : > { %v15408_v8 = vpack.c.bf16 %v8706_v14, %v8690_v13  ;;  %v15416_v24 = vpack.c.bf16 %v8708_v15, %v8692_v56  ;;  %v8667_v13 = vld [vmem:[#allocation43 + $0x70] sm:$0xff]  ;;  %v8698_v56 = vld [vmem:[#allocation43 + $0x168] sm:$0xff] }
0x1fe8   : > { %v8631_v16 = vmul.f32 %v8630_v10, %v8630_v10  ;;  %v8683_v14 = vld [vmem:[#allocation43 + $0xf0] sm:$0xff]  ;;  %v8714_v15 = vld [vmem:[#allocation43 + $0x1e8] sm:$0xff] }
0x1fe9   : > { %v15446_v19 = vpack.c.bf16 %v8683_v14, %v8667_v13 }
0x1fea   : > { %v8632_v60 = vsel %vm1789_vm2, %v8631_v16, 0.0 }
0x1feb   : > { %8633 = vadd.xlane.f32.xlu1 %v8632_v60  ;;  %v15406_v60 = vpack.c.bf16 %v8673_v12, %v8657_v11  ;;  %v8665_v12 = vld [vmem:[#allocation43 + $0x60] sm:$0xff] }
0x2078   : > { %v8634_v2 = vpop.xlane.xlu1 %8633 }
0x2079   : > { %v8635_v3 = vmul.f32 0.03125, %v8634_v2  ;;  %v8711_v2 = vld [vmem:[#allocation43 + $0x1d0] sm:$0xff] }
0x207a   : > { %v15434_v11 = vpack.c.bf16 %v8711_v2, %v8695_v26  ;;  %v8767_v26 = vld [vmem:[#allocation44 + $0x180] sm:$0xff]  ;;  %v8753_v2 = vld [vmem:[#allocation44 + $0x110] sm:$0xff] }
0x207b   : > { %v8636_v47 = vadd.f32 1e-05, %v8635_v3  ;;  %v8666_v3 = vld [vmem:[#allocation43 + $0x68] sm:$0xff] }
0x207d   : > { %16130 = vrsqrt.f32 %v8636_v47  ;;  %v8682_v47 = vld [vmem:[#allocation43 + $0xe8] sm:$0xff] }
0x207e   : > { %v15436_v36 = vpack.c.bf16 %v8682_v47, %v8666_v3  ;;  %v8769_v3 = vld [vmem:[#allocation44 + $0x190] sm:$0xff] }
0x2087   : > { %v16131_v4 = vpop.eup %16130 }
0x2088   : > { %v8638_v52 = vmul.f32 %v16131_v4, %v8630_v10  ;;  %v8664_v10 = vld [vmem:[#allocation43 + $0x58] sm:$0xff] }
0x2089   : > { %v15428_v37 = vpack.c.bf16 %v8680_v32, %v8664_v10  ;;  %v8684_v4 = vld [vmem:[#allocation43 + $0xf8] sm:$0xff]  ;;  %v8736_v10 = vld [vmem:[#allocation44 + $0x88] sm:$0xff] }
0x208a   : > { %v8645_v16 = vmul.f32 %v14194_v44, %v8638_v52  ;;  %v8668_v44 = vld [vmem:[#allocation43 + $0x78] sm:$0xff]  ;;  %v8681_v52 = vld [vmem:[#allocation43 + $0xe0] sm:$0xff]  ;;  %v15452_v25 = vpack.c.bf16 %v8736_v10, %v8720_v31  ;;  %v8756_v31 = vld [vmem:[#allocation44 + $0x128] sm:$0xff] }
0x208b   : > { %v15444_v55 = vpack.c.bf16 %v8684_v4, %v8668_v44  ;;  %v8722_v32 = vld [vmem:[#allocation44 + $0x18] sm:$0xff]  ;;  %v15466_v44 = vpack.c.bf16 %v8769_v3, %v8753_v2  ;;  %v8724_v4 = vld [vmem:[#allocation44 + $0x28] sm:$0xff]  ;;  %v8757_v2 = vld [vmem:[#allocation44 + $0x130] sm:$0xff] }
0x208c   : > { %v18654_v23 = vadd.f32 %v14195_v9, %v8645_v16  ;;  %v15426_v9 = vpack.c.bf16 %v8709_v27, %v8693_v59  ;;  %v8700_v16 = vld [vmem:[#allocation43 + $0x178] sm:$0xff]  ;;  %v15462_v59 = vpack.c.bf16 %v8737_v50, %v8721_v49  ;;  %v15456_v27 = vpack.c.bf16 %v8768_v57, %v8752_v54  ;;  %v8773_v3 = vld [vmem:[#allocation44 + $0x1b0] sm:$0xff] }
0x208e   : > { %14196 = vmatmul.mubr.msk.f32.vlgmr.msra.gmra.mrb[56].mxu1 %vm1789_vm2, %v18654_v23  ;;  %14197 = vmatmul.mubr.msk.f32.vlgmr.msra.gmra.mrb[82].mxu0 %vm1789_vm2, %v18654_v23 }
0x208f   : > { %15407 = vmatpush1.bf16.msra.mxu1 %v15406_v60  ;;  %15415 = vmatpush1.bf16.msra.mxu0 %v15414_v17  ;;  %v8716_v60 = vld [vmem:[#allocation43 + $0x1f8] sm:$0xff]  ;;  %v15438_v17 = vpack.c.bf16 %v8681_v52, %v8665_v12 }
0x2090   : > { %15409 = vmatprep.subr.bf16.mxu1 %v15408_v8  ;;  %15417 = vmatprep.subr.bf16.mxu0 %v15416_v24  ;;  %v8713_v8 = vld [vmem:[#allocation43 + $0x1e0] sm:$0xff]  ;;  %v15440_v24 = vpack.c.bf16 %v8714_v15, %v8698_v56  ;;  %v15448_v29 = vpack.c.bf16 %v8716_v60, %v8700_v16  ;;  %v8742_v52 = vld [vmem:[#allocation44 + $0xb8] sm:$0xff] }
0x2091   : > { %9075 = vmatprep.mubr.f32.mxu1 %v17249_v1  ;;  %9146 = vmatprep.mubr.f32.mxu0 %v17249_v1 }
0x2093   : > { %15411 = vmatpush1.bf16.msra.mxu1 %v15410_v33  ;;  %15419 = vmatpush1.bf16.msra.mxu0 %v15418_v40  ;;  %v8738_v33 = vld [vmem:[#allocation44 + $0x98] sm:$0xff]  ;;  %v15442_v40 = vpack.c.bf16 %v8713_v8, %v8697_v21 }
0x2094   : > { %15421 = vmatprep.subr.bf16.mxu1 %v15420_v62  ;;  %15429 = vmatprep.subr.bf16.mxu0 %v15428_v37  ;;  %v15460_v62 = vpack.c.bf16 %v8738_v33, %v8722_v32  ;;  %v8719_v37 = vld [vmem:[#allocation44] sm:$0xff]  ;;  %v8772_v33 = vld [vmem:[#allocation44 + $0x1a8] sm:$0xff] }
0x2095   : > { %v15472_v54 = vpack.c.bf16 %v8772_v33, %v8756_v31  ;;  %v8729_v33 = vld [vmem:[#allocation44 + $0x50] sm:$0xff] }
0x2096   : > { %14198 = vmatmul.mubr.msk.f32.vlgmr.msra.gmra.mrb[58].mxu1 %vm1789_vm2, %v18654_v23  ;;  %14199 = vmatmul.mubr.msk.f32.vlgmr.msra.gmra.mrb[84].mxu0 %vm1789_vm2, %v18654_v23 }
0x2097   : > { %15423 = vmatpush1.bf16.msra.mxu1 %v15422_v20  ;;  %15431 = vmatpush1.bf16.msra.mxu0 %v15430_v58  ;;  %v8770_v20 = vld [vmem:[#allocation44 + $0x198] sm:$0xff]  ;;  %v15454_v58 = vpack.c.bf16 %v8735_v39, %v8719_v37  ;;  %v15478_v39 = vpack.c.bf16 %v8741_v5, %v8725_v30 }
0x2098   : > { %15425 = vmatprep.subr.bf16.mxu1 %v15424_v34  ;;  %15433 = vmatprep.subr.bf16.mxu0 %v15432_v38  ;;  %v15464_v34 = vpack.c.bf16 %v8770_v20, %v8754_v53  ;;  %v8751_v38 = vld [vmem:[#allocation44 + $0x100] sm:$0xff] }
0x2099   : > { %9217 = vmatprep.mubr.f32.mxu1 %v17249_v1  ;;  %9288 = vmatprep.mubr.f32.mxu0 %v17249_v1  ;;  %v15458_v47 = vpack.c.bf16 %v8767_v26, %v8751_v38 }
0x209b   : > { %15427 = vmatpush1.bf16.msra.mxu1 %v15426_v9  ;;  %15435 = vmatpush1.bf16.msra.mxu0 %v15434_v11  ;;  %v8740_v9 = vld [vmem:[#allocation44 + $0xa8] sm:$0xff]  ;;  %v8726_v11 = vld [vmem:[#allocation44 + $0x38] sm:$0xff] }
0x209c   : > { %15437 = vmatprep.subr.bf16.mxu1 %v15436_v36  ;;  %15445 = vmatprep.subr.bf16.mxu0 %v15444_v55  ;;  %v15468_v12 = vpack.c.bf16 %v8740_v9, %v8724_v4  ;;  %v15476_v36 = vpack.c.bf16 %v8742_v52, %v8726_v11  ;;  %v18679_v55 = vld [vmem:[%s19230_s17] sm:$0xff]  ;;  %v8744_v9 = vld [vmem:[#allocation44 + $0xc8] sm:$0xff]  ;;  %v18694_v52 = vld [vmem:[%s19230_s17 + $0x8] sm:$0xff] }
0x209d   : > { %v8789_v13 = vrot.slane %v18679_v55, %v18226_v41  ;;  %v8797_v14 = vrot.slane %v18679_v55, %v18229_v43  ;;  %v8793_v56 = vrot.slane %v18679_v55, %v18234_v45  ;;  %v8801_v15 = vrot.slane %v18679_v55, %v18237_v48  ;;  %v8730_v11 = vld [vmem:[#allocation44 + $0x58] sm:$0xff] }
0x209e   : > { %14200 = vmatmul.mubr.msk.f32.vlgmr.msra.gmra.mrb[60].mxu1 %vm1789_vm2, %v18654_v23  ;;  %14201 = vmatmul.mubr.msk.f32.vlgmr.msra.gmra.mrb[86].mxu0 %vm1789_vm2, %v18654_v23  ;;  %v8809_v53 = vrot.slane %v18679_v55, %v18248_v6  ;;  %v8817_v20 = vrot.slane %v18679_v55, %v18251_v7 }
0x209f   : > { %15439 = vmatpush1.bf16.msra.mxu1 %v15438_v17  ;;  %15447 = vmatpush1.bf16.msra.mxu0 %v15446_v19  ;;  %v8723_v17 = vld [vmem:[#allocation44 + $0x20] sm:$0xff] }
0x20a0   : > { %15441 = vmatprep.subr.bf16.mxu1 %v15440_v24  ;;  %15449 = vmatprep.subr.bf16.mxu0 %v15448_v29  ;;  %v8739_v19 = vld [vmem:[#allocation44 + $0xa0] sm:$0xff] }
0x20a1   : > { %9359 = vmatprep.mubr.f32.mxu1 %v17249_v1  ;;  %9430 = vmatprep.mubr.f32.mxu0 %v17249_v1  ;;  %v15470_v37 = vpack.c.bf16 %v8739_v19, %v8723_v17  ;;  %v8825_v19 = vrot.slane %v18694_v52, %v18234_v45 }
0x20a3   : > { %15443 = vmatpush1.bf16.msra.mxu1 %v15442_v40  ;;  %15451 = vmatpush1.bf16.msra.mxu0 %v15450_v18  ;;  %v8758_v40 = vld [vmem:[#allocation44 + $0x138] sm:$0xff] }
0x20a4   : > { %15453 = vmatprep.subr.bf16.mxu1 %v15452_v25  ;;  %15461 = vmatprep.subr.bf16.mxu0 %v15460_v62  ;;  %v8774_v18 = vld [vmem:[#allocation44 + $0x1b8] sm:$0xff] }
0x20a5   : > { %v15480_v57 = vpack.c.bf16 %v8774_v18, %v8758_v40  ;;  %v8745_v40 = vld [vmem:[#allocation44 + $0xd0] sm:$0xff]  ;;  %v8760_v18 = vld [vmem:[#allocation44 + $0x148] sm:$0xff] }
0x20a6   : > { %14202 = vmatmul.mubr.msk.f32.vlgmr.msra.gmra.mrb[62].mxu1 %vm1789_vm2, %v18654_v23  ;;  %14203 = vmatmul.mubr.msk.f32.vlgmr.msra.gmra.mrb[88].mxu0 %vm1789_vm2, %v18654_v23 }
0x20ac   : > { %15455 = vmatpush1.bf16.xpose.msra.mxu1 %v15454_v58  ;;  %15463 = vmatpush1.bf16.xpose.msra.mxu0 %v15462_v59 }
0x20ad   : > { %15457 = vmatprep.subr.bf16.mxu1 %v15456_v27  ;;  %15465 = vmatprep.subr.bf16.mxu0 %v15464_v34  ;;  %v8755_v27 = vld [vmem:[#allocation44 + $0x120] sm:$0xff] }
0x20ae   : > { %v8771_v34 = vld [vmem:[#allocation44 + $0x1a0] sm:$0xff] }
0x20b4   : > { %15459 = vmatpush1.bf16.xpose.msra.mxu1 %v15458_v47  ;;  %15467 = vmatpush1.bf16.xpose.msra.mxu0 %v15466_v44  ;;  %v8728_v47 = vld [vmem:[#allocation44 + $0x48] sm:$0xff] }
0x20b5   : > { %15469 = vmatprep.subr.bf16.mxu1 %v15468_v12  ;;  %15477 = vmatprep.subr.bf16.mxu0 %v15476_v36  ;;  %v8746_v12 = vld [vmem:[#allocation44 + $0xd8] sm:$0xff] }
0x20b6   : > { %v15492_v17 = vpack.c.bf16 %v8746_v12, %v8730_v11  ;;  %v8734_v11 = vld [vmem:[#allocation44 + $0x78] sm:$0xff] }
0x20b7   : > { %v8750_v12 = vld [vmem:[#allocation44 + $0xf8] sm:$0xff] }
0x2161   : > { %v8935_v16 = vpop.f32.mrb[56].mxu1  ;;  %v9006_v60 = vpop.f32.mrb[82].mxu0 }
0x2162   : > { %v8936_v21 = vadd.f32 %v8935_v16, %v8789_v13  ;;  %v9007_v8 = vadd.f32 %v9006_v60, %v8797_v14  ;;  %v8937_v24 = vpop.f32.mrb[57].mxu1  ;;  %v9008_v29 = vpop.f32.mrb[83].mxu0  ;;  %v15474_v14 = vpack.c.bf16 %v8771_v34, %v8755_v27  ;;  %v8813_v16 = vrot.slane %v18679_v55, %v18261_v28 }
0x2163   : > { %v8938_v10 = vadd.f32 %v8937_v24, %v8793_v56  ;;  %v9009_v32 = vadd.f32 %v9008_v29, %v8801_v15  ;;  %v15482_v56 = vpack.c.bf16 %v8773_v3, %v8757_v2  ;;  %v8805_v15 = vrot.slane %v18679_v55, %v18258_v22  ;;  %v8727_v55 = vld [vmem:[#allocation44 + $0x40] sm:$0xff] }
0x2164   : > { %v9437_v49 = vmax.f32 %v8936_v21, 0.0  ;;  %v9439_v50 = vmax.f32 %v9007_v8, 0.0  ;;  %v15484_v60 = vpack.c.bf16 %v8744_v9, %v8728_v47  ;;  %v8833_v21 = vrot.slane %v18694_v52, %v18237_v48  ;;  %v8759_v2 = vld [vmem:[#allocation44 + $0x140] sm:$0xff]  ;;  %v8761_v47 = vld [vmem:[#allocation44 + $0x150] sm:$0xff]  ;;  %v8748_v9 = vld [vmem:[#allocation44 + $0xe8] sm:$0xff] }
0x2165   : > { %v9438_v25 = vmax.f32 %v8938_v10, 0.0  ;;  %v9440_v62 = vmax.f32 %v9009_v32, 0.0  ;;  %v8743_v10 = vld [vmem:[#allocation44 + $0xc0] sm:$0xff] }
0x2166   : > { %v8775_v3 = vld [vmem:[#allocation44 + $0x1c0] sm:$0xff] }
0x2167   : > { %9523 = vmatprep.mubr.f32.mxu1 %v9438_v25  ;;  %9593 = vmatprep.mubr.f32.mxu0 %v9440_v62  ;;  %v8776_v62 = vld [vmem:[#allocation44 + $0x1c8] sm:$0xff] }
0x2168   : > { %9524 = vmatmul.mubr.f32.vlgmr.msra.gmra.mrb[64].mxu1 %v9437_v49  ;;  %9594 = vmatmul.mubr.f32.vlgmr.msra.gmra.mrb[90].mxu0 %v9439_v50  ;;  %v15486_v49 = vpack.c.bf16 %v8743_v10, %v8727_v55  ;;  %v8764_v10 = vld [vmem:[#allocation44 + $0x168] sm:$0xff] }
0x2169   : > { %v9077_v58 = vpop.f32.mrb[58].mxu1  ;;  %v9148_v59 = vpop.f32.mrb[84].mxu0  ;;  %15471 = vmatpush1.bf16.xpose.msra.mxu1 %v15470_v37  ;;  %15479 = vmatpush1.bf16.xpose.msra.mxu0 %v15478_v39  ;;  %v8762_v37 = vld [vmem:[#allocation44 + $0x158] sm:$0xff] }
0x216a   : > { %v9079_v38 = vpop.f32.mrb[59].mxu1  ;;  %v9150_v26 = vpop.f32.mrb[85].mxu0  ;;  %15473 = vmatprep.subr.bf16.mxu1 %v15472_v54  ;;  %15481 = vmatprep.subr.bf16.mxu0 %v15480_v57  ;;  %v9078_v29 = vadd.f32 %v9077_v58, %v8805_v15  ;;  %v9149_v30 = vadd.f32 %v9148_v59, %v8813_v16  ;;  %v8778_v39 = vld [vmem:[#allocation44 + $0x1d8] sm:$0xff]  ;;  %v15494_v57 = vpack.c.bf16 %v8745_v40, %v8729_v33 }
0x216b   : > { %v9080_v44 = vadd.f32 %v9079_v38, %v8809_v53  ;;  %v9151_v4 = vadd.f32 %v9150_v26, %v8817_v20  ;;  %v15488_v20 = vpack.c.bf16 %v8776_v62, %v8760_v18  ;;  %v15496_v58 = vpack.c.bf16 %v8778_v39, %v8762_v37  ;;  %v8766_v18 = vld [vmem:[#allocation44 + $0x178] sm:$0xff] }
0x216c   : > { %v9441_v50 = vmax.f32 %v9078_v29, 0.0  ;;  %v9443_v54 = vmax.f32 %v9149_v30, 0.0  ;;  %v8829_v15 = vrot.slane %v18694_v52, %v18229_v43  ;;  %v15508_v16 = vpack.c.bf16 %v8750_v12, %v8734_v11  ;;  %v8747_v29 = vld [vmem:[#allocation44 + $0xe0] sm:$0xff] }
0x216d   : > { %v9442_v36 = vmax.f32 %v9080_v44, 0.0  ;;  %v9444_v13 = vmax.f32 %v9151_v4, 0.0  ;;  %v8777_v44 = vld [vmem:[#allocation44 + $0x1d0] sm:$0xff]  ;;  %v8732_v4 = vld [vmem:[#allocation44 + $0x68] sm:$0xff] }
0x216f   : > { %9663 = vmatprep.mubr.f32.mxu1 %v9442_v36  ;;  %9733 = vmatprep.mubr.f32.mxu0 %v9444_v13  ;;  %v15490_v36 = vpack.c.bf16 %v8775_v3, %v8759_v2  ;;  %v8821_v13 = vrot.slane %v18694_v52, %v18226_v41 }
0x2171   : > { %v9219_v8 = vpop.f32.mrb[60].mxu1  ;;  %v9290_v24 = vpop.f32.mrb[86].mxu0  ;;  %15475 = vmatpush1.bf16.xpose.msra.mxu1 %v15474_v14  ;;  %15483 = vmatpush1.bf16.xpose.msra.mxu0 %v15482_v56  ;;  %v15498_v14 = vpack.c.bf16 %v8777_v44, %v8761_v47  ;;  %v15500_v56 = vpack.c.bf16 %v8748_v9, %v8732_v4 }
0x2172   : > { %v9221_v5 = vpop.f32.mrb[61].mxu1  ;;  %v9292_v31 = vpop.f32.mrb[87].mxu0  ;;  %15485 = vmatprep.subr.bf16.mxu1 %v15484_v60  ;;  %15493 = vmatprep.subr.bf16.mxu0 %v15492_v17  ;;  %v8841_v60 = vrot.slane %v18694_v52, %v18248_v6  ;;  %v8849_v17 = vrot.slane %v18694_v52, %v18251_v7  ;;  %v9291_v30 = vadd.f32 %v9290_v24, %v8829_v15  ;;  %v8763_v24 = vld [vmem:[#allocation44 + $0x160] sm:$0xff] }
0x2173   : > { %v9222_v32 = vadd.f32 %v9221_v5, %v8825_v19  ;;  %v9293_v25 = vadd.f32 %v9292_v31, %v8833_v21  ;;  %v9220_v19 = vadd.f32 %v9219_v8, %v8821_v13  ;;  %v8731_v21 = vld [vmem:[#allocation44 + $0x60] sm:$0xff]  ;;  %v8733_v5 = vld [vmem:[#allocation44 + $0x70] sm:$0xff] }
0x2174   : > { %v8749_v31 = vld [vmem:[#allocation44 + $0xf0] sm:$0xff]  ;;  %v15502_v40 = vpack.c.bf16 %v8747_v29, %v8731_v21  ;;  %v9447_v39 = vmax.f32 %v9291_v30, 0.0 }
0x2175   : > { %v9446_v53 = vmax.f32 %v9222_v32, 0.0  ;;  %v9448_v59 = vmax.f32 %v9293_v25, 0.0  ;;  %v8780_v32 = vld [vmem:[#allocation44 + $0x1e8] sm:$0xff]  ;;  %v8782_v25 = vld [vmem:[#allocation44 + $0x1f8] sm:$0xff]  ;;  %v9445_v62 = vmax.f32 %v9220_v19, 0.0  ;;  %v15510_v37 = vpack.c.bf16 %v8749_v31, %v8733_v5 }
0x2178   : > { %9664 = vmatmul.mubr.f32.vlgmr.msra.gmra.mrb[66].mxu1 %v9441_v50  ;;  %9734 = vmatmul.mubr.f32.vlgmr.msra.gmra.mrb[92].mxu0 %v9443_v54  ;;  %v15512_v50 = vpack.c.bf16 %v8782_v25, %v8766_v18 }
0x2179   : > { %v18704_v27 = vpop.f32.mrb[62].mxu1  ;;  %v18706_v34 = vpop.f32.mrb[88].mxu0  ;;  %15487 = vmatpush1.bf16.xpose.msra.mxu1 %v15486_v49  ;;  %9803 = vmatprep.mubr.f32.mxu1 %v9446_v53  ;;  %v15504_v49 = vpack.c.bf16 %v8780_v32, %v8764_v10  ;;  %v8765_v53 = vld [vmem:[#allocation44 + $0x170] sm:$0xff] }
0x217a   : > { %15495 = vmatpush1.bf16.xpose.msra.mxu0 %v15494_v57  ;;  %9873 = vmatprep.mubr.f32.mxu0 %v9448_v59  ;;  %v9363_v38 = vpop.f32.mrb[63].mxu1  ;;  %v9434_v26 = vpop.f32.mrb[89].mxu0  ;;  %v8779_v57 = vld [vmem:[#allocation44 + $0x1e0] sm:$0xff]  ;;  %v8837_v59 = vrot.slane %v18694_v52, %v18258_v22 }
0x217b   : > { %15489 = vmatprep.subr.bf16.mxu1 %v15488_v20  ;;  %15497 = vmatprep.subr.bf16.mxu0 %v15496_v58  ;;  %v9364_v55 = vadd.f32 %v9363_v38, %v8841_v60  ;;  %v9435_v33 = vadd.f32 %v9434_v26, %v8849_v17  ;;  %v8781_v20 = vld [vmem:[#allocation44 + $0x1f0] sm:$0xff]  ;;  %v15506_v58 = vpack.c.bf16 %v8779_v57, %v8763_v24  ;;  %v14211_v24 = vld [vmem:[%s19227_s6 + $0x80] sm:$0xff]  ;;  %v14212_v57 = vld [vmem:[%s19227_s6 + $0x88] sm:$0xff] }
0x217c   : > { %v15514_v38 = vpack.c.bf16 %v8781_v20, %v8765_v53  ;;  %v8845_v26 = vrot.slane %v18694_v52, %v18261_v28  ;;  %v9362_v2 = vadd.f32 %v18704_v27, %v8837_v59  ;;  %v14204_v52 = vld [vmem:[%s19231_s0] ss:$0 sm:$0xff]  ;;  %v14209_v53 = vld [vmem:[%s19227_s6 + $0x70] sm:$0xff]  ;;  %v14210_v20 = vld [vmem:[%s19227_s6 + $0x78] sm:$0xff]  ;;  %s1676_s0 = scalar_lea.vmem [#allocation53], %s18013_s18 }
0x217d   : > { %v9450_v8 = vmax.f32 %v9364_v55, 0.0  ;;  %v9452_v54 = vmax.f32 %v9435_v33, 0.0  ;;  %v15520_v59 = vpack.c.bf16 %v14210_v20, %v14209_v53 }
0x217e   : > { %v9433_v3 = vadd.f32 %v18706_v34, %v8845_v26  ;;  %v9449_v47 = vmax.f32 %v9362_v2, 0.0 }
0x2180   : > { %v9451_v44 = vmax.f32 %v9433_v3, 0.0 }
0x2181   : > { %15491 = vmatpush1.bf16.xpose.msra.mxu1 %v15490_v36 }
0x2182   : > { %15499 = vmatpush1.bf16.xpose.msra.mxu0 %v15498_v14  ;;  %15501 = vmatprep.subr.bf16.mxu1 %v15500_v56 }
0x2183   : > { %15509 = vmatprep.subr.bf16.mxu0 %v15508_v16 }
0x2188   : > { %9804 = vmatmul.mubr.f32.vlgmr.msra.gmra.mrb[68].mxu1 %v9445_v62 }
0x2189   : > { %9874 = vmatmul.mubr.f32.vlgmr.msra.gmra.mrb[94].mxu0 %v9447_v39  ;;  %15503 = vmatpush1.bf16.xpose.msra.mxu1 %v15502_v40 }
0x218a   : > { %9943 = vmatprep.mubr.f32.mxu1 %v9450_v8  ;;  %15511 = vmatpush1.bf16.xpose.msra.mxu0 %v15510_v37  ;;  %v14207_v8 = vld [vmem:[%s19227_s6 + $0x60] sm:$0xff] }
0x218b   : > { %10013 = vmatprep.mubr.f32.mxu0 %v9452_v54  ;;  %15505 = vmatprep.subr.bf16.mxu1 %v15504_v49 }
0x218c   : > { %15513 = vmatprep.subr.bf16.mxu0 %v15512_v50  ;;  %v14208_v50 = vld [vmem:[%s19227_s6 + $0x68] sm:$0xff] }
0x218d   : > { %v15517_v54 = vpack.c.bf16 %v14208_v50, %v14207_v8 }
0x2191   : > { %15507 = vmatpush1.bf16.xpose.msra.mxu1 %v15506_v58  ;;  %v14213_v58 = vld [vmem:[%s19227_s6 + $0x90] sm:$0xff] }
0x2192   : > { %15515 = vmatpush1.bf16.xpose.msra.mxu0 %v15514_v38  ;;  %15516 = vmatprep.subr.bf16.mxu1 %v17247_v0  ;;  %v14214_v38 = vld [vmem:[%s19227_s6 + $0x98] sm:$0xff] }
0x2193   : > { %15522 = vmatprep.subr.bf16.mxu0 %v17247_v0  ;;  %v15526_v26 = vpack.c.bf16 %v14214_v38, %v14213_v58 }
0x2198   : > { %9944 = vmatmul.mubr.f32.vlgmr.msra.gmra.mrb[70].mxu1 %v9449_v47 }
0x2199   : > { %10014 = vmatmul.mubr.f32.vlgmr.msra.gmra.mrb[96].mxu0 %v9451_v44  ;;  %14862 = vmatprep.mubr.msk.f32.mxu1 %vm17248_vm0, %v17249_v1 }
0x219a   : > { %14873 = vmatprep.mubr.msk.f32.mxu0 %vm17248_vm0, %v17249_v1  ;;  %15518 = vmatpush3.bf16.msra.mxu1 %v15517_v54 }
0x219b   : > { %15519 = vmatprep.subr.bf16.mxu1 %v17247_v0 }
0x219e   : > { %15521 = vmatpush3.bf16.msra.mxu1 %v15520_v59 }
0x219f   : > { %15528 = vmatprep.subr.bf16.mxu1 %v17247_v0 }
0x223b   : > { %v9525_v4 = vpop.f32.mrb[64].mxu1  ;;  %v9595_v27 = vpop.f32.mrb[90].mxu0 }
0x223c   : > { %v9526_v9 = vadd.f32 %v14204_v52, %v9525_v4  ;;  %v9527_v11 = vpop.f32.mrb[65].mxu1  ;;  %v9597_v12 = vpop.f32.mrb[91].mxu0  ;;  %v14205_v52 = vld [vmem:[#allocation46] ss:$0 sm:$0xff] }
0x223d   : > { %v14206_v11 = vld [vmem:[#allocation47] ss:$0 sm:$0xff] }
0x223e   : > { %v9596_v36 = vadd.f32 %v9595_v27, %v9526_v9  ;;  %v14215_v27 = vld [vmem:[%s19227_s6 + $0xa0] sm:$0xff]  ;;  %v14216_v9 = vld [vmem:[%s19227_s6 + $0xa8] sm:$0xff] }
0x224b   : > { %v9665_v34 = vpop.f32.mrb[66].mxu1  ;;  %v9735_v13 = vpop.f32.mrb[92].mxu0 }
0x224c   : > { %v9666_v14 = vadd.f32 %v9665_v34, %v9596_v36  ;;  %v9667_v56 = vpop.f32.mrb[67].mxu1  ;;  %v9737_v15 = vpop.f32.mrb[93].mxu0  ;;  %v15529_v36 = vpack.c.bf16 %v14216_v9, %v14215_v27 }
0x224d   : > { %v14219_v15 = vld [vmem:[#allocation29 + $0x3] ss:$0 sm:$0xff] }
0x224e   : > { %v9736_v16 = vadd.f32 %v9735_v13, %v9666_v14  ;;  %v14217_v13 = vld [vmem:[%s19227_s6 + $0xb0] sm:$0xff]  ;;  %v14218_v14 = vld [vmem:[%s19227_s6 + $0xb8] sm:$0xff]  ;;  %s13589_s6 = scalar_lea.sflag [#allocation4], %s18013_s18 }
0x224f   : > { %v15532_v56 = vpack.c.bf16 %v14218_v14, %v14217_v13 }
0x225b   : > { %v9805_v60 = vpop.f32.mrb[68].mxu1 }
0x225c   : > { %v9806_v17 = vadd.f32 %v9805_v60, %v9736_v16  ;;  %v9875_v19 = vpop.f32.mrb[94].mxu0  ;;  %v9807_v21 = vpop.f32.mrb[69].mxu1  ;;  %v14221_v16 = vld [vmem:[#allocation29 + $0x4] ss:$0 sm:$0xff] }
0x225d   : > { %v9877_v29 = vpop.f32.mrb[95].mxu0 }
0x225e   : > { %v9876_v30 = vadd.f32 %v9875_v19, %v9806_v17 }
0x226b   : > { %v9945_v5 = vpop.f32.mrb[70].mxu1 }
0x226c   : > { %v9946_v31 = vadd.f32 %v9945_v5, %v9876_v30  ;;  %v10015_v55 = vpop.f32.mrb[96].mxu0  ;;  %v9947_v10 = vpop.f32.mrb[71].mxu1 }
0x226d   : > { %v10017_v32 = vpop.f32.mrb[97].mxu0 }
0x226e   : > { %v10016_v33 = vadd.f32 %v10015_v55, %v9946_v31  ;;  %v14223_v31 = vld [vmem:[#allocation29 + $0x5] ss:$0 sm:$0xff] }
0x2270   : > { %v10019_v40 = vadd.f32 %v10016_v33, %v18654_v23  ;;  %v15523_v23 = vpack.c.bf16 %v14212_v57, %v14211_v24 }
0x2272   : > { %v10022_v18 = vsel %vm1789_vm2, %v10019_v40, 0.0  ;;  %15524 = vmatpush3.bf16.msra.mxu0 %v15523_v23 }
0x2273   : > { %10023 = vadd.xlane.f32.xlu0 %v10022_v18  ;;  %15525 = vmatprep.subr.bf16.mxu0 %v17247_v0 }
0x2276   : > { %15527 = vmatpush3.bf16.msra.mxu0 %v15526_v26 }
0x2277   : > { %14887 = vmatprep.subr.mxu0 %v17249_v1 }
0x2300   : > { %v10024_v25 = vpop.xlane.xlu0 %10023 }
0x2301   : > { %v10025_v62 = vmul.f32 0.03125, %v10024_v25 }
0x2303   : > { %v10026_v37 = vsub.f32 %v10019_v40, %v10025_v62 }
0x2305   : > { %v10027_v39 = vmul.f32 %v10026_v37, %v10026_v37 }
0x2307   : > { %v10028_v49 = vsel %vm1789_vm2, %v10027_v39, 0.0 }
0x2308   : > { %10029 = vadd.xlane.f32.xlu1 %v10028_v49 }
0x2395   : > { %v10030_v2 = vpop.xlane.xlu1 %10029 }
0x2396   : > { %v10031_v3 = vmul.f32 0.03125, %v10030_v2 }
0x2398   : > { %v10032_v47 = vadd.f32 1e-05, %v10031_v3 }
0x239a   : > { %16132 = vrsqrt.f32 %v10032_v47 }
0x23a4   : > { %v16133_v44 = vpop.eup %16132 }
0x23a5   : > { %v10034_v4 = vmul.f32 %v16133_v44, %v10026_v37 }
0x23a7   : > { %v10041_v12 = vmul.f32 %v14205_v52, %v10034_v4 }
0x23a9   : > { %v18746_v34 = vadd.f32 %v14206_v11, %v10041_v12 }
0x23ab   : > { %14863 = vmatmul.mubr.msk.f32.vlgmr.msra.gmra.mrb[72].mxu1 %vm1789_vm2, %v18746_v34  ;;  %14874 = vmatmul.mubr.msk.f32.vlgmr.msra.gmra.mrb[98].mxu0 %vm1789_vm2, %v18746_v34 }
0x23ac   : > { %15530 = vmatpush3.bf16.msra.mxu1 %v15529_v36  ;;  %14884 = vmatprep.mubr.msk.f32.mxu1 %vm17248_vm0, %v17249_v1 }
0x23ad   : > { %15531 = vmatprep.subr.bf16.mxu1 %v17247_v0  ;;  %14889 = vmatprep.mubr.msk.f32.mxu0 %vm17248_vm0, %v17249_v1 }
0x23b0   : > { %15533 = vmatpush3.bf16.msra.mxu1 %v15532_v56 }
0x23b1   : > { %14897 = vmatprep.subr.mxu1 %v17249_v1 }
0x23b3   : > { %14885 = vmatmul.mubr.msk.f32.vlgmr.msra.gmra.mrb[74].mxu1 %vm1789_vm2, %v18746_v34 }
0x23b4   : > { %14899 = vmatprep.mubr.msk.f32.mxu1 %vm17248_vm0, %v17249_v1 }
0x247e   : > { %v10148_v60 = vpop.f32.mrb[72].mxu1  ;;  %v10224_v17 = vpop.f32.mrb[98].mxu0 }
0x247f   : > { %v10149_v19 = vadd.f32 %v14219_v15, %v10148_v60  ;;  %v10225_v21 = vadd.f32 %v14221_v16, %v10224_v17  ;;  %v14864_v29 = vpop.f32.mrb[73].mxu1  ;;  %v14875_v30 = vpop.f32.mrb[99].mxu0 }
0x2481   : > { %v10304_v5 = vmul.f32 %v10149_v19, %v18119_v35  ;;  %14888 = vmatpush3.xpose.msk.msra.mxu0 %vm1789_vm2, %v10225_v21  ;;  %v10395_v55 = vmul.f32 %v10149_v19, %v18125_v42  ;;  %v10629_v18 = vmul.f32 %v10149_v19, %v18134_v46  ;;  %v10791_v25 = vmul.f32 %v10149_v19, %v18147_v51 }
0x2482   : > { %14892 = vmatprep.subr.mxu0 %v17249_v1 }
0x2484   : > { %14890 = vmatmul.mubr.msk.f32.vlgmr.msra.gmra.mrb[100].mxu0 %vm1789_vm2, %v10304_v5 }
0x2485   : > { %14893 = vmatpush3.xpose.msk.msra.mxu0 %vm1789_vm2, %v10225_v21  ;;  %14894 = vmatprep.mubr.msk.f32.mxu0 %vm17248_vm0, %v17249_v1 }
0x2486   : > { %v10300_v10 = vpop.f32.mrb[74].mxu1  ;;  %14907 = vmatprep.subr.mxu0 %v17249_v1 }
0x2487   : > { %v18773_v32 = vadd.f32 %v14223_v31, %v10300_v10  ;;  %v14886_v33 = vpop.f32.mrb[75].mxu1  ;;  %v10067_v31 = vld [vmem:[#allocation31 + $0x20] sm:$0xff]  ;;  %v10069_v10 = vld [vmem:[#allocation31 + $0x30] sm:$0xff] }
0x2488   : > { %14895 = vmatmul.mubr.msk.f32.vlgmr.msra.gmra.mrb[102].mxu0 %vm1789_vm2, %v10395_v55  ;;  %v10068_v55 = vld [vmem:[#allocation31 + $0x28] sm:$0xff] }
0x2489   : > { %14908 = vmatpush3.xpose.msk.msra.mxu0 %vm1789_vm2, %v10225_v21  ;;  %v10482_v40 = vmul.f32 %v18773_v32, %v18125_v42  ;;  %14909 = vmatprep.mubr.msk.f32.mxu0 %vm17248_vm0, %v17249_v1  ;;  %v15535_v33 = vpack.c.bf16 %v10068_v55, %v10067_v31 }
0x248a   : > { %14917 = vmatprep.subr.mxu0 %v17249_v1 }
0x248b   : > { %14898 = vmatpush3.msra.mxu1 %v10482_v40  ;;  %v10070_v40 = vld [vmem:[#allocation31 + $0x38] sm:$0xff] }
0x248c   : > { %14910 = vmatmul.mubr.msk.f32.vlgmr.msra.gmra.mrb[104].mxu0 %vm1789_vm2, %v10629_v18  ;;  %14902 = vmatprep.subr.mxu1 %v17249_v1  ;;  %v15538_v18 = vpack.c.bf16 %v10070_v40, %v10069_v10 }
0x248d   : > { %14918 = vmatpush3.xpose.msk.msra.mxu0 %vm1789_vm2, %v10225_v21  ;;  %14919 = vmatprep.mubr.msk.f32.mxu0 %vm17248_vm0, %v17249_v1 }
0x248e   : > { %15534 = vmatprep.subr.bf16.mxu0 %v17247_v0 }
0x2490   : > { %14920 = vmatmul.mubr.msk.f32.vlgmr.msra.gmra.mrb[106].mxu0 %vm1789_vm2, %v10791_v25 }
0x2491   : > { %14935 = vmatprep.mubr.msk.f32.mxu0 %vm17248_vm0, %v17249_v1  ;;  %15536 = vmatpush3.bf16.msra.mxu0 %v15535_v33 }
0x2492   : > { %15537 = vmatprep.subr.bf16.mxu0 %v17247_v0 }
0x2495   : > { %15539 = vmatpush3.bf16.msra.mxu0 %v15538_v18  ;;  %v14239_v18 = vld [vmem:[#allocation34 + $0x1] ss:$0 sm:$0xff] }
0x2496   : > { %15546 = vmatprep.subr.bf16.mxu0 %v17247_v0 }
0x2557   : > { %v10377_v62 = vpop.f32.mrb[100].mxu0 }
0x2558   : > { %v10381_v37 = vmul.f32 0.35355338, %v10377_v62  ;;  %v14891_v39 = vpop.f32.mrb[101].mxu0 }
0x255a   : > { %v10382_v49 = vadd.f32 %v10381_v37, %v18162_v61 }
0x255b   : > { %v10465_v8 = vpop.f32.mrb[102].mxu0 }
0x255c   : > { %v10469_v50 = vmul.f32 0.35355338, %v10465_v8  ;;  %v14896_v54 = vpop.f32.mrb[103].mxu0  ;;  %v10383_v24 = vsel %vm2104_vm14, %v10382_v49, -inf  ;;  %v10394_v8 = vmul.f32 %v18773_v32, %v18119_v35 }
0x255d   : > { %10384 = vmax.xlane.f32.xlu1 %v10383_v24 }
0x255e   : > { %v10470_v57 = vadd.f32 %v10469_v50, %v18162_v61 }
0x255f   : > { %v10699_v23 = vpop.f32.mrb[104].mxu0 }
0x2560   : > { %v10703_v53 = vmul.f32 0.35355338, %v10699_v23  ;;  %v14911_v20 = vpop.f32.mrb[105].mxu0  ;;  %v10471_v58 = vsel %vm2104_vm14, %v10470_v57, -inf }
0x2561   : > { %10472 = vmax.xlane.f32.xlu0 %v10471_v58  ;;  %v10878_v20 = vmul.f32 %v18773_v32, %v18147_v51 }
0x2562   : > { %v10704_v59 = vadd.f32 %v10703_v53, %v18162_v61 }
0x2563   : > { %v10861_v38 = vpop.f32.mrb[106].mxu0 }
0x2564   : > { %v10865_v26 = vmul.f32 0.35355338, %v10861_v38  ;;  %v14921_v2 = vpop.f32.mrb[107].mxu0  ;;  %v10705_v3 = vsel %vm2104_vm14, %v10704_v59, -inf  ;;  %v11069_v38 = vld [vmem:[#allocation37 + $0x80] sm:$0xff] }
0x2565   : > { %10706 = vmax.xlane.f32.xlu0 %v10705_v3  ;;  %v11071_v3 = vld [vmem:[#allocation37 + $0x90] sm:$0xff] }
0x2566   : > { %v10866_v47 = vadd.f32 %v10865_v26, %v18162_v61  ;;  %v11070_v26 = vld [vmem:[#allocation37 + $0x88] sm:$0xff] }
0x2567   : > { %v15547_v2 = vpack.c.bf16 %v11070_v26, %v11069_v38  ;;  %v14249_v38 = vld [vmem:[%s19228_s3 + $0x5] ss:$0 sm:$0xff] }
0x2568   : > { %v10867_v44 = vsel %vm2104_vm14, %v10866_v47, -inf }
0x2569   : > { %10868 = vmax.xlane.f32.xlu1 %v10867_v44 }
0x25ea   : > { %v10385_v52 = vpop.xlane.xlu1 %10384 }
0x25eb   : > { %v10386_v4 = vsub.f32 %v10382_v49, %v10385_v52 }
0x25ed   : > { %v10387_v27 = vmul.f32 1.442695, %v10386_v4  ;;  %v14237_v4 = vld [vmem:[#allocation32 + $0x1] ss:$0 sm:$0xff] }
0x25ee   : > { %v10473_v9 = vpop.xlane.xlu0 %10472 }
0x25ef   : > { %16134 = vpow2.f32 %v10387_v27  ;;  %v10474_v11 = vsub.f32 %v10470_v57, %v10473_v9  ;;  %v10716_v57 = vmul.f32 %v18773_v32, %v18134_v46  ;;  %v11072_v32 = vld [vmem:[#allocation37 + $0x98] sm:$0xff] }
0x25f0   : > { %v15550_v52 = vpack.c.bf16 %v11072_v32, %v11071_v3 }
0x25f1   : > { %v10475_v12 = vmul.f32 1.442695, %v10474_v11 }
0x25f2   : > { %v10707_v36 = vpop.xlane.xlu0 %10706 }
0x25f3   : > { %16136 = vpow2.f32 %v10475_v12  ;;  %v10708_v13 = vsub.f32 %v10704_v59, %v10707_v36 }
0x25f5   : > { %v10709_v14 = vmul.f32 1.442695, %v10708_v13  ;;  %v14247_v13 = vld [vmem:[%s19228_s3 + $0x4] ss:$0 sm:$0xff] }
0x25f6   : > { %v10869_v56 = vpop.xlane.xlu1 %10868 }
0x25f7   : > { %16138 = vpow2.f32 %v10709_v14  ;;  %v10870_v15 = vsub.f32 %v10866_v47, %v10869_v56 }
0x25f9   : > { %v16135_v16 = vpop.eup %16134  ;;  %v10871_v60 = vmul.f32 1.442695, %v10870_v15 }
0x25fa   : > { %v10389_v61 = vsel %vm2104_vm14, %v16135_v16, 0.0 }
0x25fb   : > { %16140 = vpow2.f32 %v10871_v60  ;;  %10390 = vadd.xlane.f32.xlu1 %v10389_v61 }
0x25fd   : > { %v16137_v17 = vpop.eup %16136 }
0x25fe   : > { %v10477_v19 = vsel %vm2104_vm14, %v16137_v17, 0.0 }
0x25ff   : > { %10478 = vadd.xlane.f32.xlu0 %v10477_v19 }
0x2601   : > { %v16139_v21 = vpop.eup %16138 }
0x2602   : > { %v10711_v29 = vsel %vm2104_vm14, %v16139_v21, 0.0 }
0x2603   : > { %10712 = vadd.xlane.f32.xlu0 %v10711_v29 }
0x2605   : > { %v16141_v30 = vpop.eup %16140 }
0x2606   : > { %v10873_v5 = vsel %vm2104_vm14, %v16141_v30, 0.0 }
0x2607   : > { %10874 = vadd.xlane.f32.xlu1 %v10873_v5  ;;  %v11068_v5 = vld [vmem:[#allocation37 + $0x78] sm:$0xff] }
0x2688   : > { %v10391_v62 = vpop.xlane.xlu1 %10390 }
0x268c   : > { %v10479_v25 = vpop.xlane.xlu0 %10478 }
0x268d   : > { %16142 = vrcp.f32 %v10479_v25 }
0x268e   : > { %16144 = vrcp.f32 %v10391_v62  ;;  %v11073_v62 = vld [vmem:[#allocation37 + $0xa0] sm:$0xff] }
0x2690   : > { %v10713_v49 = vpop.xlane.xlu0 %10712 }
0x2691   : > { %16146 = vrcp.f32 %v10713_v49 }
0x2694   : > { %v10875_v24 = vpop.xlane.xlu1 %10874 }
0x2695   : > { %16148 = vrcp.f32 %v10875_v24  ;;  %v11076_v24 = vld [vmem:[#allocation37 + $0xb8] sm:$0xff] }
0x2697   : > { %v16143_v37 = vpop.eup %16142 }
0x2698   : > { %v10481_v39 = vmul.f32 %v16143_v37, %v16137_v17  ;;  %v16145_v50 = vpop.eup %16144  ;;  %v11074_v37 = vld [vmem:[#allocation37 + $0xa8] sm:$0xff] }
0x2699   : > { %v10393_v54 = vmul.f32 %v16145_v50, %v16135_v16 }
0x269a   : > { %14900 = vmatmul.mubr.msk.f32.vlgmr.msra.gmra.mrb[76].mxu1 %vm2104_vm14, %v10481_v39  ;;  %v14240_v39 = vld [vmem:[#allocation35 + $0x1] ss:$0 sm:$0xff] }
0x269b   : > { %14903 = vmatpush3.msra.mxu1 %v10394_v8  ;;  %14904 = vmatprep.mubr.msk.f32.mxu1 %vm17248_vm0, %v17249_v1  ;;  %v16147_v23 = vpop.eup %16146  ;;  %v15553_v8 = vpack.c.bf16 %v11074_v37, %v11073_v62 }
0x269c   : > { %14912 = vmatprep.subr.mxu1 %v17249_v1  ;;  %v10715_v53 = vmul.f32 %v16147_v23, %v16139_v21  ;;  %v11066_v21 = vld [vmem:[#allocation37 + $0x68] sm:$0xff]  ;;  %v14245_v23 = vld [vmem:[%s19228_s3 + $0x3] ss:$0 sm:$0xff]  ;;  %s13601_s3 = sshll.u32 %s1676_s0, 4  ;;  %s19012_s3 = int_to_ptr.vmem [resolvable:$true] %s13601_s3 }
0x269d   : > { %p17043_p13 = scmp.lt.s32.totalorder %s19012_s3, %s17041_s9 }
0x269f   : > { %v16149_v58 = vpop.eup %16148 }
0x26a0   : > { %v10877_v59 = vmul.f32 %v16149_v58, %v16141_v30  ;;  %v11067_v30 = vld [vmem:[#allocation37 + $0x70] sm:$0xff] }
0x26a1   : > { %v15544_v31 = vpack.c.bf16 %v11068_v5, %v11067_v30 }
0x26a2   : > { %14905 = vmatmul.mubr.msk.f32.vlgmr.msra.gmra.mrb[76].mxu1 %vm2104_vm14, %v10393_v54  ;;  %v11075_v54 = vld [vmem:[#allocation37 + $0xb0] sm:$0xff] }
0x26a3   : > { %14913 = vmatpush3.msra.mxu1 %v10716_v57  ;;  %14914 = vmatprep.mubr.msk.f32.mxu1 %vm17248_vm0, %v17249_v1  ;;  %v15556_v57 = vpack.c.bf16 %v11076_v24, %v11075_v54 }
0x26a4   : > { %14922 = vmatprep.subr.mxu1 %v17249_v1 }
0x26aa   : > { %14915 = vmatmul.mubr.msk.f32.vlgmr.msra.gmra.mrb[76].mxu1 %vm2104_vm14, %v10715_v53 }
0x26ab   : > { %14923 = vmatpush3.msra.mxu1 %v10878_v20  ;;  %14924 = vmatprep.mubr.msk.f32.mxu1 %vm17248_vm0, %v17249_v1 }
0x26ac   : > { %15540 = vmatprep.subr.bf16.mxu1 %v17247_v0 }
0x26b2   : > { %14925 = vmatmul.mubr.msk.f32.vlgmr.msra.gmra.mrb[76].mxu1 %vm2104_vm14, %v10877_v59 }
0x26b3   : > { %14946 = vmatprep.mubr.msk.f32.mxu1 %vm17248_vm0, %v17249_v1 }
0x2785   : > { %v10948_v47 = vpop.f32.mrb[76].mxu1 }
0x2786   : > { %v14926_v44 = vpop.f32.mrb[77].mxu1  ;;  %14936 = vmatmul.mubr.msk.f32.vlgmr.msra.gmra.mrb[108].mxu0 %vm1789_vm2, %v10948_v47 }
0x2787   : > { %15548 = vmatpush3.bf16.msra.mxu0 %v15547_v2  ;;  %14957 = vmatprep.mubr.msk.f32.mxu0 %vm17248_vm0, %v17249_v1 }
0x2788   : > { %15549 = vmatprep.subr.bf16.mxu0 %v17247_v0 }
0x278b   : > { %15551 = vmatpush3.bf16.msra.mxu0 %v15550_v52 }
0x278c   : > { %14971 = vmatprep.subr.mxu0 %v17249_v1 }
0x278e   : > { %14958 = vmatmul.mubr.msk.f32.vlgmr.msra.gmra.mrb[110].mxu0 %vm1789_vm2, %v18567_v63 }
0x278f   : > { %14973 = vmatprep.mubr.msk.f32.mxu0 %vm17248_vm0, %v17249_v1 }
0x2859   : > { %v11028_v27 = vpop.f32.mrb[108].mxu0 }
0x285a   : > { %v11029_v9 = vadd.f32 %v14237_v4, %v11028_v27  ;;  %v14937_v11 = vpop.f32.mrb[109].mxu0 }
0x285c   : > { %v11032_v12 = vadd.f32 %v11029_v9, %v18746_v34  ;;  %v11065_v34 = vld [vmem:[#allocation37 + $0x60] sm:$0xff] }
0x285d   : > { %v15541_v29 = vpack.c.bf16 %v11066_v21, %v11065_v34 }
0x285e   : > { %v11037_v36 = vsel %vm1789_vm2, %v11032_v12, 0.0 }
0x285f   : > { %11038 = vadd.xlane.f32.xlu0 %v11037_v36  ;;  %15542 = vmatpush3.bf16.msra.mxu1 %v15541_v29 }
0x2860   : > { %15543 = vmatprep.subr.bf16.mxu1 %v17247_v0 }
0x2861   : > { %v11239_v14 = vpop.f32.mrb[110].mxu0 }
0x2862   : > { %v18840_v56 = vadd.f32 %v14247_v13, %v11239_v14  ;;  %v14959_v15 = vpop.f32.mrb[111].mxu0 }
0x2863   : > { %15545 = vmatpush3.bf16.msra.mxu1 %v15544_v31 }
0x2864   : > { %14972 = vmatpush3.xpose.msk.msra.mxu0 %vm1789_vm2, %v18840_v56  ;;  %15552 = vmatprep.subr.bf16.mxu1 %v17247_v0 }
0x2865   : > { %14976 = vmatprep.subr.mxu0 %v17249_v1 }
0x28ec   : > { %v11039_v16 = vpop.xlane.xlu0 %11038 }
0x28ed   : > { %v11040_v60 = vmul.f32 0.03125, %v11039_v16 }
0x28ef   : > { %v11041_v61 = vsub.f32 %v11032_v12, %v11040_v60 }
0x28f1   : > { %v11042_v17 = vmul.f32 %v11041_v61, %v11041_v61 }
0x28f3   : > { %v11043_v19 = vsel %vm1789_vm2, %v11042_v17, 0.0 }
0x28f4   : > { %11044 = vadd.xlane.f32.xlu1 %v11043_v19 }
0x2981   : > { %v11045_v55 = vpop.xlane.xlu1 %11044 }
0x2982   : > { %v11046_v10 = vmul.f32 0.03125, %v11045_v55 }
0x2984   : > { %v11047_v33 = vadd.f32 1e-05, %v11046_v10 }
0x2986   : > { %16150 = vrsqrt.f32 %v11047_v33 }
0x2990   : > { %v16151_v40 = vpop.eup %16150 }
0x2991   : > { %v11049_v25 = vmul.f32 %v16151_v40, %v11041_v61 }
0x2993   : > { %v11056_v49 = vmul.f32 %v14239_v18, %v11049_v25 }
0x2995   : > { %v18848_v50 = vadd.f32 %v14240_v39, %v11056_v49 }
0x2997   : > { %14947 = vmatmul.mubr.msk.f32.vlgmr.msra.gmra.mrb[78].mxu1 %vm1789_vm2, %v18848_v50 }
0x2998   : > { %15554 = vmatpush3.bf16.msra.mxu1 %v15553_v8  ;;  %14968 = vmatprep.mubr.msk.f32.mxu1 %vm17248_vm0, %v17249_v1 }
0x2999   : > { %15555 = vmatprep.subr.bf16.mxu1 %v17247_v0 }
0x299c   : > { %15557 = vmatpush3.bf16.msra.mxu1 %v15556_v57  ;;  %v11082_v57 = vld [vmem:[#allocation38 + $0x20] sm:$0xff] }
0x299d   : > { %14981 = vmatprep.subr.mxu1 %v17249_v1 }
0x299f   : > { %14969 = vmatmul.mubr.msk.f32.vlgmr.msra.gmra.mrb[80].mxu1 %vm1789_vm2, %v18567_v63 }
0x29a0   : > { %14983 = vmatprep.mubr.msk.f32.mxu1 %vm17248_vm0, %v17249_v1 }
0x2a6a   : > { %v11163_v53 = vpop.f32.mrb[78].mxu1 }
0x2a6b   : > { %v11164_v20 = vadd.f32 %v14245_v23, %v11163_v53  ;;  %v14948_v58 = vpop.f32.mrb[79].mxu1  ;;  %v11083_v23 = vld [vmem:[#allocation38 + $0x28] sm:$0xff]  ;;  %v11084_v53 = vld [vmem:[#allocation38 + $0x30] sm:$0xff] }
0x2a6c   : > { %v11085_v58 = vld [vmem:[#allocation38 + $0x38] sm:$0xff] }
0x2a6d   : > { %v11319_v59 = vmul.f32 %v11164_v20, %v18119_v35  ;;  %v11409_v63 = vmul.f32 %v11164_v20, %v18125_v42  ;;  %v11642_v32 = vmul.f32 %v11164_v20, %v18134_v46  ;;  %v11803_v44 = vmul.f32 %v11164_v20, %v18147_v51 }
0x2a6e   : > { %v15559_v20 = vpack.c.bf16 %v11083_v23, %v11082_v57  ;;  %v12110_v23 = vld [vmem:[#allocation43 + $0x310] sm:$0xff] }
0x2a6f   : > { %14974 = vmatmul.mubr.msk.f32.vlgmr.msra.gmra.mrb[112].mxu0 %vm1789_vm2, %v11319_v59  ;;  %v15562_v59 = vpack.c.bf16 %v11085_v58, %v11084_v53  ;;  %v12126_v53 = vld [vmem:[#allocation43 + $0x390] sm:$0xff]  ;;  %v12081_v58 = vld [vmem:[#allocation43 + $0x228] sm:$0xff] }
0x2a70   : > { %14977 = vmatpush3.xpose.msk.msra.mxu0 %vm1789_vm2, %v18840_v56  ;;  %14978 = vmatprep.mubr.msk.f32.mxu0 %vm17248_vm0, %v17249_v1 }
0x2a71   : > { %14991 = vmatprep.subr.mxu0 %v17249_v1 }
0x2a72   : > { %v11315_v26 = vpop.f32.mrb[80].mxu1 }
0x2a73   : > { %v18870_v2 = vadd.f32 %v14249_v38, %v11315_v26  ;;  %v14970_v3 = vpop.f32.mrb[81].mxu1  ;;  %14979 = vmatmul.mubr.msk.f32.vlgmr.msra.gmra.mrb[114].mxu0 %vm1789_vm2, %v11409_v63 }
0x2a74   : > { %14992 = vmatpush3.xpose.msk.msra.mxu0 %vm1789_vm2, %v18840_v56  ;;  %14993 = vmatprep.mubr.msk.f32.mxu0 %vm17248_vm0, %v17249_v1 }
0x2a75   : > { %v11495_v47 = vmul.f32 %v18870_v2, %v18125_v42  ;;  %15001 = vmatprep.subr.mxu0 %v17249_v1 }
0x2a77   : > { %14982 = vmatpush3.msra.mxu1 %v11495_v47  ;;  %14994 = vmatmul.mubr.msk.f32.vlgmr.msra.gmra.mrb[116].mxu0 %vm1789_vm2, %v11642_v32  ;;  %v11408_v47 = vmul.f32 %v18870_v2, %v18119_v35 }
0x2a78   : > { %15002 = vmatpush3.xpose.msk.msra.mxu0 %vm1789_vm2, %v18840_v56  ;;  %15003 = vmatprep.mubr.msk.f32.mxu0 %vm17248_vm0, %v17249_v1 }
0x2a79   : > { %14986 = vmatprep.subr.mxu1 %v17249_v1  ;;  %15558 = vmatprep.subr.bf16.mxu0 %v17247_v0 }
0x2a7b   : > { %15004 = vmatmul.mubr.msk.f32.vlgmr.msra.gmra.mrb[118].mxu0 %vm1789_vm2, %v11803_v44 }
0x2a7c   : > { %15019 = vmatprep.mubr.msk.f32.mxu0 %vm17248_vm0, %v17249_v1  ;;  %15560 = vmatpush3.bf16.msra.mxu0 %v15559_v20  ;;  %v15578_v20 = vpack.c.bf16 %v12126_v53, %v12110_v23 }
0x2a7d   : > { %15561 = vmatprep.subr.bf16.mxu0 %v17247_v0 }
0x2a80   : > { %15563 = vmatpush3.bf16.msra.mxu0 %v15562_v59  ;;  %v12097_v59 = vld [vmem:[#allocation43 + $0x2a8] sm:$0xff] }
0x2b42   : > { %v11392_v42 = vpop.f32.mrb[112].mxu0 }
0x2b43   : > { %v11396_v52 = vmul.f32 0.35355338, %v11392_v42  ;;  %v14975_v4 = vpop.f32.mrb[113].mxu0 }
0x2b44   : > { %v11728_v4 = vmul.f32 %v18870_v2, %v18134_v46 }
0x2b45   : > { %v11397_v27 = vsel %vm2104_vm14, %v11396_v52, -inf }
0x2b46   : > { %11398 = vmax.xlane.f32.xlu1 %v11397_v27  ;;  %v11479_v9 = vpop.f32.mrb[114].mxu0 }
0x2b47   : > { %v11483_v11 = vmul.f32 0.35355338, %v11479_v9  ;;  %v14980_v12 = vpop.f32.mrb[115].mxu0  ;;  %v11889_v9 = vmul.f32 %v18870_v2, %v18147_v51 }
0x2b49   : > { %v11484_v36 = vsel %vm2104_vm14, %v11483_v11, -inf }
0x2b4a   : > { %11485 = vmax.xlane.f32.xlu0 %v11484_v36  ;;  %v11712_v13 = vpop.f32.mrb[116].mxu0 }
0x2b4b   : > { %v11716_v14 = vmul.f32 0.35355338, %v11712_v13  ;;  %v14995_v56 = vpop.f32.mrb[117].mxu0  ;;  %v14263_v13 = vld [vmem:[%s19229_s8 + $0x1] ss:$0 sm:$0xff]  ;;  %s17036_s8 = scalar_lea.vmem %s19012_s3, 16 }
0x2b4c   : > { %p17037_p8 = scmp.ne.s32.totalorder %s19012_s3, %s17036_s8  ;;  %p17044_p1 = scmp.lt.s32.totalorder %s17042_s10, %s17036_s8 }
0x2b4d   : > { %v11717_v15 = vsel %vm2104_vm14, %v11716_v14, -inf }
0x2b4e   : > { %11718 = vmax.xlane.f32.xlu0 %v11717_v15  ;;  %v11873_v16 = vpop.f32.mrb[118].mxu0  ;;  %p17038_p10 = pnand %p17037_p8, %p19236_p9  ;;  %p17045_p3 = por %p17044_p1, %p17043_p13 }
0x2b4f   : > { %v11877_v60 = vmul.f32 0.35355338, %v11873_v16  ;;  %v15005_v61 = vpop.f32.mrb[119].mxu0 }
0x2b50   : > { %p17039_p11 = pneg %p17038_p10 }
0x2b51   : > { %v11878_v17 = vsel %vm2104_vm14, %v11877_v60, -inf }
0x2b52   : > { %11879 = vmax.xlane.f32.xlu1 %v11878_v17  ;;  %p17046_p7 = pnand %p17045_p3, %p17039_p11 }
0x2bd3   : > { %v11399_v19 = vpop.xlane.xlu1 %11398 }
0x2bd4   : > { %v11400_v34 = vsub.f32 %v11396_v52, %v11399_v19 }
0x2bd6   : > { %v11401_v21 = vmul.f32 1.442695, %v11400_v34  ;;  %v12077_v34 = vld [vmem:[#allocation43 + $0x208] sm:$0xff] }
0x2bd7   : > { %v11486_v29 = vpop.xlane.xlu0 %11485 }
0x2bd8   : > { %16152 = vpow2.f32 %v11401_v21  ;;  %v11487_v30 = vsub.f32 %v11483_v11, %v11486_v29  ;;  %v12093_v21 = vld [vmem:[#allocation43 + $0x288] sm:$0xff]  ;;  %v12079_v29 = vld [vmem:[#allocation43 + $0x218] sm:$0xff] }
0x2bda   : > { %v11488_v5 = vmul.f32 1.442695, %v11487_v30  ;;  %v15564_v30 = vpack.c.bf16 %v12093_v21, %v12077_v34  ;;  %v12114_v34 = vld [vmem:[#allocation43 + $0x330] sm:$0xff] }
0x2bdb   : > { %v11719_v31 = vpop.xlane.xlu0 %11718  ;;  %v12130_v21 = vld [vmem:[#allocation43 + $0x3b0] sm:$0xff] }
0x2bdc   : > { %16154 = vpow2.f32 %v11488_v5  ;;  %v11720_v55 = vsub.f32 %v11716_v14, %v11719_v31  ;;  %v12095_v5 = vld [vmem:[#allocation43 + $0x298] sm:$0xff]  ;;  %v12076_v31 = vld [vmem:[#allocation43 + $0x200] sm:$0xff] }
0x2bde   : > { %v11721_v10 = vmul.f32 1.442695, %v11720_v55  ;;  %v12092_v55 = vld [vmem:[#allocation43 + $0x280] sm:$0xff] }
0x2bdf   : > { %v11880_v33 = vpop.xlane.xlu1 %11879 }
0x2be0   : > { %16156 = vpow2.f32 %v11721_v10  ;;  %v11881_v40 = vsub.f32 %v11877_v60, %v11880_v33  ;;  %v15572_v10 = vpack.c.bf16 %v12095_v5, %v12079_v29  ;;  %v15566_v33 = vpack.c.bf16 %v12092_v55, %v12076_v31  ;;  %v12085_v29 = vld [vmem:[#allocation43 + $0x248] sm:$0xff]  ;;  %v12103_v5 = vld [vmem:[#allocation43 + $0x2d8] sm:$0xff] }
0x2be1   : > { %v15594_v55 = vpack.c.bf16 %v12130_v21, %v12114_v34  ;;  %v12163_v34 = vld [vmem:[#allocation44 + $0x298] sm:$0xff] }
0x2be2   : > { %v16153_v18 = vpop.eup %16152  ;;  %v11882_v25 = vmul.f32 1.442695, %v11881_v40  ;;  %v12094_v40 = vld [vmem:[#allocation43 + $0x290] sm:$0xff]  ;;  %15573 = vmatprep.subr.bf16.mxu0 %v15572_v10  ;;  %v12084_v10 = vld [vmem:[#allocation43 + $0x240] sm:$0xff] }
0x2be3   : > { %v11403_v62 = vsel %vm2104_vm14, %v16153_v18, 0.0 }
0x2be4   : > { %16158 = vpow2.f32 %v11882_v25  ;;  %11404 = vadd.xlane.f32.xlu1 %v11403_v62  ;;  %v12109_v25 = vld [vmem:[#allocation43 + $0x308] sm:$0xff] }
0x2be5   : > { %v12125_v62 = vld [vmem:[#allocation43 + $0x388] sm:$0xff] }
0x2be6   : > { %v16155_v37 = vpop.eup %16154 }
0x2be7   : > { %v11490_v39 = vsel %vm2104_vm14, %v16155_v37, 0.0 }
0x2be8   : > { %11491 = vadd.xlane.f32.xlu0 %v11490_v39  ;;  %v15568_v39 = vpack.c.bf16 %v12125_v62, %v12109_v25  ;;  %v12102_v25 = vld [vmem:[#allocation43 + $0x2d0] sm:$0xff]  ;;  %v12117_v62 = vld [vmem:[#allocation43 + $0x348] sm:$0xff] }
0x2bea   : > { %v16157_v49 = vpop.eup %16156 }
0x2beb   : > { %v11723_v8 = vsel %vm2104_vm14, %v16157_v49, 0.0 }
0x2bec   : > { %11724 = vadd.xlane.f32.xlu0 %v11723_v8  ;;  %v12108_v8 = vld [vmem:[#allocation43 + $0x300] sm:$0xff] }
0x2bee   : > { %v16159_v54 = vpop.eup %16158 }
0x2bef   : > { %v11884_v24 = vsel %vm2104_vm14, %v16159_v54, 0.0 }
0x2bf0   : > { %11885 = vadd.xlane.f32.xlu1 %v11884_v24 }
0x2c71   : > { %v11405_v63 = vpop.xlane.xlu1 %11404 }
0x2c75   : > { %v11492_v38 = vpop.xlane.xlu0 %11491 }
0x2c76   : > { %16160 = vrcp.f32 %v11492_v38  ;;  %v12083_v38 = vld [vmem:[#allocation43 + $0x238] sm:$0xff] }
0x2c77   : > { %16162 = vrcp.f32 %v11405_v63  ;;  %v15580_v63 = vpack.c.bf16 %v12097_v59, %v12081_v58  ;;  %v12134_v58 = vld [vmem:[#allocation43 + $0x3d0] sm:$0xff]  ;;  %v12089_v59 = vld [vmem:[#allocation43 + $0x268] sm:$0xff] }
0x2c79   : > { %v11725_v32 = vpop.xlane.xlu0 %11724 }
0x2c7a   : > { %16164 = vrcp.f32 %v11725_v32 }
0x2c7d   : > { %v11886_v52 = vpop.xlane.xlu1 %11885 }
0x2c7e   : > { %16166 = vrcp.f32 %v11886_v52 }
0x2c80   : > { %v16161_v26 = vpop.eup %16160 }
0x2c81   : > { %v11494_v3 = vmul.f32 %v16161_v26, %v16155_v37  ;;  %v16163_v44 = vpop.eup %16162  ;;  %v12111_v37 = vld [vmem:[#allocation43 + $0x318] sm:$0xff] }
0x2c82   : > { %v11407_v42 = vmul.f32 %v16163_v44, %v16153_v18  ;;  %v12099_v26 = vld [vmem:[#allocation43 + $0x2b8] sm:$0xff] }
0x2c83   : > { %14984 = vmatmul.mubr.msk.f32.vlgmr.msra.gmra.mrb[82].mxu1 %vm2104_vm14, %v11494_v3  ;;  %v15588_v3 = vpack.c.bf16 %v12099_v26, %v12083_v38  ;;  %v12105_v38 = vld [vmem:[#allocation43 + $0x2e8] sm:$0xff]  ;;  %v12107_v26 = vld [vmem:[#allocation43 + $0x2f8] sm:$0xff] }
0x2c84   : > { %14987 = vmatpush3.msra.mxu1 %v11408_v47  ;;  %14988 = vmatprep.mubr.msk.f32.mxu1 %vm17248_vm0, %v17249_v1  ;;  %v16165_v35 = vpop.eup %16164 }
0x2c85   : > { %14996 = vmatprep.subr.mxu1 %v17249_v1  ;;  %v11727_v27 = vmul.f32 %v16165_v35, %v16157_v49  ;;  %v12127_v49 = vld [vmem:[#allocation43 + $0x398] sm:$0xff]  ;;  %v12080_v35 = vld [vmem:[#allocation43 + $0x220] sm:$0xff] }
0x2c86   : > { %v15576_v24 = vpack.c.bf16 %v12127_v49, %v12111_v37  ;;  %v12133_v37 = vld [vmem:[#allocation43 + $0x3c8] sm:$0xff]  ;;  %v12135_v49 = vld [vmem:[#allocation43 + $0x3d8] sm:$0xff] }
0x2c87   : > { %v15600_v23 = vpack.c.bf16 %v12133_v37, %v12117_v62 }
0x2c88   : > { %v16167_v46 = vpop.eup %16166 }
0x2c89   : > { %v11888_v11 = vmul.f32 %v16167_v46, %v16159_v54  ;;  %v12124_v54 = vld [vmem:[#allocation43 + $0x380] sm:$0xff]  ;;  %v12082_v46 = vld [vmem:[#allocation43 + $0x230] sm:$0xff] }
0x2c8a   : > { %v15570_v57 = vpack.c.bf16 %v12124_v54, %v12108_v8 }
0x2c8b   : > { %14989 = vmatmul.mubr.msk.f32.vlgmr.msra.gmra.mrb[82].mxu1 %vm2104_vm14, %v11407_v42  ;;  %v14265_v42 = vld [vmem:[#allocation40 + $0x1] ss:$0 sm:$0xff] }
0x2c8c   : > { %14997 = vmatpush3.msra.mxu1 %v11728_v4  ;;  %14998 = vmatprep.mubr.msk.f32.mxu1 %vm17248_vm0, %v17249_v1  ;;  %v14266_v4 = vld [vmem:[#allocation41 + $0x1] ss:$0 sm:$0xff] }
0x2c8d   : > { %15006 = vmatprep.subr.mxu1 %v17249_v1 }
0x2c93   : > { %14999 = vmatmul.mubr.msk.f32.vlgmr.msra.gmra.mrb[82].mxu1 %vm2104_vm14, %v11727_v27  ;;  %v12096_v27 = vld [vmem:[#allocation43 + $0x2a0] sm:$0xff] }
0x2c94   : > { %15007 = vmatpush3.msra.mxu1 %v11889_v9  ;;  %15008 = vmatprep.mubr.msk.f32.mxu1 %vm17248_vm0, %v17249_v1 }
0x2c95   : > { %15565 = vmatprep.subr.bf16.mxu1 %v15564_v30  ;;  %v12101_v30 = vld [vmem:[#allocation43 + $0x2c8] sm:$0xff] }
0x2c9b   : > { %15009 = vmatmul.mubr.msk.f32.vlgmr.msra.gmra.mrb[82].mxu1 %vm2104_vm14, %v11888_v11  ;;  %v12098_v11 = vld [vmem:[#allocation43 + $0x2b0] sm:$0xff] }
0x2c9c   : > { %12359 = vmatprep.mubr.f32.mxu1 %v17249_v1  ;;  %15567 = vmatpush1.bf16.msra.mxu1 %v15566_v33  ;;  %v12100_v33 = vld [vmem:[#allocation43 + $0x2c0] sm:$0xff] }
0x2c9d   : > { %15569 = vmatprep.subr.bf16.mxu1 %v15568_v39  ;;  %v12119_v39 = vld [vmem:[#allocation43 + $0x358] sm:$0xff]  ;;  %v15598_v8 = vpack.c.bf16 %v12100_v33, %v12084_v10  ;;  %v12162_v10 = vld [vmem:[#allocation44 + $0x290] sm:$0xff]  ;;  %v12177_v33 = vld [vmem:[#allocation44 + $0x308] sm:$0xff] }
0x2c9e   : > { %v15608_v53 = vpack.c.bf16 %v12135_v49, %v12119_v39  ;;  %v12176_v49 = vld [vmem:[#allocation44 + $0x300] sm:$0xff] }
0x2ca0   : > { %15571 = vmatpush1.bf16.msra.mxu1 %v15570_v57  ;;  %v12132_v57 = vld [vmem:[#allocation43 + $0x3c0] sm:$0xff] }
0x2ca1   : > { %15581 = vmatprep.subr.bf16.mxu1 %v15580_v63  ;;  %v12091_v63 = vld [vmem:[#allocation43 + $0x278] sm:$0xff] }
0x2d6e   : > { %v11959_v12 = vpop.f32.mrb[82].mxu1 }
0x2d6f   : > { %v15010_v36 = vpop.f32.mrb[83].mxu1  ;;  %15020 = vmatmul.mubr.msk.f32.vlgmr.msra.gmra.mrb[120].mxu0 %vm1789_vm2, %v11959_v12  ;;  %v12113_v12 = vld [vmem:[#allocation43 + $0x328] sm:$0xff] }
0x2d70   : > { %12430 = vmatprep.mubr.f32.mxu0 %v17249_v1  ;;  %v12129_v36 = vld [vmem:[#allocation43 + $0x3a8] sm:$0xff] }
0x2e42   : > { %v12039_v51 = vpop.f32.mrb[120].mxu0 }
0x2e43   : > { %v12040_v2 = vadd.f32 %v14263_v13, %v12039_v51  ;;  %v15021_v14 = vpop.f32.mrb[121].mxu0  ;;  %v12115_v13 = vld [vmem:[#allocation43 + $0x338] sm:$0xff] }
0x2e44   : > { %v12131_v51 = vld [vmem:[#allocation43 + $0x3b8] sm:$0xff]  ;;  %v15582_v14 = vpack.c.bf16 %v12096_v27, %v12080_v35  ;;  %v12106_v35 = vld [vmem:[#allocation43 + $0x2f0] sm:$0xff]  ;;  %v12121_v27 = vld [vmem:[#allocation43 + $0x368] sm:$0xff] }
0x2e45   : > { %v12043_v56 = vadd.f32 %v12040_v2, %v18848_v50  ;;  %v12078_v50 = vld [vmem:[#allocation43 + $0x210] sm:$0xff] }
0x2e46   : > { %v15574_v18 = vpack.c.bf16 %v12094_v40, %v12078_v50  ;;  %v15596_v50 = vpack.c.bf16 %v12101_v30, %v12085_v29 }
0x2e47   : > { %v12048_v15 = vsel %vm1789_vm2, %v12043_v56, 0.0 }
0x2e48   : > { %12049 = vadd.xlane.f32.xlu0 %v12048_v15  ;;  %15575 = vmatpush1.bf16.msra.mxu0 %v15574_v18  ;;  %v12112_v15 = vld [vmem:[#allocation43 + $0x320] sm:$0xff]  ;;  %v12086_v18 = vld [vmem:[#allocation43 + $0x250] sm:$0xff] }
0x2e49   : > { %15577 = vmatprep.subr.bf16.mxu0 %v15576_v24  ;;  %v15606_v54 = vpack.c.bf16 %v12102_v25, %v12086_v18  ;;  %v12116_v24 = vld [vmem:[#allocation43 + $0x340] sm:$0xff]  ;;  %v12195_v18 = vld [vmem:[#allocation44 + $0x398] sm:$0xff] }
0x2e4c   : > { %15579 = vmatpush1.bf16.msra.mxu0 %v15578_v20  ;;  %v12118_v20 = vld [vmem:[#allocation43 + $0x350] sm:$0xff] }
0x2e4d   : > { %15589 = vmatprep.subr.bf16.mxu0 %v15588_v3  ;;  %v15602_v3 = vpack.c.bf16 %v12132_v57, %v12116_v24  ;;  %v12194_v24 = vld [vmem:[#allocation44 + $0x390] sm:$0xff] }
0x2ed5   : > { %v12050_v16 = vpop.xlane.xlu0 %12049 }
0x2ed6   : > { %v12051_v60 = vmul.f32 0.03125, %v12050_v16  ;;  %v12128_v16 = vld [vmem:[#allocation43 + $0x3a0] sm:$0xff] }
0x2ed7   : > { %v15586_v31 = vpack.c.bf16 %v12128_v16, %v12112_v15  ;;  %v12138_v15 = vld [vmem:[#allocation43 + $0x3f0] sm:$0xff]  ;;  %v12145_v16 = vld [vmem:[#allocation44 + $0x208] sm:$0xff] }
0x2ed8   : > { %v12052_v61 = vsub.f32 %v12043_v56, %v12051_v60  ;;  %v15590_v56 = vpack.c.bf16 %v12098_v11, %v12082_v46  ;;  %v12123_v46 = vld [vmem:[#allocation43 + $0x378] sm:$0xff] }
0x2ed9   : > { %v12139_v11 = vld [vmem:[#allocation43 + $0x3f8] sm:$0xff] }
0x2eda   : > { %v12053_v17 = vmul.f32 %v12052_v61, %v12052_v61 }
0x2edc   : > { %v12054_v19 = vsel %vm1789_vm2, %v12053_v17, 0.0  ;;  %v15584_v17 = vpack.c.bf16 %v12129_v36, %v12113_v12 }
0x2edd   : > { %12055 = vadd.xlane.f32.xlu1 %v12054_v19  ;;  %v15592_v19 = vpack.c.bf16 %v12131_v51, %v12115_v13  ;;  %v12120_v13 = vld [vmem:[#allocation43 + $0x360] sm:$0xff] }
0x2ede   : > { %v12136_v51 = vld [vmem:[#allocation43 + $0x3e0] sm:$0xff] }
0x2edf   : > { %v15618_v21 = vpack.c.bf16 %v12136_v51, %v12120_v13  ;;  %v12181_v13 = vld [vmem:[#allocation44 + $0x328] sm:$0xff] }
0x2f6a   : > { %v12056_v32 = vpop.xlane.xlu1 %12055 }
0x2f6b   : > { %v12057_v47 = vmul.f32 0.03125, %v12056_v32  ;;  %v15610_v32 = vpack.c.bf16 %v12134_v58, %v12118_v20  ;;  %v12165_v20 = vld [vmem:[#allocation44 + $0x2a8] sm:$0xff]  ;;  %v12151_v58 = vld [vmem:[#allocation44 + $0x238] sm:$0xff] }
0x2f6d   : > { %v12058_v44 = vadd.f32 1e-05, %v12057_v47  ;;  %v12088_v47 = vld [vmem:[#allocation43 + $0x260] sm:$0xff] }
0x2f6f   : > { %16168 = vrsqrt.f32 %v12058_v44  ;;  %v12104_v44 = vld [vmem:[#allocation43 + $0x2e0] sm:$0xff] }
0x2f70   : > { %v15614_v12 = vpack.c.bf16 %v12104_v44, %v12088_v47 }
0x2f79   : > { %v16169_v52 = vpop.eup %16168 }
0x2f7a   : > { %v12060_v9 = vmul.f32 %v16169_v52, %v12052_v61  ;;  %v12087_v61 = vld [vmem:[#allocation43 + $0x258] sm:$0xff]  ;;  %v15620_v52 = vpack.c.bf16 %v12107_v26, %v12091_v63  ;;  %v18951_v26 = vld [vmem:[%s19230_s17 + $0x10] sm:$0xff] }
0x2f7b   : > { %v15604_v40 = vpack.c.bf16 %v12103_v5, %v12087_v61  ;;  %v12144_v5 = vld [vmem:[#allocation44 + $0x200] sm:$0xff]  ;;  %v12219_v47 = vrot.slane %v18951_v26, %v18234_v45  ;;  %v12227_v44 = vrot.slane %v18951_v26, %v18237_v48 }
0x2f7c   : > { %v12067_v2 = vmul.f32 %v14265_v42, %v12060_v9  ;;  %v15612_v42 = vpack.c.bf16 %v12105_v38, %v12089_v59  ;;  %v12137_v9 = vld [vmem:[#allocation43 + $0x3e8] sm:$0xff]  ;;  %v12167_v38 = vld [vmem:[#allocation44 + $0x2b8] sm:$0xff] }
0x2f7d   : > { %v15652_v63 = vpack.c.bf16 %v12167_v38, %v12151_v58  ;;  %v12239_v38 = vrot.slane %v18951_v26, %v18261_v28 }
0x2f7e   : > { %v18926_v60 = vadd.f32 %v14266_v4, %v12067_v2  ;;  %v12090_v4 = vld [vmem:[#allocation43 + $0x270] sm:$0xff]  ;;  %v15616_v2 = vpack.c.bf16 %v12137_v9, %v12121_v27 }
0x2f7f   : > { %v15622_v36 = vpack.c.bf16 %v12106_v35, %v12090_v4  ;;  %v12148_v4 = vld [vmem:[#allocation44 + $0x220] sm:$0xff] }
0x2f80   : > { %14270 = vmatmul.mubr.msk.f32.vlgmr.msra.gmra.mrb[84].mxu1 %vm1789_vm2, %v18926_v60  ;;  %14271 = vmatmul.mubr.msk.f32.vlgmr.msra.gmra.mrb[122].mxu0 %vm1789_vm2, %v18926_v60  ;;  %v12164_v35 = vld [vmem:[#allocation44 + $0x2a0] sm:$0xff] }
0x2f81   : > { %15583 = vmatpush1.bf16.msra.mxu1 %v15582_v14  ;;  %15591 = vmatpush1.bf16.msra.mxu0 %v15590_v56  ;;  %v15624_v14 = vpack.c.bf16 %v12139_v11, %v12123_v46  ;;  %v12122_v56 = vld [vmem:[#allocation43 + $0x370] sm:$0xff] }
0x2f82   : > { %15585 = vmatprep.subr.bf16.mxu1 %v15584_v17  ;;  %15593 = vmatprep.subr.bf16.mxu0 %v15592_v19  ;;  %v12161_v17 = vld [vmem:[#allocation44 + $0x288] sm:$0xff]  ;;  %v12147_v19 = vld [vmem:[#allocation44 + $0x218] sm:$0xff]  ;;  %v15626_v29 = vpack.c.bf16 %v12138_v15, %v12122_v56 }
0x2f83   : > { %12501 = vmatprep.mubr.f32.mxu1 %v17249_v1  ;;  %12572 = vmatprep.mubr.f32.mxu0 %v17249_v1  ;;  %v15628_v30 = vpack.c.bf16 %v12161_v17, %v12145_v16  ;;  %v15636_v61 = vpack.c.bf16 %v12163_v34, %v12147_v19  ;;  %v12183_v56 = vld [vmem:[#allocation44 + $0x338] sm:$0xff]  ;;  %v15646_v19 = vpack.c.bf16 %v12164_v35, %v12148_v4 }
0x2f84   : > { %v12199_v15 = vld [vmem:[#allocation44 + $0x3b8] sm:$0xff] }
0x2f85   : > { %15587 = vmatpush1.bf16.msra.mxu1 %v15586_v31  ;;  %15595 = vmatpush1.bf16.msra.mxu0 %v15594_v55  ;;  %v12160_v31 = vld [vmem:[#allocation44 + $0x280] sm:$0xff]  ;;  %v12146_v55 = vld [vmem:[#allocation44 + $0x210] sm:$0xff] }
0x2f86   : > { %15597 = vmatprep.subr.bf16.mxu1 %v15596_v50  ;;  %15605 = vmatprep.subr.bf16.mxu0 %v15604_v40  ;;  %v12193_v50 = vld [vmem:[#allocation44 + $0x388] sm:$0xff]  ;;  %v12179_v40 = vld [vmem:[#allocation44 + $0x318] sm:$0xff]  ;;  %v15630_v25 = vpack.c.bf16 %v12160_v31, %v12144_v5  ;;  %v15638_v62 = vpack.c.bf16 %v12162_v10, %v12146_v55  ;;  %v12235_v5 = vrot.slane %v18951_v26, %v18248_v6 }
0x2f87   : > { %v15632_v37 = vpack.c.bf16 %v12193_v50, %v12177_v33  ;;  %v15640_v39 = vpack.c.bf16 %v12195_v18, %v12179_v40  ;;  %v12243_v31 = vrot.slane %v18951_v26, %v18251_v7  ;;  %v12180_v33 = vld [vmem:[#allocation44 + $0x320] sm:$0xff] }
0x2f88   : > { %14272 = vmatmul.mubr.msk.f32.vlgmr.msra.gmra.mrb[86].mxu1 %vm1789_vm2, %v18926_v60  ;;  %14273 = vmatmul.mubr.msk.f32.vlgmr.msra.gmra.mrb[124].mxu0 %vm1789_vm2, %v18926_v60  ;;  %v12196_v50 = vld [vmem:[#allocation44 + $0x3a0] sm:$0xff] }
0x2f89   : > { %15599 = vmatpush1.bf16.msra.mxu1 %v15598_v8  ;;  %15607 = vmatpush1.bf16.msra.mxu0 %v15606_v54  ;;  %v12192_v8 = vld [vmem:[#allocation44 + $0x380] sm:$0xff]  ;;  %v12178_v54 = vld [vmem:[#allocation44 + $0x310] sm:$0xff] }
0x2f8a   : > { %15601 = vmatprep.subr.bf16.mxu1 %v15600_v23  ;;  %15609 = vmatprep.subr.bf16.mxu0 %v15608_v53  ;;  %v15634_v57 = vpack.c.bf16 %v12192_v8, %v12176_v49  ;;  %v15642_v23 = vpack.c.bf16 %v12194_v24, %v12178_v54  ;;  %v12149_v53 = vld [vmem:[#allocation44 + $0x228] sm:$0xff]  ;;  %v12155_v54 = vld [vmem:[#allocation44 + $0x258] sm:$0xff] }
0x2f8b   : > { %12643 = vmatprep.mubr.f32.mxu1 %v17249_v1  ;;  %12714 = vmatprep.mubr.f32.mxu0 %v17249_v1  ;;  %v15644_v59 = vpack.c.bf16 %v12165_v20, %v12149_v53  ;;  %v12169_v8 = vld [vmem:[#allocation44 + $0x2c8] sm:$0xff]  ;;  %v12171_v24 = vld [vmem:[#allocation44 + $0x2d8] sm:$0xff]  ;;  %v15650_v20 = vpack.c.bf16 %v12196_v50, %v12180_v33 }
0x2f8c   : > { %v12157_v33 = vld [vmem:[#allocation44 + $0x268] sm:$0xff] }
0x2f8d   : > { %15603 = vmatpush1.bf16.msra.mxu1 %v15602_v3  ;;  %15611 = vmatpush1.bf16.msra.mxu0 %v15610_v32  ;;  %v12215_v3 = vrot.slane %v18951_v26, %v18226_v41  ;;  %v12223_v32 = vrot.slane %v18951_v26, %v18229_v43  ;;  %v12173_v50 = vld [vmem:[#allocation44 + $0x2e8] sm:$0xff] }
0x2f8e   : > { %15613 = vmatprep.subr.bf16.mxu1 %v15612_v42  ;;  %15621 = vmatprep.subr.bf16.mxu0 %v15620_v52 }
0x2f90   : > { %14274 = vmatmul.mubr.msk.f32.vlgmr.msra.gmra.mrb[88].mxu1 %vm1789_vm2, %v18926_v60  ;;  %14275 = vmatmul.mubr.msk.f32.vlgmr.msra.gmra.mrb[126].mxu0 %vm1789_vm2, %v18926_v60 }
0x2f91   : > { %15615 = vmatpush1.bf16.msra.mxu1 %v15614_v12  ;;  %15623 = vmatpush1.bf16.msra.mxu0 %v15622_v36  ;;  %v12150_v12 = vld [vmem:[#allocation44 + $0x230] sm:$0xff] }
0x2f92   : > { %15617 = vmatprep.subr.bf16.mxu1 %v15616_v2  ;;  %15625 = vmatprep.subr.bf16.mxu0 %v15624_v14  ;;  %v12166_v36 = vld [vmem:[#allocation44 + $0x2b0] sm:$0xff]  ;;  %v12197_v14 = vld [vmem:[#allocation44 + $0x3a8] sm:$0xff] }
0x2f93   : > { %12785 = vmatprep.mubr.f32.mxu1 %v17249_v1  ;;  %12856 = vmatprep.mubr.f32.mxu0 %v17249_v1  ;;  %v15654_v34 = vpack.c.bf16 %v12166_v36, %v12150_v12  ;;  %v12170_v12 = vld [vmem:[#allocation44 + $0x2d0] sm:$0xff]  ;;  %v12185_v36 = vld [vmem:[#allocation44 + $0x348] sm:$0xff] }
0x2f95   : > { %15619 = vmatpush1.bf16.msra.mxu1 %v15618_v21  ;;  %15627 = vmatpush1.bf16.msra.mxu0 %v15626_v29 }
0x2f96   : > { %15629 = vmatprep.subr.bf16.mxu1 %v15628_v30  ;;  %15637 = vmatprep.subr.bf16.mxu0 %v15636_v61  ;;  %v15648_v30 = vpack.c.bf16 %v12197_v14, %v12181_v13  ;;  %v15656_v61 = vpack.c.bf16 %v12199_v15, %v12183_v56  ;;  %v12201_v13 = vld [vmem:[#allocation44 + $0x3c8] sm:$0xff] }
0x2f98   : > { %14276 = vmatmul.mubr.msk.f32.vlgmr.msra.gmra.mrb[90].mxu1 %vm1789_vm2, %v18926_v60  ;;  %14277 = vmatmul.mubr.msk.f32.vlgmr.msra.gmra.mrb[128].mxu0 %vm1789_vm2, %v18926_v60 }
0x2f9e   : > { %15631 = vmatpush1.bf16.xpose.msra.mxu1 %v15630_v25  ;;  %15639 = vmatpush1.bf16.xpose.msra.mxu0 %v15638_v62  ;;  %v12182_v25 = vld [vmem:[#allocation44 + $0x330] sm:$0xff] }
0x2f9f   : > { %15633 = vmatprep.subr.bf16.mxu1 %v15632_v37  ;;  %15641 = vmatprep.subr.bf16.mxu0 %v15640_v39  ;;  %v12198_v62 = vld [vmem:[#allocation44 + $0x3b0] sm:$0xff]  ;;  %v12153_v37 = vld [vmem:[#allocation44 + $0x248] sm:$0xff] }
0x2fa0   : > { %v15658_v58 = vpack.c.bf16 %v12198_v62, %v12182_v25 }
0x2fa6   : > { %15635 = vmatpush1.bf16.xpose.msra.mxu1 %v15634_v57  ;;  %15643 = vmatpush1.bf16.xpose.msra.mxu0 %v15642_v23  ;;  %v18966_v57 = vld [vmem:[%s19230_s17 + $0x18] sm:$0xff] }
0x2fa7   : > { %15645 = vmatprep.subr.bf16.mxu1 %v15644_v59  ;;  %15653 = vmatprep.subr.bf16.mxu0 %v15652_v63  ;;  %v12231_v59 = vrot.slane %v18951_v26, %v18258_v22  ;;  %v15660_v63 = vpack.c.bf16 %v12169_v8, %v12153_v37  ;;  %v12152_v26 = vld [vmem:[#allocation44 + $0x240] sm:$0xff]  ;;  %v12247_v62 = vrot.slane %v18966_v57, %v18226_v41  ;;  %v12158_v41 = vld [vmem:[#allocation44 + $0x270] sm:$0xff] }
0x3053   : > { %v12361_v42 = vpop.f32.mrb[84].mxu1  ;;  %v12432_v52 = vpop.f32.mrb[122].mxu0 }
0x3054   : > { %v12362_v27 = vadd.f32 %v12361_v42, %v12215_v3  ;;  %v12433_v9 = vadd.f32 %v12432_v52, %v12223_v32  ;;  %v12363_v46 = vpop.f32.mrb[85].mxu1  ;;  %v12434_v11 = vpop.f32.mrb[123].mxu0  ;;  %v15668_v3 = vpack.c.bf16 %v12171_v24, %v12155_v54  ;;  %v12251_v32 = vrot.slane %v18966_v57, %v18234_v45 }
0x3055   : > { %v12364_v51 = vadd.f32 %v12363_v46, %v12219_v47  ;;  %v12435_v2 = vadd.f32 %v12434_v11, %v12227_v44  ;;  %v12259_v47 = vrot.slane %v18966_v57, %v18237_v48  ;;  %v12154_v11 = vld [vmem:[#allocation44 + $0x250] sm:$0xff]  ;;  %v12203_v48 = vld [vmem:[#allocation44 + $0x3d8] sm:$0xff]  ;;  %v12267_v54 = vrot.slane %v18966_v57, %v18248_v6 }
0x3056   : > { %v12863_v21 = vmax.f32 %v12362_v27, 0.0  ;;  %v12865_v29 = vmax.f32 %v12433_v9, 0.0  ;;  %v12168_v9 = vld [vmem:[#allocation44 + $0x2c0] sm:$0xff]  ;;  %v15670_v15 = vpack.c.bf16 %v12170_v12, %v12154_v11  ;;  %v12275_v24 = vrot.slane %v18966_v57, %v18251_v7  ;;  %v12207_v6 = vld [vmem:[#allocation44 + $0x3f8] sm:$0xff]  ;;  %v12206_v11 = vld [vmem:[#allocation44 + $0x3f0] sm:$0xff] }
0x3057   : > { %v12864_v16 = vmax.f32 %v12364_v51, 0.0  ;;  %v12866_v17 = vmax.f32 %v12435_v2, 0.0  ;;  %v12187_v51 = vld [vmem:[#allocation44 + $0x358] sm:$0xff]  ;;  %v15662_v2 = vpack.c.bf16 %v12168_v9, %v12152_v26  ;;  %v12204_v9 = vld [vmem:[#allocation44 + $0x3e0] sm:$0xff] }
0x3059   : > { %12949 = vmatprep.mubr.f32.mxu1 %v12864_v16  ;;  %13019 = vmatprep.mubr.f32.mxu0 %v12866_v17  ;;  %v15664_v17 = vpack.c.bf16 %v12201_v13, %v12185_v36  ;;  %v12263_v36 = vrot.slane %v18966_v57, %v18258_v22  ;;  %v12271_v13 = vrot.slane %v18966_v57, %v18261_v28  ;;  %v14278_v22 = vld [vmem:[%s19232_s12 + $0x1] ss:$0 sm:$0xff] }
0x305a   : > { %12950 = vmatmul.mubr.f32.vlgmr.msra.gmra.mrb[92].mxu1 %v12863_v21  ;;  %13020 = vmatmul.mubr.f32.vlgmr.msra.gmra.mrb[130].mxu0 %v12865_v29 }
0x305b   : > { %v12503_v55 = vpop.f32.mrb[86].mxu1  ;;  %v12574_v10 = vpop.f32.mrb[124].mxu0  ;;  %15647 = vmatpush1.bf16.xpose.msra.mxu1 %v15646_v19  ;;  %15655 = vmatpush1.bf16.xpose.msra.mxu0 %v15654_v34  ;;  %v15672_v19 = vpack.c.bf16 %v12203_v48, %v12187_v51 }
0x305c   : > { %v12505_v40 = vpop.f32.mrb[87].mxu1  ;;  %v12576_v18 = vpop.f32.mrb[125].mxu0  ;;  %15649 = vmatprep.subr.bf16.mxu1 %v15648_v30  ;;  %15657 = vmatprep.subr.bf16.mxu0 %v15656_v61  ;;  %v12504_v52 = vadd.f32 %v12503_v55, %v12231_v59  ;;  %v12575_v4 = vadd.f32 %v12574_v10, %v12239_v38  ;;  %v12186_v55 = vld [vmem:[#allocation44 + $0x350] sm:$0xff] }
0x305d   : > { %v12506_v39 = vadd.f32 %v12505_v40, %v12235_v5  ;;  %v12577_v49 = vadd.f32 %v12576_v18, %v12243_v31  ;;  %v12184_v5 = vld [vmem:[#allocation44 + $0x340] sm:$0xff]  ;;  %v12202_v10 = vld [vmem:[#allocation44 + $0x3d0] sm:$0xff]  ;;  %v12159_v40 = vld [vmem:[#allocation44 + $0x278] sm:$0xff] }
0x305e   : > { %v12867_v14 = vmax.f32 %v12504_v52, 0.0  ;;  %v12869_v56 = vmax.f32 %v12575_v4, 0.0  ;;  %v12200_v31 = vld [vmem:[#allocation44 + $0x3c0] sm:$0xff]  ;;  %v12175_v18 = vld [vmem:[#allocation44 + $0x2f8] sm:$0xff]  ;;  %v15674_v37 = vpack.c.bf16 %v12202_v10, %v12186_v55  ;;  %v12174_v59 = vld [vmem:[#allocation44 + $0x2f0] sm:$0xff] }
0x305f   : > { %v12868_v23 = vmax.f32 %v12506_v39, 0.0  ;;  %v12870_v53 = vmax.f32 %v12577_v49, 0.0  ;;  %v15666_v25 = vpack.c.bf16 %v12200_v31, %v12184_v5  ;;  %v15676_v39 = vpack.c.bf16 %v12173_v50, %v12157_v33 }
0x3060   : > { %v12255_v49 = vrot.slane %v18966_v57, %v18229_v43  ;;  %v15684_v8 = vpack.c.bf16 %v12175_v18, %v12159_v40  ;;  %v12205_v43 = vld [vmem:[#allocation44 + $0x3e8] sm:$0xff]  ;;  %v15686_v4 = vpack.c.bf16 %v12174_v59, %v12158_v41 }
0x3061   : > { %13089 = vmatprep.mubr.f32.mxu1 %v12868_v23  ;;  %13159 = vmatprep.mubr.f32.mxu0 %v12870_v53  ;;  %v12156_v53 = vld [vmem:[#allocation44 + $0x260] sm:$0xff] }
0x3063   : > { %v12645_v44 = vpop.f32.mrb[88].mxu1  ;;  %v12716_v42 = vpop.f32.mrb[126].mxu0  ;;  %15651 = vmatpush1.bf16.xpose.msra.mxu1 %v15650_v20  ;;  %15659 = vmatpush1.bf16.xpose.msra.mxu0 %v15658_v58  ;;  %v12172_v20 = vld [vmem:[#allocation44 + $0x2e0] sm:$0xff] }
0x3064   : > { %v12647_v35 = vpop.f32.mrb[89].mxu1  ;;  %v12718_v27 = vpop.f32.mrb[127].mxu0  ;;  %15661 = vmatprep.subr.bf16.mxu1 %v15660_v63  ;;  %15669 = vmatprep.subr.bf16.mxu0 %v15668_v3  ;;  %v12646_v23 = vadd.f32 %v12645_v44, %v12247_v62  ;;  %v12717_v58 = vadd.f32 %v12716_v42, %v12255_v49  ;;  %v12189_v63 = vld [vmem:[#allocation44 + $0x368] sm:$0xff]  ;;  %v12188_v42 = vld [vmem:[#allocation44 + $0x360] sm:$0xff] }
0x3065   : > { %v12648_v46 = vadd.f32 %v12647_v35, %v12251_v32  ;;  %v12719_v45 = vadd.f32 %v12718_v27, %v12259_v47  ;;  %v15678_v32 = vpack.c.bf16 %v12172_v20, %v12156_v53  ;;  %v12191_v47 = vld [vmem:[#allocation44 + $0x378] sm:$0xff]  ;;  %v15680_v35 = vpack.c.bf16 %v12205_v43, %v12189_v63 }
0x3066   : > { %v12871_v52 = vmax.f32 %v12646_v23, 0.0  ;;  %v12873_v7 = vmax.f32 %v12717_v58, 0.0  ;;  %v15688_v27 = vpack.c.bf16 %v12207_v6, %v12191_v47  ;;  %v15682_v12 = vpack.c.bf16 %v12204_v9, %v12188_v42  ;;  %v13510_v42 = vld [vmem:[%s19233_s15 + $0x18] sm:$0xff] }
0x3067   : > { %v12872_v16 = vmax.f32 %v12648_v46, 0.0  ;;  %v12874_v34 = vmax.f32 %v12719_v45, 0.0  ;;  %v12190_v46 = vld [vmem:[#allocation44 + $0x370] sm:$0xff] }
0x3068   : > { %v15690_v45 = vpack.c.bf16 %v12206_v11, %v12190_v46 }
0x306a   : > { %13090 = vmatmul.mubr.f32.vlgmr.msra.gmra.mrb[94].mxu1 %v12867_v14  ;;  %13160 = vmatmul.mubr.f32.vlgmr.msra.gmra.mrb[132].mxu0 %v12869_v56 }
0x306b   : > { %v18976_v21 = vpop.f32.mrb[90].mxu1  ;;  %v18978_v29 = vpop.f32.mrb[128].mxu0  ;;  %15663 = vmatpush1.bf16.xpose.msra.mxu1 %v15662_v2  ;;  %13229 = vmatprep.mubr.f32.mxu1 %v12872_v16 }
0x306c   : > { %15671 = vmatpush1.bf16.xpose.msra.mxu0 %v15670_v15  ;;  %13299 = vmatprep.mubr.f32.mxu0 %v12874_v34  ;;  %v12789_v30 = vpop.f32.mrb[91].mxu1  ;;  %v12860_v61 = vpop.f32.mrb[129].mxu0  ;;  %v12788_v51 = vadd.f32 %v18976_v21, %v12263_v36  ;;  %v12859_v48 = vadd.f32 %v18978_v29, %v12271_v13 }
0x306d   : > { %15665 = vmatprep.subr.bf16.mxu1 %v15664_v17  ;;  %15673 = vmatprep.subr.bf16.mxu0 %v15672_v19  ;;  %v12790_v38 = vadd.f32 %v12789_v30, %v12267_v54  ;;  %v12861_v3 = vadd.f32 %v12860_v61, %v12275_v24 }
0x306e   : > { %v12875_v2 = vmax.f32 %v12788_v51, 0.0  ;;  %v12877_v14 = vmax.f32 %v12859_v48, 0.0  ;;  %v14282_v51 = vld [vmem:[#allocation50] ss:$0 sm:$0xff] }
0x306f   : > { %v12876_v44 = vmax.f32 %v12790_v38, 0.0  ;;  %v12878_v26 = vmax.f32 %v12861_v3, 0.0  ;;  %v14279_v38 = vld [vmem:[#allocation46 + $0x1] ss:$0 sm:$0xff] }
0x3073   : > { %15667 = vmatpush1.bf16.xpose.msra.mxu1 %v15666_v25 }
0x3074   : > { %15675 = vmatpush1.bf16.xpose.msra.mxu0 %v15674_v37  ;;  %15677 = vmatprep.subr.bf16.mxu1 %v15676_v39 }
0x3075   : > { %15685 = vmatprep.subr.bf16.mxu0 %v15684_v8 }
0x307a   : > { %13230 = vmatmul.mubr.f32.vlgmr.msra.gmra.mrb[96].mxu1 %v12871_v52 }
0x307b   : > { %13300 = vmatmul.mubr.f32.vlgmr.msra.gmra.mrb[134].mxu0 %v12873_v7  ;;  %15679 = vmatpush1.bf16.xpose.msra.mxu1 %v15678_v32 }
0x307c   : > { %13369 = vmatprep.mubr.f32.mxu1 %v12876_v44  ;;  %15687 = vmatpush1.bf16.xpose.msra.mxu0 %v15686_v4  ;;  %v13508_v44 = vld [vmem:[%s19233_s15 + $0x8] sm:$0xff] }
0x307d   : > { %13439 = vmatprep.mubr.f32.mxu0 %v12878_v26  ;;  %15681 = vmatprep.subr.bf16.mxu1 %v15680_v35  ;;  %v13507_v35 = vld [vmem:[%s19233_s15] sm:$0xff]  ;;  %v13509_v26 = vld [vmem:[%s19233_s15 + $0x10] sm:$0xff] }
0x307e   : > { %15689 = vmatprep.subr.bf16.mxu0 %v15688_v27  ;;  %v15693_v27 = vpack.c.bf16 %v13508_v44, %v13507_v35  ;;  %v15696_v9 = vpack.c.bf16 %v13510_v42, %v13509_v26 }
0x3083   : > { %15683 = vmatpush1.bf16.xpose.msra.mxu1 %v15682_v12 }
0x3084   : > { %15691 = vmatpush1.bf16.xpose.msra.mxu0 %v15690_v45  ;;  %15692 = vmatprep.subr.bf16.mxu1 %v17247_v0  ;;  %v14281_v45 = vld [vmem:[#allocation49] ss:$0 sm:$0xff] }
0x308a   : > { %13370 = vmatmul.mubr.f32.vlgmr.msra.gmra.mrb[98].mxu1 %v12875_v2 }
0x308b   : > { %13440 = vmatmul.mubr.f32.vlgmr.msra.gmra.mrb[136].mxu0 %v12877_v14  ;;  %15030 = vmatprep.mubr.msk.f32.mxu1 %vm17248_vm0, %v17249_v1  ;;  %vm13586_vm0 = vcmask 57344  }
0x308c   : > { %15694 = vmatpush3.bf16.msra.mxu1 %v15693_v27 }
0x308d   : > { %15695 = vmatprep.subr.bf16.mxu1 %v17247_v0 }
0x3090   : > { %15697 = vmatpush3.bf16.msra.mxu1 %v15696_v9 }
0x312d   : > { %v12951_v56 = vpop.f32.mrb[92].mxu1  ;;  %v13021_v15 = vpop.f32.mrb[130].mxu0 }
0x312e   : > { %v12952_v16 = vadd.f32 %v14278_v22, %v12951_v56  ;;  %v12953_v28 = vpop.f32.mrb[93].mxu1  ;;  %v13023_v57 = vpop.f32.mrb[131].mxu0  ;;  %v13511_v22 = vld [vmem:[#allocation52] sm:$0x1] }
0x3130   : > { %v13022_v17 = vadd.f32 %v13021_v15, %v12952_v16 }
0x313d   : > { %v13091_v19 = vpop.f32.mrb[94].mxu1  ;;  %v13161_v34 = vpop.f32.mrb[132].mxu0 }
0x313e   : > { %v13092_v21 = vadd.f32 %v13091_v19, %v13022_v17  ;;  %v13093_v30 = vpop.f32.mrb[95].mxu1  ;;  %v13163_v61 = vpop.f32.mrb[133].mxu0 }
0x3140   : > { %v13162_v29 = vadd.f32 %v13161_v34, %v13092_v21 }
0x314d   : > { %v13231_v5 = vpop.f32.mrb[96].mxu1 }
0x314e   : > { %v13232_v31 = vadd.f32 %v13231_v5, %v13162_v29  ;;  %v13301_v55 = vpop.f32.mrb[134].mxu0  ;;  %v13233_v10 = vpop.f32.mrb[97].mxu1 }
0x314f   : > { %v13303_v33 = vpop.f32.mrb[135].mxu0 }
0x3150   : > { %v13302_v50 = vadd.f32 %v13301_v55, %v13232_v31 }
0x315d   : > { %v13371_v1 = vpop.f32.mrb[98].mxu1 }
0x315e   : > { %v13372_v40 = vadd.f32 %v13371_v1, %v13302_v50  ;;  %v13441_v18 = vpop.f32.mrb[136].mxu0  ;;  %v13373_v25 = vpop.f32.mrb[99].mxu1 }
0x315f   : > { %v13443_v62 = vpop.f32.mrb[137].mxu0 }
0x3160   : > { %v13442_v37 = vadd.f32 %v13441_v18, %v13372_v40 }
0x3162   : > { %v13445_v39 = vadd.f32 %v13442_v37, %v18926_v60  ;;  %v14280_v60 = vld [vmem:[#allocation47 + $0x1] ss:$0 sm:$0xff] }
0x3164   : > { %v13450_v49 = vsel %vm1789_vm2, %v13445_v39, 0.0 }
0x3165   : > { %13451 = vadd.xlane.f32.xlu0 %v13450_v49 }
0x31f2   : > { %v13452_v8 = vpop.xlane.xlu0 %13451 }
0x31f3   : > { %v13453_v54 = vmul.f32 0.03125, %v13452_v8 }
0x31f5   : > { %v13454_v24 = vsub.f32 %v13445_v39, %v13453_v54 }
0x31f7   : > { %v13455_v23 = vmul.f32 %v13454_v24, %v13454_v24 }
0x31f9   : > { %v13456_v53 = vsel %vm1789_vm2, %v13455_v23, 0.0 }
0x31fa   : > { %13457 = vadd.xlane.f32.xlu1 %v13456_v53 }
0x3287   : > { %v13458_v20 = vpop.xlane.xlu1 %13457 }
0x3288   : > { %v13459_v58 = vmul.f32 0.03125, %v13458_v20 }
0x328a   : > { %v13460_v41 = vadd.f32 1e-05, %v13459_v58 }
0x328c   : > { %16170 = vrsqrt.f32 %v13460_v41 }
0x3296   : > { %v16171_v59 = vpop.eup %16170 }
0x3297   : > { %v13462_v63 = vmul.f32 %v16171_v59, %v13454_v24 }
0x3299   : > { %v13469_v43 = vmul.f32 %v14279_v38, %v13462_v63 }
0x329b   : > { %v13476_v3 = vadd.f32 %v14280_v60, %v13469_v43 }
0x329d   : > { %v13480_v32 = vsel %vm13479_vm15, %v13476_v3, 0.0 }
0x329e   : > { %13481 = vadd.xlane.f32.xlu0 %v13480_v32 }
0x332b   : > { %v13482_v47 = vpop.xlane.xlu0 %13481 }
0x332c   : > { %v13483_v6 = vmul.f32 0.03125, %v13482_v47 }
0x332e   : > { %v13484_v52 = vsub.f32 %v13476_v3, %v13483_v6 }
0x3330   : > { %v13485_v4 = vmul.f32 %v13484_v52, %v13484_v52 }
0x3332   : > { %v13486_v7 = vsel %vm13479_vm15, %v13485_v4, 0.0 }
0x3333   : > { %13487 = vadd.xlane.f32.xlu1 %v13486_v7 }
0x33c0   : > { %v13488_v46 = vpop.xlane.xlu1 %13487 }
0x33c1   : > { %v13489_v11 = vmul.f32 0.03125, %v13488_v46 }
0x33c3   : > { %v13490_v12 = vadd.f32 1e-05, %v13489_v11 }
0x33c5   : > { %16172 = vrsqrt.f32 %v13490_v12 }
0x33cf   : > { %v16173_v36 = vpop.eup %16172 }
0x33d0   : > { %v13492_v13 = vmul.f32 %v16173_v36, %v13484_v52 }
0x33d2   : > { %v13499_v48 = vmul.f32 %v14281_v45, %v13492_v13 }
0x33d4   : > { %v13506_v2 = vadd.f32 %v14282_v51, %v13499_v48 }
0x33d6   : > { %v13513_v14 = vrot.slane %v13506_v2, 7 }
0x33d8   : > { %15031 = vmatmul.mubr.msk.f32.vlgmr.msra.gmra.mrb[100].mxu1 %vm1789_vm2, %v13513_v14 }
0x34ab   : > { %v13582_v0 = vpop.f32.mrb[100].mxu1 }
0x34ac   : > { %v13583_v56 = vadd.f32 %v13582_v0, %v13511_v22  ;;  %v15032_v15 = vpop.f32.mrb[101].mxu1 }
0x34ae   : > { %13587 = vst.msk [vmem:[%s1676_s0] sm:$0x1] %vm13586_vm0, %v13583_v56 }
0x34af   : > { %17049 = shalt.err (!%p17046_p7)
}
0x34b0   : > { %s17050_s18 = scalar_lea.hbm %s19010_s5, 16  ;;  %s17054_s16 = scalar_lea.hbm %s19234_s4, 32 }
0x34b1   : > { %p17051_p2 = scmp.ne.s32.totalorder %s19010_s5, %s17050_s18  ;;  %p17055_p12 = scmp.lt.u32.totalorder %s19010_s5, %s19234_s4 }
0x34b2   : > { %p17056_p0 = scmp.lt.u32.totalorder %s17054_s16, %s17050_s18  ;;  %p17058_p8 = scmp.lt.u32.totalorder %s17050_s18, %s19010_s5 }
0x34b3   : > { %p17052_p4 = pnand %p17051_p2, %p19236_p9 }
0x34b4   : > { %p17057_p5 = por %p17056_p0, %p17055_p12 }
0x34b5   : > { %p17053_p6 = pneg %p17052_p4 }
0x34b6   : > { %p17059_p10 = por %p17058_p8, %p17057_p5 }
0x34b8   : > { %p17060_p11 = pnand %p17059_p10, %p17053_p6 }
0x34ba   : > { %17063 = shalt.err (!%p17060_p11)
}
0x34bb   : > { %15864 = dma.vmem_to_hbm [thread:$0]  (%p19236_p9), %s19012_s3, 16, %s19010_s5, %s13589_s6  }
0x34bc PF: > { %s19237_s9 = sld [smem:[#allocation104_spill]]  ;;  %s19238_s10 = sld [smem:[#allocation109_spill]] }
0x34bd   : > { %p19240_p1 = scmp.ge.s32.totalorder %s17166_s2, 2 }
0x34c2   : > { %s13613_s8 = sand.u32 1, %s19237_s9   ;;  %p19239_p13 = scmp.ne.s32.totalorder %s19238_s10, 0 }
0x34c3   : > { %s13614_s0 = scalar_lea.sflag [#allocation4], %s13613_s8 }
0x34c4   : > { %p15871_p3 = pnand %p19240_p1, %p19239_p13 }
0x34c6   : > { %17149 = dma.done.wait (!%p15871_p3), %s13614_s0, 16  }
0x34c7   : > { %17151 = vsyncadd (!%p15871_p3), %s13614_s0, 4294967280  ;;  %s19241_s2 = sld [smem:[#allocation105_spill]]  ;;  %s19242_s7 = sld [smem:[#allocation106_spill]] }
0x34c8   : > { %s19243_s0 = smov %s17158_s28  ;;  %s19244_s28 = smov %s17162_s1 }
0x34cd   : > { %p110_p7 = scmp.ge.s32.totalorder %s19241_s2, 4   ;;  %s19245_s1 = smov %s19242_s7 }
0x34cf   :  { %112 = sbr.rel (!%p110_p7) target bundleno = 99 (0x63), region = 423 }
0x34d6   :  { %13618 = vsyncpa [#allocation3], 1 }
0x34d7   :  { %13620 = vsyncpa [#allocation3 + $0x1], 1 }
0x34d8   :  { %13621 = vsyncpa [#allocation6], 1 }
0x34d9   :  { %13622 = vsyncpa [#allocation9], 1 }
0x34da   :  { %13623 = vsyncpa [#allocation12], 1 }
0x34db   :  { %13624 = vsyncpa [#allocation15], 1 }
0x34dc   :  { %13625 = vsyncpa [#allocation18], 1 }
0x34dd   :  { %13626 = vsyncpa [#allocation21], 1 }
0x34de   :  { %13627 = vsyncpa [#allocation24], 1 }
0x34df   :  { %13628 = vsyncpa [#allocation27], 1 }
0x34e0   :  { %13629 = vsyncpa [#allocation30], 1 }
0x34e1   :  { %13630 = vsyncpa [#allocation33], 1 }
0x34e2   :  { %13631 = vsyncpa [#allocation36], 1 }
0x34e3   :  { %13632 = vsyncpa [#allocation39], 1 }
0x34e4   :  { %13633 = vsyncpa [#allocation42], 1 }
0x34e5   :  { %13634 = vsyncpa [#allocation45], 1 }
0x34e6   :  { %13635 = vsyncpa [#allocation48], 1 }
0x34e7   :  { %13636 = vsyncpa [#allocation51], 1 }
0x34e8   :  { %13637 = vsyncpa [#allocation4], 1 }
0x34e9   :  { %13639 = vsyncpa [#allocation4 + $0x1], 1 }

</bundles_post_ra>
